<compile_context>
chip_gen: v7x
topology: tpu7x:2x2x1
jax: 0.10.0
libtpu: 0.0.40
codegen_flags: <defaults>
</compile_context>

<pallas_src>
import jax
import jax.numpy as jnp
import numpy as np
from jax.experimental import pallas as pl
from jax.experimental.pallas import tpu as pltpu

# ------------------------- problem configuration -------------------------
NUM_LEN = 4            # len(scaler.num_idx)  -> sigmoid columns
CATEGORIES = (2, 3)    # scaler.ohe.categories_[i].shape[0] per bin col
DATA_DIM = NUM_LEN + sum(CATEGORIES)     # 9
HIDDEN = 256           # generator_dim entries
PAD = 128              # lane-aligned width of the padded-z tile; lane PAD-1 is the bias lane
PAD_OUT = 128          # lane-aligned padded output width of the final Linear
BN_EPS = 1e-5

# categorical segment boundaries (static)
_SEGMENTS = []
_st = NUM_LEN
for _n in CATEGORIES:
    _SEGMENTS.append((_st, _st + _n))
    _st += _n
_SEGMENTS = tuple(_SEGMENTS)


def _bn_relu(x):
    """Training-mode BatchNorm1d (gamma=1, beta=0, biased variance) + ReLU.

    Single reduction pass: s1 = sum(x), s2 = sum(x*x); var = s2/B - mean^2.
    """
    inv_n = 1.0 / x.shape[0]
    s1 = jnp.sum(x, axis=0, keepdims=True)
    s2 = jnp.sum(x * x, axis=0, keepdims=True)
    mean = s1 * inv_n
    var = s2 * inv_n - mean * mean
    return jnp.maximum((x - mean) * jax.lax.rsqrt(var + BN_EPS), 0.0)


def generator_kernel(zpad_ref, g_ref, w1_ref, w2z_ref, w2h_ref,
                     w3z_ref, w3h1_ref, w3h2_ref, out_ref):
    zpad = zpad_ref[...]                                        # (B, 128) bf16, bias lane = 1

    # ---- z-dependent partial products: no dependence on any BN, issue first on the MXU ----
    h1_pre = jnp.dot(zpad, w1_ref[...], preferred_element_type=jnp.float32)   # Linear1 (+bias)
    pz2 = jnp.dot(zpad, w2z_ref[...], preferred_element_type=jnp.float32)     # Linear2 z-part (+bias)
    pz3 = jnp.dot(zpad, w3z_ref[...], preferred_element_type=jnp.float32)     # Linear3 z-part (+bias)

    # ---- Residual block 1: BN -> ReLU ----
    h1 = _bn_relu(h1_pre)
    h1b = h1.astype(jnp.bfloat16)

    # ---- Residual block 2: h1-dependent partials overlap with BN2 reductions ----
    h2_pre = pz2 + jnp.dot(h1b, w2h_ref[...], preferred_element_type=jnp.float32)
    p13 = jnp.dot(h1b, w3h1_ref[...], preferred_element_type=jnp.float32)     # Linear3 h1-part
    h2 = _bn_relu(h2_pre)
    h2b = h2.astype(jnp.bfloat16)

    # ---- Final Linear(D+512, D) (lane-padded to 128 output lanes) ----
    data = pz3 + p13 + jnp.dot(h2b, w3h2_ref[...], preferred_element_type=jnp.float32)

    # ---- output head: sigmoid numerics + hard gumbel-softmax (= one_hot(argmax)) ----
    noisy = data + g_ref[...]                                   # host-sampled Gumbel(0,1) noise
    lane = jax.lax.broadcasted_iota(jnp.int32, (data.shape[0], PAD_OUT), 1)
    result = jnp.where(lane < NUM_LEN, jax.nn.sigmoid(data), 0.0)
    for st, en in _SEGMENTS:                 # static 2-iteration loop, unrolled at trace time
        seg = (lane >= st) & (lane < en)
        vals = jnp.where(seg, noisy, -jnp.inf)
        row_max = jnp.max(vals, axis=1, keepdims=True)
        # tie-safe argmax: first lane achieving the max (matches torch.max tie-breaking)
        idx = jnp.min(jnp.where(vals == row_max, lane, PAD_OUT), axis=1, keepdims=True)
        result = result + jnp.where(lane == idx, 1.0, 0.0)

    out_ref[...] = result                    # single unmasked, lane-dense (B, 128) store


def _compiler_kwargs(est_bytes):
    """Only raise the scoped-VMEM limit for large batches; derive the cap from the
    actual chip with headroom (v7x physical VMEM is only 64 MiB per TC)."""
    default_scoped = 32 * 1024 * 1024
    if est_bytes <= default_scoped:
        return {}
    try:
        phys = pltpu.get_tpu_info().vmem_capacity_bytes
    except Exception:                        # e.g. interpret mode / no TPU info available
        phys = 64 * 1024 * 1024
    cap = int(phys * 0.85)                   # leave headroom for compiler scratch
    return {"compiler_params": pltpu.CompilerParams(
        vmem_limit_bytes=max(default_scoped, min(int(est_bytes * 2), cap)))}


def generator_forward(zpad, gumbel, packed_params):
    """zpad: (B, 128) bf16 padded z with bias lane; gumbel: (B, 128) f32 Gumbel noise."""
    w1p, w2z, w2h, w3z, w3h1, w3h2 = packed_params
    B = zpad.shape[0]
    vmem = pl.BlockSpec(memory_space=pltpu.MemorySpace.VMEM)

    est = (B * PAD * 2                           # bf16 zpad
           + B * PAD_OUT * 4                     # f32 gumbel
           + B * PAD_OUT * 4                     # f32 out
           + B * (3 * HIDDEN + 4 * PAD_OUT) * 4  # f32 temporaries (h1/h2/data/head)
           + sum(w.size for w in packed_params) * 2)

    out = pl.pallas_call(
        generator_kernel,
        out_shape=jax.ShapeDtypeStruct((B, PAD_OUT), jnp.float32),
        in_specs=[vmem] * 8,
        out_specs=vmem,
        **_compiler_kwargs(est),
    )(zpad, gumbel, w1p, w2z, w2h, w3z, w3h1, w3h2)
    return out[:, :DATA_DIM]                     # lane-dense store; slice fused by XLA


def pack_z(z):
    """Host-side: pad z to (B, 128) bf16 with zeros in lanes D..126 and 1.0 in the bias lane."""
    B = z.shape[0]
    zp = (jnp.zeros((B, PAD), jnp.float32)
          .at[:, :DATA_DIM].set(z)
          .at[:, PAD - 1].set(1.0))
    return zp.astype(jnp.bfloat16)


def init_params(key):
    """Deterministic synthetic parameters packed into lane-aligned bf16 slabs.

    Each layer's z-facing slab has rows 0..D-1 = z-weight, rows D..PAD-2 = 0 and
    row PAD-1 = the layer bias (multiplied by the constant-1 bias lane of zpad);
    the h1/h2-facing slabs are plain (256, out) matrices.
    """
    ks = jax.random.split(key, 9)
    scale = 0.05

    def w(k, shape):
        return scale * jax.random.normal(k, shape, dtype=jnp.float32)

    w1 = w(ks[0], (DATA_DIM, HIDDEN));    b1 = w(ks[1], (HIDDEN,))
    w2z = w(ks[2], (DATA_DIM, HIDDEN));   w2h = w(ks[3], (HIDDEN, HIDDEN)); b2 = w(ks[4], (HIDDEN,))
    w3z = w(ks[5], (DATA_DIM, DATA_DIM)); w3h1 = w(ks[6], (HIDDEN, DATA_DIM))
    w3h2 = w(ks[7], (HIDDEN, DATA_DIM));  b3 = w(ks[8], (DATA_DIM,))

    def pack_zslab(z_part, bias, out_width):
        zp = jnp.zeros((PAD, out_width), jnp.float32)
        zp = zp.at[:DATA_DIM, :z_part.shape[1]].set(z_part)
        zp = zp.at[PAD - 1, :bias.shape[0]].set(bias)
        return zp.astype(jnp.bfloat16)

    def pack_hslab(h_part, out_width):
        hp = jnp.zeros((h_part.shape[0], out_width), jnp.float32)
        hp = hp.at[:, :h_part.shape[1]].set(h_part)
        return hp.astype(jnp.bfloat16)

    return (pack_zslab(w1, b1, HIDDEN),                 # (128, 256)
            pack_zslab(w2z, b2, HIDDEN),                # (128, 256)
            pack_hslab(w2h, HIDDEN),                    # (256, 256)
            pack_zslab(w3z, b3, PAD_OUT),               # (128, 128)
            pack_hslab(w3h1, PAD_OUT),                  # (256, 128)
            pack_hslab(w3h2, PAD_OUT))                  # (256, 128)


def reference_numeric_columns(zpad, packed_params):
    """Pure-JAX reference for the deterministic (sigmoid) output columns, mirroring the
    kernel's bf16-operand / f32-accumulate math (categorical columns depend on gumbel
    noise; they are verified structurally instead)."""
    w1p, w2z, w2h, w3z, w3h1, w3h2 = packed_params
    h1 = _bn_relu(jnp.dot(zpad, w1p, preferred_element_type=jnp.float32))
    h1b = h1.astype(jnp.bfloat16)
    h2 = _bn_relu(jnp.dot(zpad, w2z, preferred_element_type=jnp.float32)
                  + jnp.dot(h1b, w2h, preferred_element_type=jnp.float32))
    h2b = h2.astype(jnp.bfloat16)
    data = (jnp.dot(zpad, w3z, preferred_element_type=jnp.float32)
            + jnp.dot(h1b, w3h1, preferred_element_type=jnp.float32)
            + jnp.dot(h2b, w3h2, preferred_element_type=jnp.float32))
    return jax.nn.sigmoid(data[:, :NUM_LEN])


if __name__ == "__main__":
    key = jax.random.PRNGKey(0)
    k_z, k_g, k_p = jax.random.split(key, 3)

    # Whole batch in a single pallas_call (BatchNorm stats must be batch-global); batch
    # large enough to amortize the fixed call overhead yet tiny in absolute VMEM terms.
    B = 256
    z = jax.random.normal(k_z, (B, DATA_DIM), dtype=jnp.float32)
    zpad = pack_z(z)
    # Gumbel(0,1) noise sampled host-side (the in-kernel hardware PRNG has no
    # CPU/interpret lowering); a fresh key per call keeps draws i.i.d. across calls.
    gumbel = jax.random.gumbel(k_g, (B, PAD_OUT), dtype=jnp.float32)
    params = init_params(k_p)

    fwd = jax.jit(generator_forward)
    out = jax.block_until_ready(fwd(zpad, gumbel, params))

    assert out.shape == (B, DATA_DIM), out.shape
    out_np = np.asarray(out)

    # numeric (sigmoid) columns are noise-free -> compare against the pure-JAX reference
    ref_num = np.asarray(reference_numeric_columns(zpad, params))
    assert np.allclose(out_np[:, :NUM_LEN], ref_num, atol=5e-3, rtol=0.0), \
        float(np.max(np.abs(out_np[:, :NUM_LEN] - ref_num)))
    assert np.all((out_np[:, :NUM_LEN] > 0.0) & (out_np[:, :NUM_LEN] < 1.0))

    # categorical segments: hard gumbel-softmax rows must be exactly one-hot
    st = NUM_LEN
    for n_cat in CATEGORIES:
        seg = out_np[:, st:st + n_cat]
        assert np.all(np.isin(seg, (0.0, 1.0)))
        assert np.allclose(seg.sum(axis=1), 1.0)
        st += n_cat

    # TODO(synk): 'constrained' training branch (scaler.inverse_transform / correct_preds /
    # scaler.transform) depends on an external constraints file and scaler object; the
    # kernel implements the standard (inference) branch.
    print("KERNEL_OK")
</pallas_src>

<mosaic_0001>
module attributes {stable_mosaic.version = 11 : i64} {
  func.func @generator_kernel(%arg0: memref<256x128xbf16, #tpu.memory_space<vmem>>, %arg1: memref<256x128xf32, #tpu.memory_space<vmem>>, %arg2: memref<128x256xbf16, #tpu.memory_space<vmem>>, %arg3: memref<128x256xbf16, #tpu.memory_space<vmem>>, %arg4: memref<256x256xbf16, #tpu.memory_space<vmem>>, %arg5: memref<128x128xbf16, #tpu.memory_space<vmem>>, %arg6: memref<256x128xbf16, #tpu.memory_space<vmem>>, %arg7: memref<256x128xbf16, #tpu.memory_space<vmem>>, %arg8: memref<256x128xf32, #tpu.memory_space<vmem>>) attributes {dimension_semantics = [], scalar_prefetch = 0 : i64, scratch_operands = 0 : i64, tpu.core_type = #tpu.core_type<tc>} {
    %c0 = arith.constant 0 : index
    %c0_0 = arith.constant 0 : index
    %0 = vector.load %arg0[%c0, %c0_0] : memref<256x128xbf16, #tpu.memory_space<vmem>>, vector<256x128xbf16>
    %c0_1 = arith.constant 0 : index
    %c0_2 = arith.constant 0 : index
    %1 = vector.load %arg2[%c0_1, %c0_2] : memref<128x256xbf16, #tpu.memory_space<vmem>>, vector<128x256xbf16>
    %cst = arith.constant dense<0.000000e+00> : vector<256x256xf32>
    %2 = tpu.matmul %0, %1, %cst {dimension_numbers = #tpu.dot_dimension_numbers<[1], [0], [0], [1], [0, 0, 1, 1], [], []>} : vector<256x128xbf16>, vector<128x256xbf16>, vector<256x256xf32> -> vector<256x256xf32>
    %c0_3 = arith.constant 0 : index
    %c0_4 = arith.constant 0 : index
    %3 = vector.load %arg3[%c0_3, %c0_4] : memref<128x256xbf16, #tpu.memory_space<vmem>>, vector<128x256xbf16>
    %cst_5 = arith.constant dense<0.000000e+00> : vector<256x256xf32>
    %4 = tpu.matmul %0, %3, %cst_5 {dimension_numbers = #tpu.dot_dimension_numbers<[1], [0], [0], [1], [0, 0, 1, 1], [], []>} : vector<256x128xbf16>, vector<128x256xbf16>, vector<256x256xf32> -> vector<256x256xf32>
    %c0_6 = arith.constant 0 : index
    %c0_7 = arith.constant 0 : index
    %5 = vector.load %arg5[%c0_6, %c0_7] : memref<128x128xbf16, #tpu.memory_space<vmem>>, vector<128x128xbf16>
    %cst_8 = arith.constant dense<0.000000e+00> : vector<256x128xf32>
    %6 = tpu.matmul %0, %5, %cst_8 {dimension_numbers = #tpu.dot_dimension_numbers<[1], [0], [0], [1], [0, 0, 1, 1], [], []>} : vector<256x128xbf16>, vector<128x128xbf16>, vector<256x128xf32> -> vector<256x128xf32>
    %cst_9 = arith.constant dense<0.000000e+00> : vector<256xf32>
    %7 = vector.multi_reduction <add>, %2, %cst_9 [0] : vector<256x256xf32> to vector<256xf32>
    %8 = vector.shape_cast %7 : vector<256xf32> to vector<1x256xf32>
    %9 = arith.mulf %2, %2 : vector<256x256xf32>
    %cst_10 = arith.constant dense<0.000000e+00> : vector<256xf32>
    %10 = vector.multi_reduction <add>, %9, %cst_10 [0] : vector<256x256xf32> to vector<256xf32>
    %11 = vector.shape_cast %10 : vector<256xf32> to vector<1x256xf32>
    %cst_11 = arith.constant 3.906250e-03 : f32
    %12 = vector.broadcast %cst_11 : f32 to vector<1x256xf32>
    %13 = arith.mulf %8, %12 : vector<1x256xf32>
    %cst_12 = arith.constant 3.906250e-03 : f32
    %14 = vector.broadcast %cst_12 : f32 to vector<1x256xf32>
    %15 = arith.mulf %11, %14 : vector<1x256xf32>
    %16 = arith.mulf %13, %13 : vector<1x256xf32>
    %17 = arith.subf %15, %16 : vector<1x256xf32>
    %18 = vector.broadcast %13 : vector<1x256xf32> to vector<256x256xf32>
    %19 = arith.subf %2, %18 : vector<256x256xf32>
    %cst_13 = arith.constant 9.99999974E-6 : f32
    %20 = vector.broadcast %cst_13 : f32 to vector<1x256xf32>
    %21 = arith.addf %17, %20 : vector<1x256xf32>
    %22 = math.rsqrt %21 : vector<1x256xf32>
    %23 = vector.broadcast %22 : vector<1x256xf32> to vector<256x256xf32>
    %24 = arith.mulf %19, %23 : vector<256x256xf32>
    %cst_14 = arith.constant 0.000000e+00 : f32
    %25 = vector.broadcast %cst_14 : f32 to vector<256x256xf32>
    %26 = arith.maximumf %24, %25 : vector<256x256xf32>
    %27 = arith.truncf %26 : vector<256x256xf32> to vector<256x256xbf16>
    %c0_15 = arith.constant 0 : index
    %c0_16 = arith.constant 0 : index
    %28 = vector.load %arg4[%c0_15, %c0_16] : memref<256x256xbf16, #tpu.memory_space<vmem>>, vector<256x256xbf16>
    %cst_17 = arith.constant dense<0.000000e+00> : vector<256x256xf32>
    %29 = tpu.matmul %27, %28, %cst_17 {dimension_numbers = #tpu.dot_dimension_numbers<[1], [0], [0], [1], [0, 0, 1, 1], [], []>} : vector<256x256xbf16>, vector<256x256xbf16>, vector<256x256xf32> -> vector<256x256xf32>
    %30 = arith.addf %4, %29 : vector<256x256xf32>
    %c0_18 = arith.constant 0 : index
    %c0_19 = arith.constant 0 : index
    %31 = vector.load %arg6[%c0_18, %c0_19] : memref<256x128xbf16, #tpu.memory_space<vmem>>, vector<256x128xbf16>
    %cst_20 = arith.constant dense<0.000000e+00> : vector<256x128xf32>
    %32 = tpu.matmul %27, %31, %cst_20 {dimension_numbers = #tpu.dot_dimension_numbers<[1], [0], [0], [1], [0, 0, 1, 1], [], []>} : vector<256x256xbf16>, vector<256x128xbf16>, vector<256x128xf32> -> vector<256x128xf32>
    %cst_21 = arith.constant dense<0.000000e+00> : vector<256xf32>
    %33 = vector.multi_reduction <add>, %30, %cst_21 [0] : vector<256x256xf32> to vector<256xf32>
    %34 = vector.shape_cast %33 : vector<256xf32> to vector<1x256xf32>
    %35 = arith.mulf %30, %30 : vector<256x256xf32>
    %cst_22 = arith.constant dense<0.000000e+00> : vector<256xf32>
    %36 = vector.multi_reduction <add>, %35, %cst_22 [0] : vector<256x256xf32> to vector<256xf32>
    %37 = vector.shape_cast %36 : vector<256xf32> to vector<1x256xf32>
    %cst_23 = arith.constant 3.906250e-03 : f32
    %38 = vector.broadcast %cst_23 : f32 to vector<1x256xf32>
    %39 = arith.mulf %34, %38 : vector<1x256xf32>
    %cst_24 = arith.constant 3.906250e-03 : f32
    %40 = vector.broadcast %cst_24 : f32 to vector<1x256xf32>
    %41 = arith.mulf %37, %40 : vector<1x256xf32>
    %42 = arith.mulf %39, %39 : vector<1x256xf32>
    %43 = arith.subf %41, %42 : vector<1x256xf32>
    %44 = vector.broadcast %39 : vector<1x256xf32> to vector<256x256xf32>
    %45 = arith.subf %30, %44 : vector<256x256xf32>
    %cst_25 = arith.constant 9.99999974E-6 : f32
    %46 = vector.broadcast %cst_25 : f32 to vector<1x256xf32>
    %47 = arith.addf %43, %46 : vector<1x256xf32>
    %48 = math.rsqrt %47 : vector<1x256xf32>
    %49 = vector.broadcast %48 : vector<1x256xf32> to vector<256x256xf32>
    %50 = arith.mulf %45, %49 : vector<256x256xf32>
    %cst_26 = arith.constant 0.000000e+00 : f32
    %51 = vector.broadcast %cst_26 : f32 to vector<256x256xf32>
    %52 = arith.maximumf %50, %51 : vector<256x256xf32>
    %53 = arith.truncf %52 : vector<256x256xf32> to vector<256x256xbf16>
    %54 = arith.addf %6, %32 : vector<256x128xf32>
    %c0_27 = arith.constant 0 : index
    %c0_28 = arith.constant 0 : index
    %55 = vector.load %arg7[%c0_27, %c0_28] : memref<256x128xbf16, #tpu.memory_space<vmem>>, vector<256x128xbf16>
    %cst_29 = arith.constant dense<0.000000e+00> : vector<256x128xf32>
    %56 = tpu.matmul %53, %55, %cst_29 {dimension_numbers = #tpu.dot_dimension_numbers<[1], [0], [0], [1], [0, 0, 1, 1], [], []>} : vector<256x256xbf16>, vector<256x128xbf16>, vector<256x128xf32> -> vector<256x128xf32>
    %57 = arith.addf %54, %56 : vector<256x128xf32>
    %c0_30 = arith.constant 0 : index
    %c0_31 = arith.constant 0 : index
    %58 = vector.load %arg1[%c0_30, %c0_31] : memref<256x128xf32, #tpu.memory_space<vmem>>, vector<256x128xf32>
    %59 = arith.addf %57, %58 : vector<256x128xf32>
    %60 = tpu.iota {dimensions = array<i32: 1>} : vector<256x128xi32>
    %c4_i32 = arith.constant 4 : i32
    %61 = vector.broadcast %c4_i32 : i32 to vector<256x128xi32>
    %62 = arith.cmpi slt, %60, %61 : vector<256x128xi32>
    %63 = arith.negf %57 : vector<256x128xf32>
    %64 = math.exp %63 : vector<256x128xf32>
    %cst_32 = arith.constant 1.000000e+00 : f32
    %65 = vector.broadcast %cst_32 : f32 to vector<256x128xf32>
    %66 = arith.addf %65, %64 : vector<256x128xf32>
    %67 = arith.divf %65, %66 : vector<256x128xf32>
    %cst_33 = arith.constant 0.000000e+00 : f32
    %68 = vector.broadcast %cst_33 : f32 to vector<256x128xf32>
    %69 = arith.select %62, %67, %68 : vector<256x128xi1>, vector<256x128xf32>
    %c4_i32_34 = arith.constant 4 : i32
    %70 = vector.broadcast %c4_i32_34 : i32 to vector<256x128xi32>
    %71 = arith.cmpi sge, %60, %70 : vector<256x128xi32>
    %c6_i32 = arith.constant 6 : i32
    %72 = vector.broadcast %c6_i32 : i32 to vector<256x128xi32>
    %73 = arith.cmpi slt, %60, %72 : vector<256x128xi32>
    %74 = arith.andi %71, %73 : vector<256x128xi1>
    %cst_35 = arith.constant 0xFF800000 : f32
    %75 = vector.broadcast %cst_35 : f32 to vector<256x128xf32>
    %76 = arith.select %74, %59, %75 : vector<256x128xi1>, vector<256x128xf32>
    %cst_36 = arith.constant dense<0xFF800000> : vector<256xf32>
    %77 = vector.multi_reduction <maximumf>, %76, %cst_36 [1] : vector<256x128xf32> to vector<256xf32>
    %78 = vector.shape_cast %77 : vector<256xf32> to vector<256x1xf32>
    %79 = vector.broadcast %78 : vector<256x1xf32> to vector<256x128xf32>
    %80 = arith.cmpf oeq, %76, %79 : vector<256x128xf32>
    %c128_i32 = arith.constant 128 : i32
    %81 = vector.broadcast %c128_i32 : i32 to vector<256x128xi32>
    %82 = arith.select %80, %60, %81 : vector<256x128xi1>, vector<256x128xi32>
    %cst_37 = arith.constant dense<2147483647> : vector<256xi32>
    %83 = vector.multi_reduction <minsi>, %82, %cst_37 [1] : vector<256x128xi32> to vector<256xi32>
    %84 = vector.shape_cast %83 : vector<256xi32> to vector<256x1xi32>
    %85 = vector.broadcast %84 : vector<256x1xi32> to vector<256x128xi32>
    %86 = arith.cmpi eq, %60, %85 : vector<256x128xi32>
    %cst_38 = arith.constant 1.000000e+00 : f32
    %cst_39 = arith.constant 0.000000e+00 : f32
    %87 = vector.broadcast %cst_38 : f32 to vector<256x128xf32>
    %88 = vector.broadcast %cst_39 : f32 to vector<256x128xf32>
    %89 = arith.select %86, %87, %88 : vector<256x128xi1>, vector<256x128xf32>
    %90 = arith.addf %69, %89 : vector<256x128xf32>
    %c6_i32_40 = arith.constant 6 : i32
    %91 = vector.broadcast %c6_i32_40 : i32 to vector<256x128xi32>
    %92 = arith.cmpi sge, %60, %91 : vector<256x128xi32>
    %c9_i32 = arith.constant 9 : i32
    %93 = vector.broadcast %c9_i32 : i32 to vector<256x128xi32>
    %94 = arith.cmpi slt, %60, %93 : vector<256x128xi32>
    %95 = arith.andi %92, %94 : vector<256x128xi1>
    %cst_41 = arith.constant 0xFF800000 : f32
    %96 = vector.broadcast %cst_41 : f32 to vector<256x128xf32>
    %97 = arith.select %95, %59, %96 : vector<256x128xi1>, vector<256x128xf32>
    %cst_42 = arith.constant dense<0xFF800000> : vector<256xf32>
    %98 = vector.multi_reduction <maximumf>, %97, %cst_42 [1] : vector<256x128xf32> to vector<256xf32>
    %99 = vector.shape_cast %98 : vector<256xf32> to vector<256x1xf32>
    %100 = vector.broadcast %99 : vector<256x1xf32> to vector<256x128xf32>
    %101 = arith.cmpf oeq, %97, %100 : vector<256x128xf32>
    %c128_i32_43 = arith.constant 128 : i32
    %102 = vector.broadcast %c128_i32_43 : i32 to vector<256x128xi32>
    %103 = arith.select %101, %60, %102 : vector<256x128xi1>, vector<256x128xi32>
    %cst_44 = arith.constant dense<2147483647> : vector<256xi32>
    %104 = vector.multi_reduction <minsi>, %103, %cst_44 [1] : vector<256x128xi32> to vector<256xi32>
    %105 = vector.shape_cast %104 : vector<256xi32> to vector<256x1xi32>
    %106 = vector.broadcast %105 : vector<256x1xi32> to vector<256x128xi32>
    %107 = arith.cmpi eq, %60, %106 : vector<256x128xi32>
    %cst_45 = arith.constant 1.000000e+00 : f32
    %cst_46 = arith.constant 0.000000e+00 : f32
    %108 = vector.broadcast %cst_45 : f32 to vector<256x128xf32>
    %109 = vector.broadcast %cst_46 : f32 to vector<256x128xf32>
    %110 = arith.select %107, %108, %109 : vector<256x128xi1>, vector<256x128xf32>
    %111 = arith.addf %90, %110 : vector<256x128xf32>
    %c0_47 = arith.constant 0 : index
    %c0_48 = arith.constant 0 : index
    %112 = vector.load %arg8[%c0_47, %c0_48] : memref<256x128xf32, #tpu.memory_space<vmem>>, vector<256x128xf32>
    tpu.vector_store %arg8[%c0_47, %c0_48], %111 {strides = array<i32>} : memref<256x128xf32, #tpu.memory_space<vmem>>, vector<256x128xf32>,
    return
  }
}

</mosaic_0001>

<bundles_post_ra>
// kernel: generator_forward.1
= control target key start
LH: loop header
LB: loop body
LE: loop exit
PB: predicated region body
PF: predicated region fallthrough
CT: control target
= control target key end

     0   :  { %13 = vsyncpa [#allocation3], 0  ;;  %s9699_s0 = inlined_call_operand.hbm [shape: bf16[256,128], index: 0, kind: input, shape index: {}]   ;;  %s9700_s1 = inlined_call_operand.hbm [shape: f32[256,128], index: 1, kind: input, shape index: {}]   ;;  %s9701_s2 = inlined_call_operand.hbm [shape: bf16[128,256], index: 2, kind: input, shape index: {}]   ;;  %s9702_s3 = inlined_call_operand.hbm [shape: bf16[128,256], index: 3, kind: input, shape index: {}]   ;;  %s9703_s4 = inlined_call_operand.hbm [shape: bf16[256,256], index: 4, kind: input, shape index: {}]   ;;  %s9704_s5 = inlined_call_operand.hbm [shape: bf16[128,128], index: 5, kind: input, shape index: {}]   ;;  %s9705_s6 = inlined_call_operand.hbm [shape: bf16[256,128], index: 6, kind: input, shape index: {}]   ;;  %s9706_s7 = inlined_call_operand.hbm [shape: bf16[256,128], index: 7, kind: input, shape index: {}]   ;;  %s9707_s8 = inlined_call_operand.vmem [shape: f32[256,128], index: 8, kind: output, shape index: {}]  }
   0x1   :  { %14 = vsyncpa [#allocation5], 0 }
   0x2   :  { %15 = vsyncpa [#allocation8], 0 }
   0x3   :  { %16 = vsyncpa [#allocation11], 0 }
   0x4   :  { %17 = vsyncpa [#allocation14], 0  ;;  %s5755_s27 = smov [#allocation4]   ;;  %s5569_s9 = scalar_lea.hbm %s9700_s1, 4096 }
   0x5   :  { %s35_s28 = sshll.u32 %s5755_s27, 4  ;;  %p5570_p0 = scmp.ne.s32.totalorder %s9700_s1, %s5569_s9  ;;  %s36_s28 = int_to_ptr.vmem [resolvable:$true] %s35_s28 }
   0x6   :  { %p5573_p1 = scmp.lt.u32.totalorder %s5569_s9, %s9700_s1 }
   0x8   :  { %p5575_p2 = pnand %p5573_p1, %p5570_p0 }
   0xa   :  { %5578 = shalt.err (!%p5575_p2)
}
   0xb   :  { %s5579_s14 = scalar_lea.vmem %s36_s28, 4096  ;;  %p5584_p4 = scmp.lt.s32.totalorder %s36_s28, %s36_s28 }
   0xc   :  { %p5580_p3 = scmp.ne.s32.totalorder %s36_s28, %s5579_s14  ;;  %p5585_p5 = scmp.lt.s32.totalorder %s5579_s14, %s5579_s14 }
   0xe   :  { %p5586_p6 = por %p5585_p5, %p5584_p4 }
  0x10   :  { %p5587_p7 = pnand %p5586_p6, %p5580_p3 }
  0x12   :  { %5590 = shalt.err (!%p5587_p7)
}
  0x13   :  { %s5756_s15 = smov 128   ;;  %s5757_s16 = smov 8  }
  0x14   :  { %41 = dma.hbm_to_vmem [thread:$0]  %s9700_s1, 4096, %s36_s28, [#allocation5], %s5756_s15, %s5756_s15, %s5757_s16  }
  0x15   :  { %s5758_s19 = smov [#allocation7]   ;;  %s5591_s23 = scalar_lea.hbm %s9702_s3, 2048 }
  0x16   :  { %s59_s20 = sshll.u32 %s5758_s19, 4  ;;  %p5592_p8 = scmp.ne.s32.totalorder %s9702_s3, %s5591_s23  ;;  %s60_s20 = int_to_ptr.vmem [resolvable:$true] %s59_s20 }
  0x17   :  { %p5595_p9 = scmp.lt.u32.totalorder %s5591_s23, %s9702_s3 }
  0x19   :  { %p5597_p10 = pnand %p5595_p9, %p5592_p8 }
  0x1b   :  { %5600 = shalt.err (!%p5597_p10)
}
  0x1c   :  { %s5601_s29 = scalar_lea.vmem %s60_s20, 2048  ;;  %p5606_p12 = scmp.lt.s32.totalorder %s60_s20, %s60_s20 }
  0x1d   :  { %p5602_p11 = scmp.ne.s32.totalorder %s60_s20, %s5601_s29  ;;  %p5607_p13 = scmp.lt.s32.totalorder %s5601_s29, %s5601_s29 }
  0x1f   :  { %p5608_p0 = por %p5607_p13, %p5606_p12 }
  0x21   :  { %p5609_p1 = pnand %p5608_p0, %p5602_p11 }
  0x23   :  { %5612 = shalt.err (!%p5609_p1)
}
  0x24   :  { %65 = dma.hbm_to_vmem [thread:$0]  %s9702_s3, 2048, %s60_s20, [#allocation8], %s5756_s15, %s5756_s15, %s5757_s16  }
  0x25   :  { %s5759_s30 = smov [#allocation10]   ;;  %s5760_s10 = smov [#allocation2]  }
  0x26   :  { %s83_s9 = sshll.u32 %s5759_s30, 4  ;;  %s23_s11 = sshll.u32 %s5760_s10, 4  ;;  %s84_s9 = int_to_ptr.vmem [resolvable:$true] %s83_s9  ;;  %s5844_s11 = int_to_ptr.vmem [resolvable:$true] %s23_s11 }
  0x27   :  { %s5613_s14 = scalar_lea.hbm %s9704_s5, 1024 }
  0x28   :  { %p5614_p2 = scmp.ne.s32.totalorder %s9704_s5, %s5613_s14  ;;  %p5617_p3 = scmp.lt.u32.totalorder %s5613_s14, %s9704_s5 }
  0x2a   :  { %p5619_p4 = pnand %p5617_p3, %p5614_p2 }
  0x2c   :  { %5622 = shalt.err (!%p5619_p4)
}
  0x2d   :  { %s5623_s3 = scalar_lea.vmem %s84_s9, 1024  ;;  %p5628_p6 = scmp.lt.s32.totalorder %s84_s9, %s84_s9 }
  0x2e   :  { %p5624_p5 = scmp.ne.s32.totalorder %s84_s9, %s5623_s3  ;;  %p5629_p7 = scmp.lt.s32.totalorder %s5623_s3, %s5623_s3 }
  0x30   :  { %p5630_p8 = por %p5629_p7, %p5628_p6 }
  0x32   :  { %p5631_p9 = pnand %p5630_p8, %p5624_p5 }
  0x34   :  { %5634 = shalt.err (!%p5631_p9)
}
  0x35   :  { %s5761_s20 = smov 64   ;;  %s5762_s22 = smov 4  }
  0x36   :  { %89 = dma.hbm_to_vmem [thread:$0]  %s9704_s5, 1024, %s84_s9, [#allocation11], %s5761_s20, %s5761_s20, %s5762_s22  }
  0x37   :  { %s5635_s27 = scalar_lea.hbm %s9699_s0, 2048 }
  0x38   :  { %p5636_p10 = scmp.ne.s32.totalorder %s9699_s0, %s5635_s27  ;;  %p5639_p11 = scmp.lt.u32.totalorder %s5635_s27, %s9699_s0 }
  0x3a   :  { %p5641_p12 = pnand %p5639_p11, %p5636_p10 }
  0x3c   :  { %5644 = shalt.err (!%p5641_p12)
}
  0x3d   :  { %s5645_s10 = scalar_lea.vmem %s5844_s11, 2048  ;;  %p5650_p0 = scmp.lt.s32.totalorder %s5844_s11, %s5844_s11 }
  0x3e   :  { %p5646_p13 = scmp.ne.s32.totalorder %s5844_s11, %s5645_s10  ;;  %p5651_p1 = scmp.lt.s32.totalorder %s5645_s10, %s5645_s10 }
  0x40   :  { %p5652_p2 = por %p5651_p1, %p5650_p0 }
  0x42   :  { %p5653_p3 = pnand %p5652_p2, %p5646_p13 }
  0x44   :  { %5656 = shalt.err (!%p5653_p3)
}
  0x45   :  { %29 = dma.hbm_to_vmem [thread:$0]  %s9699_s0, 2048, %s5844_s11, [#allocation3], %s5761_s20, %s5761_s20, %s5762_s22  }
  0x46   :  { %s5763_s12 = smov [#allocation6]   ;;  %s5764_s14 = smov [#allocation9]  }
  0x47   :  { %s47_s13 = sshll.u32 %s5763_s12, 4  ;;  %s71_s17 = sshll.u32 %s5764_s14, 4  ;;  %s48_s13 = int_to_ptr.vmem [resolvable:$true] %s47_s13  ;;  %s5881_s17 = int_to_ptr.vmem [resolvable:$true] %s71_s17 }
  0x48   :  { %s5657_s21 = scalar_lea.hbm %s9701_s2, 2048 }
  0x49   :  { %p5658_p4 = scmp.ne.s32.totalorder %s9701_s2, %s5657_s21  ;;  %p5661_p5 = scmp.lt.u32.totalorder %s5657_s21, %s9701_s2 }
  0x4b   :  { %p5663_p6 = pnand %p5661_p5, %p5658_p4 }
  0x4d   :  { %5666 = shalt.err (!%p5663_p6)
}
  0x4e   :  { %s5667_s0 = scalar_lea.vmem %s48_s13, 2048  ;;  %p5672_p8 = scmp.lt.s32.totalorder %s48_s13, %s48_s13 }
  0x4f   :  { %p5668_p7 = scmp.ne.s32.totalorder %s48_s13, %s5667_s0  ;;  %p5673_p9 = scmp.lt.s32.totalorder %s5667_s0, %s5667_s0 }
  0x51   :  { %p5674_p10 = por %p5673_p9, %p5672_p8 }
  0x53   :  { %p5675_p11 = pnand %p5674_p10, %p5668_p7 }
  0x55   :  { %5678 = shalt.err (!%p5675_p11)
}
  0x56   :  { %53 = dma.hbm_to_vmem [thread:$0]  %s9701_s2, 2048, %s48_s13, [#allocation5], %s5756_s15, %s5756_s15, %s5757_s16  }
  0x57   :  { %s5679_s1 = scalar_lea.hbm %s9703_s4, 4096 }
  0x58   :  { %p5680_p12 = scmp.ne.s32.totalorder %s9703_s4, %s5679_s1  ;;  %p5683_p13 = scmp.lt.u32.totalorder %s5679_s1, %s9703_s4 }
  0x5a   :  { %p5685_p0 = pnand %p5683_p13, %p5680_p12 }
  0x5c   :  { %5688 = shalt.err (!%p5685_p0)
}
  0x5d   :  { %s5689_s9 = scalar_lea.vmem %s5881_s17, 4096  ;;  %p5694_p2 = scmp.lt.s32.totalorder %s5881_s17, %s5881_s17 }
  0x5e   :  { %p5690_p1 = scmp.ne.s32.totalorder %s5881_s17, %s5689_s9  ;;  %p5695_p3 = scmp.lt.s32.totalorder %s5689_s9, %s5689_s9 }
  0x60   :  { %p5696_p4 = por %p5695_p3, %p5694_p2 }
  0x62   :  { %p5697_p5 = pnand %p5696_p4, %p5690_p1 }
  0x64   :  { %5700 = shalt.err (!%p5697_p5)
}
  0x65   :  { %77 = dma.hbm_to_vmem [thread:$0]  %s9703_s4, 4096, %s5881_s17, [#allocation8], %s5756_s15, %s5756_s15, %s5757_s16  }
  0x66   :  { %s5765_s13 = smov [#allocation12]   ;;  %s5766_s18 = smov [#allocation13]  }
  0x67   :  { %s95_s14 = sshll.u32 %s5765_s13, 4  ;;  %s107_s19 = sshll.u32 %s5766_s18, 4  ;;  %s96_s14 = int_to_ptr.vmem [resolvable:$true] %s95_s14  ;;  %s5918_s19 = int_to_ptr.vmem [resolvable:$true] %s107_s19 }
  0x68   :  { %s5701_s23 = scalar_lea.hbm %s9705_s6, 2048 }
  0x69   :  { %p5702_p6 = scmp.ne.s32.totalorder %s9705_s6, %s5701_s23  ;;  %p5705_p7 = scmp.lt.u32.totalorder %s5701_s23, %s9705_s6 }
  0x6b   :  { %p5707_p8 = pnand %p5705_p7, %p5702_p6 }
  0x6d   :  { %5710 = shalt.err (!%p5707_p8)
}
  0x6e   :  { %s5711_s4 = scalar_lea.vmem %s96_s14, 2048  ;;  %p5716_p10 = scmp.lt.s32.totalorder %s96_s14, %s96_s14 }
  0x6f   :  { %p5712_p9 = scmp.ne.s32.totalorder %s96_s14, %s5711_s4  ;;  %p5717_p11 = scmp.lt.s32.totalorder %s5711_s4, %s5711_s4 }
  0x71   :  { %p5718_p12 = por %p5717_p11, %p5716_p10 }
  0x73   :  { %p5719_p13 = pnand %p5718_p12, %p5712_p9 }
  0x75   :  { %5722 = shalt.err (!%p5719_p13)
}
  0x76   :  { %101 = dma.hbm_to_vmem [thread:$0]  %s9705_s6, 2048, %s96_s14, [#allocation11], %s5761_s20, %s5761_s20, %s5762_s22  }
  0x77   :  { %s5723_s27 = scalar_lea.hbm %s9706_s7, 2048 }
  0x78   :  { %p5724_p0 = scmp.ne.s32.totalorder %s9706_s7, %s5723_s27  ;;  %p5727_p1 = scmp.lt.u32.totalorder %s5723_s27, %s9706_s7 }
  0x7a   :  { %p5729_p2 = pnand %p5727_p1, %p5724_p0 }
  0x7c   :  { %5732 = shalt.err (!%p5729_p2)
}
  0x7d   :  { %s5733_s10 = scalar_lea.vmem %s5918_s19, 2048  ;;  %p5738_p4 = scmp.lt.s32.totalorder %s5918_s19, %s5918_s19 }
  0x7e   :  { %p5734_p3 = scmp.ne.s32.totalorder %s5918_s19, %s5733_s10  ;;  %p5739_p5 = scmp.lt.s32.totalorder %s5733_s10, %s5733_s10 }
  0x80   :  { %p5740_p6 = por %p5739_p5, %p5738_p4 }
  0x82   :  { %p5741_p7 = pnand %p5740_p6, %p5734_p3 }
  0x84   :  { %5744 = shalt.err (!%p5741_p7)
}
  0x85   :  { %113 = dma.hbm_to_vmem [thread:$0]  %s9706_s7, 2048, %s5918_s19, [#allocation14], %s5761_s20, %s5761_s20, %s5762_s22  }
  0x86   :  { %5745 = dma.done.wait [#allocation3], 2048  }
  0x87   :  { %5746 = vsyncadd [#allocation3], 4294965248 }
  0x88   :  { %5747 = dma.done.wait [#allocation5], 6144  }
  0x89   :  { %5748 = vsyncadd [#allocation5], 4294961152 }
  0x8a   :  { %5749 = dma.done.wait [#allocation8], 6144  }
  0x8b   :  { %5750 = vsyncadd [#allocation8], 4294961152 }
  0x8c   :  { %5751 = dma.done.wait [#allocation11], 3072  }
  0x8d   :  { %5752 = vsyncadd [#allocation11], 4294964224 }
  0x8e   :  { %5753 = dma.done.wait [#allocation14], 2048  }
  0x8f   :  { %5754 = vsyncadd [#allocation14], 4294965248  ;;  %v9708_v0 = vmov 0   ;;  %v5265_v1 = vld [vmem:[#allocation6 + $0x4] ss:$8 sps:$4 sm:$0xff]   ;;  %v5291_v19 = vld [vmem:[#allocation2 + $0x10] sm:$0xff]  }
  0x90   :  { %395 = vmatprep.mubr.bf16.mxu0 %v9708_v0  ;;  %v5267_v2 = vld [vmem:[#allocation6] ss:$8 sps:$4 sm:$0xff]   ;;  %363 = vmatprep.subr.bf16.mxu0 %v5265_v1  ;;  %v5268_v3 = vld [vmem:[#allocation6 + $0x14] ss:$8 sps:$4 sm:$0xff]   ;;  %v5270_v4 = vld [vmem:[#allocation6 + $0x10] ss:$8 sps:$4 sm:$0xff]  }
  0x91   :  { %364 = vmatpush1.bf16.msra.mxu0 %v5267_v2  ;;  %v5271_v5 = vld [vmem:[#allocation6 + $0x24] ss:$8 sps:$4 sm:$0xff]   ;;  %v5273_v6 = vld [vmem:[#allocation6 + $0x20] ss:$8 sps:$4 sm:$0xff]   ;;  %v5274_v7 = vld [vmem:[#allocation6 + $0x34] ss:$8 sps:$4 sm:$0xff]  }
  0x92   :  { %365 = vmatprep.subr.bf16.mxu0 %v5268_v3  ;;  %v5276_v8 = vld [vmem:[#allocation6 + $0x30] ss:$8 sps:$4 sm:$0xff]   ;;  %v5277_v9 = vld [vmem:[#allocation6 + $0x44] ss:$8 sps:$4 sm:$0xff]   ;;  %v5279_v10 = vld [vmem:[#allocation6 + $0x40] ss:$8 sps:$4 sm:$0xff]  }
  0x93   :  { %v5280_v11 = vld [vmem:[#allocation6 + $0x54] ss:$8 sps:$4 sm:$0xff]   ;;  %v5282_v12 = vld [vmem:[#allocation6 + $0x50] ss:$8 sps:$4 sm:$0xff]   ;;  %v5283_v13 = vld [vmem:[#allocation6 + $0x64] ss:$8 sps:$4 sm:$0xff]  }
  0x94   :  { %v5285_v14 = vld [vmem:[#allocation6 + $0x60] ss:$8 sps:$4 sm:$0xff]   ;;  %v5286_v15 = vld [vmem:[#allocation6 + $0x74] ss:$8 sps:$4 sm:$0xff]   ;;  %v5288_v16 = vld [vmem:[#allocation6 + $0x70] ss:$8 sps:$4 sm:$0xff]  }
  0x95   :  { %366 = vmatpush1.bf16.msra.mxu0 %v5270_v4  ;;  %v5289_v17 = vld [vmem:[#allocation2] sm:$0xff]   ;;  %v5290_v18 = vld [vmem:[#allocation2 + $0x8] sm:$0xff]   ;;  %v5292_v20 = vld [vmem:[#allocation2 + $0x18] sm:$0xff]  }
  0x96   :  { %367 = vmatprep.subr.bf16.mxu0 %v5271_v5  ;;  %v5293_v21 = vld [vmem:[#allocation2 + $0x20] sm:$0xff]   ;;  %v5294_v22 = vld [vmem:[#allocation2 + $0x28] sm:$0xff]   ;;  %v5295_v23 = vld [vmem:[#allocation2 + $0x30] sm:$0xff]  }
  0x97   :  { %v5296_v24 = vld [vmem:[#allocation2 + $0x38] sm:$0xff]   ;;  %v5297_v25 = vld [vmem:[#allocation2 + $0x40] sm:$0xff]   ;;  %v5298_v26 = vld [vmem:[#allocation2 + $0x48] sm:$0xff]  }
  0x98   :  { %v5299_v27 = vld [vmem:[#allocation2 + $0x50] sm:$0xff]   ;;  %v5300_v28 = vld [vmem:[#allocation2 + $0x58] sm:$0xff]   ;;  %v5301_v29 = vld [vmem:[#allocation2 + $0x60] sm:$0xff]  }
  0x99   :  { %368 = vmatpush1.bf16.msra.mxu0 %v5273_v6  ;;  %v5302_v30 = vld [vmem:[#allocation2 + $0x68] sm:$0xff]   ;;  %v5303_v31 = vld [vmem:[#allocation2 + $0x70] sm:$0xff]   ;;  %v5304_v32 = vld [vmem:[#allocation2 + $0x78] sm:$0xff]  }
  0x9a   :  { %369 = vmatprep.subr.bf16.mxu0 %v5274_v7  ;;  %v5305_v33 = vld [vmem:[#allocation9 + $0x4] ss:$8 sps:$4 sm:$0xff]   ;;  %v5307_v34 = vld [vmem:[#allocation9] ss:$8 sps:$4 sm:$0xff]   ;;  %v5308_v35 = vld [vmem:[#allocation9 + $0x14] ss:$8 sps:$4 sm:$0xff]  }
  0x9b   :  { %5155 = vmatprep.subr.bf16.mxu1 %v5305_v33  ;;  %v5310_v36 = vld [vmem:[#allocation9 + $0x10] ss:$8 sps:$4 sm:$0xff]   ;;  %v5311_v37 = vld [vmem:[#allocation9 + $0x24] ss:$8 sps:$4 sm:$0xff]   ;;  %v5313_v38 = vld [vmem:[#allocation9 + $0x20] ss:$8 sps:$4 sm:$0xff]  }
  0x9c   :  { %5171 = vmatpush1.bf16.msra.mxu1 %v5307_v34  ;;  %v5314_v39 = vld [vmem:[#allocation9 + $0x34] ss:$8 sps:$4 sm:$0xff]   ;;  %v5316_v40 = vld [vmem:[#allocation9 + $0x30] ss:$8 sps:$4 sm:$0xff]   ;;  %v5317_v41 = vld [vmem:[#allocation9 + $0x44] ss:$8 sps:$4 sm:$0xff]  }
  0x9d   :  { %370 = vmatpush1.bf16.msra.mxu0 %v5276_v8  ;;  %5156 = vmatprep.subr.bf16.mxu1 %v5308_v35  ;;  %v5319_v42 = vld [vmem:[#allocation9 + $0x40] ss:$8 sps:$4 sm:$0xff]   ;;  %v5320_v43 = vld [vmem:[#allocation9 + $0x54] ss:$8 sps:$4 sm:$0xff]   ;;  %v5322_v44 = vld [vmem:[#allocation9 + $0x50] ss:$8 sps:$4 sm:$0xff]  }
  0x9e   :  { %371 = vmatprep.subr.bf16.mxu0 %v5277_v9  ;;  %v5323_v5 = vld [vmem:[#allocation9 + $0x64] ss:$8 sps:$4 sm:$0xff]   ;;  %v5325_v9 = vld [vmem:[#allocation9 + $0x60] ss:$8 sps:$4 sm:$0xff]  }
  0xa0   :  { %5172 = vmatpush1.bf16.msra.mxu1 %v5310_v36 }
  0xa1   :  { %372 = vmatpush1.bf16.msra.mxu0 %v5279_v10  ;;  %5157 = vmatprep.subr.bf16.mxu1 %v5311_v37 }
  0xa2   :  { %373 = vmatprep.subr.bf16.mxu0 %v5280_v11 }
  0xa4   :  { %5173 = vmatpush1.bf16.msra.mxu1 %v5313_v38 }
  0xa5   :  { %374 = vmatpush1.bf16.msra.mxu0 %v5282_v12  ;;  %5158 = vmatprep.subr.bf16.mxu1 %v5314_v39  ;;  %v5326_v12 = vld [vmem:[#allocation9 + $0x74] ss:$8 sps:$4 sm:$0xff]  }
  0xa6   :  { %375 = vmatprep.subr.bf16.mxu0 %v5283_v13 }
  0xa8   :  { %5174 = vmatpush1.bf16.msra.mxu1 %v5316_v40 }
  0xa9   :  { %376 = vmatpush1.bf16.msra.mxu0 %v5285_v14  ;;  %5159 = vmatprep.subr.bf16.mxu1 %v5317_v41  ;;  %v5328_v14 = vld [vmem:[#allocation9 + $0x70] ss:$8 sps:$4 sm:$0xff]  }
  0xaa   :  { %377 = vmatprep.subr.bf16.mxu0 %v5286_v15 }
  0xac   :  { %5175 = vmatpush1.bf16.msra.mxu1 %v5319_v42 }
  0xad   :  { %378 = vmatpush1.bf16.msra.mxu0 %v5288_v16  ;;  %5160 = vmatprep.subr.bf16.mxu1 %v5320_v43 }
  0xae   :  { %1228 = vmatprep.subr.bf16.mxu0 %v5305_v33 }
  0xb0   :  { %396 = vmatmul.mubr.bf16.vlgmr.msra.gmra.mrb[0].mxu0 %v5289_v17  ;;  %5176 = vmatpush1.bf16.msra.mxu1 %v5322_v44 }
  0xb1   :  { %405 = vmatprep.mubr.bf16.mxu0 %v9708_v0  ;;  %1229 = vmatpush1.bf16.msra.mxu0 %v5307_v34  ;;  %v5334_v34 = vld [vmem:[#allocation9 + $0x90] ss:$8 sps:$4 sm:$0xff]  }
  0xb2   :  { %1230 = vmatprep.subr.bf16.mxu0 %v5308_v35  ;;  %5161 = vmatprep.subr.bf16.mxu1 %v5323_v5 }
  0xb4   :  { %5177 = vmatpush1.bf16.msra.mxu1 %v5325_v9 }
  0xb5   :  { %1231 = vmatpush1.bf16.msra.mxu0 %v5310_v36  ;;  %5162 = vmatprep.subr.bf16.mxu1 %v5326_v12 }
  0xb6   :  { %1232 = vmatprep.subr.bf16.mxu0 %v5311_v37 }
  0xb8   :  { %406 = vmatmul.mubr.bf16.gmra.mrb[4].mxu0 %v5290_v18  ;;  %5178 = vmatpush1.bf16.msra.mxu1 %v5328_v14 }
  0xb9   :  { %415 = vmatprep.mubr.bf16.mxu0 %v9708_v0  ;;  %1233 = vmatpush1.bf16.msra.mxu0 %v5313_v38 }
  0xba   :  { %1234 = vmatprep.subr.bf16.mxu0 %v5314_v39 }
  0xbd   :  { %1235 = vmatpush1.bf16.msra.mxu0 %v5316_v40 }
  0xbe   :  { %1236 = vmatprep.subr.bf16.mxu0 %v5317_v41 }
  0xc0   :  { %416 = vmatmul.mubr.bf16.gmra.mrb[8].mxu0 %v5291_v19 }
  0xc1   :  { %425 = vmatprep.mubr.bf16.mxu0 %v9708_v0  ;;  %1237 = vmatpush1.bf16.msra.mxu0 %v5319_v42 }
  0xc2   :  { %1238 = vmatprep.subr.bf16.mxu0 %v5320_v43 }
  0xc5   :  { %1239 = vmatpush1.bf16.msra.mxu0 %v5322_v44 }
  0xc6   :  { %1240 = vmatprep.subr.bf16.mxu0 %v5323_v5 }
  0xc8   :  { %426 = vmatmul.mubr.bf16.gmra.mrb[12].mxu0 %v5292_v20 }
  0xc9   :  { %435 = vmatprep.mubr.bf16.mxu0 %v9708_v0  ;;  %1241 = vmatpush1.bf16.msra.mxu0 %v5325_v9 }
  0xca   :  { %1242 = vmatprep.subr.bf16.mxu0 %v5326_v12 }
  0xcd   :  { %1243 = vmatpush1.bf16.msra.mxu0 %v5328_v14 }
  0xd0   :  { %436 = vmatmul.mubr.bf16.gmra.mrb[16].mxu0 %v5293_v21 }
  0xd1   :  { %445 = vmatprep.mubr.bf16.mxu0 %v9708_v0 }
  0xd8   :  { %446 = vmatmul.mubr.bf16.gmra.mrb[20].mxu0 %v5294_v22 }
  0xd9   :  { %455 = vmatprep.mubr.bf16.mxu0 %v9708_v0 }
  0xe0   :  { %456 = vmatmul.mubr.bf16.gmra.mrb[24].mxu0 %v5295_v23 }
  0xe1   :  { %465 = vmatprep.mubr.bf16.mxu0 %v9708_v0 }
  0xe8   :  { %466 = vmatmul.mubr.bf16.gmra.mrb[28].mxu0 %v5296_v24 }
  0xe9   :  { %475 = vmatprep.mubr.bf16.mxu0 %v9708_v0 }
  0xf0   :  { %476 = vmatmul.mubr.bf16.gmra.mrb[32].mxu0 %v5297_v25  ;;  %v5329_v25 = vld [vmem:[#allocation9 + $0x84] ss:$8 sps:$4 sm:$0xff]  }
  0xf1   :  { %485 = vmatprep.mubr.bf16.mxu0 %v9708_v0  ;;  %5163 = vmatprep.subr.bf16.mxu1 %v5329_v25 }
  0xf2   :  { %1244 = vmatprep.subr.bf16.mxu0 %v5329_v25 }
  0xf8   :  { %486 = vmatmul.mubr.bf16.gmra.mrb[36].mxu0 %v5298_v26 }
  0xf9   :  { %495 = vmatprep.mubr.bf16.mxu0 %v9708_v0 }
 0x100   :  { %496 = vmatmul.mubr.bf16.gmra.mrb[40].mxu0 %v5299_v27 }
 0x101   :  { %505 = vmatprep.mubr.bf16.mxu0 %v9708_v0 }
 0x108   :  { %506 = vmatmul.mubr.bf16.gmra.mrb[44].mxu0 %v5300_v28 }
 0x109   :  { %515 = vmatprep.mubr.bf16.mxu0 %v9708_v0 }
 0x110   :  { %516 = vmatmul.mubr.bf16.gmra.mrb[48].mxu0 %v5301_v29  ;;  %v5331_v29 = vld [vmem:[#allocation9 + $0x80] ss:$8 sps:$4 sm:$0xff]  }
 0x111   :  { %525 = vmatprep.mubr.bf16.mxu0 %v9708_v0  ;;  %5179 = vmatpush1.bf16.msra.mxu1 %v5331_v29 }
 0x112   :  { %1245 = vmatpush1.bf16.msra.mxu0 %v5331_v29 }
 0x118   :  { %526 = vmatmul.mubr.bf16.gmra.mrb[52].mxu0 %v5302_v30 }
 0x119   :  { %535 = vmatprep.mubr.bf16.mxu0 %v9708_v0 }
 0x120   :  { %536 = vmatmul.mubr.bf16.gmra.mrb[56].mxu0 %v5303_v31 }
 0x121   :  { %545 = vmatprep.mubr.bf16.mxu0 %v9708_v0 }
 0x128   :  { %546 = vmatmul.mubr.bf16.gmra.mrb[60].mxu0 %v5304_v32  ;;  %v5332_v32 = vld [vmem:[#allocation9 + $0x94] ss:$8 sps:$4 sm:$0xff]  }
 0x129   :  { %5164 = vmatprep.subr.bf16.mxu1 %v5332_v32  ;;  %1246 = vmatprep.subr.bf16.mxu0 %v5332_v32 }
 0x12a   :  { %5180 = vmatpush1.bf16.msra.mxu1 %v5334_v34  ;;  %1247 = vmatpush1.bf16.msra.mxu0 %v5334_v34 }
 0x183   :  { %v5971_v45 = vpop.f32.mrb[0].mxu0 }
 0x184   :  { %v5973_v46 = vpop.f32.mrb[1].mxu0  ;;  %v662_v48 = vmul.f32 %v5971_v45, %v5971_v45 }
 0x185   :  { %v5975_v47 = vpop.f32.mrb[2].mxu0  ;;  %v663_v52 = vmul.f32 %v5973_v46, %v5973_v46 }
 0x186   :  { %v588_v49 = vadd.f32 %v5975_v47, %v5971_v45  ;;  %v664_v50 = vmul.f32 %v5975_v47, %v5975_v47  ;;  %v5983_v51 = vpop.f32.mrb[3].mxu0 }
 0x187   :  { %v625_v53 = vadd.f32 %v5983_v51, %v5973_v46  ;;  %v665_v54 = vmul.f32 %v5983_v51, %v5983_v51 }
 0x188   :  { %v726_v55 = vadd.f32 %v664_v50, %v662_v48  ;;  %v5335_v48 = vld [vmem:[#allocation9 + $0xa4] ss:$8 sps:$4 sm:$0xff]  }
 0x189   :  { %v763_v56 = vadd.f32 %v665_v54, %v663_v52  ;;  %5165 = vmatprep.subr.bf16.mxu1 %v5335_v48  ;;  %1248 = vmatprep.subr.bf16.mxu0 %v5335_v48  ;;  %v5350_v48 = vld [vmem:[#allocation9 + $0xf4] ss:$8 sps:$4 sm:$0xff]  }
 0x18b   :  { %v5991_v57 = vpop.f32.mrb[4].mxu0 }
 0x18c   :  { %v589_v58 = vadd.f32 %v588_v49, %v5991_v57  ;;  %v666_v59 = vmul.f32 %v5991_v57, %v5991_v57  ;;  %v5996_v60 = vpop.f32.mrb[5].mxu0 }
 0x18d   :  { %v626_v61 = vadd.f32 %v625_v53, %v5996_v60  ;;  %v667_v62 = vmul.f32 %v5996_v60, %v5996_v60  ;;  %v6001_v63 = vpop.f32.mrb[6].mxu0  ;;  %v5337_v53 = vld [vmem:[#allocation9 + $0xa0] ss:$8 sps:$4 sm:$0xff]  }
 0x18e   :  { %v727_v1 = vadd.f32 %v726_v55, %v666_v59  ;;  %v590_v2 = vadd.f32 %v589_v58, %v6001_v63  ;;  %v668_v3 = vmul.f32 %v6001_v63, %v6001_v63  ;;  %v6006_v4 = vpop.f32.mrb[7].mxu0  ;;  %5181 = vmatpush1.bf16.msra.mxu1 %v5337_v53  ;;  %1249 = vmatpush1.bf16.msra.mxu0 %v5337_v53  ;;  %v5340_v59 = vld [vmem:[#allocation9 + $0xb0] ss:$8 sps:$4 sm:$0xff]  }
 0x18f   :  { %v764_v6 = vadd.f32 %v763_v56, %v667_v62  ;;  %v627_v7 = vadd.f32 %v626_v61, %v6006_v4  ;;  %v669_v8 = vmul.f32 %v6006_v4, %v6006_v4  ;;  %v5338_v56 = vld [vmem:[#allocation9 + $0xb4] ss:$8 sps:$4 sm:$0xff]  }
 0x190   :  { %v728_v10 = vadd.f32 %v727_v1, %v668_v3  ;;  %5166 = vmatprep.subr.bf16.mxu1 %v5338_v56  ;;  %1250 = vmatprep.subr.bf16.mxu0 %v5338_v56 }
 0x191   :  { %v765_v11 = vadd.f32 %v764_v6, %v669_v8 }
 0x192   :  { %5182 = vmatpush1.bf16.msra.mxu1 %v5340_v59  ;;  %1251 = vmatpush1.bf16.msra.mxu0 %v5340_v59 }
 0x193   :  { %v6011_v13 = vpop.f32.mrb[8].mxu0 }
 0x194   :  { %v591_v15 = vadd.f32 %v590_v2, %v6011_v13  ;;  %v670_v16 = vmul.f32 %v6011_v13, %v6011_v13  ;;  %v6016_v17 = vpop.f32.mrb[9].mxu0 }
 0x195   :  { %9950 = vst [vmem:[#allocation20_spill] sm:$0xff] %v6016_v17  ;;  %v628_v18 = vadd.f32 %v627_v7, %v6016_v17  ;;  %v671_v19 = vmul.f32 %v6016_v17, %v6016_v17  ;;  %v6021_v20 = vpop.f32.mrb[10].mxu0 }
 0x196   :  { %v729_v21 = vadd.f32 %v728_v10, %v670_v16  ;;  %v592_v22 = vadd.f32 %v591_v15, %v6021_v20  ;;  %v672_v23 = vmul.f32 %v6021_v20, %v6021_v20  ;;  %v6026_v24 = vpop.f32.mrb[11].mxu0  ;;  %v5341_v10 = vld [vmem:[#allocation9 + $0xc4] ss:$8 sps:$4 sm:$0xff]   ;;  %v5343_v15 = vld [vmem:[#allocation9 + $0xc0] ss:$8 sps:$4 sm:$0xff]  }
 0x197   :  { %9951 = vst [vmem:[#allocation21_spill] sm:$0xff] %v6026_v24  ;;  %v766_v26 = vadd.f32 %v765_v11, %v671_v19  ;;  %v629_v27 = vadd.f32 %v628_v18, %v6026_v24  ;;  %v673_v28 = vmul.f32 %v6026_v24, %v6026_v24  ;;  %5167 = vmatprep.subr.bf16.mxu1 %v5341_v10  ;;  %v5344_v19 = vld [vmem:[#allocation9 + $0xd4] ss:$8 sps:$4 sm:$0xff]  }
 0x198   :  { %v730_v30 = vadd.f32 %v729_v21, %v672_v23  ;;  %1252 = vmatprep.subr.bf16.mxu0 %v5341_v10  ;;  %5183 = vmatpush1.bf16.msra.mxu1 %v5343_v15  ;;  %v5355_v10 = vld [vmem:[#allocation7 + $0x4] ss:$8 sps:$4 sm:$0xff]  }
 0x199   :  { %v767_v31 = vadd.f32 %v766_v26, %v673_v28  ;;  %1253 = vmatpush1.bf16.msra.mxu0 %v5343_v15  ;;  %5168 = vmatprep.subr.bf16.mxu1 %v5344_v19 }
 0x19a   :  { %1254 = vmatprep.subr.bf16.mxu0 %v5344_v19 }
 0x19b   :  { %v6031_v33 = vpop.f32.mrb[12].mxu0 }
 0x19c   :  { %v593_v35 = vadd.f32 %v592_v22, %v6031_v33  ;;  %v674_v36 = vmul.f32 %v6031_v33, %v6031_v33  ;;  %v6036_v37 = vpop.f32.mrb[13].mxu0  ;;  %v5346_v22 = vld [vmem:[#allocation9 + $0xd0] ss:$8 sps:$4 sm:$0xff]  }
 0x19d   :  { %9952 = vst [vmem:[#allocation22_spill] sm:$0xff] %v6036_v37  ;;  %v630_v38 = vadd.f32 %v629_v27, %v6036_v37  ;;  %v675_v39 = vmul.f32 %v6036_v37, %v6036_v37  ;;  %v6041_v40 = vpop.f32.mrb[14].mxu0  ;;  %5184 = vmatpush1.bf16.msra.mxu1 %v5346_v22  ;;  %1255 = vmatpush1.bf16.msra.mxu0 %v5346_v22 }
 0x19e   :  { %v731_v41 = vadd.f32 %v730_v30, %v674_v36  ;;  %v594_v42 = vadd.f32 %v593_v35, %v6041_v40  ;;  %v676_v43 = vmul.f32 %v6041_v40, %v6041_v40  ;;  %v6046_v44 = vpop.f32.mrb[15].mxu0  ;;  %v5347_v35 = vld [vmem:[#allocation9 + $0xe4] ss:$8 sps:$4 sm:$0xff]  }
 0x19f   :  { %9953 = vst [vmem:[#allocation23_spill] sm:$0xff] %v6046_v44  ;;  %v768_v49 = vadd.f32 %v767_v31, %v675_v39  ;;  %v631_v50 = vadd.f32 %v630_v38, %v6046_v44  ;;  %v677_v52 = vmul.f32 %v6046_v44, %v6046_v44  ;;  %5169 = vmatprep.subr.bf16.mxu1 %v5347_v35 }
 0x1a0   :  { %v732_v54 = vadd.f32 %v731_v41, %v676_v43  ;;  %v5349_v41 = vld [vmem:[#allocation9 + $0xe0] ss:$8 sps:$4 sm:$0xff]   ;;  %1256 = vmatprep.subr.bf16.mxu0 %v5347_v35 }
 0x1a1   :  { %v769_v55 = vadd.f32 %v768_v49, %v677_v52  ;;  %5185 = vmatpush1.bf16.msra.mxu1 %v5349_v41  ;;  %1257 = vmatpush1.bf16.msra.mxu0 %v5349_v41  ;;  %v5352_v49 = vld [vmem:[#allocation9 + $0xf0] ss:$8 sps:$4 sm:$0xff]  }
 0x1a2   :  { %5170 = vmatprep.subr.bf16.mxu1 %v5350_v48  ;;  %1258 = vmatprep.subr.bf16.mxu0 %v5350_v48 }
 0x1a3   :  { %v6051_v58 = vpop.f32.mrb[16].mxu0 }
 0x1a4   :  { %v595_v61 = vadd.f32 %v594_v42, %v6051_v58  ;;  %v678_v62 = vmul.f32 %v6051_v58, %v6051_v58  ;;  %v6056_v1 = vpop.f32.mrb[17].mxu0 }
 0x1a5   :  { %9954 = vst [vmem:[#allocation24_spill] sm:$0xff] %v6056_v1  ;;  %v632_v2 = vadd.f32 %v631_v50, %v6056_v1  ;;  %v679_v3 = vmul.f32 %v6056_v1, %v6056_v1  ;;  %v6061_v5 = vpop.f32.mrb[18].mxu0  ;;  %5186 = vmatpush1.bf16.msra.mxu1 %v5352_v49  ;;  %1259 = vmatpush1.bf16.msra.mxu0 %v5352_v49 }
 0x1a6   :  { %v733_v6 = vadd.f32 %v732_v54, %v678_v62  ;;  %v596_v7 = vadd.f32 %v595_v61, %v6061_v5  ;;  %v680_v8 = vmul.f32 %v6061_v5, %v6061_v5  ;;  %v6066_v9 = vpop.f32.mrb[19].mxu0  ;;  %1501 = vmatprep.subr.bf16.mxu1 %v5355_v10 }
 0x1a7   :  { %9955 = vst [vmem:[#allocation25_spill] sm:$0xff] %v6066_v9  ;;  %v770_v11 = vadd.f32 %v769_v55, %v679_v3  ;;  %v633_v12 = vadd.f32 %v632_v2, %v6066_v9  ;;  %v681_v14 = vmul.f32 %v6066_v9, %v6066_v9 }
 0x1a8   :  { %v734_v16 = vadd.f32 %v733_v6, %v680_v8 }
 0x1a9   :  { %v771_v18 = vadd.f32 %v770_v11, %v681_v14 }
 0x1ab   :  { %v6071_v21 = vpop.f32.mrb[20].mxu0 }
 0x1ac   :  { %v597_v23 = vadd.f32 %v596_v7, %v6071_v21  ;;  %v682_v25 = vmul.f32 %v6071_v21, %v6071_v21  ;;  %v6076_v26 = vpop.f32.mrb[21].mxu0 }
 0x1ad   :  { %9956 = vst [vmem:[#allocation26_spill] sm:$0xff] %v6076_v26  ;;  %v634_v27 = vadd.f32 %v633_v12, %v6076_v26  ;;  %v683_v28 = vmul.f32 %v6076_v26, %v6076_v26  ;;  %v6081_v29 = vpop.f32.mrb[22].mxu0 }
 0x1ae   :  { %v735_v30 = vadd.f32 %v734_v16, %v682_v25  ;;  %v598_v31 = vadd.f32 %v597_v23, %v6081_v29  ;;  %v684_v32 = vmul.f32 %v6081_v29, %v6081_v29  ;;  %v6086_v34 = vpop.f32.mrb[23].mxu0 }
 0x1af   :  { %9957 = vst [vmem:[#allocation27_spill] sm:$0xff] %v6086_v34  ;;  %v772_v36 = vadd.f32 %v771_v18, %v683_v28  ;;  %v635_v38 = vadd.f32 %v634_v27, %v6086_v34  ;;  %v685_v39 = vmul.f32 %v6086_v34, %v6086_v34 }
 0x1b0   :  { %v736_v42 = vadd.f32 %v735_v30, %v684_v32 }
 0x1b1   :  { %v773_v43 = vadd.f32 %v772_v36, %v685_v39 }
 0x1b3   :  { %v6091_v50 = vpop.f32.mrb[24].mxu0 }
 0x1b4   :  { %v599_v52 = vadd.f32 %v598_v31, %v6091_v50  ;;  %v686_v53 = vmul.f32 %v6091_v50, %v6091_v50  ;;  %v6096_v54 = vpop.f32.mrb[25].mxu0 }
 0x1b5   :  { %9958 = vst [vmem:[#allocation28_spill] sm:$0xff] %v6096_v54  ;;  %v636_v55 = vadd.f32 %v635_v38, %v6096_v54  ;;  %v687_v56 = vmul.f32 %v6096_v54, %v6096_v54  ;;  %v6101_v59 = vpop.f32.mrb[26].mxu0 }
 0x1b6   :  { %v737_v61 = vadd.f32 %v736_v42, %v686_v53  ;;  %v600_v62 = vadd.f32 %v599_v52, %v6101_v59  ;;  %v688_v2 = vmul.f32 %v6101_v59, %v6101_v59  ;;  %v6106_v3 = vpop.f32.mrb[27].mxu0 }
 0x1b7   :  { %9959 = vst [vmem:[#allocation29_spill] sm:$0xff] %v6106_v3  ;;  %v774_v6 = vadd.f32 %v773_v43, %v687_v56  ;;  %v637_v7 = vadd.f32 %v636_v55, %v6106_v3  ;;  %v689_v8 = vmul.f32 %v6106_v3, %v6106_v3 }
 0x1b8   :  { %v738_v11 = vadd.f32 %v737_v61, %v688_v2 }
 0x1b9   :  { %v775_v12 = vadd.f32 %v774_v6, %v689_v8  ;;  %v5359_v8 = vld [vmem:[#allocation12 + $0x40] sm:$0xff]  }
 0x1ba   :  { %4859 = vmatprep.subr.bf16.mxu0 %v5359_v8 }
 0x1bb   :  { %v6111_v14 = vpop.f32.mrb[28].mxu0 }
 0x1bc   :  { %v601_v15 = vadd.f32 %v600_v62, %v6111_v14  ;;  %v690_v16 = vmul.f32 %v6111_v14, %v6111_v14  ;;  %v6116_v18 = vpop.f32.mrb[29].mxu0 }
 0x1bd   :  { %9960 = vst [vmem:[#allocation30_spill] sm:$0xff] %v6116_v18  ;;  %v638_v19 = vadd.f32 %v637_v7, %v6116_v18  ;;  %v691_v22 = vmul.f32 %v6116_v18, %v6116_v18  ;;  %v6121_v23 = vpop.f32.mrb[30].mxu0 }
 0x1be   :  { %v739_v25 = vadd.f32 %v738_v11, %v690_v16  ;;  %v602_v27 = vadd.f32 %v601_v15, %v6121_v23  ;;  %v692_v28 = vmul.f32 %v6121_v23, %v6121_v23  ;;  %v6126_v30 = vpop.f32.mrb[31].mxu0 }
 0x1bf   :  { %9961 = vst [vmem:[#allocation31_spill] sm:$0xff] %v6126_v30  ;;  %v776_v31 = vadd.f32 %v775_v12, %v691_v22  ;;  %v639_v32 = vadd.f32 %v638_v19, %v6126_v30  ;;  %v693_v35 = vmul.f32 %v6126_v30, %v6126_v30 }
 0x1c0   :  { %v740_v36 = vadd.f32 %v739_v25, %v692_v28 }
 0x1c1   :  { %v777_v38 = vadd.f32 %v776_v31, %v693_v35 }
 0x1c3   :  { %v6131_v39 = vpop.f32.mrb[32].mxu0 }
 0x1c4   :  { %v603_v41 = vadd.f32 %v602_v27, %v6131_v39  ;;  %v694_v42 = vmul.f32 %v6131_v39, %v6131_v39  ;;  %v6136_v43 = vpop.f32.mrb[33].mxu0 }
 0x1c5   :  { %9962 = vst [vmem:[#allocation32_spill] sm:$0xff] %v6136_v43  ;;  %v640_v48 = vadd.f32 %v639_v32, %v6136_v43  ;;  %v695_v49 = vmul.f32 %v6136_v43, %v6136_v43  ;;  %v6141_v52 = vpop.f32.mrb[34].mxu0 }
 0x1c6   :  { %v741_v53 = vadd.f32 %v740_v36, %v694_v42  ;;  %v604_v55 = vadd.f32 %v603_v41, %v6141_v52  ;;  %v696_v56 = vmul.f32 %v6141_v52, %v6141_v52  ;;  %v6146_v61 = vpop.f32.mrb[35].mxu0 }
 0x1c7   :  { %9963 = vst [vmem:[#allocation33_spill] sm:$0xff] %v6146_v61  ;;  %v778_v62 = vadd.f32 %v777_v38, %v695_v49  ;;  %v641_v2 = vadd.f32 %v640_v48, %v6146_v61  ;;  %v697_v6 = vmul.f32 %v6146_v61, %v6146_v61 }
 0x1c8   :  { %v742_v7 = vadd.f32 %v741_v53, %v696_v56 }
 0x1c9   :  { %v779_v10 = vadd.f32 %v778_v62, %v697_v6 }
 0x1cb   :  { %v6151_v11 = vpop.f32.mrb[36].mxu0 }
 0x1cc   :  { %v605_v12 = vadd.f32 %v604_v55, %v6151_v11  ;;  %v698_v15 = vmul.f32 %v6151_v11, %v6151_v11  ;;  %v6156_v16 = vpop.f32.mrb[37].mxu0 }
 0x1cd   :  { %9964 = vst [vmem:[#allocation34_spill] sm:$0xff] %v6156_v16  ;;  %v642_v19 = vadd.f32 %v641_v2, %v6156_v16  ;;  %v699_v22 = vmul.f32 %v6156_v16, %v6156_v16  ;;  %v6161_v25 = vpop.f32.mrb[38].mxu0 }
 0x1ce   :  { %v743_v27 = vadd.f32 %v742_v7, %v698_v15  ;;  %v606_v28 = vadd.f32 %v605_v12, %v6161_v25  ;;  %v700_v31 = vmul.f32 %v6161_v25, %v6161_v25  ;;  %v6166_v32 = vpop.f32.mrb[39].mxu0 }
 0x1cf   :  { %9965 = vst [vmem:[#allocation35_spill] sm:$0xff] %v6166_v32  ;;  %v780_v35 = vadd.f32 %v779_v10, %v699_v22  ;;  %v643_v36 = vadd.f32 %v642_v19, %v6166_v32  ;;  %v701_v38 = vmul.f32 %v6166_v32, %v6166_v32 }
 0x1d0   :  { %v744_v41 = vadd.f32 %v743_v27, %v700_v31 }
 0x1d1   :  { %v781_v42 = vadd.f32 %v780_v35, %v701_v38 }
 0x1d3   :  { %v6171_v48 = vpop.f32.mrb[40].mxu0 }
 0x1d4   :  { %v607_v49 = vadd.f32 %v606_v28, %v6171_v48  ;;  %v702_v53 = vmul.f32 %v6171_v48, %v6171_v48  ;;  %v6176_v55 = vpop.f32.mrb[41].mxu0 }
 0x1d5   :  { %9966 = vst [vmem:[#allocation36_spill] sm:$0xff] %v6176_v55  ;;  %v644_v56 = vadd.f32 %v643_v36, %v6176_v55  ;;  %v703_v62 = vmul.f32 %v6176_v55, %v6176_v55  ;;  %v6181_v2 = vpop.f32.mrb[42].mxu0 }
 0x1d6   :  { %v745_v6 = vadd.f32 %v744_v41, %v702_v53  ;;  %v608_v7 = vadd.f32 %v607_v49, %v6181_v2  ;;  %v704_v8 = vmul.f32 %v6181_v2, %v6181_v2  ;;  %v6186_v10 = vpop.f32.mrb[43].mxu0 }
 0x1d7   :  { %9967 = vst [vmem:[#allocation37_spill] sm:$0xff] %v6186_v10  ;;  %v782_v12 = vadd.f32 %v781_v42, %v703_v62  ;;  %v645_v15 = vadd.f32 %v644_v56, %v6186_v10  ;;  %v705_v19 = vmul.f32 %v6186_v10, %v6186_v10 }
 0x1d8   :  { %v746_v22 = vadd.f32 %v745_v6, %v704_v8 }
 0x1d9   :  { %v783_v27 = vadd.f32 %v782_v12, %v705_v19 }
 0x1db   :  { %v6191_v28 = vpop.f32.mrb[44].mxu0 }
 0x1dc   :  { %v609_v31 = vadd.f32 %v608_v7, %v6191_v28  ;;  %v706_v35 = vmul.f32 %v6191_v28, %v6191_v28  ;;  %v6196_v36 = vpop.f32.mrb[45].mxu0 }
 0x1dd   :  { %9968 = vst [vmem:[#allocation38_spill] sm:$0xff] %v6196_v36  ;;  %v646_v38 = vadd.f32 %v645_v15, %v6196_v36  ;;  %v707_v41 = vmul.f32 %v6196_v36, %v6196_v36  ;;  %v6201_v42 = vpop.f32.mrb[46].mxu0 }
 0x1de   :  { %v747_v49 = vadd.f32 %v746_v22, %v706_v35  ;;  %v610_v53 = vadd.f32 %v609_v31, %v6201_v42  ;;  %v708_v56 = vmul.f32 %v6201_v42, %v6201_v42  ;;  %v6206_v62 = vpop.f32.mrb[47].mxu0 }
 0x1df   :  { %9969 = vst [vmem:[#allocation39_spill] sm:$0xff] %v6206_v62  ;;  %v784_v6 = vadd.f32 %v783_v27, %v707_v41  ;;  %v647_v7 = vadd.f32 %v646_v38, %v6206_v62  ;;  %v709_v8 = vmul.f32 %v6206_v62, %v6206_v62 }
 0x1e0   :  { %v748_v12 = vadd.f32 %v747_v49, %v708_v56 }
 0x1e1   :  { %v785_v15 = vadd.f32 %v784_v6, %v709_v8 }
 0x1e3   :  { %v6211_v19 = vpop.f32.mrb[48].mxu0 }
 0x1e4   :  { %v611_v0 = vadd.f32 %v610_v53, %v6211_v19  ;;  %v710_v22 = vmul.f32 %v6211_v19, %v6211_v19  ;;  %v6216_v31 = vpop.f32.mrb[49].mxu0 }
 0x1e5   :  { %9970 = vst [vmem:[#allocation40_spill] sm:$0xff] %v6216_v31  ;;  %v648_v35 = vadd.f32 %v647_v7, %v6216_v31  ;;  %v711_v27 = vmul.f32 %v6216_v31, %v6216_v31  ;;  %v6221_v38 = vpop.f32.mrb[50].mxu0 }
 0x1e6   :  { %v749_v41 = vadd.f32 %v748_v12, %v710_v22  ;;  %v612_v49 = vadd.f32 %v611_v0, %v6221_v38  ;;  %v712_v56 = vmul.f32 %v6221_v38, %v6221_v38  ;;  %v6226_v6 = vpop.f32.mrb[51].mxu0 }
 0x1e7   :  { %9971 = vst [vmem:[#allocation41_spill] sm:$0xff] %v6226_v6  ;;  %v786_v53 = vadd.f32 %v785_v15, %v711_v27  ;;  %v649_v8 = vadd.f32 %v648_v35, %v6226_v6  ;;  %v713_v62 = vmul.f32 %v6226_v6, %v6226_v6 }
 0x1e8   :  { %v750_v7 = vadd.f32 %v749_v41, %v712_v56 }
 0x1e9   :  { %v787_v36 = vadd.f32 %v786_v53, %v713_v62 }
 0x1eb   :  { %v6231_v10 = vpop.f32.mrb[52].mxu0 }
 0x1ec   :  { %v613_v31 = vadd.f32 %v612_v49, %v6231_v10  ;;  %v714_v0 = vmul.f32 %v6231_v10, %v6231_v10  ;;  %v6236_v12 = vpop.f32.mrb[53].mxu0 }
 0x1ed   :  { %9972 = vst [vmem:[#allocation42_spill] sm:$0xff] %v6236_v12  ;;  %v650_v22 = vadd.f32 %v649_v8, %v6236_v12  ;;  %v715_v15 = vmul.f32 %v6236_v12, %v6236_v12  ;;  %v6241_v35 = vpop.f32.mrb[54].mxu0 }
 0x1ee   :  { %v751_v27 = vadd.f32 %v750_v7, %v714_v0  ;;  %v614_v41 = vadd.f32 %v613_v31, %v6241_v35  ;;  %v716_v62 = vmul.f32 %v6241_v35, %v6241_v35  ;;  %v6246_v56 = vpop.f32.mrb[55].mxu0 }
 0x1ef   :  { %9973 = vst [vmem:[#allocation43_spill] sm:$0xff] %v6246_v56  ;;  %v788_v49 = vadd.f32 %v787_v36, %v715_v15  ;;  %v651_v53 = vadd.f32 %v650_v22, %v6246_v56  ;;  %v717_v6 = vmul.f32 %v6246_v56, %v6246_v56 }
 0x1f0   :  { %v752_v8 = vadd.f32 %v751_v27, %v716_v62 }
 0x1f1   :  { %v789_v55 = vadd.f32 %v788_v49, %v717_v6 }
 0x1f3   :  { %v6251_v32 = vpop.f32.mrb[56].mxu0 }
 0x1f4   :  { %v615_v12 = vadd.f32 %v614_v41, %v6251_v32  ;;  %v718_v31 = vmul.f32 %v6251_v32, %v6251_v32  ;;  %v6256_v7 = vpop.f32.mrb[57].mxu0 }
 0x1f5   :  { %9974 = vst [vmem:[#allocation44_spill] sm:$0xff] %v6256_v7  ;;  %v652_v0 = vadd.f32 %v651_v53, %v6256_v7  ;;  %v719_v36 = vmul.f32 %v6256_v7, %v6256_v7  ;;  %v6261_v22 = vpop.f32.mrb[58].mxu0 }
 0x1f6   :  { %v753_v15 = vadd.f32 %v752_v8, %v718_v31  ;;  %v616_v27 = vadd.f32 %v615_v12, %v6261_v22  ;;  %v720_v6 = vmul.f32 %v6261_v22, %v6261_v22  ;;  %v6266_v62 = vpop.f32.mrb[59].mxu0 }
 0x1f7   :  { %9975 = vst [vmem:[#allocation45_spill] sm:$0xff] %v6266_v62  ;;  %v790_v41 = vadd.f32 %v789_v55, %v719_v36  ;;  %v653_v49 = vadd.f32 %v652_v0, %v6266_v62  ;;  %v721_v56 = vmul.f32 %v6266_v62, %v6266_v62 }
 0x1f8   :  { %v754_v53 = vadd.f32 %v753_v15, %v720_v6 }
 0x1f9   :  { %v791_v16 = vadd.f32 %v790_v41, %v721_v56 }
 0x1fb   :  { %v6271_v61 = vpop.f32.mrb[60].mxu0 }
 0x1fc   :  { %v617_v7 = vadd.f32 %v616_v27, %v6271_v61  ;;  %v722_v12 = vmul.f32 %v6271_v61, %v6271_v61  ;;  %v6276_v8 = vpop.f32.mrb[61].mxu0 }
 0x1fd   :  { %9976 = vst [vmem:[#allocation46_spill] sm:$0xff] %v6276_v8  ;;  %v654_v31 = vadd.f32 %v653_v49, %v6276_v8  ;;  %v723_v55 = vmul.f32 %v6276_v8, %v6276_v8  ;;  %v6281_v0 = vpop.f32.mrb[62].mxu0 }
 0x1fe   :  { %v755_v36 = vadd.f32 %v754_v53, %v722_v12  ;;  %v618_v15 = vadd.f32 %v617_v7, %v6281_v0  ;;  %v724_v56 = vmul.f32 %v6281_v0, %v6281_v0  ;;  %v6286_v6 = vpop.f32.mrb[63].mxu0 }
 0x1ff   :  { %v792_v27 = vadd.f32 %v791_v16, %v723_v55  ;;  %v655_v41 = vadd.f32 %v654_v31, %v6286_v6  ;;  %v725_v62 = vmul.f32 %v6286_v6, %v6286_v6 }
 0x200   :  { %v619_v49 = vrot.slane %v618_v15, 4  ;;  %v756_v43 = vadd.f32 %v755_v36, %v724_v56 }
 0x201   :  { %v656_v30 = vrot.slane %v655_v41, 4  ;;  %v793_v8 = vadd.f32 %v792_v27, %v725_v62 }
 0x202   :  { %v620_v18 = vadd.f32 %v619_v49, %v618_v15  ;;  %v757_v3 = vrot.slane %v756_v43, 4  ;;  %v9988_v49 = vld [vmem:[#allocation31_spill] sm:$0xff] }
 0x203   :  { %v657_v53 = vadd.f32 %v656_v30, %v655_v41  ;;  %v794_v12 = vrot.slane %v793_v8, 4 }
 0x204   :  { %v621_v7 = vrot.slane %v620_v18, 2  ;;  %v758_v54 = vadd.f32 %v757_v3, %v756_v43 }
 0x205   :  { %v658_v34 = vrot.slane %v657_v53, 2  ;;  %v795_v26 = vadd.f32 %v794_v12, %v793_v8  ;;  %v10002_v12 = vld [vmem:[#allocation43_spill] sm:$0xff]  ;;  %v10004_v8 = vld [vmem:[#allocation45_spill] sm:$0xff] }
 0x206   :  { %v622_v9 = vadd.f32 %v621_v7, %v620_v18  ;;  %v759_v1 = vrot.slane %v758_v54, 2 }
 0x207   :  { %v659_v16 = vadd.f32 %v658_v34, %v657_v53  ;;  %v796_v55 = vrot.slane %v795_v26, 2  ;;  %v9987_v53 = vld [vmem:[#allocation30_spill] sm:$0xff]  ;;  %v10000_v34 = vld [vmem:[#allocation41_spill] sm:$0xff] }
 0x208   :  { %v623_v31 = vrot.slane %v622_v9, 1  ;;  %v760_v44 = vadd.f32 %v759_v1, %v758_v54  ;;  %v10001_v54 = vld [vmem:[#allocation42_spill] sm:$0xff] }
 0x209   :  { %v660_v37 = vrot.slane %v659_v16, 1  ;;  %v797_v24 = vadd.f32 %v796_v55, %v795_v26  ;;  %v9978_v55 = vld [vmem:[#allocation21_spill] sm:$0xff] }
 0x20a   :  { %v624_v17 = vadd.f32 %v623_v31, %v622_v9  ;;  %v761_v36 = vrot.slane %v760_v44, 1  ;;  %v9984_v31 = vld [vmem:[#allocation27_spill] sm:$0xff] }
 0x20b   :  { %v661_v56 = vadd.f32 %v660_v37, %v659_v16  ;;  %v798_v62 = vrot.slane %v797_v24, 1  ;;  %v10003_v16 = vld [vmem:[#allocation44_spill] sm:$0xff] }
 0x20c   :  { %v762_v15 = vadd.f32 %v761_v36, %v760_v44  ;;  %v6291_v27 = vmul.f32 0.00390625, %v624_v17 }
 0x20d   :  { %v799_v30 = vadd.f32 %v798_v62, %v797_v24  ;;  %v6293_v41 = vmul.f32 0.00390625, %v661_v56 }
 0x20e   :  { %v802_v3 = vmul.f32 0.00390625, %v762_v15  ;;  %v804_v18 = vmul.f32 %v6291_v27, %v6291_v27  ;;  %v9998_v37 = vsub.f32 %v6281_v0, %v6291_v27 }
 0x20f   :  { %v803_v15 = vmul.f32 0.00390625, %v799_v30  ;;  %v805_v62 = vmul.f32 %v6293_v41, %v6293_v41  ;;  %v9977_v30 = vld [vmem:[#allocation20_spill] sm:$0xff]  ;;  %v859_v26 = vsub.f32 %v10000_v34, %v6293_v41  ;;  %v861_v24 = vsub.f32 %v10001_v54, %v6293_v41 }
 0x210   :  { %v806_v9 = vsub.f32 %v802_v3, %v804_v18  ;;  %v9980_v3 = vld [vmem:[#allocation23_spill] sm:$0xff]  ;;  %v9981_v18 = vld [vmem:[#allocation24_spill] sm:$0xff]  ;;  %v863_v17 = vsub.f32 %v10002_v12, %v6293_v41  ;;  %v10007_v34 = vsub.f32 %v5975_v47, %v6291_v27  ;;  %v10008_v12 = vsub.f32 %v5991_v57, %v6291_v27 }
 0x211   :  { %v807_v56 = vsub.f32 %v803_v15, %v805_v62  ;;  %v9983_v62 = vld [vmem:[#allocation26_spill] sm:$0xff]  ;;  %v865_v15 = vsub.f32 %v10003_v16, %v6293_v41  ;;  %v10011_v47 = vsub.f32 %v6021_v20, %v6291_v27  ;;  %v10012_v57 = vsub.f32 %v6031_v33, %v6291_v27 }
 0x212   :  { %v872_v7 = vadd.f32 1e-05, %v806_v9  ;;  %v9982_v9 = vld [vmem:[#allocation25_spill] sm:$0xff]  ;;  %v10015_v20 = vsub.f32 %v6061_v5, %v6291_v27  ;;  %v10016_v33 = vsub.f32 %v6071_v21, %v6291_v27  ;;  %v10019_v5 = vsub.f32 %v6101_v59, %v6291_v27 }
 0x213   :  { %v873_v36 = vadd.f32 1e-05, %v807_v56  ;;  %v867_v56 = vsub.f32 %v10004_v8, %v6293_v41  ;;  %v10009_v8 = vsub.f32 %v6001_v63, %v6291_v27  ;;  %v10013_v63 = vsub.f32 %v6041_v40, %v6291_v27 }
 0x214   :  { %5417 = vrsqrt.f32 %v872_v7  ;;  %v9979_v7 = vld [vmem:[#allocation22_spill] sm:$0xff]  ;;  %v10017_v40 = vsub.f32 %v6081_v29, %v6291_v27  ;;  %v10020_v21 = vsub.f32 %v6111_v14, %v6291_v27  ;;  %v10021_v29 = vsub.f32 %v6121_v23, %v6291_v27 }
 0x215   :  { %5419 = vrsqrt.f32 %v873_v36  ;;  %v10005_v36 = vld [vmem:[#allocation46_spill] sm:$0xff]  ;;  %v10023_v59 = vsub.f32 %v6141_v52, %v6291_v27  ;;  %v10024_v14 = vsub.f32 %v6151_v11, %v6291_v27  ;;  %v10025_v23 = vsub.f32 %v6161_v25, %v6291_v27 }
 0x216   :  { %v869_v0 = vsub.f32 %v10005_v36, %v6293_v41  ;;  %v10027_v52 = vsub.f32 %v6181_v2, %v6291_v27  ;;  %v10028_v11 = vsub.f32 %v6191_v28, %v6291_v27  ;;  %v10030_v25 = vsub.f32 %v6201_v42, %v6291_v27 }
 0x217   :  { %v10034_v2 = vsub.f32 %v6221_v38, %v6291_v27  ;;  %v10036_v28 = vsub.f32 %v6231_v10, %v6291_v27  ;;  %v10038_v42 = vsub.f32 %v6241_v35, %v6291_v27  ;;  %v10042_v38 = vsub.f32 %v6286_v6, %v6293_v41 }
 0x218   :  { %v10044_v10 = vsub.f32 %v6261_v22, %v6291_v27  ;;  %v10046_v35 = vsub.f32 %v6271_v61, %v6291_v27  ;;  %v10051_v22 = vsub.f32 %v6006_v4, %v6293_v41  ;;  %v10052_v61 = vsub.f32 %v9977_v30, %v6293_v41 }
 0x219   :  { %v10056_v30 = vsub.f32 %v9981_v18, %v6293_v41  ;;  %v10060_v18 = vsub.f32 %v9987_v53, %v6293_v41  ;;  %v10068_v53 = vld [vmem:[#allocation35_spill] sm:$0xff] }
 0x21e   :  { %v5418_v44 = vpop.eup %5417 }
 0x21f   :  { %v6418_v1 = vmul.f32 %v5418_v44, %v9998_v37  ;;  %v10006_v37 = vsub.f32 %v5971_v45, %v6291_v27  ;;  %v6440_v54 = vmul.f32 %v5418_v44, %v10007_v34  ;;  %v6445_v16 = vmul.f32 %v5418_v44, %v10008_v12 }
 0x220   :  { %v6450_v43 = vmul.f32 %v5418_v44, %v10009_v8  ;;  %v10010_v45 = vsub.f32 %v6011_v13, %v6291_v27  ;;  %v6465_v34 = vmul.f32 %v5418_v44, %v10012_v57  ;;  %v6470_v12 = vmul.f32 %v5418_v44, %v10013_v63 }
 0x221   :  { %9999 = vst [vmem:[#allocation20_spill] sm:$0xff] %v6418_v1  ;;  %v6435_v1 = vmul.f32 %v5418_v44, %v10006_v37  ;;  %v6460_v37 = vmul.f32 %v5418_v44, %v10011_v47  ;;  %v10014_v13 = vsub.f32 %v6051_v58, %v6291_v27  ;;  %v6485_v47 = vmul.f32 %v5418_v44, %v10016_v33 }
 0x222   :  { %v6455_v36 = vmul.f32 %v5418_v44, %v10010_v45  ;;  %v6480_v45 = vmul.f32 %v5418_v44, %v10015_v20  ;;  %v6490_v57 = vmul.f32 %v5418_v44, %v10017_v40  ;;  %v10018_v58 = vsub.f32 %v6091_v50, %v6291_v27 }
 0x223   :  { %v6475_v8 = vmul.f32 %v5418_v44, %v10014_v13  ;;  %v6500_v13 = vmul.f32 %v5418_v44, %v10019_v5  ;;  %v6505_v20 = vmul.f32 %v5418_v44, %v10020_v21  ;;  %v6510_v33 = vmul.f32 %v5418_v44, %v10021_v29 }
 0x224   :  { %v6495_v63 = vmul.f32 %v5418_v44, %v10018_v58  ;;  %v10022_v50 = vsub.f32 %v6131_v39, %v6291_v27  ;;  %v6520_v58 = vmul.f32 %v5418_v44, %v10023_v59  ;;  %v6525_v5 = vmul.f32 %v5418_v44, %v10024_v14 }
 0x225   :  { %v6530_v21 = vmul.f32 %v5418_v44, %v10025_v23  ;;  %v10026_v39 = vsub.f32 %v6171_v48, %v6291_v27  ;;  %v6545_v59 = vmul.f32 %v5418_v44, %v10028_v11  ;;  %v6550_v14 = vmul.f32 %v5418_v44, %v10030_v25 }
 0x226   :  { %v6515_v40 = vmul.f32 %v5418_v44, %v10022_v50  ;;  %v6540_v50 = vmul.f32 %v5418_v44, %v10027_v52  ;;  %v10032_v48 = vsub.f32 %v6211_v19, %v6291_v27  ;;  %v6560_v52 = vmul.f32 %v5418_v44, %v10034_v2 }
 0x227   :  { %v6535_v29 = vmul.f32 %v5418_v44, %v10026_v39  ;;  %10029 = vst [vmem:[#allocation21_spill] sm:$0xff] %v6545_v59  ;;  %10031 = vst [vmem:[#allocation22_spill] sm:$0xff] %v6550_v14  ;;  %v5420_v39 = vpop.eup %5419  ;;  %v6565_v11 = vmul.f32 %v5418_v44, %v10036_v28  ;;  %v6570_v25 = vmul.f32 %v5418_v44, %v10038_v42 }
 0x228   :  { %v6555_v23 = vmul.f32 %v5418_v44, %v10032_v48  ;;  %10035 = vst [vmem:[#allocation24_spill] sm:$0xff] %v6560_v52  ;;  %v10040_v19 = vsub.f32 %v6251_v32, %v6291_v27  ;;  %v6580_v2 = vmul.f32 %v5420_v39, %v10042_v38  ;;  %v6585_v28 = vmul.f32 %v5418_v44, %v10044_v10  ;;  %v10078_v52 = vld [vmem:[#allocation40_spill] sm:$0xff] }
 0x229   :  { %10037 = vst [vmem:[#allocation25_spill] sm:$0xff] %v6565_v11  ;;  %10039 = vst [vmem:[#allocation26_spill] sm:$0xff] %v6570_v25  ;;  %v6590_v42 = vmul.f32 %v5418_v44, %v10046_v35  ;;  %v10048_v32 = vsub.f32 %v5973_v46, %v6293_v41  ;;  %v10050_v38 = vsub.f32 %v5996_v60, %v6293_v41  ;;  %v10074_v25 = vld [vmem:[#allocation38_spill] sm:$0xff]  ;;  %v10076_v11 = vld [vmem:[#allocation39_spill] sm:$0xff] }
 0x22a   :  { %10033 = vst [vmem:[#allocation23_spill] sm:$0xff] %v6555_v23  ;;  %v6575_v48 = vmul.f32 %v5418_v44, %v10040_v19  ;;  %10043 = vst [vmem:[#allocation30_spill] sm:$0xff] %v6580_v2  ;;  %v883_v10 = vmul.f32 %v5420_v39, %v10051_v22  ;;  %v6607_v27 = vmul.f32 %v5420_v39, %v10052_v61 }
 0x22b   :  { %10045 = vst [vmem:[#allocation31_spill] sm:$0xff] %v6585_v28  ;;  %10047 = vst [vmem:[#allocation41_spill] sm:$0xff] %v6590_v42  ;;  %v877_v19 = vmul.f32 %v5420_v39, %v10048_v32  ;;  %v881_v2 = vmul.f32 %v5420_v39, %v10050_v38  ;;  %v10053_v46 = vsub.f32 %v9978_v55, %v6293_v41  ;;  %v10072_v28 = vld [vmem:[#allocation37_spill] sm:$0xff] }
 0x22c   :  { %10041 = vst [vmem:[#allocation27_spill] sm:$0xff] %v6575_v48  ;;  %v10049_v48 = vsub.f32 %v5983_v51, %v6293_v41  ;;  %v10054_v51 = vsub.f32 %v9979_v7, %v6293_v41  ;;  %v10055_v60 = vsub.f32 %v9980_v3, %v6293_v41  ;;  %v6627_v35 = vmul.f32 %v5420_v39, %v10056_v30 }
 0x22d   :  { %v6612_v44 = vmul.f32 %v5420_v39, %v10053_v46  ;;  %v10057_v55 = vsub.f32 %v9982_v9, %v6293_v41  ;;  %v10058_v7 = vsub.f32 %v9983_v62, %v6293_v41  ;;  %v10059_v3 = vsub.f32 %v9984_v31, %v6293_v41  ;;  %v10064_v62 = vld [vmem:[#allocation33_spill] sm:$0xff]  ;;  %v10066_v31 = vld [vmem:[#allocation34_spill] sm:$0xff] }
 0x22e   :  { %v879_v6 = vmul.f32 %v5420_v39, %v10049_v48  ;;  %v6617_v48 = vmul.f32 %v5420_v39, %v10054_v51  ;;  %v6622_v4 = vmul.f32 %v5420_v39, %v10055_v60  ;;  %v905_v61 = vmul.f32 %v5420_v39, %v10060_v18  ;;  %v10062_v51 = vld [vmem:[#allocation32_spill] sm:$0xff] }
 0x22f   :  { %v6632_v32 = vmul.f32 %v5420_v39, %v10057_v55  ;;  %v6637_v38 = vmul.f32 %v5420_v39, %v10058_v7  ;;  %v6642_v22 = vmul.f32 %v5420_v39, %v10059_v3  ;;  %v10061_v46 = vsub.f32 %v9988_v49, %v6293_v41 }
 0x230   :  { %v10063_v60 = vsub.f32 %v10062_v51, %v6293_v41  ;;  %v10065_v55 = vsub.f32 %v10064_v62, %v6293_v41  ;;  %v10067_v3 = vsub.f32 %v10066_v31, %v6293_v41  ;;  %v10069_v18 = vsub.f32 %v10068_v53, %v6293_v41 }
 0x231   :  { %v907_v9 = vmul.f32 %v5420_v39, %v10061_v46  ;;  %v10070_v46 = vld [vmem:[#allocation36_spill] sm:$0xff]  ;;  %v10073_v62 = vsub.f32 %v10072_v28, %v6293_v41  ;;  %v10075_v31 = vsub.f32 %v10074_v25, %v6293_v41  ;;  %v10077_v53 = vsub.f32 %v10076_v11, %v6293_v41 }
 0x232   :  { %v6653_v30 = vmul.f32 %v5420_v39, %v10063_v60  ;;  %v6658_v7 = vmul.f32 %v5420_v39, %v10065_v55  ;;  %v6663_v42 = vmul.f32 %v5420_v39, %v10067_v3  ;;  %v6668_v49 = vmul.f32 %v5420_v39, %v10069_v18 }
 0x233   :  { %v10071_v51 = vsub.f32 %v10070_v46, %v6293_v41  ;;  %v6678_v55 = vmul.f32 %v5420_v39, %v10073_v62  ;;  %v6683_v3 = vmul.f32 %v5420_v39, %v10075_v31  ;;  %v6688_v18 = vmul.f32 %v5420_v39, %v10077_v53 }
 0x234   :  { %v10079_v46 = vsub.f32 %v10078_v52, %v6293_v41  ;;  %v6695_v23 = vmul.f32 %v5420_v39, %v859_v26  ;;  %v6697_v28 = vmul.f32 %v5420_v39, %v861_v24  ;;  %v6699_v62 = vmul.f32 %v5420_v39, %v863_v17  ;;  %v10087_v24 = vld [vmem:[#allocation29_spill] sm:$0xff] }
 0x235   :  { %v6673_v60 = vmul.f32 %v5420_v39, %v10071_v51  ;;  %v6701_v14 = vmul.f32 %v5420_v39, %v865_v15  ;;  %v6703_v25 = vmul.f32 %v5420_v39, %v867_v56  ;;  %v6705_v31 = vmul.f32 %v5420_v39, %v869_v0 }
 0x236   :  { %v6693_v51 = vmul.f32 %v5420_v39, %v10079_v46  ;;  %10080 = vst [vmem:[#allocation42_spill] sm:$0xff] %v6695_v23  ;;  %10081 = vst [vmem:[#allocation43_spill] sm:$0xff] %v6699_v62  ;;  %v940_v11 = vmax.f32 %v6435_v1, 0.0  ;;  %v942_v53 = vmax.f32 %v6440_v54, 0.0  ;;  %v941_v59 = vmax.f32 %v877_v19, 0.0  ;;  %v10085_v46 = vld [vmem:[#allocation28_spill] sm:$0xff] }
 0x237   :  { %10082 = vst [vmem:[#allocation44_spill] sm:$0xff] %v6701_v14  ;;  %10083 = vst [vmem:[#allocation45_spill] sm:$0xff] %v6703_v25  ;;  %v943_v52 = vmax.f32 %v879_v6, 0.0  ;;  %v10086_v26 = vsub.f32 %v10085_v46, %v6293_v41  ;;  %v10088_v17 = vsub.f32 %v10087_v24, %v6293_v41  ;;  %v964_v15 = vmax.f32 %v6495_v63, 0.0  ;;  %v5360_v19 = vld [vmem:[#allocation12] sm:$0xff]  }
 0x238   :  { %10084 = vst [vmem:[#allocation46_spill] sm:$0xff] %v6705_v31  ;;  %v966_v56 = vmax.f32 %v6500_v13, 0.0  ;;  %v6717_v0 = vpack.c.bf16 %v942_v53, %v940_v11  ;;  %v945_v1 = vmax.f32 %v881_v2, 0.0  ;;  %v947_v54 = vmax.f32 %v883_v10, 0.0  ;;  %v5353_v2 = vld [vmem:[#allocation7] ss:$8 sps:$4 sm:$0xff]  }
 0x239   :  { %v901_v23 = vmul.f32 %v5420_v39, %v10086_v26  ;;  %v903_v62 = vmul.f32 %v5420_v39, %v10088_v17  ;;  %v6719_v31 = vpack.c.bf16 %v943_v52, %v941_v59  ;;  %v969_v46 = vmax.f32 %v905_v61, 0.0  ;;  %v5364_v26 = vld [vmem:[#allocation12 + $0x48] sm:$0xff]   ;;  %v5366_v52 = vld [vmem:[#allocation12 + $0x50] sm:$0xff]  }
 0x23a   :  { %v6721_v14 = vpack.c.bf16 %v966_v56, %v964_v15  ;;  %v6724_v41 = vpack.c.bf16 %v947_v54, %v945_v1  ;;  %v971_v63 = vmax.f32 %v907_v9, 0.0  ;;  %v944_v13 = vmax.f32 %v6445_v16, 0.0  ;;  %v5365_v11 = vld [vmem:[#allocation12 + $0x8] sm:$0xff]  }
 0x23b   :  { %v965_v6 = vmax.f32 %v901_v23, 0.0  ;;  %v967_v25 = vmax.f32 %v903_v62, 0.0  ;;  %1260 = vmatprep.mubr.bf16.mxu0 %v6719_v31  ;;  %v946_v39 = vmax.f32 %v6450_v43, 0.0  ;;  %v968_v23 = vmax.f32 %v6505_v20, 0.0 }
 0x23c   :  { %1261 = vmatmul.mubr.bf16.vlgmr.msra.gmra.mrb[64].mxu0 %v6717_v0  ;;  %v970_v10 = vmax.f32 %v6510_v33, 0.0  ;;  %v949_v61 = vmax.f32 %v6607_v27, 0.0  ;;  %v6735_v62 = vpack.c.bf16 %v971_v63, %v969_v46  ;;  %v951_v16 = vmax.f32 %v6612_v44, 0.0 }
 0x23d   :  { %v6728_v59 = vpack.c.bf16 %v967_v25, %v965_v6  ;;  %1270 = vmatprep.mubr.bf16.mxu0 %v6724_v41  ;;  %v6737_v9 = vpack.c.bf16 %v946_v39, %v944_v13  ;;  %v973_v43 = vmax.f32 %v6653_v30, 0.0  ;;  %v5358_v25 = vld [vmem:[#allocation7 + $0x14] ss:$8 sps:$4 sm:$0xff]   ;;  %4860 = vmatpush3.bf16.msra.mxu0 %v5360_v19  ;;  %v975_v33 = vmax.f32 %v6658_v7, 0.0 }
 0x23e   :  { %v6742_v20 = vpack.c.bf16 %v970_v10, %v968_v23  ;;  %v948_v27 = vmax.f32 %v6455_v36, 0.0  ;;  %v950_v53 = vmax.f32 %v6460_v37, 0.0  ;;  %4861 = vmatprep.subr.bf16.mxu0 %v5364_v26  ;;  %v6748_v44 = vpack.c.bf16 %v951_v16, %v949_v61  ;;  %v5356_v36 = vld [vmem:[#allocation7 + $0x10] ss:$8 sps:$4 sm:$0xff]  }
 0x23f   :  { %1320 = vmatprep.mubr.bf16.mxu1 %v6728_v59  ;;  %v972_v30 = vmax.f32 %v6515_v40, 0.0  ;;  %v974_v24 = vmax.f32 %v6520_v58, 0.0  ;;  %v953_v17 = vmax.f32 %v6617_v48, 0.0  ;;  %v6754_v7 = vpack.c.bf16 %v975_v33, %v973_v43  ;;  %v5363_v58 = vld [vmem:[#allocation7 + $0x24] ss:$8 sps:$4 sm:$0xff]   ;;  %v5368_v13 = vld [vmem:[#allocation12 + $0x58] sm:$0xff]  }
 0x240   :  { %1321 = vmatmul.mubr.bf16.vlgmr.msra.gmra.mrb[0].mxu1 %v6721_v14  ;;  %v6756_v15 = vpack.c.bf16 %v950_v53, %v948_v27  ;;  %v955_v37 = vmax.f32 %v6622_v4, 0.0  ;;  %v977_v56 = vmax.f32 %v6663_v42, 0.0  ;;  %v979_v40 = vmax.f32 %v6668_v49, 0.0  ;;  %v5367_v4 = vld [vmem:[#allocation12 + $0x10] sm:$0xff]  }
 0x241   :  { %1502 = vmatpush1.bf16.msra.mxu1 %v5353_v2  ;;  %1330 = vmatprep.mubr.bf16.mxu1 %v6735_v62  ;;  %v6760_v1 = vpack.c.bf16 %v974_v24, %v972_v30  ;;  %v952_v48 = vmax.f32 %v6465_v34, 0.0  ;;  %v954_v54 = vmax.f32 %v6470_v12, 0.0  ;;  %v976_v6 = vmax.f32 %v6525_v5, 0.0  ;;  %v5361_v12 = vld [vmem:[#allocation7 + $0x20] ss:$8 sps:$4 sm:$0xff]   ;;  %v10090_v27 = vld [vmem:[#allocation22_spill] sm:$0xff] }
 0x242   :  { %1503 = vmatprep.subr.bf16.mxu1 %v5358_v25  ;;  %4862 = vmatpush3.bf16.msra.mxu0 %v5365_v11  ;;  %v6765_v19 = vpack.c.bf16 %v955_v37, %v953_v17  ;;  %v978_v46 = vmax.f32 %v6530_v21, 0.0  ;;  %v957_v42 = vmax.f32 %v6627_v35, 0.0  ;;  %v6770_v26 = vpack.c.bf16 %v979_v40, %v977_v56  ;;  %v5369_v11 = vld [vmem:[#allocation7 + $0x30] ss:$8 sps:$4 sm:$0xff]   ;;  %v5374_v37 = vld [vmem:[#allocation12 + $0x20] sm:$0xff]  }
 0x243   :  { %4863 = vmatprep.subr.bf16.mxu0 %v5366_v52  ;;  %v6772_v63 = vpack.c.bf16 %v954_v54, %v952_v48  ;;  %v959_v49 = vmax.f32 %v6632_v32, 0.0  ;;  %v981_v34 = vmax.f32 %v6673_v60, 0.0  ;;  %v983_v21 = vmax.f32 %v6678_v55, 0.0  ;;  %v5371_v32 = vld [vmem:[#allocation7 + $0x34] ss:$8 sps:$4 sm:$0xff]   ;;  %v10093_v40 = vld [vmem:[#allocation24_spill] sm:$0xff] }
 0x244   :  { %1271 = vmatmul.mubr.bf16.gmra.mrb[68].mxu0 %v6737_v9  ;;  %v6777_v5 = vpack.c.bf16 %v978_v46, %v976_v6  ;;  %v956_v35 = vmax.f32 %v6475_v8, 0.0  ;;  %v958_v39 = vmax.f32 %v6480_v45, 0.0  ;;  %v980_v60 = vmax.f32 %v6535_v29, 0.0  ;;  %v5372_v55 = vld [vmem:[#allocation12 + $0x18] sm:$0xff]   ;;  %v5373_v29 = vld [vmem:[#allocation12 + $0x60] sm:$0xff]   ;;  %v5375_v6 = vld [vmem:[#allocation12 + $0x68] sm:$0xff]  }
 0x245   :  { %1504 = vmatpush1.bf16.msra.mxu1 %v5356_v36  ;;  %1280 = vmatprep.mubr.bf16.mxu0 %v6748_v44  ;;  %v6783_v2 = vpack.c.bf16 %v959_v49, %v957_v42  ;;  %v982_v23 = vmax.f32 %v6540_v50, 0.0  ;;  %v961_v10 = vmax.f32 %v6637_v38, 0.0  ;;  %v6788_v61 = vpack.c.bf16 %v983_v21, %v981_v34  ;;  %v10092_v17 = vld [vmem:[#allocation23_spill] sm:$0xff]  ;;  %v10095_v42 = vld [vmem:[#allocation25_spill] sm:$0xff]  ;;  %v10096_v49 = vld [vmem:[#allocation26_spill] sm:$0xff] }
 0x246   :  { %1505 = vmatprep.subr.bf16.mxu1 %v5363_v58  ;;  %4864 = vmatpush3.bf16.msra.mxu0 %v5367_v4  ;;  %v6790_v16 = vpack.c.bf16 %v958_v39, %v956_v35  ;;  %v963_v8 = vmax.f32 %v6642_v22, 0.0  ;;  %v985_v45 = vmax.f32 %v6683_v3, 0.0  ;;  %v987_v50 = vmax.f32 %v6688_v18, 0.0  ;;  %v10089_v22 = vld [vmem:[#allocation21_spill] sm:$0xff]  ;;  %v10094_v54 = vld [vmem:[#allocation43_spill] sm:$0xff] }
 0x247   :  { %4865 = vmatprep.subr.bf16.mxu0 %v5368_v13  ;;  %v6795_v43 = vpack.c.bf16 %v982_v23, %v980_v60  ;;  %v960_v38 = vmax.f32 %v6485_v47, 0.0  ;;  %v962_v25 = vmax.f32 %v6490_v57, 0.0  ;;  %v984_v3 = vmax.f32 %v10089_v22, 0.0  ;;  %v5379_v18 = vld [vmem:[#allocation7 + $0x44] ss:$8 sps:$4 sm:$0xff]   ;;  %v10091_v47 = vld [vmem:[#allocation42_spill] sm:$0xff] }
 0x248   :  { %1331 = vmatmul.mubr.bf16.gmra.mrb[4].mxu1 %v6742_v20  ;;  %v6801_v33 = vpack.c.bf16 %v963_v8, %v961_v10  ;;  %v986_v53 = vmax.f32 %v10090_v27, 0.0  ;;  %v989_v52 = vmax.f32 %v6693_v51, 0.0  ;;  %v6806_v30 = vpack.c.bf16 %v987_v50, %v985_v45  ;;  %v10097_v13 = vld [vmem:[#allocation44_spill] sm:$0xff]  ;;  %v10099_v60 = vld [vmem:[#allocation27_spill] sm:$0xff] }
 0x249   :  { %1340 = vmatprep.mubr.bf16.mxu1 %v6754_v7  ;;  %1506 = vmatpush1.bf16.msra.mxu1 %v5361_v12  ;;  %v6808_v24 = vpack.c.bf16 %v962_v25, %v960_v38  ;;  %v991_v57 = vmax.f32 %v10091_v47, 0.0  ;;  %v988_v36 = vmax.f32 %v10092_v17, 0.0  ;;  %v990_v58 = vmax.f32 %v10093_v40, 0.0  ;;  %v5377_v21 = vld [vmem:[#allocation7 + $0x40] ss:$8 sps:$4 sm:$0xff]   ;;  %v10100_v8 = vld [vmem:[#allocation31_spill] sm:$0xff] }
 0x24a   :  { %1507 = vmatprep.subr.bf16.mxu1 %v5371_v32  ;;  %4866 = vmatpush3.bf16.msra.mxu0 %v5372_v55  ;;  %v6812_v56 = vpack.c.bf16 %v986_v53, %v984_v3  ;;  %v993_v48 = vmax.f32 %v6697_v28, 0.0  ;;  %v995_v51 = vmax.f32 %v10094_v54, 0.0  ;;  %v992_v4 = vmax.f32 %v10095_v42, 0.0  ;;  %v10098_v28 = vld [vmem:[#allocation45_spill] sm:$0xff]  ;;  %v5386_v10 = vld [vmem:[#allocation7 + $0x54] ss:$8 sps:$4 sm:$0xff]  }
 0x24b   :  { %4867 = vmatprep.subr.bf16.mxu0 %v5373_v29  ;;  %v6817_v46 = vpack.c.bf16 %v991_v57, %v989_v52  ;;  %v994_v34 = vmax.f32 %v10096_v49, 0.0  ;;  %v997_v12 = vmax.f32 %v10097_v13, 0.0  ;;  %v6823_v35 = vpack.c.bf16 %v990_v58, %v988_v36  ;;  %v10101_v29 = vld [vmem:[#allocation46_spill] sm:$0xff]  ;;  %v10103_v3 = vld [vmem:[#allocation41_spill] sm:$0xff]  ;;  %v10104_v53 = vld [vmem:[#allocation20_spill] sm:$0xff] }
 0x24c   :  { %1281 = vmatmul.mubr.bf16.gmra.mrb[72].mxu0 %v6756_v15  ;;  %v6825_v39 = vpack.c.bf16 %v995_v51, %v993_v48  ;;  %v999_v32 = vmax.f32 %v10098_v28, 0.0  ;;  %v996_v23 = vmax.f32 %v10099_v60, 0.0  ;;  %v998_v45 = vmax.f32 %v10100_v8, 0.0  ;;  %v10102_v38 = vld [vmem:[#allocation30_spill] sm:$0xff]  ;;  %v5382_v58 = vld [vmem:[#allocation12 + $0x78] sm:$0xff]   ;;  %v5404_v28 = vld [vmem:[#allocation13 + $0x8] sm:$0xff]  }
 0x24d   :  { %1508 = vmatpush1.bf16.msra.mxu1 %v5369_v11  ;;  %1290 = vmatprep.mubr.bf16.mxu0 %v6765_v19  ;;  %v6830_v55 = vpack.c.bf16 %v994_v34, %v992_v4  ;;  %v1001_v50 = vmax.f32 %v10101_v29, 0.0  ;;  %v1003_v25 = vmax.f32 %v10102_v38, 0.0  ;;  %v5376_v11 = vld [vmem:[#allocation12 + $0x28] sm:$0xff]   ;;  %v1000_v27 = vmax.f32 %v10103_v3, 0.0  ;;  %v5384_v17 = vld [vmem:[#allocation7 + $0x50] ss:$8 sps:$4 sm:$0xff]  }
 0x24e   :  { %1509 = vmatprep.subr.bf16.mxu1 %v5379_v18  ;;  %4868 = vmatpush3.bf16.msra.mxu0 %v5374_v37  ;;  %v6835_v22 = vpack.c.bf16 %v999_v32, %v997_v12  ;;  %v1002_v52 = vmax.f32 %v10104_v53, 0.0  ;;  %v5380_v18 = vld [vmem:[#allocation12 + $0x70] sm:$0xff]   ;;  %v6840_v47 = vpack.c.bf16 %v998_v45, %v996_v23  ;;  %v5389_v37 = vld [vmem:[#allocation7 + $0x64] ss:$8 sps:$4 sm:$0xff]   ;;  %v5387_v48 = vld [vmem:[#allocation7 + $0x60] ss:$8 sps:$4 sm:$0xff]  }
 0x24f   :  { %4869 = vmatprep.subr.bf16.mxu0 %v5375_v6  ;;  %v6842_v57 = vpack.c.bf16 %v1003_v25, %v1001_v50  ;;  %v5381_v40 = vld [vmem:[#allocation12 + $0x30] sm:$0xff]   ;;  %v5383_v51 = vld [vmem:[#allocation12 + $0x38] sm:$0xff]   ;;  %v5393_v6 = vld [vmem:[#allocation10] sm:$0xff]  }
 0x250   :  { %1341 = vmatmul.mubr.bf16.gmra.mrb[8].mxu1 %v6760_v1  ;;  %v6845_v36 = vpack.c.bf16 %v1002_v52, %v1000_v27  ;;  %v5392_v54 = vld [vmem:[#allocation7 + $0x74] ss:$8 sps:$4 sm:$0xff]   ;;  %v5390_v42 = vld [vmem:[#allocation7 + $0x70] ss:$8 sps:$4 sm:$0xff]   ;;  %v5394_v4 = vld [vmem:[#allocation10 + $0x8] sm:$0xff]  }
 0x251   :  { %1350 = vmatprep.mubr.bf16.mxu1 %v6770_v26  ;;  %1510 = vmatpush1.bf16.msra.mxu1 %v5377_v21  ;;  %v5395_v49 = vld [vmem:[#allocation10 + $0x10] sm:$0xff]   ;;  %v5396_v34 = vld [vmem:[#allocation10 + $0x18] sm:$0xff]  }
 0x252   :  { %1511 = vmatprep.subr.bf16.mxu1 %v5386_v10  ;;  %4870 = vmatpush3.bf16.msra.mxu0 %v5376_v11  ;;  %v5405_v50 = vld [vmem:[#allocation13 + $0x50] sm:$0xff]  }
 0x253   :  { %4871 = vmatprep.subr.bf16.mxu0 %v5380_v18  ;;  %v5406_v38 = vld [vmem:[#allocation13 + $0x10] sm:$0xff]  }
 0x254   :  { %1291 = vmatmul.mubr.bf16.gmra.mrb[76].mxu0 %v6772_v63 }
 0x255   :  { %1512 = vmatpush1.bf16.msra.mxu1 %v5384_v17  ;;  %1300 = vmatprep.mubr.bf16.mxu0 %v6783_v2 }
 0x256   :  { %1513 = vmatprep.subr.bf16.mxu1 %v5389_v37  ;;  %4872 = vmatpush3.bf16.msra.mxu0 %v5381_v40 }
 0x257   :  { %4873 = vmatprep.subr.bf16.mxu0 %v5382_v58 }
 0x258   :  { %1351 = vmatmul.mubr.bf16.gmra.mrb[12].mxu1 %v6777_v5 }
 0x259   :  { %1360 = vmatprep.mubr.bf16.mxu1 %v6788_v61  ;;  %1514 = vmatpush1.bf16.msra.mxu1 %v5387_v48 }
 0x25a   :  { %1515 = vmatprep.subr.bf16.mxu1 %v5392_v54  ;;  %4874 = vmatpush3.bf16.msra.mxu0 %v5383_v51 }
 0x25b   :  { %5107 = vmatprep.subr.bf16.mxu0 %v5393_v6 }
 0x25c   :  { %1301 = vmatmul.mubr.bf16.gmra.mrb[80].mxu0 %v6790_v16 }
 0x25d   :  { %1516 = vmatpush1.bf16.msra.mxu1 %v5390_v42  ;;  %1310 = vmatprep.mubr.bf16.mxu0 %v6801_v33 }
 0x260   :  { %1361 = vmatmul.mubr.bf16.gmra.mrb[16].mxu1 %v6795_v43 }
 0x261   :  { %1370 = vmatprep.mubr.bf16.mxu1 %v6806_v30 }
 0x264   :  { %1311 = vmatmul.mubr.bf16.gmra.mrb[84].mxu0 %v6808_v24 }
 0x265   :  { %1854 = vmatprep.mubr.bf16.mxu0 %v6719_v31  ;;  %v5397_v31 = vld [vmem:[#allocation10 + $0x20] sm:$0xff]  }
 0x268   :  { %1371 = vmatmul.mubr.bf16.gmra.mrb[20].mxu1 %v6812_v56 }
 0x269   :  { %1380 = vmatprep.mubr.bf16.mxu1 %v6817_v46 }
 0x26c   :  { %1855 = vmatmul.mubr.bf16.vlgmr.msra.gmra.mrb[88].mxu0 %v6717_v0  ;;  %v5398_v0 = vld [vmem:[#allocation10 + $0x28] sm:$0xff]  }
 0x26d   :  { %1862 = vmatprep.mubr.bf16.mxu0 %v6724_v41  ;;  %5108 = vmatpush3.bf16.msra.mxu0 %v5393_v6  ;;  %v5399_v41 = vld [vmem:[#allocation10 + $0x30] sm:$0xff]  }
 0x26e   :  { %5109 = vmatprep.subr.bf16.mxu0 %v5394_v4 }
 0x270   :  { %1381 = vmatmul.mubr.bf16.gmra.mrb[24].mxu1 %v6823_v35 }
 0x271   :  { %1390 = vmatprep.mubr.bf16.mxu1 %v6825_v39  ;;  %5110 = vmatpush3.bf16.msra.mxu0 %v5394_v4  ;;  %v5409_v4 = vld [vmem:[#allocation13 + $0x60] sm:$0xff]  }
 0x272   :  { %5111 = vmatprep.subr.bf16.mxu0 %v5395_v49 }
 0x274   :  { %1863 = vmatmul.mubr.bf16.gmra.mrb[92].mxu0 %v6737_v9  ;;  %v5400_v9 = vld [vmem:[#allocation10 + $0x38] sm:$0xff]  }
 0x275   :  { %1870 = vmatprep.mubr.bf16.mxu0 %v6748_v44  ;;  %5112 = vmatpush3.bf16.msra.mxu0 %v5395_v49  ;;  %v10105_v44 = vmov 0   ;;  %v5410_v49 = vld [vmem:[#allocation13 + $0x20] sm:$0xff]  }
 0x276   :  { %5113 = vmatprep.subr.bf16.mxu0 %v5396_v34 }
 0x278   :  { %1391 = vmatmul.mubr.bf16.gmra.mrb[28].mxu1 %v6830_v55 }
 0x279   :  { %1400 = vmatprep.mubr.bf16.mxu1 %v6835_v22  ;;  %5114 = vmatpush3.bf16.msra.mxu0 %v5396_v34 }
 0x27a   :  { %5115 = vmatprep.subr.bf16.mxu0 %v5397_v31 }
 0x27c   :  { %1871 = vmatmul.mubr.bf16.gmra.mrb[96].mxu0 %v6756_v15  ;;  %v5553_v15 = vld [vmem:[#allocation2] sm:$0xff]  }
 0x27d   :  { %1878 = vmatprep.mubr.bf16.mxu0 %v6765_v19  ;;  %5116 = vmatpush3.bf16.msra.mxu0 %v5397_v31  ;;  %v5554_v19 = vld [vmem:[#allocation2 + $0x8] sm:$0xff]  }
 0x27e   :  { %5117 = vmatprep.subr.bf16.mxu0 %v5398_v0 }
 0x280   :  { %1401 = vmatmul.mubr.bf16.gmra.mrb[32].mxu1 %v6840_v47 }
 0x281   :  { %1410 = vmatprep.mubr.bf16.mxu1 %v6842_v57  ;;  %5118 = vmatpush3.bf16.msra.mxu0 %v5398_v0 }
 0x282   :  { %5119 = vmatprep.subr.bf16.mxu0 %v5399_v41 }
 0x284   :  { %1879 = vmatmul.mubr.bf16.gmra.mrb[100].mxu0 %v6772_v63  ;;  %v5555_v63 = vld [vmem:[#allocation2 + $0x10] sm:$0xff]  }
 0x285   :  { %1886 = vmatprep.mubr.bf16.mxu0 %v6783_v2  ;;  %5120 = vmatpush3.bf16.msra.mxu0 %v5399_v41  ;;  %v5556_v2 = vld [vmem:[#allocation2 + $0x18] sm:$0xff]  }
 0x286   :  { %5121 = vmatprep.subr.bf16.mxu0 %v5400_v9 }
 0x288   :  { %1411 = vmatmul.mubr.bf16.gmra.mrb[36].mxu1 %v6845_v36 }
 0x289   :  { %1533 = vmatprep.mubr.bf16.mxu1 %v10105_v44  ;;  %5122 = vmatpush3.bf16.msra.mxu0 %v5400_v9 }
 0x28c   :  { %1887 = vmatmul.mubr.bf16.gmra.mrb[104].mxu0 %v6790_v16  ;;  %v5566_v16 = vld [vmem:[#allocation2 + $0x68] sm:$0xff]  }
 0x28d   :  { %1894 = vmatprep.mubr.bf16.mxu0 %v6801_v33  ;;  %v5568_v33 = vld [vmem:[#allocation2 + $0x78] sm:$0xff]  }
 0x290   :  { %1534 = vmatmul.mubr.bf16.vlgmr.msra.gmra.mrb[40].mxu1 %v5553_v15 }
 0x291   :  { %1543 = vmatprep.mubr.bf16.mxu1 %v10105_v44 }
 0x294   :  { %1895 = vmatmul.mubr.bf16.gmra.mrb[108].mxu0 %v6808_v24  ;;  %v5402_v24 = vld [vmem:[#allocation13] sm:$0xff]  }
 0x295   :  { %1902 = vmatprep.mubr.bf16.mxu0 %v6728_v59  ;;  %v5557_v59 = vld [vmem:[#allocation2 + $0x20] sm:$0xff]  }
 0x298   :  { %1544 = vmatmul.mubr.bf16.gmra.mrb[44].mxu1 %v5554_v19 }
 0x299   :  { %1553 = vmatprep.mubr.bf16.mxu1 %v10105_v44 }
 0x29c   :  { %1903 = vmatmul.mubr.bf16.gmra.mrb[112].mxu0 %v6721_v14  ;;  %v5558_v14 = vld [vmem:[#allocation2 + $0x28] sm:$0xff]  }
 0x29d   :  { %1910 = vmatprep.mubr.bf16.mxu0 %v6735_v62  ;;  %v5559_v62 = vld [vmem:[#allocation2 + $0x30] sm:$0xff]  }
 0x2a0   :  { %1554 = vmatmul.mubr.bf16.gmra.mrb[48].mxu1 %v5555_v63 }
 0x2a1   :  { %1563 = vmatprep.mubr.bf16.mxu1 %v10105_v44 }
 0x2a4   :  { %1911 = vmatmul.mubr.bf16.gmra.mrb[116].mxu0 %v6742_v20  ;;  %v5560_v20 = vld [vmem:[#allocation2 + $0x38] sm:$0xff]  }
 0x2a5   :  { %1918 = vmatprep.mubr.bf16.mxu0 %v6754_v7  ;;  %v5561_v7 = vld [vmem:[#allocation2 + $0x40] sm:$0xff]  }
 0x2a8   :  { %1564 = vmatmul.mubr.bf16.gmra.mrb[52].mxu1 %v5556_v2 }
 0x2a9   :  { %1573 = vmatprep.mubr.bf16.mxu1 %v10105_v44 }
 0x2ac   :  { %1919 = vmatmul.mubr.bf16.gmra.mrb[120].mxu0 %v6760_v1  ;;  %v5562_v1 = vld [vmem:[#allocation2 + $0x48] sm:$0xff]  }
 0x2ad   :  { %1926 = vmatprep.mubr.bf16.mxu0 %v6770_v26  ;;  %v5563_v26 = vld [vmem:[#allocation2 + $0x50] sm:$0xff]  }
 0x2b0   :  { %1574 = vmatmul.mubr.bf16.gmra.mrb[56].mxu1 %v5557_v59 }
 0x2b1   :  { %1583 = vmatprep.mubr.bf16.mxu1 %v10105_v44 }
 0x2b4   :  { %1927 = vmatmul.mubr.bf16.gmra.mrb[124].mxu0 %v6777_v5  ;;  %v5564_v5 = vld [vmem:[#allocation2 + $0x58] sm:$0xff]  }
 0x2b5   :  { %1934 = vmatprep.mubr.bf16.mxu0 %v6788_v61  ;;  %v5565_v61 = vld [vmem:[#allocation2 + $0x60] sm:$0xff]  }
 0x2b8   :  { %1584 = vmatmul.mubr.bf16.gmra.mrb[60].mxu1 %v5558_v14 }
 0x2b9   :  { %1593 = vmatprep.mubr.bf16.mxu1 %v10105_v44 }
 0x2bc   :  { %1935 = vmatmul.mubr.bf16.gmra.mrb[128].mxu0 %v6795_v43  ;;  %v5567_v43 = vld [vmem:[#allocation2 + $0x70] sm:$0xff]  }
 0x2bd   :  { %1942 = vmatprep.mubr.bf16.mxu0 %v6806_v30  ;;  %v5401_v30 = vld [vmem:[#allocation13 + $0x40] sm:$0xff]  }
 0x2be   :  { %4995 = vmatprep.subr.bf16.mxu1 %v5401_v30 }
 0x2bf   :  { %4996 = vmatpush3.bf16.msra.mxu1 %v5402_v24 }
 0x2c0   :  { %1594 = vmatmul.mubr.bf16.gmra.mrb[0].mxu1 %v5559_v62 }
 0x2c1   :  { %1603 = vmatprep.mubr.bf16.mxu1 %v10105_v44 }
 0x2c4   :  { %1943 = vmatmul.mubr.bf16.gmra.mrb[132].mxu0 %v6812_v56 }
 0x2c5   :  { %1950 = vmatprep.mubr.bf16.mxu0 %v6817_v46 }
 0x2c8   :  { %1604 = vmatmul.mubr.bf16.gmra.mrb[4].mxu1 %v5560_v20 }
 0x2c9   :  { %1613 = vmatprep.mubr.bf16.mxu1 %v10105_v44 }
 0x2cc   :  { %1951 = vmatmul.mubr.bf16.gmra.mrb[136].mxu0 %v6823_v35 }
 0x2cd   :  { %1958 = vmatprep.mubr.bf16.mxu0 %v6825_v39  ;;  %v5403_v39 = vld [vmem:[#allocation13 + $0x48] sm:$0xff]  }
 0x2ce   :  { %4997 = vmatprep.subr.bf16.mxu1 %v5403_v39 }
 0x2cf   :  { %4998 = vmatpush3.bf16.msra.mxu1 %v5404_v28 }
 0x2d0   :  { %1614 = vmatmul.mubr.bf16.gmra.mrb[8].mxu1 %v5561_v7  ;;  %4999 = vmatprep.subr.bf16.mxu1 %v5405_v50 }
 0x2d1   :  { %1623 = vmatprep.mubr.bf16.mxu1 %v10105_v44 }
 0x2d3   :  { %5000 = vmatpush3.bf16.msra.mxu1 %v5406_v38 }
 0x2d4   :  { %1959 = vmatmul.mubr.bf16.gmra.mrb[140].mxu0 %v6830_v55 }
 0x2d5   :  { %1966 = vmatprep.mubr.bf16.mxu0 %v6835_v22 }
 0x2d8   :  { %1624 = vmatmul.mubr.bf16.gmra.mrb[12].mxu1 %v5562_v1 }
 0x2d9   :  { %1633 = vmatprep.mubr.bf16.mxu1 %v10105_v44 }
 0x2dc   :  { %1967 = vmatmul.mubr.bf16.gmra.mrb[144].mxu0 %v6840_v47  ;;  %v5407_v47 = vld [vmem:[#allocation13 + $0x58] sm:$0xff]  }
 0x2dd   :  { %1974 = vmatprep.mubr.bf16.mxu0 %v6842_v57  ;;  %v5408_v57 = vld [vmem:[#allocation13 + $0x18] sm:$0xff]   ;;  %5001 = vmatprep.subr.bf16.mxu1 %v5407_v47 }
 0x2de   :  { %5002 = vmatpush3.bf16.msra.mxu1 %v5408_v57 }
 0x2df   :  { %5003 = vmatprep.subr.bf16.mxu1 %v5409_v4 }
 0x2e0   :  { %1634 = vmatmul.mubr.bf16.gmra.mrb[16].mxu1 %v5563_v26 }
 0x2e1   :  { %1643 = vmatprep.mubr.bf16.mxu1 %v10105_v44 }
 0x2e2   :  { %5004 = vmatpush3.bf16.msra.mxu1 %v5410_v49 }
 0x2e4   :  { %1975 = vmatmul.mubr.bf16.gmra.mrb[148].mxu0 %v6845_v36 }
 0x2e5   :  { %5123 = vmatprep.mubr.bf16.mxu0 %v5553_v15 }
 0x2e8   :  { %1644 = vmatmul.mubr.bf16.gmra.mrb[20].mxu1 %v5564_v5 }
 0x2e9   :  { %1653 = vmatprep.mubr.bf16.mxu1 %v10105_v44 }
 0x2ec   :  { %5124 = vmatmul.mubr.bf16.vlgmr.msra.gmra.mrb[152].mxu0 %v5554_v19 }
 0x2ed   :  { %5127 = vmatprep.mubr.bf16.mxu0 %v5555_v63 }
 0x2f0   :  { %1654 = vmatmul.mubr.bf16.gmra.mrb[24].mxu1 %v5565_v61 }
 0x2f1   :  { %1663 = vmatprep.mubr.bf16.mxu1 %v10105_v44 }
 0x2f4   :  { %5128 = vmatmul.mubr.bf16.gmra.mrb[156].mxu0 %v5556_v2 }
 0x2f5   :  { %5131 = vmatprep.mubr.bf16.mxu0 %v5557_v59 }
 0x2f8   :  { %1664 = vmatmul.mubr.bf16.gmra.mrb[28].mxu1 %v5566_v16 }
 0x2f9   :  { %1673 = vmatprep.mubr.bf16.mxu1 %v10105_v44 }
 0x2fc   :  { %5132 = vmatmul.mubr.bf16.gmra.mrb[160].mxu0 %v5558_v14 }
 0x2fd   :  { %5135 = vmatprep.mubr.bf16.mxu0 %v5559_v62  ;;  %v5411_v62 = vld [vmem:[#allocation13 + $0x68] sm:$0xff]  }
 0x2fe   :  { %5005 = vmatprep.subr.bf16.mxu1 %v5411_v62 }
 0x300   :  { %1674 = vmatmul.mubr.bf16.gmra.mrb[32].mxu1 %v5567_v43 }
 0x301   :  { %1683 = vmatprep.mubr.bf16.mxu1 %v10105_v44 }
 0x304   :  { %5136 = vmatmul.mubr.bf16.gmra.mrb[164].mxu0 %v5560_v20  ;;  %v5412_v20 = vld [vmem:[#allocation13 + $0x28] sm:$0xff]  }
 0x305   :  { %5139 = vmatprep.mubr.bf16.mxu0 %v5561_v7  ;;  %5006 = vmatpush3.bf16.msra.mxu1 %v5412_v20 }
 0x308   :  { %1684 = vmatmul.mubr.bf16.gmra.mrb[36].mxu1 %v5568_v33 }
 0x30c   :  { %5140 = vmatmul.mubr.bf16.gmra.mrb[168].mxu0 %v5562_v1 }
 0x30d   :  { %5143 = vmatprep.mubr.bf16.mxu0 %v5563_v26 }
 0x30f   :  { %v6913_v56 = vpop.f32.mrb[64].mxu0 }
 0x310   :  { %v6915_v46 = vpop.f32.mrb[65].mxu0 }
 0x311   :  { %v6917_v13 = vpop.f32.mrb[66].mxu0 }
 0x312   :  { %v6919_v12 = vpop.f32.mrb[67].mxu0 }
 0x314   :  { %5144 = vmatmul.mubr.bf16.gmra.mrb[172].mxu0 %v5564_v5 }
 0x315   :  { %5147 = vmatprep.mubr.bf16.mxu0 %v5565_v61 }
 0x317   :  { %v6921_v21 = vpop.f32.mrb[68].mxu0 }
 0x318   :  { %v6923_v35 = vpop.f32.mrb[69].mxu0 }
 0x319   :  { %v6925_v32 = vpop.f32.mrb[70].mxu0 }
 0x31a   :  { %v6927_v60 = vpop.f32.mrb[71].mxu0 }
 0x31c   :  { %5148 = vmatmul.mubr.bf16.gmra.mrb[176].mxu0 %v5566_v16 }
 0x31d   :  { %5151 = vmatprep.mubr.bf16.mxu0 %v5567_v43 }
 0x31f   :  { %v6929_v23 = vpop.f32.mrb[72].mxu0 }
 0x320   :  { %v6931_v10 = vpop.f32.mrb[73].mxu0 }
 0x321   :  { %v6933_v55 = vpop.f32.mrb[74].mxu0 }
 0x322   :  { %v6935_v8 = vpop.f32.mrb[75].mxu0 }
 0x324   :  { %5152 = vmatmul.mubr.bf16.gmra.mrb[180].mxu0 %v5568_v33 }
 0x327   :  { %v6937_v45 = vpop.f32.mrb[76].mxu0 }
 0x328   :  { %v6939_v29 = vpop.f32.mrb[77].mxu0 }
 0x329   :  { %v6941_v25 = vpop.f32.mrb[78].mxu0 }
 0x32a   :  { %v6943_v11 = vpop.f32.mrb[79].mxu0 }
 0x32f   :  { %v6945_v22 = vpop.f32.mrb[80].mxu0 }
 0x330   :  { %v6947_v3 = vpop.f32.mrb[81].mxu0 }
 0x331   :  { %v6949_v27 = vpop.f32.mrb[82].mxu0 }
 0x332   :  { %v6951_v53 = vpop.f32.mrb[83].mxu0 }
 0x337   :  { %v6953_v52 = vpop.f32.mrb[84].mxu0 }
 0x338   :  { %v6955_v18 = vpop.f32.mrb[85].mxu0 }
 0x339   :  { %v6957_v17 = vpop.f32.mrb[86].mxu0 }
 0x33a   :  { %v6959_v36 = vpop.f32.mrb[87].mxu0 }
 0x33f   :  { %v4875_v37 = vpop.f32.mrb[88].mxu0 }
 0x340   :  { %v4876_v40 = vpop.f32.mrb[89].mxu0 }
 0x341   :  { %v6961_v58 = vadd.f32 %v4876_v40, %v4875_v37  ;;  %v4878_v48 = vpop.f32.mrb[90].mxu0 }
 0x342   :  { %v4879_v54 = vpop.f32.mrb[91].mxu0 }
 0x343   :  { %v6963_v51 = vadd.f32 %v4879_v54, %v4878_v48 }
 0x347   :  { %v4881_v6 = vpop.f32.mrb[92].mxu0 }
 0x348   :  { %v4882_v42 = vpop.f32.mrb[93].mxu0 }
 0x349   :  { %v6965_v34 = vadd.f32 %v4882_v42, %v4881_v6  ;;  %v4884_v31 = vpop.f32.mrb[94].mxu0 }
 0x34a   :  { %v4885_v0 = vpop.f32.mrb[95].mxu0 }
 0x34b   :  { %v6967_v41 = vadd.f32 %v4885_v0, %v4884_v31 }
 0x34f   :  { %v4887_v9 = vpop.f32.mrb[96].mxu0 }
 0x350   :  { %v4888_v44 = vpop.f32.mrb[97].mxu0 }
 0x351   :  { %v6969_v15 = vadd.f32 %v4888_v44, %v4887_v9  ;;  %v4890_v19 = vpop.f32.mrb[98].mxu0 }
 0x352   :  { %v4891_v63 = vpop.f32.mrb[99].mxu0 }
 0x353   :  { %v6971_v2 = vadd.f32 %v4891_v63, %v4890_v19 }
 0x357   :  { %v4893_v59 = vpop.f32.mrb[100].mxu0 }
 0x358   :  { %v4894_v14 = vpop.f32.mrb[101].mxu0 }
 0x359   :  { %v6973_v7 = vadd.f32 %v4894_v14, %v4893_v59  ;;  %v4896_v1 = vpop.f32.mrb[102].mxu0 }
 0x35a   :  { %v4897_v26 = vpop.f32.mrb[103].mxu0 }
 0x35b   :  { %v6975_v5 = vadd.f32 %v4897_v26, %v4896_v1 }
 0x35f   :  { %v4899_v61 = vpop.f32.mrb[104].mxu0 }
 0x360   :  { %v4900_v16 = vpop.f32.mrb[105].mxu0 }
 0x361   :  { %v6977_v43 = vadd.f32 %v4900_v16, %v4899_v61  ;;  %v4902_v33 = vpop.f32.mrb[106].mxu0 }
 0x362   :  { %v4903_v24 = vpop.f32.mrb[107].mxu0 }
 0x363   :  { %v1535_v30 = vpop.f32.mrb[40].mxu1  ;;  %v6982_v50 = vadd.f32 %v4903_v24, %v4902_v33 }
 0x364   :  { %v6980_v39 = vadd.f32 %v1535_v30, %v6913_v56  ;;  %v1537_v28 = vpop.f32.mrb[41].mxu1 }
 0x365   :  { %v6985_v38 = vadd.f32 %v1537_v28, %v6915_v46  ;;  %v1539_v47 = vpop.f32.mrb[42].mxu1 }
 0x366   :  { %v6988_v57 = vadd.f32 %v1539_v47, %v6917_v13  ;;  %v1541_v37 = vpop.f32.mrb[43].mxu1 }
 0x367   :  { %10106 = vst [vmem:[#allocation32_spill] sm:$0xff] %v6985_v38  ;;  %v6991_v40 = vadd.f32 %v1541_v37, %v6919_v12  ;;  %v4905_v48 = vpop.f32.mrb[108].mxu0  ;;  %v2058_v33 = vmul.f32 %v6985_v38, %v6985_v38 }
 0x368   :  { %v4906_v54 = vpop.f32.mrb[109].mxu0 }
 0x369   :  { %10107 = vst [vmem:[#allocation33_spill] sm:$0xff] %v6991_v40  ;;  %v6993_v6 = vadd.f32 %v4906_v54, %v4905_v48  ;;  %v4908_v56 = vpop.f32.mrb[110].mxu0  ;;  %v2060_v62 = vmul.f32 %v6991_v40, %v6991_v40  ;;  %v2020_v30 = vadd.f32 %v6991_v40, %v6985_v38 }
 0x36a   :  { %v4909_v4 = vpop.f32.mrb[111].mxu0 }
 0x36b   :  { %v1545_v42 = vpop.f32.mrb[44].mxu1  ;;  %v6998_v31 = vadd.f32 %v4909_v4, %v4908_v56  ;;  %v2158_v56 = vadd.f32 %v2060_v62, %v2058_v33 }
 0x36c   :  { %v6996_v49 = vadd.f32 %v1545_v42, %v6921_v21  ;;  %v1547_v46 = vpop.f32.mrb[45].mxu1  ;;  %v2059_v21 = vmul.f32 %v6988_v57, %v6988_v57 }
 0x36d   :  { %v7001_v13 = vadd.f32 %v1547_v46, %v6923_v35  ;;  %v1549_v0 = vpop.f32.mrb[46].mxu1  ;;  %v2057_v35 = vmul.f32 %v6980_v39, %v6980_v39 }
 0x36e   :  { %v7004_v12 = vadd.f32 %v1549_v0, %v6925_v32  ;;  %v1551_v9 = vpop.f32.mrb[47].mxu1  ;;  %v2061_v1 = vmul.f32 %v6996_v49, %v6996_v49 }
 0x36f   :  { %10108 = vst [vmem:[#allocation34_spill] sm:$0xff] %v7001_v13  ;;  %v7007_v44 = vadd.f32 %v1551_v9, %v6927_v60  ;;  %v4911_v19 = vpop.f32.mrb[112].mxu0  ;;  %v1983_v60 = vadd.f32 %v6988_v57, %v6980_v39  ;;  %v2062_v24 = vmul.f32 %v7001_v13, %v7001_v13  ;;  %v2121_v37 = vadd.f32 %v2059_v21, %v2057_v35 }
 0x370   :  { %v4912_v63 = vpop.f32.mrb[113].mxu0  ;;  %v2021_v42 = vadd.f32 %v2020_v30, %v7001_v13  ;;  %v2063_v0 = vmul.f32 %v7004_v12, %v7004_v12 }
 0x371   :  { %10109 = vst [vmem:[#allocation35_spill] sm:$0xff] %v7007_v44  ;;  %v7011_v59 = vadd.f32 %v4912_v63, %v4911_v19  ;;  %v4914_v14 = vpop.f32.mrb[114].mxu0  ;;  %v2122_v46 = vadd.f32 %v2121_v37, %v2061_v1  ;;  %v2159_v9 = vadd.f32 %v2158_v56, %v2062_v24  ;;  %v2064_v19 = vmul.f32 %v7007_v44, %v7007_v44 }
 0x372   :  { %v4915_v20 = vpop.f32.mrb[115].mxu0 }
 0x373   :  { %v1555_v32 = vpop.f32.mrb[48].mxu1  ;;  %v7024_v16 = vadd.f32 %v4915_v20, %v4914_v14  ;;  %v2160_v24 = vadd.f32 %v2159_v9, %v2064_v19 }
 0x374   :  { %v7022_v26 = vadd.f32 %v1555_v32, %v6929_v23  ;;  %v1557_v61 = vpop.f32.mrb[49].mxu1  ;;  %v1984_v23 = vadd.f32 %v1983_v60, %v6996_v49  ;;  %v2123_v60 = vadd.f32 %v2122_v46, %v2063_v0 }
 0x375   :  { %v7033_v28 = vadd.f32 %v1557_v61, %v6931_v10  ;;  %v1559_v47 = vpop.f32.mrb[50].mxu1 }
 0x376   :  { %10110 = vst [vmem:[#allocation36_spill] sm:$0xff] %v7022_v26  ;;  %v7037_v48 = vadd.f32 %v1559_v47, %v6933_v55  ;;  %v1561_v54 = vpop.f32.mrb[51].mxu1  ;;  %v1985_v55 = vadd.f32 %v1984_v23, %v7004_v12  ;;  %v2065_v21 = vmul.f32 %v7022_v26, %v7022_v26 }
 0x377   :  { %10111 = vst [vmem:[#allocation37_spill] sm:$0xff] %v7033_v28  ;;  %v7041_v4 = vadd.f32 %v1561_v54, %v6935_v8  ;;  %v4917_v10 = vpop.f32.mrb[116].mxu0  ;;  %v2022_v8 = vadd.f32 %v2021_v42, %v7007_v44  ;;  %v2066_v62 = vmul.f32 %v7033_v28, %v7033_v28 }
 0x378   :  { %10112 = vst [vmem:[#allocation38_spill] sm:$0xff] %v7037_v48  ;;  %v4918_v63 = vpop.f32.mrb[117].mxu0  ;;  %v1986_v1 = vadd.f32 %v1985_v55, %v7022_v26  ;;  %v2124_v54 = vadd.f32 %v2123_v60, %v2065_v21  ;;  %v2067_v56 = vmul.f32 %v7037_v48, %v7037_v48 }
 0x379   :  { %10113 = vst [vmem:[#allocation39_spill] sm:$0xff] %v7041_v4  ;;  %v7050_v14 = vadd.f32 %v4918_v63, %v4917_v10  ;;  %v4920_v35 = vpop.f32.mrb[118].mxu0  ;;  %v2023_v47 = vadd.f32 %v2022_v8, %v7033_v28  ;;  %v2068_v0 = vmul.f32 %v7041_v4, %v7041_v4 }
 0x37a   :  { %v4921_v20 = vpop.f32.mrb[119].mxu0  ;;  %v1987_v9 = vadd.f32 %v1986_v1, %v7037_v48  ;;  %v2125_v21 = vadd.f32 %v2124_v54, %v2067_v56 }
 0x37b   :  { %v1565_v32 = vpop.f32.mrb[52].mxu1  ;;  %v7059_v30 = vadd.f32 %v4921_v20, %v4920_v35  ;;  %v2024_v63 = vadd.f32 %v2023_v47, %v7041_v4 }
 0x37c   :  { %v7057_v61 = vadd.f32 %v1565_v32, %v6937_v45  ;;  %v1567_v33 = vpop.f32.mrb[53].mxu1  ;;  %v2161_v45 = vadd.f32 %v2160_v24, %v2066_v62 }
 0x37d   :  { %v7063_v37 = vadd.f32 %v1567_v33, %v6939_v29  ;;  %v1569_v23 = vpop.f32.mrb[54].mxu1 }
 0x37e   :  { %10114 = vst [vmem:[#allocation40_spill] sm:$0xff] %v7057_v61  ;;  %v7068_v42 = vadd.f32 %v1569_v23, %v6941_v25  ;;  %v1571_v46 = vpop.f32.mrb[55].mxu1  ;;  %v2069_v29 = vmul.f32 %v7057_v61, %v7057_v61  ;;  %v1988_v35 = vadd.f32 %v1987_v9, %v7057_v61 }
 0x37f   :  { %10115 = vst [vmem:[#allocation28_spill] sm:$0xff] %v7063_v37  ;;  %v7073_v10 = vadd.f32 %v1571_v46, %v6943_v11  ;;  %v4923_v19 = vpop.f32.mrb[120].mxu0  ;;  %v2070_v25 = vmul.f32 %v7063_v37, %v7063_v37  ;;  %v2162_v11 = vadd.f32 %v2161_v45, %v2068_v0  ;;  %v2025_v32 = vadd.f32 %v2024_v63, %v7063_v37 }
 0x380   :  { %10116 = vst [vmem:[#allocation29_spill] sm:$0xff] %v7068_v42  ;;  %v4924_v55 = vpop.f32.mrb[121].mxu0  ;;  %v2126_v1 = vadd.f32 %v2125_v21, %v2069_v29  ;;  %v2071_v33 = vmul.f32 %v7068_v42, %v7068_v42  ;;  %v1989_v0 = vadd.f32 %v1988_v35, %v7068_v42 }
 0x381   :  { %10117 = vst [vmem:[#allocation21_spill] sm:$0xff] %v7073_v10  ;;  %v7082_v8 = vadd.f32 %v4924_v55, %v4923_v19  ;;  %v4926_v62 = vpop.f32.mrb[122].mxu0  ;;  %v2163_v54 = vadd.f32 %v2162_v11, %v2070_v25  ;;  %v2072_v56 = vmul.f32 %v7073_v10, %v7073_v10  ;;  %v2026_v19 = vadd.f32 %v2025_v32, %v7073_v10 }
 0x382   :  { %v4927_v60 = vpop.f32.mrb[123].mxu0 }
 0x383   :  { %v1575_v20 = vpop.f32.mrb[56].mxu1  ;;  %v7090_v23 = vadd.f32 %v4927_v60, %v4926_v62  ;;  %v2164_v35 = vadd.f32 %v2163_v54, %v2072_v56 }
 0x384   :  { %v7088_v24 = vadd.f32 %v1575_v20, %v6945_v22  ;;  %v1577_v47 = vpop.f32.mrb[57].mxu1 }
 0x385   :  { %v7095_v46 = vadd.f32 %v1577_v47, %v6947_v3  ;;  %v1579_v45 = vpop.f32.mrb[58].mxu1  ;;  %v2127_v3 = vadd.f32 %v2126_v1, %v2071_v33 }
 0x386   :  { %10118 = vst [vmem:[#allocation22_spill] sm:$0xff] %v7088_v24  ;;  %v2073_v9 = vmul.f32 %v7088_v24, %v7088_v24  ;;  %v7101_v29 = vadd.f32 %v1579_v45, %v6949_v27  ;;  %v1581_v22 = vpop.f32.mrb[59].mxu1  ;;  %v1990_v55 = vadd.f32 %v1989_v0, %v7088_v24 }
 0x387   :  { %10119 = vst [vmem:[#allocation42_spill] sm:$0xff] %v7095_v46  ;;  %v2074_v63 = vmul.f32 %v7095_v46, %v7095_v46  ;;  %v7107_v25 = vadd.f32 %v1581_v22, %v6951_v53  ;;  %v4929_v21 = vpop.f32.mrb[124].mxu0  ;;  %v2027_v62 = vadd.f32 %v2026_v19, %v7095_v46  ;;  %v5414_v22 = vld [vmem:[#allocation13 + $0x30] sm:$0xff]   ;;  %v5415_v19 = vld [vmem:[#allocation13 + $0x78] sm:$0xff]  }
 0x388   :  { %10120 = vst [vmem:[#allocation23_spill] sm:$0xff] %v7101_v29  ;;  %v4930_v11 = vpop.f32.mrb[125].mxu0  ;;  %v2128_v20 = vadd.f32 %v2127_v3, %v2073_v9  ;;  %v2075_v27 = vmul.f32 %v7101_v29, %v7101_v29  ;;  %v1991_v33 = vadd.f32 %v1990_v55, %v7101_v29  ;;  %v5413_v9 = vld [vmem:[#allocation13 + $0x70] sm:$0xff]  }
 0x389   :  { %10121 = vst [vmem:[#allocation24_spill] sm:$0xff] %v7107_v25  ;;  %v7113_v60 = vadd.f32 %v4930_v11, %v4929_v21  ;;  %v4932_v32 = vpop.f32.mrb[126].mxu0  ;;  %v2165_v47 = vadd.f32 %v2164_v35, %v2074_v63  ;;  %v2076_v53 = vmul.f32 %v7107_v25, %v7107_v25  ;;  %v2028_v3 = vadd.f32 %v2027_v62, %v7107_v25 }
 0x38a   :  { %v4933_v1 = vpop.f32.mrb[127].mxu0  ;;  %v2129_v35 = vadd.f32 %v2128_v20, %v2075_v27  ;;  %5007 = vmatprep.subr.bf16.mxu1 %v5413_v9  ;;  %v5416_v20 = vld [vmem:[#allocation13 + $0x38] sm:$0xff]  }
 0x38b   :  { %v1585_v45 = vpop.f32.mrb[60].mxu1  ;;  %v7121_v0 = vadd.f32 %v4933_v1, %v4932_v32  ;;  %5008 = vmatpush3.bf16.msra.mxu1 %v5414_v22 }
 0x38c   :  { %v7119_v54 = vadd.f32 %v1585_v45, %v6953_v52  ;;  %v1587_v56 = vpop.f32.mrb[61].mxu1  ;;  %v2166_v45 = vadd.f32 %v2165_v47, %v2076_v53  ;;  %5009 = vmatprep.subr.bf16.mxu1 %v5415_v19 }
 0x38d   :  { %v7125_v63 = vadd.f32 %v1587_v56, %v6955_v18  ;;  %v1589_v21 = vpop.f32.mrb[62].mxu1 }
 0x38e   :  { %10122 = vst [vmem:[#allocation43_spill] sm:$0xff] %v7119_v54  ;;  %v1992_v11 = vadd.f32 %v1991_v33, %v7119_v54  ;;  %v2077_v55 = vmul.f32 %v7119_v54, %v7119_v54  ;;  %v7131_v52 = vadd.f32 %v1589_v21, %v6957_v17  ;;  %v1591_v32 = vpop.f32.mrb[63].mxu1 }
 0x38f   :  { %10123 = vst [vmem:[#allocation25_spill] sm:$0xff] %v7125_v63  ;;  %v2029_v1 = vadd.f32 %v2028_v3, %v7125_v63  ;;  %v2078_v62 = vmul.f32 %v7125_v63, %v7125_v63  ;;  %v7137_v18 = vadd.f32 %v1591_v32, %v6959_v36  ;;  %v4935_v56 = vpop.f32.mrb[128].mxu0  ;;  %5010 = vmatpush3.bf16.msra.mxu1 %v5416_v20 }
 0x390   :  { %10124 = vst [vmem:[#allocation26_spill] sm:$0xff] %v7131_v52  ;;  %v2130_v27 = vadd.f32 %v2129_v35, %v2077_v55  ;;  %v2079_v33 = vmul.f32 %v7131_v52, %v7131_v52  ;;  %v4936_v53 = vpop.f32.mrb[129].mxu0  ;;  %v1993_v9 = vadd.f32 %v1992_v11, %v7131_v52 }
 0x391   :  { %10125 = vst [vmem:[#allocation44_spill] sm:$0xff] %v7137_v18  ;;  %v2167_v17 = vadd.f32 %v2166_v45, %v2078_v62  ;;  %v2080_v47 = vmul.f32 %v7137_v18, %v7137_v18  ;;  %v7144_v3 = vadd.f32 %v4936_v53, %v4935_v56  ;;  %v4938_v21 = vpop.f32.mrb[130].mxu0  ;;  %v2030_v36 = vadd.f32 %v2029_v1, %v7137_v18 }
 0x392   :  { %v4939_v35 = vpop.f32.mrb[131].mxu0  ;;  %v2131_v55 = vadd.f32 %v2130_v27, %v2079_v33 }
 0x393   :  { %v7147_v22 = vpop.f32.mrb[0].mxu1  ;;  %v7154_v62 = vadd.f32 %v4939_v35, %v4938_v21  ;;  %v2168_v11 = vadd.f32 %v2167_v17, %v2080_v47 }
 0x394   :  { %v1994_v32 = vadd.f32 %v1993_v9, %v7147_v22  ;;  %v2081_v19 = vmul.f32 %v7147_v22, %v7147_v22  ;;  %v7152_v45 = vpop.f32.mrb[1].mxu1 }
 0x395   :  { %10126 = vst [vmem:[#allocation45_spill] sm:$0xff] %v7152_v45  ;;  %v2031_v56 = vadd.f32 %v2030_v36, %v7152_v45  ;;  %v2082_v1 = vmul.f32 %v7152_v45, %v7152_v45  ;;  %v7159_v53 = vpop.f32.mrb[2].mxu1 }
 0x396   :  { %v2132_v18 = vadd.f32 %v2131_v55, %v2081_v19  ;;  %v1995_v20 = vadd.f32 %v1994_v32, %v7159_v53  ;;  %v2083_v27 = vmul.f32 %v7159_v53, %v7159_v53  ;;  %v7164_v33 = vpop.f32.mrb[3].mxu1 }
 0x397   :  { %10127 = vst [vmem:[#allocation27_spill] sm:$0xff] %v7164_v33  ;;  %v2169_v9 = vadd.f32 %v2168_v11, %v2082_v1  ;;  %v2032_v21 = vadd.f32 %v2031_v56, %v7164_v33  ;;  %v2084_v17 = vmul.f32 %v7164_v33, %v7164_v33  ;;  %v4941_v36 = vpop.f32.mrb[132].mxu0 }
 0x398   :  { %v2133_v47 = vadd.f32 %v2132_v18, %v2083_v27  ;;  %v4942_v45 = vpop.f32.mrb[133].mxu0 }
 0x399   :  { %v2170_v35 = vadd.f32 %v2169_v9, %v2084_v17  ;;  %v7169_v63 = vadd.f32 %v4942_v45, %v4941_v36  ;;  %v4944_v55 = vpop.f32.mrb[134].mxu0 }
 0x39a   :  { %v4945_v32 = vpop.f32.mrb[135].mxu0 }
 0x39b   :  { %v7171_v19 = vpop.f32.mrb[4].mxu1  ;;  %v7178_v56 = vadd.f32 %v4945_v32, %v4944_v55 }
 0x39c   :  { %v1996_v25 = vadd.f32 %v1995_v20, %v7171_v19  ;;  %v2085_v11 = vmul.f32 %v7171_v19, %v7171_v19  ;;  %v7176_v1 = vpop.f32.mrb[5].mxu1  ;;  %v10189_v54 = vld [vmem:[#allocation45_spill] sm:$0xff] }
 0x39d   :  { %10128 = vst [vmem:[#allocation31_spill] sm:$0xff] %v7176_v1  ;;  %v2033_v18 = vadd.f32 %v2032_v21, %v7176_v1  ;;  %v2086_v27 = vmul.f32 %v7176_v1, %v7176_v1  ;;  %v7183_v45 = vpop.f32.mrb[6].mxu1 }
 0x39e   :  { %v2134_v9 = vadd.f32 %v2133_v47, %v2085_v11  ;;  %v1997_v17 = vadd.f32 %v1996_v25, %v7183_v45  ;;  %v2087_v20 = vmul.f32 %v7183_v45, %v7183_v45  ;;  %v7188_v36 = vpop.f32.mrb[7].mxu1 }
 0x39f   :  { %10129 = vst [vmem:[#allocation46_spill] sm:$0xff] %v7188_v36  ;;  %v2171_v33 = vadd.f32 %v2170_v35, %v2086_v27  ;;  %v2034_v46 = vadd.f32 %v2033_v18, %v7188_v36  ;;  %v2088_v55 = vmul.f32 %v7188_v36, %v7188_v36  ;;  %v4947_v32 = vpop.f32.mrb[136].mxu0 }
 0x3a0   :  { %v2135_v21 = vadd.f32 %v2134_v9, %v2087_v20  ;;  %v4948_v1 = vpop.f32.mrb[137].mxu0 }
 0x3a1   :  { %v2172_v10 = vadd.f32 %v2171_v33, %v2088_v55  ;;  %v7193_v37 = vadd.f32 %v4948_v1, %v4947_v32  ;;  %v4950_v47 = vpop.f32.mrb[138].mxu0 }
 0x3a2   :  { %v4951_v25 = vpop.f32.mrb[139].mxu0 }
 0x3a3   :  { %10130 = vst [vmem:[#allocation30_spill] sm:$0xff] %v7193_v37  ;;  %v7195_v11 = vpop.f32.mrb[8].mxu1  ;;  %v7202_v18 = vadd.f32 %v4951_v25, %v4950_v47 }
 0x3a4   :  { %v1998_v4 = vadd.f32 %v1997_v17, %v7195_v11  ;;  %v2089_v35 = vmul.f32 %v7195_v11, %v7195_v11  ;;  %v7200_v27 = vpop.f32.mrb[9].mxu1 }
 0x3a5   :  { %10131 = vst [vmem:[#allocation41_spill] sm:$0xff] %v7200_v27  ;;  %10132 = vst [vmem:[#allocation20_spill] sm:$0xff] %v7202_v18  ;;  %v2035_v9 = vadd.f32 %v2034_v46, %v7200_v27  ;;  %v2090_v33 = vmul.f32 %v7200_v27, %v7200_v27  ;;  %v7207_v1 = vpop.f32.mrb[10].mxu1 }
 0x3a6   :  { %v2136_v20 = vadd.f32 %v2135_v21, %v2089_v35  ;;  %v1999_v55 = vadd.f32 %v1998_v4, %v7207_v1  ;;  %v2091_v17 = vmul.f32 %v7207_v1, %v7207_v1  ;;  %v7212_v32 = vpop.f32.mrb[11].mxu1 }
 0x3a7   :  { %10133 = vst [vmem:[#allocation47_spill] sm:$0xff] %v7212_v32  ;;  %v2173_v37 = vadd.f32 %v2172_v10, %v2090_v33  ;;  %v2036_v36 = vadd.f32 %v2035_v9, %v7212_v32  ;;  %v2092_v47 = vmul.f32 %v7212_v32, %v7212_v32  ;;  %v4953_v25 = vpop.f32.mrb[140].mxu0 }
 0x3a8   :  { %v2137_v46 = vadd.f32 %v2136_v20, %v2091_v17  ;;  %v4954_v27 = vpop.f32.mrb[141].mxu0 }
 0x3a9   :  { %v2174_v18 = vadd.f32 %v2173_v37, %v2092_v47  ;;  %v7217_v28 = vadd.f32 %v4954_v27, %v4953_v25  ;;  %v4956_v21 = vpop.f32.mrb[142].mxu0 }
 0x3aa   :  { %v4957_v4 = vpop.f32.mrb[143].mxu0 }
 0x3ab   :  { %10134 = vst [vmem:[#allocation48_spill] sm:$0xff] %v7217_v28  ;;  %v7219_v35 = vpop.f32.mrb[12].mxu1  ;;  %v7226_v9 = vadd.f32 %v4957_v4, %v4956_v21 }
 0x3ac   :  { %v2000_v44 = vadd.f32 %v1999_v55, %v7219_v35  ;;  %v2093_v10 = vmul.f32 %v7219_v35, %v7219_v35  ;;  %v7224_v33 = vpop.f32.mrb[13].mxu1 }
 0x3ad   :  { %10135 = vst [vmem:[#allocation49_spill] sm:$0xff] %v7224_v33  ;;  %10136 = vst [vmem:[#allocation50_spill] sm:$0xff] %v7226_v9  ;;  %v2037_v20 = vadd.f32 %v2036_v36, %v7224_v33  ;;  %v2094_v37 = vmul.f32 %v7224_v33, %v7224_v33  ;;  %v7231_v27 = vpop.f32.mrb[14].mxu1 }
 0x3ae   :  { %v2138_v17 = vadd.f32 %v2137_v46, %v2093_v10  ;;  %v2001_v47 = vadd.f32 %v2000_v44, %v7231_v27  ;;  %v2095_v55 = vmul.f32 %v7231_v27, %v7231_v27  ;;  %v7236_v25 = vpop.f32.mrb[15].mxu1 }
 0x3af   :  { %10137 = vst [vmem:[#allocation51_spill] sm:$0xff] %v7236_v25  ;;  %v2175_v28 = vadd.f32 %v2174_v18, %v2094_v37  ;;  %v2038_v32 = vadd.f32 %v2037_v20, %v7236_v25  ;;  %v2096_v21 = vmul.f32 %v7236_v25, %v7236_v25  ;;  %v4959_v4 = vpop.f32.mrb[144].mxu0 }
 0x3b0   :  { %v2139_v36 = vadd.f32 %v2138_v17, %v2095_v55  ;;  %v4960_v33 = vpop.f32.mrb[145].mxu0 }
 0x3b1   :  { %v2176_v9 = vadd.f32 %v2175_v28, %v2096_v21  ;;  %v7241_v13 = vadd.f32 %v4960_v33, %v4959_v4  ;;  %v4962_v46 = vpop.f32.mrb[146].mxu0 }
 0x3b2   :  { %v4963_v44 = vpop.f32.mrb[147].mxu0 }
 0x3b3   :  { %10138 = vst [vmem:[#allocation52_spill] sm:$0xff] %v7241_v13  ;;  %v7243_v10 = vpop.f32.mrb[16].mxu1  ;;  %v7250_v20 = vadd.f32 %v4963_v44, %v4962_v46 }
 0x3b4   :  { %v2002_v40 = vadd.f32 %v2001_v47, %v7243_v10  ;;  %v2097_v18 = vmul.f32 %v7243_v10, %v7243_v10  ;;  %v7248_v37 = vpop.f32.mrb[17].mxu1 }
 0x3b5   :  { %10139 = vst [vmem:[#allocation53_spill] sm:$0xff] %v7248_v37  ;;  %10140 = vst [vmem:[#allocation54_spill] sm:$0xff] %v7250_v20  ;;  %v2039_v17 = vadd.f32 %v2038_v32, %v7248_v37  ;;  %v2098_v28 = vmul.f32 %v7248_v37, %v7248_v37  ;;  %v7255_v33 = vpop.f32.mrb[18].mxu1 }
 0x3b6   :  { %10141 = vst [vmem:[#allocation55_spill] sm:$0xff] %v7255_v33  ;;  %v2140_v55 = vadd.f32 %v2139_v36, %v2097_v18  ;;  %v2003_v21 = vadd.f32 %v2002_v40, %v7255_v33  ;;  %v2099_v47 = vmul.f32 %v7255_v33, %v7255_v33  ;;  %v7260_v4 = vpop.f32.mrb[19].mxu1 }
 0x3b7   :  { %10142 = vst [vmem:[#allocation56_spill] sm:$0xff] %v7260_v4  ;;  %v2177_v13 = vadd.f32 %v2176_v9, %v2098_v28  ;;  %v2040_v25 = vadd.f32 %v2039_v17, %v7260_v4  ;;  %v2100_v46 = vmul.f32 %v7260_v4, %v7260_v4  ;;  %v4965_v44 = vpop.f32.mrb[148].mxu0 }
 0x3b8   :  { %v2141_v32 = vadd.f32 %v2140_v55, %v2099_v47  ;;  %v4966_v37 = vpop.f32.mrb[149].mxu0 }
 0x3b9   :  { %v2178_v20 = vadd.f32 %v2177_v13, %v2100_v46  ;;  %v7265_v38 = vadd.f32 %v4966_v37, %v4965_v44  ;;  %v4968_v36 = vpop.f32.mrb[150].mxu0 }
 0x3ba   :  { %v4969_v40 = vpop.f32.mrb[151].mxu0 }
 0x3bb   :  { %10143 = vst [vmem:[#allocation57_spill] sm:$0xff] %v7265_v38  ;;  %v7267_v18 = vpop.f32.mrb[20].mxu1  ;;  %v7274_v17 = vadd.f32 %v4969_v40, %v4968_v36 }
 0x3bc   :  { %v2004_v33 = vadd.f32 %v2003_v21, %v7267_v18  ;;  %v2101_v9 = vmul.f32 %v7267_v18, %v7267_v18  ;;  %v7272_v28 = vpop.f32.mrb[21].mxu1 }
 0x3bd   :  { %10144 = vst [vmem:[#allocation58_spill] sm:$0xff] %v7272_v28  ;;  %10145 = vst [vmem:[#allocation59_spill] sm:$0xff] %v7274_v17  ;;  %v2041_v55 = vadd.f32 %v2040_v25, %v7272_v28  ;;  %v2102_v13 = vmul.f32 %v7272_v28, %v7272_v28  ;;  %v7279_v37 = vpop.f32.mrb[22].mxu1 }
 0x3be   :  { %10146 = vst [vmem:[#allocation60_spill] sm:$0xff] %v7279_v37  ;;  %v2142_v47 = vadd.f32 %v2141_v32, %v2101_v9  ;;  %v2005_v46 = vadd.f32 %v2004_v33, %v7279_v37  ;;  %v2103_v21 = vmul.f32 %v7279_v37, %v7279_v37  ;;  %v7284_v44 = vpop.f32.mrb[23].mxu1 }
 0x3bf   :  { %v2179_v38 = vadd.f32 %v2178_v20, %v2102_v13  ;;  %v2042_v4 = vadd.f32 %v2041_v55, %v7284_v44  ;;  %v2104_v36 = vmul.f32 %v7284_v44, %v7284_v44  ;;  %v5125_v40 = vpop.f32.mrb[152].mxu0 }
 0x3c0   :  { %v2143_v25 = vadd.f32 %v2142_v47, %v2103_v21  ;;  %v7290_v28 = vadd.f32 %v5125_v40, %v6965_v34  ;;  %v2513_v32 = vpop.f32.mrb[153].mxu0 }
 0x3c1   :  { %v2180_v17 = vadd.f32 %v2179_v38, %v2104_v36  ;;  %v7293_v33 = vadd.f32 %v6961_v58, %v2513_v32  ;;  %v5126_v9 = vpop.f32.mrb[154].mxu0 }
 0x3c2   :  { %10147 = vst [vmem:[#allocation61_spill] sm:$0xff] %v7290_v28  ;;  %v7298_v20 = vadd.f32 %v5126_v9, %v6967_v41  ;;  %v2516_v55 = vpop.f32.mrb[155].mxu0 }
 0x3c3   :  { %10148 = vst [vmem:[#allocation62_spill] sm:$0xff] %v7293_v33  ;;  %v7295_v37 = vpop.f32.mrb[24].mxu1  ;;  %v7306_v34 = vadd.f32 %v6963_v51, %v2516_v55 }
 0x3c4   :  { %10149 = vst [vmem:[#allocation63_spill] sm:$0xff] %v7298_v20  ;;  %v2006_v13 = vadd.f32 %v2005_v46, %v7295_v37  ;;  %v2105_v47 = vmul.f32 %v7295_v37, %v7295_v37  ;;  %v7303_v38 = vpop.f32.mrb[25].mxu1 }
 0x3c5   :  { %10150 = vst [vmem:[#allocation64_spill] sm:$0xff] %v7306_v34  ;;  %v2043_v58 = vadd.f32 %v2042_v4, %v7303_v38  ;;  %v2106_v21 = vmul.f32 %v7303_v38, %v7303_v38  ;;  %v7311_v36 = vpop.f32.mrb[26].mxu1 }
 0x3c6   :  { %v2144_v41 = vadd.f32 %v2143_v25, %v2105_v47  ;;  %v2007_v40 = vadd.f32 %v2006_v13, %v7311_v36  ;;  %v2107_v46 = vmul.f32 %v7311_v36, %v7311_v36  ;;  %v7316_v32 = vpop.f32.mrb[27].mxu1 }
 0x3c7   :  { %v2181_v9 = vadd.f32 %v2180_v17, %v2106_v21  ;;  %v2044_v20 = vadd.f32 %v2043_v58, %v7316_v32  ;;  %v2108_v51 = vmul.f32 %v7316_v32, %v7316_v32  ;;  %v5129_v55 = vpop.f32.mrb[156].mxu0 }
 0x3c8   :  { %v2145_v4 = vadd.f32 %v2144_v41, %v2107_v46  ;;  %v7322_v34 = vadd.f32 %v5129_v55, %v6973_v7  ;;  %v2529_v25 = vpop.f32.mrb[157].mxu0 }
 0x3c9   :  { %v2182_v28 = vadd.f32 %v2181_v9, %v2108_v51  ;;  %v7325_v13 = vadd.f32 %v6969_v15, %v2529_v25  ;;  %v5130_v47 = vpop.f32.mrb[158].mxu0 }
 0x3ca   :  { %10151 = vst [vmem:[#allocation65_spill] sm:$0xff] %v7322_v34  ;;  %v7330_v17 = vadd.f32 %v5130_v47, %v6975_v5  ;;  %v2532_v58 = vpop.f32.mrb[159].mxu0 }
 0x3cb   :  { %10152 = vst [vmem:[#allocation66_spill] sm:$0xff] %v7325_v13  ;;  %v7327_v33 = vpop.f32.mrb[28].mxu1  ;;  %v7338_v7 = vadd.f32 %v6971_v2, %v2532_v58 }
 0x3cc   :  { %10153 = vst [vmem:[#allocation67_spill] sm:$0xff] %v7330_v17  ;;  %v2008_v21 = vadd.f32 %v2007_v40, %v7327_v33  ;;  %v2109_v41 = vmul.f32 %v7327_v33, %v7327_v33  ;;  %v7335_v46 = vpop.f32.mrb[29].mxu1 }
 0x3cd   :  { %10154 = vst [vmem:[#allocation68_spill] sm:$0xff] %v7338_v7  ;;  %v2045_v15 = vadd.f32 %v2044_v20, %v7335_v46  ;;  %v2110_v9 = vmul.f32 %v7335_v46, %v7335_v46  ;;  %v7343_v51 = vpop.f32.mrb[30].mxu1 }
 0x3ce   :  { %v2146_v5 = vadd.f32 %v2145_v4, %v2109_v41  ;;  %v2009_v55 = vadd.f32 %v2008_v21, %v7343_v51  ;;  %v2111_v40 = vmul.f32 %v7343_v51, %v7343_v51  ;;  %v7348_v25 = vpop.f32.mrb[31].mxu1 }
 0x3cf   :  { %10155 = vst [vmem:[#allocation69_spill] sm:$0xff] %v7348_v25  ;;  %v2183_v47 = vadd.f32 %v2182_v28, %v2110_v9  ;;  %v2046_v17 = vadd.f32 %v2045_v15, %v7348_v25  ;;  %v2112_v2 = vmul.f32 %v7348_v25, %v7348_v25  ;;  %v5133_v58 = vpop.f32.mrb[160].mxu0 }
 0x3d0   :  { %v2147_v20 = vadd.f32 %v2146_v5, %v2111_v40  ;;  %v7354_v7 = vadd.f32 %v5133_v58, %v6993_v6  ;;  %v2545_v4 = vpop.f32.mrb[161].mxu0 }
 0x3d1   :  { %v2184_v34 = vadd.f32 %v2183_v47, %v2112_v2  ;;  %v7357_v21 = vadd.f32 %v6977_v43, %v2545_v4  ;;  %v5134_v41 = vpop.f32.mrb[162].mxu0 }
 0x3d2   :  { %10156 = vst [vmem:[#allocation70_spill] sm:$0xff] %v7354_v7  ;;  %v7362_v28 = vadd.f32 %v5134_v41, %v6998_v31  ;;  %v2548_v15 = vpop.f32.mrb[163].mxu0 }
 0x3d3   :  { %10157 = vst [vmem:[#allocation71_spill] sm:$0xff] %v7357_v21  ;;  %v7359_v13 = vpop.f32.mrb[32].mxu1  ;;  %v7370_v6 = vadd.f32 %v6982_v50, %v2548_v15 }
 0x3d4   :  { %10158 = vst [vmem:[#allocation72_spill] sm:$0xff] %v7362_v28  ;;  %v2010_v9 = vadd.f32 %v2009_v55, %v7359_v13  ;;  %v2113_v5 = vmul.f32 %v7359_v13, %v7359_v13  ;;  %v7367_v40 = vpop.f32.mrb[33].mxu1 }
 0x3d5   :  { %10159 = vst [vmem:[#allocation73_spill] sm:$0xff] %v7367_v40  ;;  %10160 = vst [vmem:[#allocation74_spill] sm:$0xff] %v7370_v6  ;;  %v2047_v43 = vadd.f32 %v2046_v17, %v7367_v40  ;;  %v2114_v47 = vmul.f32 %v7367_v40, %v7367_v40  ;;  %v7375_v2 = vpop.f32.mrb[34].mxu1 }
 0x3d6   :  { %v2148_v31 = vadd.f32 %v2147_v20, %v2113_v5  ;;  %v2011_v58 = vadd.f32 %v2010_v9, %v7375_v2  ;;  %v2115_v55 = vmul.f32 %v7375_v2, %v7375_v2  ;;  %v7380_v4 = vpop.f32.mrb[35].mxu1 }
 0x3d7   :  { %10161 = vst [vmem:[#allocation75_spill] sm:$0xff] %v7380_v4  ;;  %v2185_v41 = vadd.f32 %v2184_v34, %v2114_v47  ;;  %v2048_v28 = vadd.f32 %v2047_v43, %v7380_v4  ;;  %v2116_v50 = vmul.f32 %v7380_v4, %v7380_v4  ;;  %v5137_v15 = vpop.f32.mrb[164].mxu0 }
 0x3d8   :  { %v2149_v17 = vadd.f32 %v2148_v31, %v2115_v55  ;;  %v7386_v6 = vadd.f32 %v5137_v15, %v7050_v14  ;;  %v2561_v20 = vpop.f32.mrb[165].mxu0 }
 0x3d9   :  { %v2186_v7 = vadd.f32 %v2185_v41, %v2116_v50  ;;  %v7389_v9 = vadd.f32 %v7011_v59, %v2561_v20  ;;  %v5138_v5 = vpop.f32.mrb[166].mxu0 }
 0x3da   :  { %10162 = vst [vmem:[#allocation76_spill] sm:$0xff] %v7386_v6  ;;  %v7394_v34 = vadd.f32 %v5138_v5, %v7059_v30  ;;  %v2564_v43 = vpop.f32.mrb[167].mxu0 }
 0x3db   :  { %10163 = vst [vmem:[#allocation77_spill] sm:$0xff] %v7389_v9  ;;  %v7391_v21 = vpop.f32.mrb[36].mxu1  ;;  %v7402_v14 = vadd.f32 %v7024_v16, %v2564_v43 }
 0x3dc   :  { %10164 = vst [vmem:[#allocation78_spill] sm:$0xff] %v7394_v34  ;;  %v2012_v47 = vadd.f32 %v2011_v58, %v7391_v21  ;;  %v2117_v31 = vmul.f32 %v7391_v21, %v7391_v21  ;;  %v7399_v55 = vpop.f32.mrb[37].mxu1 }
 0x3dd   :  { %10165 = vst [vmem:[#allocation79_spill] sm:$0xff] %v7399_v55  ;;  %10166 = vst [vmem:[#allocation80_spill] sm:$0xff] %v7402_v14  ;;  %v2049_v59 = vadd.f32 %v2048_v28, %v7399_v55  ;;  %v2118_v41 = vmul.f32 %v7399_v55, %v7399_v55  ;;  %v7407_v50 = vpop.f32.mrb[38].mxu1 }
 0x3de   :  { %v2150_v30 = vadd.f32 %v2149_v17, %v2117_v31  ;;  %v2013_v15 = vadd.f32 %v2012_v47, %v7407_v50  ;;  %v2119_v58 = vmul.f32 %v7407_v50, %v7407_v50  ;;  %v7412_v20 = vpop.f32.mrb[39].mxu1 }
 0x3df   :  { %v2187_v5 = vadd.f32 %v2186_v7, %v2118_v41  ;;  %v2050_v34 = vadd.f32 %v2049_v59, %v7412_v20  ;;  %v2120_v16 = vmul.f32 %v7412_v20, %v7412_v20  ;;  %v5141_v6 = vpop.f32.mrb[168].mxu0 }
 0x3e0   :  { %v2014_v28 = vrot.slane %v2013_v15, 4  ;;  %v2151_v43 = vadd.f32 %v2150_v30, %v2119_v58  ;;  %v7418_v17 = vadd.f32 %v5141_v6, %v7113_v60  ;;  %v2577_v47 = vpop.f32.mrb[169].mxu0 }
 0x3e1   :  { %v2051_v14 = vrot.slane %v2050_v34, 4  ;;  %v2188_v9 = vadd.f32 %v2187_v5, %v2120_v16  ;;  %v7421_v4 = vadd.f32 %v7082_v8, %v2577_v47  ;;  %v5142_v7 = vpop.f32.mrb[170].mxu0 }
 0x3e2   :  { %10167 = vst [vmem:[#allocation81_spill] sm:$0xff] %v7418_v17  ;;  %v2015_v31 = vadd.f32 %v2014_v28, %v2013_v15  ;;  %v2152_v55 = vrot.slane %v2151_v43, 4  ;;  %v7424_v40 = vadd.f32 %v5142_v7, %v7121_v0  ;;  %v2580_v25 = vpop.f32.mrb[171].mxu0 }
 0x3e3   :  { %10168 = vst [vmem:[#allocation82_spill] sm:$0xff] %v7421_v4  ;;  %v2052_v41 = vadd.f32 %v2051_v14, %v2050_v34  ;;  %v2189_v59 = vrot.slane %v2188_v9, 4  ;;  %v7427_v5 = vadd.f32 %v7090_v23, %v2580_v25 }
 0x3e4   :  { %10169 = vst [vmem:[#allocation83_spill] sm:$0xff] %v7424_v40  ;;  %v2016_v30 = vrot.slane %v2015_v31, 2  ;;  %v2153_v58 = vadd.f32 %v2152_v55, %v2151_v43 }
 0x3e5   :  { %10170 = vst [vmem:[#allocation84_spill] sm:$0xff] %v7427_v5  ;;  %v2053_v60 = vrot.slane %v2052_v41, 2  ;;  %v2190_v6 = vadd.f32 %v2189_v59, %v2188_v9 }
 0x3e6   :  { %v2017_v16 = vadd.f32 %v2016_v30, %v2015_v31  ;;  %v2154_v15 = vrot.slane %v2153_v58, 2 }
 0x3e7   :  { %v2054_v28 = vadd.f32 %v2053_v60, %v2052_v41  ;;  %v2191_v17 = vrot.slane %v2190_v6, 2  ;;  %v5145_v4 = vpop.f32.mrb[172].mxu0 }
 0x3e8   :  { %v2018_v8 = vrot.slane %v2017_v16, 1  ;;  %v2155_v47 = vadd.f32 %v2154_v15, %v2153_v58  ;;  %v7430_v0 = vadd.f32 %v5145_v4, %v7169_v63  ;;  %v2593_v7 = vpop.f32.mrb[173].mxu0 }
 0x3e9   :  { %v2055_v34 = vrot.slane %v2054_v28, 1  ;;  %v2192_v14 = vadd.f32 %v2191_v17, %v2190_v6  ;;  %v7433_v23 = vadd.f32 %v7144_v3, %v2593_v7  ;;  %v5146_v25 = vpop.f32.mrb[174].mxu0  ;;  %v10190_v6 = vld [vmem:[#allocation27_spill] sm:$0xff] }
 0x3ea   :  { %10171 = vst [vmem:[#allocation85_spill] sm:$0xff] %v7430_v0  ;;  %v2019_v40 = vadd.f32 %v2018_v8, %v2017_v16  ;;  %v2156_v55 = vrot.slane %v2155_v47, 1  ;;  %v7436_v31 = vadd.f32 %v5146_v25, %v7178_v56  ;;  %v2596_v41 = vpop.f32.mrb[175].mxu0  ;;  %v10197_v16 = vld [vmem:[#allocation53_spill] sm:$0xff] }
 0x3eb   :  { %10172 = vst [vmem:[#allocation86_spill] sm:$0xff] %v7433_v23  ;;  %v2056_v9 = vadd.f32 %v2055_v34, %v2054_v28  ;;  %v2193_v43 = vrot.slane %v2192_v14, 1  ;;  %v7441_v17 = vadd.f32 %v7154_v62, %v2596_v41  ;;  %v10191_v62 = vld [vmem:[#allocation31_spill] sm:$0xff]  ;;  %v10192_v23 = vld [vmem:[#allocation46_spill] sm:$0xff] }
 0x3ec   :  { %10173 = vst [vmem:[#allocation87_spill] sm:$0xff] %v7436_v31  ;;  %v2157_v59 = vadd.f32 %v2156_v55, %v2155_v47  ;;  %v7438_v30 = vmul.f32 0.00390625, %v2019_v40  ;;  %v10181_v40 = vld [vmem:[#allocation37_spill] sm:$0xff] }
 0x3ed   :  { %10174 = vst [vmem:[#allocation88_spill] sm:$0xff] %v7441_v17  ;;  %v2194_v63 = vadd.f32 %v2193_v43, %v2192_v14  ;;  %v7443_v4 = vmul.f32 0.00390625, %v2056_v9  ;;  %v10194_v17 = vld [vmem:[#allocation47_spill] sm:$0xff] }
 0x3ee   :  { %v2197_v58 = vmul.f32 0.00390625, %v2157_v59  ;;  %v2199_v3 = vmul.f32 %v7438_v30, %v7438_v30  ;;  %v2227_v41 = vsub.f32 %v7147_v22, %v7438_v30  ;;  %v2229_v59 = vsub.f32 %v7159_v53, %v7438_v30 }
 0x3ef   :  { %v7465_v34 = vpop.f32.mrb[176].mxu0  ;;  %v2233_v55 = vsub.f32 %v7183_v45, %v7438_v30  ;;  %v2235_v25 = vsub.f32 %v7195_v11, %v7438_v30  ;;  %v2239_v22 = vsub.f32 %v7219_v35, %v7438_v30  ;;  %v2241_v53 = vsub.f32 %v7231_v27, %v7438_v30  ;;  %v10175_v45 = vld [vmem:[#allocation55_spill] sm:$0xff] }
 0x3f0   :  { %v2201_v15 = vsub.f32 %v2197_v58, %v2199_v3  ;;  %v7475_v9 = vpop.f32.mrb[177].mxu0  ;;  %v2231_v58 = vsub.f32 %v7171_v19, %v7438_v30  ;;  %v2243_v19 = vsub.f32 %v7243_v10, %v7438_v30  ;;  %v2245_v14 = vsub.f32 %v10175_v45, %v7438_v30 }
 0x3f1   :  { %v7483_v3 = vpop.f32.mrb[178].mxu0  ;;  %v2247_v11 = vsub.f32 %v7267_v18, %v7438_v30  ;;  %v2251_v35 = vsub.f32 %v7295_v37, %v7438_v30  ;;  %v2255_v27 = vsub.f32 %v7327_v33, %v7438_v30  ;;  %v2257_v10 = vsub.f32 %v7343_v51, %v7438_v30  ;;  %v10177_v33 = vld [vmem:[#allocation32_spill] sm:$0xff]  ;;  %v10178_v51 = vld [vmem:[#allocation33_spill] sm:$0xff] }
 0x3f2   :  { %v2267_v43 = vadd.f32 1e-05, %v2201_v15  ;;  %v2237_v15 = vsub.f32 %v7207_v1, %v7438_v30  ;;  %v7493_v7 = vpop.f32.mrb[179].mxu0  ;;  %v10176_v1 = vld [vmem:[#allocation60_spill] sm:$0xff]  ;;  %v2259_v45 = vsub.f32 %v7359_v13, %v7438_v30  ;;  %v2261_v18 = vsub.f32 %v7375_v2, %v7438_v30  ;;  %v10179_v13 = vld [vmem:[#allocation34_spill] sm:$0xff]  ;;  %v10180_v2 = vld [vmem:[#allocation35_spill] sm:$0xff] }
 0x3f3   :  { %v2249_v47 = vsub.f32 %v10176_v1, %v7438_v30  ;;  %v2263_v1 = vsub.f32 %v7391_v21, %v7438_v30  ;;  %v2198_v8 = vmul.f32 0.00390625, %v2194_v63  ;;  %v2200_v37 = vmul.f32 %v7443_v4, %v7443_v4 }
 0x3f4   :  { %5421 = vrsqrt.f32 %v2267_v43  ;;  %v2253_v43 = vsub.f32 %v7311_v36, %v7438_v30  ;;  %v2228_v29 = vsub.f32 %v10189_v54, %v7443_v4  ;;  %v2230_v24 = vsub.f32 %v10190_v6, %v7443_v4  ;;  %v10195_v54 = vld [vmem:[#allocation49_spill] sm:$0xff]  ;;  %v10196_v6 = vld [vmem:[#allocation51_spill] sm:$0xff] }
 0x3f5   :  { %v2202_v63 = vsub.f32 %v2198_v8, %v2200_v37  ;;  %v2232_v8 = vsub.f32 %v10191_v62, %v7443_v4  ;;  %v2234_v56 = vsub.f32 %v10192_v23, %v7443_v4  ;;  %v10193_v37 = vld [vmem:[#allocation41_spill] sm:$0xff]  ;;  %v2238_v31 = vsub.f32 %v10194_v17, %v7443_v4  ;;  %v10198_v23 = vld [vmem:[#allocation56_spill] sm:$0xff] }
 0x3f6   :  { %v2240_v52 = vsub.f32 %v10195_v54, %v7443_v4  ;;  %v2242_v61 = vsub.f32 %v10196_v6, %v7443_v4  ;;  %v2244_v28 = vsub.f32 %v10197_v16, %v7443_v4  ;;  %v2246_v48 = vsub.f32 %v10198_v23, %v7443_v4 }
 0x3f7   :  { %v7531_v21 = vpop.f32.mrb[180].mxu0  ;;  %v2268_v60 = vadd.f32 1e-05, %v2202_v63  ;;  %v2236_v63 = vsub.f32 %v10193_v37, %v7443_v4  ;;  %v10199_v37 = vld [vmem:[#allocation58_spill] sm:$0xff]  ;;  %v2250_v17 = vsub.f32 %v7284_v44, %v7443_v4  ;;  %v10200_v54 = vsub.f32 %v7407_v50, %v7438_v30 }
 0x3f8   :  { %v7539_v0 = vpop.f32.mrb[181].mxu0  ;;  %v2248_v26 = vsub.f32 %v10199_v37, %v7443_v4  ;;  %v10202_v16 = vsub.f32 %v6980_v39, %v7438_v30  ;;  %v10203_v37 = vsub.f32 %v6988_v57, %v7438_v30 }
 0x3f9   :  { %v7549_v5 = vpop.f32.mrb[182].mxu0  ;;  %5423 = vrsqrt.f32 %v2268_v60  ;;  %v2252_v60 = vsub.f32 %v7303_v38, %v7443_v4 }
 0x3fa   :  { %v7557_v42 = vpop.f32.mrb[183].mxu0 }
 0x3fe   :  { %v7573_v62 = vpop.eup %5421 }
 0x3ff   :  { %v7587_v6 = vmul.f32 %v7573_v62, %v10200_v54  ;;  %v2271_v23 = vmul.f32 %v7573_v62, %v10202_v16  ;;  %v2273_v36 = vmul.f32 %v7573_v62, %v10203_v37  ;;  %v7598_v44 = vmul.f32 %v7573_v62, %v2227_v41 }
 0x400   :  { %v7601_v38 = vmul.f32 %v7573_v62, %v2229_v59  ;;  %v7604_v50 = vmul.f32 %v7573_v62, %v2231_v58  ;;  %v7607_v54 = vmul.f32 %v7573_v62, %v2233_v55  ;;  %v7610_v39 = vmul.f32 %v7573_v62, %v2235_v25 }
 0x401   :  { %10201 = vst [vmem:[#allocation55_spill] sm:$0xff] %v7587_v6  ;;  %v7613_v16 = vmul.f32 %v7573_v62, %v2237_v15  ;;  %v7616_v57 = vmul.f32 %v7573_v62, %v2239_v22  ;;  %v7619_v41 = vmul.f32 %v7573_v62, %v2241_v53  ;;  %v7622_v59 = vmul.f32 %v7573_v62, %v2243_v19 }
 0x402   :  { %v7625_v58 = vmul.f32 %v7573_v62, %v2245_v14  ;;  %v7628_v55 = vmul.f32 %v7573_v62, %v2247_v11  ;;  %v7631_v25 = vmul.f32 %v7573_v62, %v2249_v47  ;;  %v7634_v15 = vmul.f32 %v7573_v62, %v2251_v35 }
 0x403   :  { %v7637_v22 = vmul.f32 %v7573_v62, %v2253_v43  ;;  %v7640_v53 = vmul.f32 %v7573_v62, %v2255_v27  ;;  %v7643_v19 = vmul.f32 %v7573_v62, %v2257_v10  ;;  %v7646_v14 = vmul.f32 %v7573_v62, %v2259_v45  ;;  %v10209_v10 = vld [vmem:[#allocation69_spill] sm:$0xff] }
 0x404   :  { %v7649_v11 = vmul.f32 %v7573_v62, %v2261_v18  ;;  %v7652_v47 = vmul.f32 %v7573_v62, %v2263_v1  ;;  %v2335_v35 = vmax.f32 %v2271_v23, 0.0  ;;  %v2337_v37 = vmax.f32 %v2273_v36, 0.0  ;;  %v10210_v45 = vld [vmem:[#allocation73_spill] sm:$0xff]  ;;  %v10211_v18 = vld [vmem:[#allocation75_spill] sm:$0xff]  ;;  %v10213_v36 = vld [vmem:[#allocation48_spill] sm:$0xff] }
 0x405   :  { %10204 = vst [vmem:[#allocation60_spill] sm:$0xff] %v7640_v53  ;;  %10205 = vst [vmem:[#allocation32_spill] sm:$0xff] %v7643_v19  ;;  %v2254_v43 = vsub.f32 %v7316_v32, %v7443_v4  ;;  %v2256_v27 = vsub.f32 %v7335_v46, %v7443_v4  ;;  %v2258_v6 = vsub.f32 %v10209_v10, %v7443_v4  ;;  %v10212_v1 = vld [vmem:[#allocation79_spill] sm:$0xff]  ;;  %v7670_v32 = vpop.eup %5423  ;;  %v10215_v46 = vld [vmem:[#allocation30_spill] sm:$0xff] }
 0x406   :  { %10206 = vst [vmem:[#allocation33_spill] sm:$0xff] %v7646_v14  ;;  %10207 = vst [vmem:[#allocation34_spill] sm:$0xff] %v7649_v11  ;;  %v2260_v14 = vsub.f32 %v10210_v45, %v7443_v4  ;;  %v2399_v19 = vpack.c.bf16 %v2337_v37, %v2335_v35  ;;  %v2262_v11 = vsub.f32 %v10211_v18, %v7443_v4  ;;  %v10217_v10 = vld [vmem:[#allocation50_spill] sm:$0xff]  ;;  %v10219_v35 = vld [vmem:[#allocation20_spill] sm:$0xff] }
 0x407   :  { %10208 = vst [vmem:[#allocation35_spill] sm:$0xff] %v7652_v47  ;;  %v2264_v23 = vsub.f32 %v10212_v1, %v7443_v4  ;;  %v7668_v47 = vadd.f32 %v7465_v34, %v10213_v36  ;;  %v7674_v53 = vadd.f32 %v10215_v46, %v7475_v9  ;;  %v7678_v45 = vadd.f32 %v7483_v3, %v10217_v10  ;;  %v10221_v18 = vld [vmem:[#allocation57_spill] sm:$0xff] }
 0x408   :  { %v7682_v37 = vadd.f32 %v10219_v35, %v7493_v7  ;;  %v7686_v1 = vadd.f32 %v7531_v21, %v10221_v18  ;;  %v10223_v34 = vsub.f32 %v7412_v20, %v7443_v4  ;;  %v7695_v9 = vmul.f32 %v7670_v32, %v2228_v29 }
 0x409   :  { %10214 = vst [vmem:[#allocation37_spill] sm:$0xff] %v7668_v47  ;;  %10216 = vst [vmem:[#allocation45_spill] sm:$0xff] %v7674_v53  ;;  %v7698_v3 = vmul.f32 %v7670_v32, %v2230_v24  ;;  %v7701_v46 = vmul.f32 %v7670_v32, %v2232_v8  ;;  %v7704_v7 = vmul.f32 %v7670_v32, %v2234_v56 }
 0x40a   :  { %10218 = vst [vmem:[#allocation27_spill] sm:$0xff] %v7678_v45  ;;  %10220 = vst [vmem:[#allocation31_spill] sm:$0xff] %v7682_v37  ;;  %v7692_v36 = vmul.f32 %v7670_v32, %v10223_v34  ;;  %v7707_v21 = vmul.f32 %v7670_v32, %v2236_v63  ;;  %v7710_v20 = vmul.f32 %v7670_v32, %v2238_v31 }
 0x40b   :  { %10222 = vst [vmem:[#allocation46_spill] sm:$0xff] %v7686_v1  ;;  %v7713_v10 = vmul.f32 %v7670_v32, %v2240_v52  ;;  %v7716_v29 = vmul.f32 %v7670_v32, %v2242_v61  ;;  %v7719_v24 = vmul.f32 %v7670_v32, %v2244_v28  ;;  %v7722_v8 = vmul.f32 %v7670_v32, %v2246_v48 }
 0x40c   :  { %10224 = vst [vmem:[#allocation41_spill] sm:$0xff] %v7692_v36  ;;  %v7725_v56 = vmul.f32 %v7670_v32, %v2248_v26  ;;  %v7728_v63 = vmul.f32 %v7670_v32, %v2250_v17  ;;  %v7731_v31 = vmul.f32 %v7670_v32, %v2252_v60  ;;  %v7734_v52 = vmul.f32 %v7670_v32, %v2254_v43  ;;  %v10225_v60 = vld [vmem:[#allocation52_spill] sm:$0xff]  ;;  %v10227_v43 = vld [vmem:[#allocation59_spill] sm:$0xff]  ;;  %v10260_v36 = vld [vmem:[#allocation25_spill] sm:$0xff] }
 0x40d   :  { %v7737_v61 = vmul.f32 %v7670_v32, %v2256_v27  ;;  %v7740_v28 = vmul.f32 %v7670_v32, %v2258_v6  ;;  %v7743_v48 = vmul.f32 %v7670_v32, %v2260_v14  ;;  %v7746_v26 = vmul.f32 %v7670_v32, %v2262_v11  ;;  %v10229_v6 = vld [vmem:[#allocation54_spill] sm:$0xff] }
 0x40e   :  { %v7749_v17 = vmul.f32 %v7670_v32, %v2264_v23  ;;  %v7753_v35 = vadd.f32 %v10225_v60, %v7539_v0  ;;  %v7757_v27 = vadd.f32 %v7549_v5, %v10227_v43  ;;  %v7761_v18 = vadd.f32 %v10229_v6, %v7557_v42 }
 0x40f   :  { %v10231_v14 = vsub.f32 %v10177_v33, %v7443_v4  ;;  %v10232_v23 = vsub.f32 %v10178_v51, %v7443_v4  ;;  %v10233_v0 = vsub.f32 %v10179_v13, %v7443_v4  ;;  %v10234_v60 = vsub.f32 %v10180_v2, %v7443_v4 }
 0x410   :  { %10226 = vst [vmem:[#allocation47_spill] sm:$0xff] %v7753_v35  ;;  %10228 = vst [vmem:[#allocation49_spill] sm:$0xff] %v7757_v27  ;;  %v10235_v33 = vsub.f32 %v6996_v49, %v7438_v30  ;;  %v10236_v51 = vsub.f32 %v7004_v12, %v7438_v30  ;;  %v10237_v13 = vsub.f32 %v10181_v40, %v7443_v4  ;;  %v10240_v12 = vld [vmem:[#allocation36_spill] sm:$0xff] }
 0x411   :  { %10230 = vst [vmem:[#allocation51_spill] sm:$0xff] %v7761_v18  ;;  %v2272_v11 = vmul.f32 %v7670_v32, %v10231_v14  ;;  %v2274_v34 = vmul.f32 %v7670_v32, %v10232_v23  ;;  %v2276_v5 = vmul.f32 %v7670_v32, %v10233_v0  ;;  %v2278_v42 = vmul.f32 %v7670_v32, %v10234_v60  ;;  %v10238_v0 = vld [vmem:[#allocation39_spill] sm:$0xff] }
 0x412   :  { %v2275_v43 = vmul.f32 %v7573_v62, %v10235_v33  ;;  %v2277_v14 = vmul.f32 %v7573_v62, %v10236_v51  ;;  %v2280_v23 = vmul.f32 %v7670_v32, %v10237_v13  ;;  %v10239_v2 = vsub.f32 %v10238_v0, %v7443_v4  ;;  %v10242_v13 = vld [vmem:[#allocation38_spill] sm:$0xff] }
 0x413   :  { %v2336_v6 = vmax.f32 %v2272_v11, 0.0  ;;  %v2338_v27 = vmax.f32 %v2274_v34, 0.0  ;;  %v2340_v49 = vmax.f32 %v2276_v5, 0.0  ;;  %v2342_v1 = vmax.f32 %v2278_v42, 0.0 }
 0x414   :  { %v2282_v60 = vmul.f32 %v7670_v32, %v10239_v2  ;;  %v2339_v33 = vmax.f32 %v2275_v43, 0.0  ;;  %v2341_v11 = vmax.f32 %v2277_v14, 0.0  ;;  %v2344_v18 = vmax.f32 %v2280_v23, 0.0  ;;  %v10244_v2 = vld [vmem:[#allocation28_spill] sm:$0xff]  ;;  %v10246_v23 = vld [vmem:[#allocation21_spill] sm:$0xff] }
 0x415   :  { %v10241_v51 = vsub.f32 %v10240_v12, %v7438_v30  ;;  %v2400_v40 = vpack.c.bf16 %v2338_v27, %v2336_v6  ;;  %v2402_v47 = vpack.c.bf16 %v2342_v1, %v2340_v49  ;;  %v10243_v37 = vsub.f32 %v10242_v13, %v7438_v30  ;;  %v10248_v6 = vld [vmem:[#allocation40_spill] sm:$0xff] }
 0x416   :  { %v2346_v35 = vmax.f32 %v2282_v60, 0.0  ;;  %v10245_v34 = vsub.f32 %v10244_v2, %v7443_v4  ;;  %v2401_v42 = vpack.c.bf16 %v2341_v11, %v2339_v33  ;;  %v10247_v60 = vsub.f32 %v10246_v23, %v7443_v4 }
 0x417   :  { %v2279_v45 = vmul.f32 %v7573_v62, %v10241_v51  ;;  %v2281_v0 = vmul.f32 %v7573_v62, %v10243_v37  ;;  %2800 = vmatprep.mubr.bf16.mxu1 %v2400_v40  ;;  %v10249_v49 = vsub.f32 %v10248_v6, %v7438_v30  ;;  %v10250_v51 = vld [vmem:[#allocation29_spill] sm:$0xff]  ;;  %v10254_v40 = vld [vmem:[#allocation24_spill] sm:$0xff] }
 0x418   :  { %v2284_v5 = vmul.f32 %v7670_v32, %v10245_v34  ;;  %v2404_v43 = vpack.c.bf16 %v2346_v35, %v2344_v18  ;;  %v2286_v12 = vmul.f32 %v7670_v32, %v10247_v60  ;;  %v10251_v13 = vsub.f32 %v10250_v51, %v7438_v30  ;;  %2801 = vmatmul.mubr.bf16.vlgmr.msra.gmra.mrb[64].mxu1 %v2399_v19  ;;  %v10252_v35 = vld [vmem:[#allocation42_spill] sm:$0xff] }
 0x419   :  { %v2343_v14 = vmax.f32 %v2279_v45, 0.0  ;;  %v2345_v1 = vmax.f32 %v2281_v0, 0.0  ;;  %v2283_v37 = vmul.f32 %v7573_v62, %v10249_v49  ;;  %v10253_v18 = vsub.f32 %v10252_v35, %v7443_v4  ;;  %v10256_v34 = vld [vmem:[#allocation22_spill] sm:$0xff]  ;;  %2808 = vmatprep.mubr.bf16.mxu1 %v2402_v47 }
 0x41a   :  { %v2348_v27 = vmax.f32 %v2284_v5, 0.0  ;;  %v2285_v33 = vmul.f32 %v7573_v62, %v10251_v13  ;;  %v2350_v45 = vmax.f32 %v2286_v12, 0.0  ;;  %v10255_v0 = vsub.f32 %v10254_v40, %v7443_v4  ;;  %v10258_v12 = vld [vmem:[#allocation23_spill] sm:$0xff] }
 0x41b   :  { %v2288_v11 = vmul.f32 %v7670_v32, %v10253_v18  ;;  %v10257_v5 = vsub.f32 %v10256_v34, %v7438_v30  ;;  %v2403_v60 = vpack.c.bf16 %v2345_v1, %v2343_v14  ;;  %v2347_v6 = vmax.f32 %v2283_v37, 0.0  ;;  %v10262_v14 = vld [vmem:[#allocation44_spill] sm:$0xff] }
 0x41c   :  { %v2290_v2 = vmul.f32 %v7670_v32, %v10255_v0  ;;  %v2349_v19 = vmax.f32 %v2285_v33, 0.0  ;;  %v10259_v49 = vsub.f32 %v10258_v12, %v7438_v30  ;;  %v2406_v13 = vpack.c.bf16 %v2350_v45, %v2348_v27 }
 0x41d   :  { %v2287_v23 = vmul.f32 %v7573_v62, %v10257_v5  ;;  %v2352_v35 = vmax.f32 %v2288_v11, 0.0  ;;  %v10261_v34 = vsub.f32 %v10260_v36, %v7443_v4  ;;  %v10263_v1 = vsub.f32 %v10262_v14, %v7443_v4  ;;  %v10264_v5 = vld [vmem:[#allocation43_spill] sm:$0xff]  ;;  %v10266_v11 = vld [vmem:[#allocation26_spill] sm:$0xff] }
 0x41e   :  { %v2289_v51 = vmul.f32 %v7573_v62, %v10259_v49  ;;  %v2354_v18 = vmax.f32 %v2290_v2, 0.0  ;;  %v7835_v53 = vpack.c.bf16 %v2349_v19, %v2347_v6  ;;  %v10265_v27 = vsub.f32 %v10264_v5, %v7438_v30 }
 0x41f   :  { %v2351_v40 = vmax.f32 %v2287_v23, 0.0  ;;  %v2292_v47 = vmul.f32 %v7670_v32, %v10261_v34  ;;  %v2294_v37 = vmul.f32 %v7670_v32, %v10263_v1  ;;  %v10267_v2 = vsub.f32 %v10266_v11, %v7438_v30 }
 0x420   :  { %v2353_v0 = vmax.f32 %v2289_v51, 0.0  ;;  %v7845_v33 = vpack.c.bf16 %v2354_v18, %v2352_v35  ;;  %v2291_v45 = vmul.f32 %v7573_v62, %v10265_v27  ;;  %v2360_v36 = vmax.f32 %v7695_v9, 0.0  ;;  %2809 = vmatmul.mubr.bf16.gmra.mrb[68].mxu1 %v2401_v42 }
 0x421   :  { %v2293_v23 = vmul.f32 %v7573_v62, %v10267_v2  ;;  %v2356_v19 = vmax.f32 %v2292_v47, 0.0  ;;  %v2358_v4 = vmax.f32 %v2294_v37, 0.0  ;;  %v2362_v32 = vmax.f32 %v7698_v3, 0.0  ;;  %2816 = vmatprep.mubr.bf16.mxu1 %v2404_v43 }
 0x422   :  { %v7856_v6 = vpack.c.bf16 %v2353_v0, %v2351_v40  ;;  %v2355_v12 = vmax.f32 %v2291_v45, 0.0  ;;  %v2359_v51 = vmax.f32 %v7598_v44, 0.0  ;;  %v2361_v35 = vmax.f32 %v7601_v38, 0.0 }
 0x423   :  { %v2357_v49 = vmax.f32 %v2293_v23, 0.0  ;;  %v7861_v18 = vpack.c.bf16 %v2358_v4, %v2356_v19  ;;  %v7863_v34 = vpack.c.bf16 %v2362_v32, %v2360_v36  ;;  %v2364_v30 = vmax.f32 %v7701_v46, 0.0  ;;  %v10268_v36 = vld [vmem:[#allocation60_spill] sm:$0xff] }
 0x424   :  { %v2366_v62 = vmax.f32 %v7704_v7, 0.0  ;;  %v2411_v40 = vpack.c.bf16 %v2361_v35, %v2359_v51  ;;  %v2363_v0 = vmax.f32 %v7604_v50, 0.0  ;;  %v2365_v3 = vmax.f32 %v7607_v54, 0.0  ;;  %v10269_v19 = vld [vmem:[#allocation32_spill] sm:$0xff] }
 0x425   :  { %v2409_v9 = vpack.c.bf16 %v2357_v49, %v2355_v12  ;;  %v2368_v44 = vmax.f32 %v7707_v21, 0.0  ;;  %v2370_v38 = vmax.f32 %v7710_v20, 0.0  ;;  %v2367_v14 = vmax.f32 %v7610_v39, 0.0 }
 0x426   :  { %v2414_v47 = vpack.c.bf16 %v2366_v62, %v2364_v30  ;;  %v2413_v1 = vpack.c.bf16 %v2365_v3, %v2363_v0  ;;  %v2369_v46 = vmax.f32 %v7613_v16, 0.0  ;;  %v2372_v7 = vmax.f32 %v7713_v10, 0.0  ;;  %v10273_v30 = vld [vmem:[#allocation35_spill] sm:$0xff] }
 0x427   :  { %v2374_v42 = vmax.f32 %v7716_v29, 0.0  ;;  %v2416_v37 = vpack.c.bf16 %v2370_v38, %v2368_v44  ;;  %v2371_v50 = vmax.f32 %v7616_v57, 0.0  ;;  %v2373_v54 = vmax.f32 %v7619_v41, 0.0  ;;  %v10274_v0 = vld [vmem:[#allocation55_spill] sm:$0xff] }
 0x428   :  { %v2376_v43 = vmax.f32 %v7719_v24, 0.0  ;;  %v2415_v5 = vpack.c.bf16 %v2369_v46, %v2367_v14  ;;  %v2378_v20 = vmax.f32 %v7722_v8, 0.0  ;;  %v2375_v39 = vmax.f32 %v7622_v59, 0.0  ;;  %2817 = vmatmul.mubr.bf16.gmra.mrb[72].mxu1 %v2403_v60  ;;  %v10270_v60 = vld [vmem:[#allocation33_spill] sm:$0xff] }
 0x429   :  { %v2418_v21 = vpack.c.bf16 %v2374_v42, %v2372_v7  ;;  %v2417_v27 = vpack.c.bf16 %v2373_v54, %v2371_v50  ;;  %v2377_v16 = vmax.f32 %v7625_v58, 0.0  ;;  %v2380_v10 = vmax.f32 %v7725_v56, 0.0  ;;  %2824 = vmatprep.mubr.bf16.mxu1 %v2406_v13  ;;  %v2962_v46 = vld [vmem:[#allocation4 + $0x8] sm:$0xff]  ;;  %v10279_v7 = vld [vmem:[#allocation64_spill] sm:$0xff] }
 0x42a   :  { %v2382_v29 = vmax.f32 %v7728_v63, 0.0  ;;  %v2420_v45 = vpack.c.bf16 %v2378_v20, %v2376_v43  ;;  %v2379_v57 = vmax.f32 %v7628_v55, 0.0  ;;  %v2381_v41 = vmax.f32 %v7631_v25, 0.0 }
 0x42b   :  { %v2384_v24 = vmax.f32 %v7731_v31, 0.0  ;;  %v2419_v11 = vpack.c.bf16 %v2377_v16, %v2375_v39  ;;  %v2386_v8 = vmax.f32 %v7734_v52, 0.0  ;;  %v2383_v59 = vmax.f32 %v7634_v15, 0.0 }
 0x42c   :  { %v2422_v2 = vpack.c.bf16 %v2382_v29, %v2380_v10  ;;  %v2421_v23 = vpack.c.bf16 %v2381_v41, %v2379_v57  ;;  %v2385_v58 = vmax.f32 %v7637_v22, 0.0  ;;  %v2388_v56 = vmax.f32 %v7737_v61, 0.0  ;;  %v10271_v22 = vld [vmem:[#allocation34_spill] sm:$0xff]  ;;  %v10283_v29 = vld [vmem:[#allocation61_spill] sm:$0xff] }
 0x42d   :  { %v2390_v63 = vmax.f32 %v7740_v28, 0.0  ;;  %v2424_v55 = vpack.c.bf16 %v2386_v8, %v2384_v24  ;;  %v2387_v25 = vmax.f32 %v10268_v36, 0.0  ;;  %v2389_v31 = vmax.f32 %v10269_v19, 0.0  ;;  %v10272_v28 = vld [vmem:[#allocation41_spill] sm:$0xff]  ;;  %v2963_v10 = vld [vmem:[#allocation4 + $0x10] sm:$0xff]  ;;  %v2964_v24 = vld [vmem:[#allocation4 + $0x18] sm:$0xff] }
 0x42e   :  { %v2392_v4 = vmax.f32 %v7743_v48, 0.0  ;;  %v2423_v32 = vpack.c.bf16 %v2385_v58, %v2383_v59  ;;  %v2394_v15 = vmax.f32 %v7746_v26, 0.0  ;;  %v2391_v12 = vmax.f32 %v10270_v60, 0.0  ;;  %v2965_v19 = vld [vmem:[#allocation4 + $0x20] sm:$0xff]  ;;  %v2966_v60 = vld [vmem:[#allocation4 + $0x28] sm:$0xff] }
 0x42f   :  { %v2426_v52 = vpack.c.bf16 %v2390_v63, %v2388_v56  ;;  %v2425_v49 = vpack.c.bf16 %v2389_v31, %v2387_v25  ;;  %v2393_v51 = vmax.f32 %v10271_v22, 0.0  ;;  %v2396_v61 = vmax.f32 %v7749_v17, 0.0  ;;  %v10287_v31 = vld [vmem:[#allocation66_spill] sm:$0xff] }
 0x430   :  { %v2398_v13 = vmax.f32 %v10272_v28, 0.0  ;;  %v2428_v35 = vpack.c.bf16 %v2394_v15, %v2392_v4  ;;  %v2395_v62 = vmax.f32 %v10273_v30, 0.0  ;;  %v2397_v3 = vmax.f32 %v10274_v0, 0.0  ;;  %2825 = vmatmul.mubr.bf16.gmra.mrb[76].mxu1 %v7835_v53 }
 0x431   :  { %v2427_v44 = vpack.c.bf16 %v2393_v51, %v2391_v12  ;;  %2832 = vmatprep.mubr.bf16.mxu1 %v7845_v33  ;;  %v3025_v53 = vlaneseq  ;;  %v10289_v12 = vld [vmem:[#allocation68_spill] sm:$0xff] }
 0x432   :  { %v2430_v48 = vpack.c.bf16 %v2398_v13, %v2396_v61  ;;  %v2429_v38 = vpack.c.bf16 %v2397_v3, %v2395_v62  ;;  %v2967_v3 = vld [vmem:[#allocation4 + $0x30] sm:$0xff] }
 0x433   :  { %v7906_v26 = vand.u32 127, %v3025_v53 }
 0x435   :  { %vm3252_vm0 = vcmp.ge.s32.totalorder %v7906_v26, 4  ;;  %vm3253_vm1 = vcmp.lt.s32.totalorder %v7906_v26, 6  ;;  %vm3959_vm3 = vcmp.ge.s32.totalorder %v7906_v26, 6  ;;  %vm3960_vm4 = vcmp.lt.s32.totalorder %v7906_v26, 9 }
 0x436   :  { %vm7913_vm2 = vmand %vm3252_vm0, %vm3253_vm1 }
 0x437   :  { %vm7929_vm5 = vmand %vm3959_vm3, %vm3960_vm4 }
 0x438   :  { %2833 = vmatmul.mubr.bf16.gmra.mrb[80].mxu1 %v7856_v6 }
 0x439   :  { %2840 = vmatprep.mubr.bf16.mxu1 %v7861_v18 }
 0x440   :  { %2841 = vmatmul.mubr.bf16.gmra.mrb[84].mxu1 %v2409_v9  ;;  %v2961_v9 = vld [vmem:[#allocation4] sm:$0xff] }
 0x441   :  { %2848 = vmatprep.mubr.bf16.mxu1 %v7863_v34 }
 0x448   :  { %2849 = vmatmul.mubr.bf16.gmra.mrb[88].mxu1 %v2411_v40  ;;  %v10275_v40 = vld [vmem:[#allocation62_spill] sm:$0xff] }
 0x449   :  { %2856 = vmatprep.mubr.bf16.mxu1 %v2414_v47 }
 0x450   :  { %2857 = vmatmul.mubr.bf16.gmra.mrb[92].mxu1 %v2413_v1 }
 0x451   :  { %2864 = vmatprep.mubr.bf16.mxu1 %v2416_v37 }
 0x458   :  { %2865 = vmatmul.mubr.bf16.gmra.mrb[96].mxu1 %v2415_v5 }
 0x459   :  { %2872 = vmatprep.mubr.bf16.mxu1 %v2418_v21 }
 0x460   :  { %2873 = vmatmul.mubr.bf16.gmra.mrb[100].mxu1 %v2417_v27 }
 0x461   :  { %2880 = vmatprep.mubr.bf16.mxu1 %v2420_v45 }
 0x468   :  { %2881 = vmatmul.mubr.bf16.gmra.mrb[104].mxu1 %v2419_v11  ;;  %v10285_v11 = vld [vmem:[#allocation63_spill] sm:$0xff] }
 0x469   :  { %2888 = vmatprep.mubr.bf16.mxu1 %v2422_v2 }
 0x470   :  { %2889 = vmatmul.mubr.bf16.gmra.mrb[108].mxu1 %v2421_v23 }
 0x471   :  { %2896 = vmatprep.mubr.bf16.mxu1 %v2424_v55 }
 0x478   :  { %2897 = vmatmul.mubr.bf16.gmra.mrb[112].mxu1 %v2423_v32 }
 0x479   :  { %2904 = vmatprep.mubr.bf16.mxu1 %v2426_v52 }
 0x480   :  { %2905 = vmatmul.mubr.bf16.gmra.mrb[116].mxu1 %v2425_v49 }
 0x481   :  { %2912 = vmatprep.mubr.bf16.mxu1 %v2428_v35 }
 0x488   :  { %2913 = vmatmul.mubr.bf16.gmra.mrb[120].mxu1 %v2427_v44  ;;  %v10291_v44 = vld [vmem:[#allocation65_spill] sm:$0xff] }
 0x489   :  { %2920 = vmatprep.mubr.bf16.mxu1 %v2430_v48 }
 0x490   :  { %2921 = vmatmul.mubr.bf16.gmra.mrb[124].mxu1 %v2429_v38 }
 0x4eb   :  { %v5011_v17 = vpop.f32.mrb[64].mxu1 }
 0x4ec   :  { %v5012_v33 = vpop.f32.mrb[65].mxu1 }
 0x4ed   :  { %v5013_v6 = vadd.f32 %v5012_v33, %v5011_v17  ;;  %v5014_v18 = vpop.f32.mrb[66].mxu1  ;;  %v2968_v33 = vld [vmem:[#allocation4 + $0x38] sm:$0xff] }
 0x4ee   :  { %v5015_v34 = vpop.f32.mrb[67].mxu1 }
 0x4ef   :  { %v7911_v47 = vadd.f32 %v5013_v6, %v10275_v40  ;;  %v5016_v14 = vadd.f32 %v5015_v34, %v5014_v18  ;;  %v10293_v6 = vld [vmem:[#allocation67_spill] sm:$0xff] }
 0x4f1   :  { %10276 = vst [vmem:[#allocation53_spill] sm:$0xff] %v7911_v47  ;;  %v7918_v42 = vadd.f32 %v5016_v14, %v10279_v7  ;;  %v2993_v37 = vadd.f32 %v2961_v9, %v7911_v47 }
 0x4f3   :  { %10280 = vst [vmem:[#allocation56_spill] sm:$0xff] %v7918_v42  ;;  %v5017_v50 = vpop.f32.mrb[68].mxu1  ;;  %v7925_v54 = vsel %vm7913_vm2, %v2993_v37, -inf  ;;  %v2994_v43 = vadd.f32 %v2962_v46, %v7918_v42  ;;  %v7943_v41 = vsel %vm7929_vm5, %v2993_v37, -inf }
 0x4f4   :  { %v5018_v5 = vpop.f32.mrb[69].mxu1  ;;  %3287 = vmax.xlane.f32.xlu0 %v7925_v54 }
 0x4f5   :  { %v5019_v20 = vadd.f32 %v5018_v5, %v5017_v50  ;;  %v5020_v39 = vpop.f32.mrb[70].mxu1  ;;  %v7935_v27 = vsel %vm7929_vm5, %v2994_v43, -inf  ;;  %v7956_v58 = vsel %vm7913_vm2, %v2994_v43, -inf  ;;  %v2969_v5 = vld [vmem:[#allocation4 + $0x40] sm:$0xff] }
 0x4f6   :  { %v5021_v16 = vpop.f32.mrb[71].mxu1  ;;  %3996 = vmax.xlane.f32.xlu1 %v7935_v27 }
 0x4f7   :  { %v7939_v45 = vadd.f32 %v5019_v20, %v10283_v29  ;;  %v5022_v57 = vadd.f32 %v5021_v16, %v5020_v39  ;;  %v10295_v20 = vld [vmem:[#allocation71_spill] sm:$0xff] }
 0x4f8   :  { %3994 = vmax.xlane.f32.xlu0 %v7943_v41 }
 0x4f9   :  { %10284 = vst [vmem:[#allocation58_spill] sm:$0xff] %v7939_v45  ;;  %v7947_v2 = vadd.f32 %v5022_v57, %v10285_v11  ;;  %v2995_v8 = vadd.f32 %v2963_v10, %v7939_v45  ;;  %v2970_v57 = vld [vmem:[#allocation4 + $0x48] sm:$0xff] }
 0x4fb   :  { %10286 = vst [vmem:[#allocation69_spill] sm:$0xff] %v7947_v2  ;;  %v5023_v59 = vpop.f32.mrb[72].mxu1  ;;  %v7952_v23 = vsel %vm7913_vm2, %v2995_v8, -inf  ;;  %v2996_v56 = vadd.f32 %v2964_v24, %v7947_v2  ;;  %v7970_v15 = vsel %vm7929_vm5, %v2995_v8, -inf  ;;  %v10297_v24 = vld [vmem:[#allocation74_spill] sm:$0xff] }
 0x4fc   :  { %v5024_v63 = vpop.f32.mrb[73].mxu1  ;;  %3291 = vmax.xlane.f32.xlu1 %v7952_v23  ;;  %3289 = vmax.xlane.f32.xlu0 %v7956_v58 }
 0x4fd   :  { %v5025_v55 = vadd.f32 %v5024_v63, %v5023_v59  ;;  %v5026_v36 = vpop.f32.mrb[74].mxu1  ;;  %v7966_v52 = vsel %vm7913_vm2, %v2996_v56, -inf  ;;  %v7980_v61 = vsel %vm7929_vm5, %v2996_v56, -inf }
 0x4fe   :  { %v5027_v25 = vpop.f32.mrb[75].mxu1 }
 0x4ff   :  { %v7962_v4 = vadd.f32 %v5025_v55, %v10287_v31  ;;  %v5028_v32 = vadd.f32 %v5027_v25, %v5026_v36 }
 0x500   :  { %3293 = vmax.xlane.f32.xlu1 %v7966_v52  ;;  %3998 = vmax.xlane.f32.xlu0 %v7970_v15 }
 0x501   :  { %10288 = vst [vmem:[#allocation73_spill] sm:$0xff] %v7962_v4  ;;  %v7975_v49 = vadd.f32 %v5028_v32, %v10289_v12  ;;  %v2997_v22 = vadd.f32 %v2965_v19, %v7962_v4  ;;  %v2971_v32 = vld [vmem:[#allocation4 + $0x50] sm:$0xff] }
 0x503   :  { %10290 = vst [vmem:[#allocation75_spill] sm:$0xff] %v7975_v49  ;;  %v5029_v51 = vpop.f32.mrb[76].mxu1  ;;  %v7984_v28 = vsel %vm7913_vm2, %v2997_v22, -inf  ;;  %v2998_v13 = vadd.f32 %v2966_v60, %v7975_v49  ;;  %v7998_v17 = vsel %vm7929_vm5, %v2997_v22, -inf  ;;  %v10299_v60 = vld [vmem:[#allocation70_spill] sm:$0xff] }
 0x504   :  { %v5030_v35 = vpop.f32.mrb[77].mxu1  ;;  %4000 = vmax.xlane.f32.xlu1 %v7980_v61  ;;  %3295 = vmax.xlane.f32.xlu0 %v7984_v28 }
 0x505   :  { %v5031_v30 = vadd.f32 %v5030_v35, %v5029_v51  ;;  %v5032_v62 = vpop.f32.mrb[78].mxu1  ;;  %v7994_v53 = vsel %vm7913_vm2, %v2998_v13, -inf  ;;  %v8008_v40 = vsel %vm7929_vm5, %v2998_v13, -inf  ;;  %v2972_v35 = vld [vmem:[#allocation4 + $0x58] sm:$0xff] }
 0x506   :  { %v5033_v0 = vpop.f32.mrb[79].mxu1 }
 0x507   :  { %v7990_v48 = vadd.f32 %v5031_v30, %v10291_v44  ;;  %v5034_v38 = vadd.f32 %v5033_v0, %v5032_v62  ;;  %v10301_v30 = vld [vmem:[#allocation72_spill] sm:$0xff] }
 0x508   :  { %3297 = vmax.xlane.f32.xlu1 %v7994_v53  ;;  %4002 = vmax.xlane.f32.xlu0 %v7998_v17 }
 0x509   :  { %10292 = vst [vmem:[#allocation79_spill] sm:$0xff] %v7990_v48  ;;  %v8003_v18 = vadd.f32 %v5034_v38, %v10293_v6  ;;  %v2999_v34 = vadd.f32 %v2967_v3, %v7990_v48 }
 0x50b   :  { %10294 = vst [vmem:[#allocation48_spill] sm:$0xff] %v8003_v18  ;;  %v5035_v9 = vpop.f32.mrb[80].mxu1  ;;  %v8012_v14 = vsel %vm7913_vm2, %v2999_v34, -inf  ;;  %v3000_v46 = vadd.f32 %v2968_v33, %v8003_v18  ;;  %v8026_v29 = vsel %vm7929_vm5, %v2999_v34, -inf }
 0x50c   :  { %v5036_v7 = vpop.f32.mrb[81].mxu1  ;;  %4004 = vmax.xlane.f32.xlu1 %v8008_v40  ;;  %3299 = vmax.xlane.f32.xlu0 %v8012_v14 }
 0x50d   :  { %v5037_v37 = vadd.f32 %v5036_v7, %v5035_v9  ;;  %v5038_v50 = vpop.f32.mrb[82].mxu1  ;;  %v8022_v10 = vsel %vm7913_vm2, %v3000_v46, -inf  ;;  %v8036_v56 = vsel %vm7929_vm5, %v3000_v46, -inf  ;;  %v2973_v7 = vld [vmem:[#allocation4 + $0x60] sm:$0xff] }
 0x50e   :  { %v5039_v43 = vpop.f32.mrb[83].mxu1 }
 0x50f   :  { %v8018_v39 = vadd.f32 %v5037_v37, %v10295_v20  ;;  %v5040_v16 = vadd.f32 %v5039_v43, %v5038_v50  ;;  %v10303_v37 = vld [vmem:[#allocation77_spill] sm:$0xff] }
 0x510   :  { %3301 = vmax.xlane.f32.xlu1 %v8022_v10  ;;  %4006 = vmax.xlane.f32.xlu0 %v8026_v29 }
 0x511   :  { %10296 = vst [vmem:[#allocation30_spill] sm:$0xff] %v8018_v39  ;;  %v8031_v11 = vadd.f32 %v5040_v16, %v10297_v24  ;;  %v3001_v8 = vadd.f32 %v2969_v5, %v8018_v39  ;;  %v2974_v16 = vld [vmem:[#allocation4 + $0x68] sm:$0xff] }
 0x513   :  { %10298 = vst [vmem:[#allocation50_spill] sm:$0xff] %v8031_v11  ;;  %v5041_v59 = vpop.f32.mrb[84].mxu1  ;;  %v8040_v63 = vsel %vm7913_vm2, %v3001_v8, -inf  ;;  %v3002_v55 = vadd.f32 %v2970_v57, %v8031_v11  ;;  %v8054_v13 = vsel %vm7929_vm5, %v3001_v8, -inf  ;;  %v10305_v57 = vld [vmem:[#allocation80_spill] sm:$0xff] }
 0x514   :  { %v5042_v36 = vpop.f32.mrb[85].mxu1  ;;  %4008 = vmax.xlane.f32.xlu1 %v8036_v56  ;;  %3303 = vmax.xlane.f32.xlu0 %v8040_v63 }
 0x515   :  { %v5043_v25 = vadd.f32 %v5042_v36, %v5041_v59  ;;  %v5044_v19 = vpop.f32.mrb[86].mxu1  ;;  %v8050_v51 = vsel %vm7913_vm2, %v3002_v55, -inf  ;;  %v8064_v44 = vsel %vm7929_vm5, %v3002_v55, -inf }
 0x516   :  { %v5045_v31 = vpop.f32.mrb[87].mxu1 }
 0x517   :  { %v8046_v12 = vadd.f32 %v5043_v25, %v10299_v60  ;;  %v5046_v22 = vadd.f32 %v5045_v31, %v5044_v19 }
 0x518   :  { %3305 = vmax.xlane.f32.xlu1 %v8050_v51  ;;  %4010 = vmax.xlane.f32.xlu0 %v8054_v13 }
 0x519   :  { %10300 = vst [vmem:[#allocation20_spill] sm:$0xff] %v8046_v12  ;;  %v8059_v62 = vadd.f32 %v5046_v22, %v10301_v30  ;;  %v3003_v0 = vadd.f32 %v2971_v32, %v8046_v12  ;;  %v2975_v22 = vld [vmem:[#allocation4 + $0x70] sm:$0xff] }
 0x51b   :  { %10302 = vst [vmem:[#allocation57_spill] sm:$0xff] %v8059_v62  ;;  %v5047_v3 = vpop.f32.mrb[88].mxu1  ;;  %v8068_v38 = vsel %vm7913_vm2, %v3003_v0, -inf  ;;  %v3004_v33 = vadd.f32 %v2972_v35, %v8059_v62  ;;  %v8082_v20 = vsel %vm7929_vm5, %v3003_v0, -inf  ;;  %v10307_v35 = vld [vmem:[#allocation76_spill] sm:$0xff] }
 0x51c   :  { %v5048_v6 = vpop.f32.mrb[89].mxu1  ;;  %4012 = vmax.xlane.f32.xlu1 %v8064_v44  ;;  %3307 = vmax.xlane.f32.xlu0 %v8068_v38 }
 0x51d   :  { %v5049_v34 = vadd.f32 %v5048_v6, %v5047_v3  ;;  %v5050_v9 = vpop.f32.mrb[90].mxu1  ;;  %v8078_v5 = vsel %vm7913_vm2, %v3004_v33, -inf  ;;  %v8092_v55 = vsel %vm7929_vm5, %v3004_v33, -inf  ;;  %v2976_v6 = vld [vmem:[#allocation4 + $0x78] sm:$0xff] }
 0x51e   :  { %v5051_v46 = vpop.f32.mrb[91].mxu1 }
 0x51f   :  { %v8074_v50 = vadd.f32 %v5049_v34, %v10303_v37  ;;  %v5052_v43 = vadd.f32 %v5051_v46, %v5050_v9  ;;  %v10309_v34 = vld [vmem:[#allocation78_spill] sm:$0xff] }
 0x520   :  { %3309 = vmax.xlane.f32.xlu1 %v8078_v5  ;;  %4014 = vmax.xlane.f32.xlu0 %v8082_v20 }
 0x521   :  { %10304 = vst [vmem:[#allocation52_spill] sm:$0xff] %v8074_v50  ;;  %v8087_v24 = vadd.f32 %v5052_v43, %v10305_v57  ;;  %v3005_v8 = vadd.f32 %v2973_v7, %v8074_v50 }
 0x523   :  { %10306 = vst [vmem:[#allocation59_spill] sm:$0xff] %v8087_v24  ;;  %v5053_v59 = vpop.f32.mrb[92].mxu1  ;;  %v8096_v36 = vsel %vm7913_vm2, %v3005_v8, -inf  ;;  %v3006_v25 = vadd.f32 %v2974_v16, %v8087_v24  ;;  %v8110_v33 = vsel %vm7929_vm5, %v3005_v8, -inf }
 0x524   :  { %v5054_v19 = vpop.f32.mrb[93].mxu1  ;;  %4016 = vmax.xlane.f32.xlu1 %v8092_v55  ;;  %3311 = vmax.xlane.f32.xlu0 %v8096_v36 }
 0x525   :  { %v5055_v31 = vadd.f32 %v5054_v19, %v5053_v59  ;;  %v5056_v32 = vpop.f32.mrb[94].mxu1  ;;  %v8106_v3 = vsel %vm7913_vm2, %v3006_v25, -inf  ;;  %v8120_v37 = vsel %vm7929_vm5, %v3006_v25, -inf }
 0x526   :  { %v5057_v60 = vpop.f32.mrb[95].mxu1 }
 0x527   :  { %v8102_v30 = vadd.f32 %v5055_v31, %v10307_v35  ;;  %v5058_v0 = vadd.f32 %v5057_v60, %v5056_v32  ;;  %v2977_v31 = vld [vmem:[#allocation4 + $0x80] sm:$0xff]  ;;  %v10311_v32 = vld [vmem:[#allocation82_spill] sm:$0xff] }
 0x528   :  { %3313 = vmax.xlane.f32.xlu1 %v8106_v3  ;;  %4018 = vmax.xlane.f32.xlu0 %v8110_v33 }
 0x529   :  { %10308 = vst [vmem:[#allocation54_spill] sm:$0xff] %v8102_v30  ;;  %v8115_v9 = vadd.f32 %v5058_v0, %v10309_v34  ;;  %v3007_v46 = vadd.f32 %v2975_v22, %v8102_v30  ;;  %v2978_v0 = vld [vmem:[#allocation4 + $0x88] sm:$0xff] }
 0x52b   :  { %10310 = vst [vmem:[#allocation39_spill] sm:$0xff] %v8115_v9  ;;  %v5059_v7 = vpop.f32.mrb[96].mxu1  ;;  %v8124_v43 = vsel %vm7913_vm2, %v3007_v46, -inf  ;;  %v3008_v16 = vadd.f32 %v2976_v6, %v8115_v9  ;;  %v8138_v35 = vsel %vm7929_vm5, %v3007_v46, -inf  ;;  %v10313_v6 = vld [vmem:[#allocation84_spill] sm:$0xff] }
 0x52c   :  { %v5060_v57 = vpop.f32.mrb[97].mxu1  ;;  %4020 = vmax.xlane.f32.xlu1 %v8120_v37  ;;  %3315 = vmax.xlane.f32.xlu0 %v8124_v43 }
 0x52d   :  { %v5061_v8 = vadd.f32 %v5060_v57, %v5059_v7  ;;  %v5062_v59 = vpop.f32.mrb[98].mxu1  ;;  %v8134_v22 = vsel %vm7913_vm2, %v3008_v16, -inf }
 0x52e   :  { %v5063_v19 = vpop.f32.mrb[99].mxu1 }
 0x52f   :  { %v8130_v60 = vadd.f32 %v5061_v8, %v10311_v32  ;;  %v5064_v25 = vadd.f32 %v5063_v19, %v5062_v59  ;;  %v8148_v8 = vsel %vm7929_vm5, %v3008_v16, -inf }
 0x530   :  { %3317 = vmax.xlane.f32.xlu1 %v8134_v22  ;;  %4022 = vmax.xlane.f32.xlu0 %v8138_v35 }
 0x531   :  { %10312 = vst [vmem:[#allocation36_spill] sm:$0xff] %v8130_v60  ;;  %v8143_v34 = vadd.f32 %v5064_v25, %v10313_v6  ;;  %v3009_v7 = vadd.f32 %v2977_v31, %v8130_v60  ;;  %v2979_v31 = vld [vmem:[#allocation4 + $0x90] sm:$0xff]  ;;  %v10315_v60 = vld [vmem:[#allocation81_spill] sm:$0xff] }
 0x533   :  { %10314 = vst [vmem:[#allocation38_spill] sm:$0xff] %v8143_v34  ;;  %v5065_v57 = vpop.f32.mrb[100].mxu1  ;;  %v8152_v59 = vsel %vm7913_vm2, %v3009_v7, -inf  ;;  %v3010_v46 = vadd.f32 %v2978_v0, %v8143_v34  ;;  %v8166_v0 = vsel %vm7929_vm5, %v3009_v7, -inf }
 0x534   :  { %v5066_v19 = vpop.f32.mrb[101].mxu1  ;;  %4024 = vmax.xlane.f32.xlu1 %v8148_v8  ;;  %3319 = vmax.xlane.f32.xlu0 %v8152_v59 }
 0x535   :  { %v5067_v32 = vadd.f32 %v5066_v19, %v5065_v57  ;;  %v5068_v25 = vpop.f32.mrb[102].mxu1  ;;  %v8162_v30 = vsel %vm7913_vm2, %v3010_v46, -inf  ;;  %v2980_v57 = vld [vmem:[#allocation4 + $0x98] sm:$0xff] }
 0x536   :  { %v5069_v6 = vpop.f32.mrb[103].mxu1  ;;  %v10317_v19 = vld [vmem:[#allocation83_spill] sm:$0xff] }
 0x537   :  { %v8158_v9 = vadd.f32 %v5067_v32, %v10315_v60  ;;  %v5070_v16 = vadd.f32 %v5069_v6, %v5068_v25  ;;  %v8176_v25 = vsel %vm7929_vm5, %v3010_v46, -inf }
 0x538   :  { %3321 = vmax.xlane.f32.xlu1 %v8162_v30  ;;  %4026 = vmax.xlane.f32.xlu0 %v8166_v0 }
 0x539   :  { %10316 = vst [vmem:[#allocation28_spill] sm:$0xff] %v8158_v9  ;;  %v8171_v34 = vadd.f32 %v5070_v16, %v10317_v19  ;;  %v3011_v60 = vadd.f32 %v2979_v31, %v8158_v9  ;;  %v2981_v31 = vld [vmem:[#allocation4 + $0xa0] sm:$0xff]  ;;  %v10319_v9 = vld [vmem:[#allocation86_spill] sm:$0xff] }
 0x53b   :  { %10318 = vst [vmem:[#allocation21_spill] sm:$0xff] %v8171_v34  ;;  %v5071_v32 = vpop.f32.mrb[104].mxu1  ;;  %v8180_v6 = vsel %vm7913_vm2, %v3011_v60, -inf  ;;  %v3012_v7 = vadd.f32 %v2980_v57, %v8171_v34  ;;  %v8194_v57 = vsel %vm7929_vm5, %v3011_v60, -inf }
 0x53c   :  { %v5072_v24 = vpop.f32.mrb[105].mxu1  ;;  %4028 = vmax.xlane.f32.xlu1 %v8176_v25  ;;  %3323 = vmax.xlane.f32.xlu0 %v8180_v6 }
 0x53d   :  { %v5073_v16 = vadd.f32 %v5072_v24, %v5071_v32  ;;  %v5074_v19 = vpop.f32.mrb[106].mxu1  ;;  %v8190_v12 = vsel %vm7913_vm2, %v3012_v7, -inf  ;;  %v2982_v24 = vld [vmem:[#allocation4 + $0xa8] sm:$0xff]  ;;  %v10321_v32 = vld [vmem:[#allocation88_spill] sm:$0xff] }
 0x53e   :  { %v5075_v50 = vpop.f32.mrb[107].mxu1 }
 0x53f   :  { %v8186_v62 = vadd.f32 %v5073_v16, %v10319_v9  ;;  %v5076_v46 = vadd.f32 %v5075_v50, %v5074_v19  ;;  %v8204_v50 = vsel %vm7929_vm5, %v3012_v7, -inf }
 0x540   :  { %3325 = vmax.xlane.f32.xlu1 %v8190_v12  ;;  %4030 = vmax.xlane.f32.xlu0 %v8194_v57 }
 0x541   :  { %10320 = vst [vmem:[#allocation40_spill] sm:$0xff] %v8186_v62  ;;  %v8199_v34 = vadd.f32 %v5076_v46, %v10321_v32  ;;  %v3013_v9 = vadd.f32 %v2981_v31, %v8186_v62  ;;  %v2983_v31 = vld [vmem:[#allocation4 + $0xb0] sm:$0xff]  ;;  %v10324_v62 = vld [vmem:[#allocation85_spill] sm:$0xff] }
 0x543   :  { %10322 = vst [vmem:[#allocation29_spill] sm:$0xff] %v8199_v34  ;;  %v5077_v16 = vpop.f32.mrb[108].mxu1  ;;  %v8208_v19 = vsel %vm7913_vm2, %v3013_v9, -inf  ;;  %v3014_v60 = vadd.f32 %v2982_v24, %v8199_v34  ;;  %v8222_v24 = vsel %vm7929_vm5, %v3013_v9, -inf }
 0x544   :  { %10323 = vst [vmem:[#allocation42_spill] sm:$0xff] %v8208_v19  ;;  %v5078_v11 = vpop.f32.mrb[109].mxu1  ;;  %4032 = vmax.xlane.f32.xlu1 %v8204_v50  ;;  %3327 = vmax.xlane.f32.xlu0 %v8208_v19 }
 0x545   :  { %v5079_v46 = vadd.f32 %v5078_v11, %v5077_v16  ;;  %v5080_v32 = vpop.f32.mrb[110].mxu1  ;;  %v8218_v48 = vsel %vm7913_vm2, %v3014_v60, -inf  ;;  %v2984_v11 = vld [vmem:[#allocation4 + $0xb8] sm:$0xff] }
 0x546   :  { %v5081_v39 = vpop.f32.mrb[111].mxu1  ;;  %10326 = vst [vmem:[#allocation22_spill] sm:$0xff] %v8218_v48  ;;  %v10327_v16 = vld [vmem:[#allocation87_spill] sm:$0xff] }
 0x547   :  { %v8214_v18 = vadd.f32 %v5079_v46, %v10324_v62  ;;  %v5082_v7 = vadd.f32 %v5081_v39, %v5080_v32  ;;  %v8232_v39 = vsel %vm7929_vm5, %v3014_v60, -inf }
 0x548   :  { %3329 = vmax.xlane.f32.xlu1 %v8218_v48  ;;  %4034 = vmax.xlane.f32.xlu0 %v8222_v24  ;;  %10329 = vst [vmem:[#allocation25_spill] sm:$0xff] %v8232_v39 }
 0x549   :  { %10325 = vst [vmem:[#allocation24_spill] sm:$0xff] %v8214_v18  ;;  %v8227_v34 = vadd.f32 %v5082_v7, %v10327_v16  ;;  %v3015_v62 = vadd.f32 %v2983_v31, %v8214_v18  ;;  %v2985_v31 = vld [vmem:[#allocation4 + $0xc0] sm:$0xff]  ;;  %v10331_v18 = vld [vmem:[#allocation45_spill] sm:$0xff] }
 0x54b   :  { %10328 = vst [vmem:[#allocation23_spill] sm:$0xff] %v8227_v34  ;;  %v5083_v46 = vpop.f32.mrb[112].mxu1  ;;  %v8236_v32 = vsel %vm7913_vm2, %v3015_v62, -inf  ;;  %v3016_v9 = vadd.f32 %v2984_v11, %v8227_v34  ;;  %v8250_v11 = vsel %vm7929_vm5, %v3015_v62, -inf }
 0x54c   :  { %10330 = vst [vmem:[#allocation44_spill] sm:$0xff] %v8236_v32  ;;  %v5084_v49 = vpop.f32.mrb[113].mxu1  ;;  %4036 = vmax.xlane.f32.xlu1 %v8232_v39  ;;  %3331 = vmax.xlane.f32.xlu0 %v8236_v32 }
 0x54d   :  { %v5085_v7 = vadd.f32 %v5084_v49, %v5083_v46  ;;  %v5086_v16 = vpop.f32.mrb[114].mxu1  ;;  %v8246_v45 = vsel %vm7913_vm2, %v3016_v9, -inf  ;;  %v2986_v49 = vld [vmem:[#allocation4 + $0xc8] sm:$0xff]  ;;  %v10334_v46 = vld [vmem:[#allocation31_spill] sm:$0xff] }
 0x54e   :  { %v5087_v4 = vpop.f32.mrb[115].mxu1  ;;  %10333 = vst [vmem:[#allocation26_spill] sm:$0xff] %v8246_v45 }
 0x54f   :  { %v8242_v2 = vadd.f32 %v5085_v7, %v10331_v18  ;;  %v5088_v60 = vadd.f32 %v5087_v4, %v5086_v16  ;;  %v8260_v4 = vsel %vm7929_vm5, %v3016_v9, -inf }
 0x550   :  { %3333 = vmax.xlane.f32.xlu1 %v8246_v45  ;;  %4038 = vmax.xlane.f32.xlu0 %v8250_v11  ;;  %10336 = vst [vmem:[#allocation32_spill] sm:$0xff] %v8260_v4 }
 0x551   :  { %10332 = vst [vmem:[#allocation43_spill] sm:$0xff] %v8242_v2  ;;  %v8255_v34 = vadd.f32 %v5088_v60, %v10334_v46  ;;  %v3017_v18 = vadd.f32 %v2985_v31, %v8242_v2  ;;  %v2987_v31 = vld [vmem:[#allocation4 + $0xd0] sm:$0xff]  ;;  %v10338_v2 = vld [vmem:[#allocation37_spill] sm:$0xff] }
 0x553   :  { %10335 = vst [vmem:[#allocation60_spill] sm:$0xff] %v8255_v34  ;;  %v5089_v7 = vpop.f32.mrb[116].mxu1  ;;  %v8264_v16 = vsel %vm7913_vm2, %v3017_v18, -inf  ;;  %v3018_v62 = vadd.f32 %v2986_v49, %v8255_v34  ;;  %v8278_v49 = vsel %vm7929_vm5, %v3017_v18, -inf }
 0x554   :  { %10337 = vst [vmem:[#allocation33_spill] sm:$0xff] %v8264_v16  ;;  %v5090_v42 = vpop.f32.mrb[117].mxu1  ;;  %4040 = vmax.xlane.f32.xlu1 %v8260_v4  ;;  %3335 = vmax.xlane.f32.xlu0 %v8264_v16 }
 0x555   :  { %v5091_v60 = vadd.f32 %v5090_v42, %v5089_v7  ;;  %v5092_v46 = vpop.f32.mrb[118].mxu1  ;;  %v8274_v32 = vsel %vm7913_vm2, %v3018_v62, -inf  ;;  %v2988_v42 = vld [vmem:[#allocation4 + $0xd8] sm:$0xff] }
 0x556   :  { %v5093_v47 = vpop.f32.mrb[119].mxu1  ;;  %10340 = vst [vmem:[#allocation41_spill] sm:$0xff] %v8274_v32  ;;  %v10341_v7 = vld [vmem:[#allocation27_spill] sm:$0xff] }
 0x557   :  { %v8270_v45 = vadd.f32 %v5091_v60, %v10338_v2  ;;  %v5094_v9 = vadd.f32 %v5093_v47, %v5092_v46  ;;  %v8288_v47 = vsel %vm7929_vm5, %v3018_v62, -inf }
 0x558   :  { %3337 = vmax.xlane.f32.xlu1 %v8274_v32  ;;  %4042 = vmax.xlane.f32.xlu0 %v8278_v49  ;;  %10343 = vst [vmem:[#allocation55_spill] sm:$0xff] %v8288_v47 }
 0x559   :  { %10339 = vst [vmem:[#allocation34_spill] sm:$0xff] %v8270_v45  ;;  %v8283_v34 = vadd.f32 %v5094_v9, %v10341_v7  ;;  %v3019_v2 = vadd.f32 %v2987_v31, %v8270_v45  ;;  %v2989_v31 = vld [vmem:[#allocation4 + $0xe0] sm:$0xff]  ;;  %v10344_v45 = vld [vmem:[#allocation47_spill] sm:$0xff] }
 0x55b   :  { %10342 = vst [vmem:[#allocation35_spill] sm:$0xff] %v8283_v34  ;;  %v5095_v60 = vpop.f32.mrb[120].mxu1  ;;  %v8292_v46 = vsel %vm7913_vm2, %v3019_v2, -inf  ;;  %v3020_v18 = vadd.f32 %v2988_v42, %v8283_v34  ;;  %v8306_v42 = vsel %vm7929_vm5, %v3019_v2, -inf }
 0x55c   :  { %v5096_v32 = vpop.f32.mrb[121].mxu1  ;;  %4044 = vmax.xlane.f32.xlu1 %v8288_v47  ;;  %3339 = vmax.xlane.f32.xlu0 %v8292_v46 }
 0x55d   :  { %v5097_v9 = vadd.f32 %v5096_v32, %v5095_v60  ;;  %v5098_v7 = vpop.f32.mrb[122].mxu1  ;;  %v8302_v39 = vsel %vm7913_vm2, %v3020_v18, -inf  ;;  %v2990_v32 = vld [vmem:[#allocation4 + $0xe8] sm:$0xff]  ;;  %v10347_v60 = vld [vmem:[#allocation51_spill] sm:$0xff] }
 0x55e   :  { %v5099_v16 = vpop.f32.mrb[123].mxu1  ;;  %10346 = vst [vmem:[#allocation64_spill] sm:$0xff] %v8302_v39 }
 0x55f   :  { %v8298_v4 = vadd.f32 %v5097_v9, %v10344_v45  ;;  %v5100_v62 = vadd.f32 %v5099_v16, %v5098_v7  ;;  %v8316_v16 = vsel %vm7929_vm5, %v3020_v18, -inf }
 0x560   :  { %3341 = vmax.xlane.f32.xlu1 %v8302_v39  ;;  %4046 = vmax.xlane.f32.xlu0 %v8306_v42 }
 0x561   :  { %10345 = vst [vmem:[#allocation62_spill] sm:$0xff] %v8298_v4  ;;  %v8311_v34 = vadd.f32 %v5100_v62, %v10347_v60  ;;  %v3021_v45 = vadd.f32 %v2989_v31, %v8298_v4  ;;  %v2991_v31 = vld [vmem:[#allocation4 + $0xf0] sm:$0xff] }
 0x562   :  { %v10349_v4 = vld [vmem:[#allocation46_spill] sm:$0xff] }
 0x563   :  { %10348 = vst [vmem:[#allocation61_spill] sm:$0xff] %v8311_v34  ;;  %v5101_v9 = vpop.f32.mrb[124].mxu1  ;;  %v8320_v7 = vsel %vm7913_vm2, %v3021_v45, -inf  ;;  %v3022_v2 = vadd.f32 %v2990_v32, %v8311_v34  ;;  %v8334_v32 = vsel %vm7929_vm5, %v3021_v45, -inf }
 0x564   :  { %v5102_v39 = vpop.f32.mrb[125].mxu1  ;;  %4048 = vmax.xlane.f32.xlu1 %v8316_v16  ;;  %3343 = vmax.xlane.f32.xlu0 %v8320_v7 }
 0x565   :  { %v5103_v62 = vadd.f32 %v5102_v39, %v5101_v9  ;;  %v5104_v60 = vpop.f32.mrb[126].mxu1  ;;  %v8330_v19 = vsel %vm7913_vm2, %v3022_v2, -inf  ;;  %v2992_v39 = vld [vmem:[#allocation4 + $0xf8] sm:$0xff]  ;;  %v10351_v9 = vld [vmem:[#allocation49_spill] sm:$0xff] }
 0x566   :  { %v5105_v47 = vpop.f32.mrb[127].mxu1 }
 0x567   :  { %v8326_v48 = vadd.f32 %v5103_v62, %v10349_v4  ;;  %v5106_v18 = vadd.f32 %v5105_v47, %v5104_v60  ;;  %v8344_v47 = vsel %vm7929_vm5, %v3022_v2, -inf }
 0x568   :  { %3345 = vmax.xlane.f32.xlu1 %v8330_v19  ;;  %4050 = vmax.xlane.f32.xlu0 %v8334_v32  ;;  %10353 = vst [vmem:[#allocation68_spill] sm:$0xff] %v8344_v47 }
 0x569   :  { %10350 = vst [vmem:[#allocation63_spill] sm:$0xff] %v8326_v48  ;;  %v8339_v34 = vadd.f32 %v5106_v18, %v10351_v9  ;;  %v3023_v4 = vadd.f32 %v2991_v31, %v8326_v48 }
 0x56b   :  { %10352 = vst [vmem:[#allocation66_spill] sm:$0xff] %v8339_v34  ;;  %v8348_v62 = vsel %vm7913_vm2, %v3023_v4, -inf  ;;  %v3024_v45 = vadd.f32 %v2992_v39, %v8339_v34  ;;  %v8359_v31 = vsel %vm7929_vm5, %v3023_v4, -inf }
 0x56c   :  { %4052 = vmax.xlane.f32.xlu1 %v8344_v47  ;;  %3347 = vmax.xlane.f32.xlu0 %v8348_v62 }
 0x56d   :  { %v8355_v60 = vsel %vm7913_vm2, %v3024_v45, -inf  ;;  %v8365_v2 = vsel %vm7929_vm5, %v3024_v45, -inf }
 0x56e   :  { %10354 = vst [vmem:[#allocation65_spill] sm:$0xff] %v8355_v60  ;;  %10355 = vst [vmem:[#allocation67_spill] sm:$0xff] %v8365_v2 }
 0x570   :  { %3349 = vmax.xlane.f32.xlu1 %v8355_v60  ;;  %4054 = vmax.xlane.f32.xlu0 %v8359_v31 }
 0x574   :  { %4056 = vmax.xlane.f32.xlu1 %v8365_v2 }
 0x581   :  { %v3288_v18 = vpop.xlane.xlu0 %3287 }
 0x582   :  { %vm3351_vm6 = vcmp.eq.f32.partialorder %v7925_v54, %v3288_v18 }
 0x583   :  { %v8370_v1 = vsel %vm3351_vm6, %v7906_v26, 128  ;;  %v3997_v9 = vpop.xlane.xlu1 %3996 }
 0x584   :  { %v3416_v39 = vshra.s32 %v8370_v1, 16  ;;  %vm4059_vm8 = vcmp.eq.f32.partialorder %v7935_v27, %v3997_v9 }
 0x585   :  { %v3995_v4 = vpop.xlane.xlu0 %3994  ;;  %v8386_v2 = vsel %vm4059_vm8, %v7906_v26, 128 }
 0x586   :  { %vm4058_vm7 = vcmp.eq.f32.partialorder %v7943_v41, %v3995_v4  ;;  %v8374_v34 = vcvt.s32.f32 %v3416_v39 }
 0x587   :  { %v8377_v21 = vsel %vm4058_vm7, %v7906_v26, 128 }
 0x588   :  { %10356 = vst [vmem:[#allocation71_spill] sm:$0xff] %v8377_v21  ;;  %3419 = vmin.xlane.f32.xlu0 %v8374_v34  ;;  %v4123_v54 = vshra.s32 %v8377_v21, 16 }
 0x589   :  { %v3292_v45 = vpop.xlane.xlu1 %3291  ;;  %v3290_v18 = vpop.xlane.xlu0 %3289 }
 0x58a   :  { %vm3352_vm9 = vcmp.eq.f32.partialorder %v7956_v58, %v3290_v18  ;;  %v8383_v48 = vcvt.s32.f32 %v4123_v54  ;;  %vm3353_vm10 = vcmp.eq.f32.partialorder %v7952_v23, %v3292_v45  ;;  %v4137_v58 = vshra.s32 %v8386_v2, 16 }
 0x58b   :  { %v8389_v41 = vsel %vm3352_vm9, %v7906_v26, 128  ;;  %v8399_v54 = vsel %vm3353_vm10, %v7906_v26, 128 }
 0x58c   :  { %10357 = vst [vmem:[#allocation74_spill] sm:$0xff] %v8383_v48  ;;  %4126 = vmin.xlane.f32.xlu1 %v8383_v48  ;;  %v3430_v27 = vshra.s32 %v8389_v41, 16  ;;  %v8407_v21 = vcvt.s32.f32 %v4137_v58 }
 0x58d   :  { %v3294_v39 = vpop.xlane.xlu1 %3293  ;;  %v3999_v9 = vpop.xlane.xlu0 %3998 }
 0x58e   :  { %vm4060_vm11 = vcmp.eq.f32.partialorder %v7970_v15, %v3999_v9  ;;  %v8395_v4 = vcvt.s32.f32 %v3430_v27  ;;  %vm3354_vm12 = vcmp.eq.f32.partialorder %v7966_v52, %v3294_v39  ;;  %v3444_v27 = vshra.s32 %v8399_v54, 16 }
 0x58f   :  { %v8402_v18 = vsel %vm4060_vm11, %v7906_v26, 128  ;;  %v8413_v9 = vsel %vm3354_vm12, %v7906_v26, 128 }
 0x590   :  { %10358 = vst [vmem:[#allocation70_spill] sm:$0xff] %v8402_v18  ;;  %3433 = vmin.xlane.f32.xlu0 %v8395_v4  ;;  %v4151_v23 = vshra.s32 %v8402_v18, 16  ;;  %v8419_v18 = vcvt.s32.f32 %v3444_v27  ;;  %v3458_v58 = vshra.s32 %v8413_v9, 16 }
 0x591   :  { %v4001_v45 = vpop.xlane.xlu1 %4000  ;;  %v3296_v48 = vpop.xlane.xlu0 %3295 }
 0x592   :  { %v8409_v15 = vcvt.s32.f32 %v4151_v23  ;;  %vm4061_vm13 = vcmp.eq.f32.partialorder %v7980_v61, %v4001_v45  ;;  %vm3355_vm15 = vcmp.eq.f32.partialorder %v7984_v28, %v3296_v48  ;;  %v8431_v47 = vcvt.s32.f32 %v3458_v58 }
 0x593   :  { %v8423_v23 = vsel %vm4061_vm13, %v7906_v26, 128 }
 0x594   :  { %10359 = vst [vmem:[#allocation72_spill] sm:$0xff] %v8409_v15  ;;  %4140 = vmin.xlane.f32.xlu0 %v8407_v21  ;;  %4154 = vmin.xlane.f32.xlu1 %v8409_v15  ;;  %10360 = vst [vmem:[#allocation77_spill] sm:$0xff] %v8423_v23  ;;  %v4165_v27 = vshra.s32 %v8423_v23, 16 }
 0x595   :  { %v3298_v52 = vpop.xlane.xlu1 %3297  ;;  %v4003_v39 = vpop.xlane.xlu0 %4002  ;;  %10362 = vst [vmem:[#allocation76_spill] sm:$0xff] %v8431_v47 }
 0x596   :  { %vm4062_vm14 = vcmp.eq.f32.partialorder %v7998_v17, %v4003_v39  ;;  %v8437_v39 = vsel %vm3355_vm15, %v7906_v26, 128  ;;  %vm3356_vm0 = vcmp.eq.f32.partialorder %v7994_v53, %v3298_v52 }
 0x597   :  { %v8426_v60 = vsel %vm4062_vm14, %v7906_v26, 128  ;;  %v3472_v58 = vshra.s32 %v8437_v39, 16 }
 0x598   :  { %10361 = vst [vmem:[#allocation80_spill] sm:$0xff] %v8426_v60  ;;  %3447 = vmin.xlane.f32.xlu0 %v8419_v18  ;;  %v4179_v61 = vshra.s32 %v8426_v60, 16  ;;  %v8443_v60 = vcvt.s32.f32 %v4165_v27 }
 0x599   :  { %v4005_v45 = vpop.xlane.xlu1 %4004  ;;  %v3300_v15 = vpop.xlane.xlu0 %3299 }
 0x59a   :  { %v8433_v17 = vcvt.s32.f32 %v4179_v61  ;;  %v8447_v61 = vsel %vm3356_vm0, %v7906_v26, 128  ;;  %vm4063_vm2 = vcmp.eq.f32.partialorder %v8008_v40, %v4005_v45  ;;  %vm3357_vm3 = vcmp.eq.f32.partialorder %v8012_v14, %v3300_v15 }
 0x59b   :  { %10364 = vst [vmem:[#allocation82_spill] sm:$0xff] %v8447_v61  ;;  %v3486_v27 = vshra.s32 %v8447_v61, 16 }
 0x59c   :  { %10363 = vst [vmem:[#allocation78_spill] sm:$0xff] %v8433_v17  ;;  %3461 = vmin.xlane.f32.xlu0 %v8431_v47  ;;  %4182 = vmin.xlane.f32.xlu1 %v8433_v17  ;;  %v8455_v47 = vcvt.s32.f32 %v3472_v58 }
 0x59d   :  { %v3302_v28 = vpop.xlane.xlu1 %3301  ;;  %v4007_v48 = vpop.xlane.xlu0 %4006 }
 0x59e   :  { %vm4064_vm1 = vcmp.eq.f32.partialorder %v8026_v29, %v4007_v48  ;;  %10366 = vst [vmem:[#allocation81_spill] sm:$0xff] %v8455_v47  ;;  %v8461_v48 = vsel %vm4063_vm2, %v7906_v26, 128  ;;  %vm3358_vm5 = vcmp.eq.f32.partialorder %v8022_v10, %v3302_v28 }
 0x59f   :  { %v8450_v23 = vsel %vm4064_vm1, %v7906_v26, 128  ;;  %v4193_v58 = vshra.s32 %v8461_v48, 16 }
 0x5a0   :  { %10365 = vst [vmem:[#allocation84_spill] sm:$0xff] %v8450_v23  ;;  %4168 = vmin.xlane.f32.xlu0 %v8443_v60  ;;  %v4207_v53 = vshra.s32 %v8450_v23, 16  ;;  %v8467_v23 = vcvt.s32.f32 %v3486_v27 }
 0x5a1   :  { %v4009_v52 = vpop.xlane.xlu1 %4008  ;;  %v3304_v17 = vpop.xlane.xlu0 %3303 }
 0x5a2   :  { %v8457_v29 = vcvt.s32.f32 %v4207_v53  ;;  %v8471_v53 = vsel %vm3357_vm3, %v7906_v26, 128  ;;  %vm4065_vm6 = vcmp.eq.f32.partialorder %v8036_v56, %v4009_v52  ;;  %vm3359_vm8 = vcmp.eq.f32.partialorder %v8040_v63, %v3304_v17 }
 0x5a3   :  { %10368 = vst [vmem:[#allocation86_spill] sm:$0xff] %v8471_v53  ;;  %v3500_v27 = vshra.s32 %v8471_v53, 16 }
 0x5a4   :  { %10367 = vst [vmem:[#allocation83_spill] sm:$0xff] %v8457_v29  ;;  %3475 = vmin.xlane.f32.xlu0 %v8455_v47  ;;  %4210 = vmin.xlane.f32.xlu1 %v8457_v29  ;;  %v8479_v47 = vcvt.s32.f32 %v4193_v58 }
 0x5a5   :  { %v3306_v40 = vpop.xlane.xlu1 %3305  ;;  %v4011_v45 = vpop.xlane.xlu0 %4010  ;;  %v8491_v28 = vcvt.s32.f32 %v3500_v27 }
 0x5a6   :  { %vm4066_vm4 = vcmp.eq.f32.partialorder %v8054_v13, %v4011_v45  ;;  %v8485_v45 = vsel %vm3358_vm5, %v7906_v26, 128  ;;  %vm3360_vm9 = vcmp.eq.f32.partialorder %v8050_v51, %v3306_v40 }
 0x5a7   :  { %v8474_v61 = vsel %vm4066_vm4, %v7906_v26, 128  ;;  %v3514_v58 = vshra.s32 %v8485_v45, 16 }
 0x5a8   :  { %10369 = vst [vmem:[#allocation88_spill] sm:$0xff] %v8474_v61  ;;  %3489 = vmin.xlane.f32.xlu0 %v8467_v23  ;;  %v4235_v14 = vshra.s32 %v8474_v61, 16 }
 0x5a9   :  { %v4013_v15 = vpop.xlane.xlu1 %4012  ;;  %v3308_v29 = vpop.xlane.xlu0 %3307 }
 0x5aa   :  { %v8481_v13 = vcvt.s32.f32 %v4235_v14  ;;  %v8495_v14 = vsel %vm4065_vm6, %v7906_v26, 128  ;;  %vm4067_vm11 = vcmp.eq.f32.partialorder %v8064_v44, %v4013_v15  ;;  %vm3361_vm12 = vcmp.eq.f32.partialorder %v8068_v38, %v3308_v29 }
 0x5ab   :  { %10371 = vst [vmem:[#allocation87_spill] sm:$0xff] %v8495_v14  ;;  %v4221_v27 = vshra.s32 %v8495_v14, 16 }
 0x5ac   :  { %10370 = vst [vmem:[#allocation85_spill] sm:$0xff] %v8481_v13  ;;  %4196 = vmin.xlane.f32.xlu0 %v8479_v47  ;;  %4238 = vmin.xlane.f32.xlu1 %v8481_v13  ;;  %v8503_v13 = vcvt.s32.f32 %v3514_v58 }
 0x5ad   :  { %v4015_v10 = vpop.xlane.xlu0 %4014  ;;  %v3310_v61 = vpop.xlane.xlu1 %3309 }
 0x5ae   :  { %vm4068_vm7 = vcmp.eq.f32.partialorder %v8082_v20, %v4015_v10  ;;  %v8509_v10 = vsel %vm3359_vm8, %v7906_v26, 128  ;;  %vm3362_vm14 = vcmp.eq.f32.partialorder %v8078_v5, %v3310_v61 }
 0x5af   :  { %v8498_v53 = vsel %vm4068_vm7, %v7906_v26, 128  ;;  %10374 = vst [vmem:[#allocation37_spill] sm:$0xff] %v8509_v10  ;;  %v3528_v58 = vshra.s32 %v8509_v10, 16 }
 0x5b0   :  { %10372 = vst [vmem:[#allocation45_spill] sm:$0xff] %v8498_v53  ;;  %3503 = vmin.xlane.f32.xlu0 %v8491_v28  ;;  %v4263_v56 = vshra.s32 %v8498_v53, 16  ;;  %v8515_v53 = vcvt.s32.f32 %v4221_v27 }
 0x5b1   :  { %v3312_v52 = vpop.xlane.xlu0 %3311  ;;  %v4017_v63 = vpop.xlane.xlu1 %4016 }
 0x5b2   :  { %v8505_v20 = vcvt.s32.f32 %v4263_v56  ;;  %v8519_v56 = vsel %vm3360_vm9, %v7906_v26, 128  ;;  %vm4069_vm15 = vcmp.eq.f32.partialorder %v8092_v55, %v4017_v63  ;;  %vm3363_vm1 = vcmp.eq.f32.partialorder %v8096_v36, %v3312_v52 }
 0x5b3   :  { %v3542_v27 = vshra.s32 %v8519_v56, 16 }
 0x5b4   :  { %10373 = vst [vmem:[#allocation31_spill] sm:$0xff] %v8505_v20  ;;  %3517 = vmin.xlane.f32.xlu0 %v8503_v13  ;;  %4266 = vmin.xlane.f32.xlu1 %v8505_v20  ;;  %v8529_v20 = vcvt.s32.f32 %v3528_v58 }
 0x5b5   :  { %v4019_v17 = vpop.xlane.xlu0 %4018  ;;  %v3314_v10 = vpop.xlane.xlu1 %3313  ;;  %v8541_v15 = vcvt.s32.f32 %v3542_v27 }
 0x5b6   :  { %vm4070_vm10 = vcmp.eq.f32.partialorder %v8110_v33, %v4019_v17  ;;  %v8535_v17 = vsel %vm4067_vm11, %v7906_v26, 128  ;;  %vm3364_vm2 = vcmp.eq.f32.partialorder %v8106_v3, %v3314_v10 }
 0x5b7   :  { %v8522_v14 = vsel %vm4070_vm10, %v7906_v26, 128  ;;  %10377 = vst [vmem:[#allocation51_spill] sm:$0xff] %v8535_v17  ;;  %v4249_v58 = vshra.s32 %v8535_v17, 16  ;;  %v8561_v17 = vsel %vm3362_vm14, %v7906_v26, 128 }
 0x5b8   :  { %10375 = vst [vmem:[#allocation27_spill] sm:$0xff] %v8522_v14  ;;  %4224 = vmin.xlane.f32.xlu0 %v8515_v53  ;;  %v4291_v51 = vshra.s32 %v8522_v14, 16 }
 0x5b9   :  { %v8527_v40 = vpop.xlane.xlu0 %3315  ;;  %v4021_v29 = vpop.xlane.xlu1 %4020 }
 0x5ba   :  { %v8531_v33 = vcvt.s32.f32 %v4291_v51  ;;  %v8545_v51 = vsel %vm3361_vm12, %v7906_v26, 128  ;;  %vm4071_vm4 = vcmp.eq.f32.partialorder %v8120_v37, %v4021_v29  ;;  %vm3365_vm5 = vcmp.eq.f32.partialorder %v8124_v43, %v8527_v40 }
 0x5bb   :  { %10378 = vst [vmem:[#allocation46_spill] sm:$0xff] %v8545_v51 }
 0x5bc   :  { %10376 = vst [vmem:[#allocation47_spill] sm:$0xff] %v8531_v33  ;;  %3531 = vmin.xlane.f32.xlu0 %v8529_v20  ;;  %4294 = vmin.xlane.f32.xlu1 %v8531_v33 }
 0x5bd   :  { %v4023_v44 = vpop.xlane.xlu0 %4022 }
 0x5be   :  { %vm4072_vm13 = vcmp.eq.f32.partialorder %v8138_v35, %v4023_v44  ;;  %v8555_v35 = vcvt.s32.f32 %v4249_v58  ;;  %v3556_v44 = vshra.s32 %v8545_v51, 16  ;;  %v3570_v58 = vshra.s32 %v8561_v17, 16 }
 0x5bf   :  { %v8548_v14 = vsel %vm4072_vm13, %v7906_v26, 128 }
 0x5c0   :  { %10379 = vst [vmem:[#allocation49_spill] sm:$0xff] %v8548_v14  ;;  %3545 = vmin.xlane.f32.xlu0 %v8541_v15  ;;  %v4319_v38 = vshra.s32 %v8548_v14, 16  ;;  %v8567_v61 = vcvt.s32.f32 %v3556_v44  ;;  %v3318_v14 = vpop.xlane.xlu1 %3317  ;;  %v8582_v44 = vcvt.s32.f32 %v3570_v58  ;;  %v8597_v58 = vsel %vm3364_vm2, %v7906_v26, 128 }
 0x5c1   :  { %v8553_v33 = vpop.xlane.xlu0 %3319  ;;  %10385 = vst [vmem:[#allocation94_spill] sm:$0xff] %v8597_v58  ;;  %vm3366_vm7 = vcmp.eq.f32.partialorder %v8134_v22, %v3318_v14 }
 0x5c2   :  { %v8557_v27 = vcvt.s32.f32 %v4319_v38  ;;  %v8571_v38 = vsel %vm4069_vm15, %v7906_v26, 128  ;;  %vm3367_vm10 = vcmp.eq.f32.partialorder %v8152_v59, %v8553_v33 }
 0x5c3   :  { %10381 = vst [vmem:[#allocation90_spill] sm:$0xff] %v8571_v38 }
 0x5c4   :  { %10380 = vst [vmem:[#allocation89_spill] sm:$0xff] %v8557_v27  ;;  %4252 = vmin.xlane.f32.xlu0 %v8555_v35  ;;  %4322 = vmin.xlane.f32.xlu1 %v8557_v27  ;;  %v8587_v27 = vsel %vm3363_vm1, %v7906_v26, 128  ;;  %v4025_v36 = vpop.xlane.xlu1 %4024 }
 0x5c5   :  { %v4027_v5 = vpop.xlane.xlu0 %4026  ;;  %10384 = vst [vmem:[#allocation93_spill] sm:$0xff] %v8587_v27  ;;  %vm4073_vm8 = vcmp.eq.f32.partialorder %v8148_v8, %v4025_v36 }
 0x5c6   :  { %vm4074_vm0 = vcmp.eq.f32.partialorder %v8166_v0, %v4027_v5  ;;  %v4277_v0 = vshra.s32 %v8571_v38, 16 }
 0x5c7   :  { %v8574_v51 = vsel %vm4074_vm0, %v7906_v26, 128 }
 0x5c8   :  { %10382 = vst [vmem:[#allocation91_spill] sm:$0xff] %v8574_v51  ;;  %3559 = vmin.xlane.f32.xlu0 %v8567_v61  ;;  %v4347_v55 = vshra.s32 %v8574_v51, 16  ;;  %v3584_v51 = vshra.s32 %v8587_v27, 16  ;;  %v8594_v38 = vcvt.s32.f32 %v4277_v0  ;;  %v3598_v27 = vshra.s32 %v8597_v58, 16 }
 0x5c9   :  { %v8579_v63 = vpop.xlane.xlu0 %3323  ;;  %v8613_v0 = vsel %vm4071_vm4, %v7906_v26, 128 }
 0x5ca   :  { %v8584_v5 = vcvt.s32.f32 %v4347_v55  ;;  %10387 = vst [vmem:[#allocation96_spill] sm:$0xff] %v8613_v0  ;;  %v4305_v29 = vshra.s32 %v8613_v0, 16  ;;  %vm3369_vm15 = vcmp.eq.f32.partialorder %v8180_v6, %v8579_v63 }
 0x5cc   :  { %10383 = vst [vmem:[#allocation92_spill] sm:$0xff] %v8584_v5  ;;  %3573 = vmin.xlane.f32.xlu0 %v8582_v44  ;;  %4350 = vmin.xlane.f32.xlu1 %v8584_v5  ;;  %v8608_v5 = vcvt.s32.f32 %v3584_v51  ;;  %v8621_v51 = vcvt.s32.f32 %v3598_v27 }
 0x5cd   :  { %v4031_v52 = vpop.xlane.xlu0 %4030 }
 0x5ce   :  { %vm4076_vm3 = vcmp.eq.f32.partialorder %v8194_v57, %v4031_v52  ;;  %v3322_v52 = vpop.xlane.xlu1 %3321  ;;  %10388 = vst [vmem:[#allocation97_spill] sm:$0xff] %v8621_v51 }
 0x5cf   :  { %v8600_v55 = vsel %vm4076_vm3, %v7906_v26, 128  ;;  %vm3368_vm11 = vcmp.eq.f32.partialorder %v8162_v30, %v3322_v52 }
 0x5d0   :  { %4280 = vmin.xlane.f32.xlu0 %v8594_v38  ;;  %v4375_v3 = vshra.s32 %v8600_v55, 16 }
 0x5d1   :  { %v8605_v10 = vpop.xlane.xlu0 %3327 }
 0x5d2   :  { %v8610_v57 = vcvt.s32.f32 %v4375_v3  ;;  %v8624_v3 = vsel %vm3365_vm5, %v7906_v26, 128  ;;  %v4029_v40 = vpop.xlane.xlu1 %4028 }
 0x5d3   :  { %10389 = vst [vmem:[#allocation98_spill] sm:$0xff] %v8624_v3  ;;  %v3612_v0 = vshra.s32 %v8624_v3, 16  ;;  %vm4075_vm13 = vcmp.eq.f32.partialorder %v8176_v25, %v4029_v40 }
 0x5d4   :  { %10386 = vst [vmem:[#allocation95_spill] sm:$0xff] %v8610_v57  ;;  %3587 = vmin.xlane.f32.xlu0 %v8608_v5  ;;  %4378 = vmin.xlane.f32.xlu1 %v8610_v57 }
 0x5d5   :  { %v4035_v37 = vpop.xlane.xlu0 %4034 }
 0x5d6   :  { %vm4078_vm6 = vcmp.eq.f32.partialorder %v8222_v24, %v4035_v37  ;;  %v8635_v24 = vcvt.s32.f32 %v4305_v29  ;;  %v8640_v37 = vsel %vm3366_vm7, %v7906_v26, 128  ;;  %v8650_v29 = vsel %vm4073_vm8, %v7906_v26, 128 }
 0x5d7   :  { %v8627_v58 = vsel %vm4078_vm6, %v7906_v26, 128  ;;  %10390 = vst [vmem:[#allocation99_spill] sm:$0xff] %v8640_v37  ;;  %v3626_v14 = vshra.s32 %v8640_v37, 16  ;;  %10392 = vst [vmem:[#allocation101_spill] sm:$0xff] %v8650_v29  ;;  %v8667_v37 = vsel %vm3367_vm10, %v7906_v26, 128 }
 0x5d8   :  { %3601 = vmin.xlane.f32.xlu0 %v8621_v51  ;;  %v4403_v43 = vshra.s32 %v8627_v58, 16  ;;  %v8647_v51 = vcvt.s32.f32 %v3612_v0  ;;  %10395 = vst [vmem:[#allocation104_spill] sm:$0xff] %v8667_v37 }
 0x5d9   :  { %v8632_v57 = vpop.xlane.xlu0 %3331  ;;  %v8662_v0 = vcvt.s32.f32 %v3626_v14  ;;  %v8677_v14 = vsel %vm3368_vm11, %v7906_v26, 128 }
 0x5da   :  { %v8637_v27 = vcvt.s32.f32 %v4403_v43  ;;  %10391 = vst [vmem:[#allocation100_spill] sm:$0xff] %v8647_v51  ;;  %v3326_v43 = vpop.xlane.xlu1 %3325 }
 0x5db   :  { %10393 = vst [vmem:[#allocation102_spill] sm:$0xff] %v8662_v0  ;;  %vm3370_vm1 = vcmp.eq.f32.partialorder %v8190_v12, %v3326_v43 }
 0x5dc   :  { %4308 = vmin.xlane.f32.xlu0 %v8635_v24  ;;  %4406 = vmin.xlane.f32.xlu1 %v8637_v27 }
 0x5dd   :  { %v4039_v22 = vpop.xlane.xlu0 %4038 }
 0x5de   :  { %vm4080_vm9 = vcmp.eq.f32.partialorder %v8250_v11, %v4039_v22  ;;  %v4333_v11 = vshra.s32 %v8650_v29, 16  ;;  %v4033_v59 = vpop.xlane.xlu1 %4032 }
 0x5df   :  { %v8653_v3 = vsel %vm4080_vm9, %v7906_v26, 128  ;;  %vm4077_vm3 = vcmp.eq.f32.partialorder %v8204_v50, %v4033_v59  ;;  %v10405_v59 = vld [vmem:[#allocation42_spill] sm:$0xff] }
 0x5e0   :  { %3615 = vmin.xlane.f32.xlu0 %v8647_v51  ;;  %v4431_v8 = vshra.s32 %v8653_v3, 16  ;;  %v3640_v51 = vshra.s32 %v8667_v37, 16  ;;  %v8674_v29 = vcvt.s32.f32 %v4333_v11  ;;  %vm3371_vm5 = vcmp.eq.f32.partialorder %v10405_v59, %v8605_v10  ;;  %v10409_v59 = vld [vmem:[#allocation22_spill] sm:$0xff] }
 0x5e1   :  { %v8659_v36 = vpop.xlane.xlu0 %3335 }
 0x5e2   :  { %v8664_v22 = vcvt.s32.f32 %v4431_v8  ;;  %v3330_v37 = vpop.xlane.xlu1 %3329 }
 0x5e3   :  { %vm3372_vm7 = vcmp.eq.f32.partialorder %v10409_v59, %v3330_v37  ;;  %v10413_v59 = vld [vmem:[#allocation25_spill] sm:$0xff] }
 0x5e4   :  { %10394 = vst [vmem:[#allocation103_spill] sm:$0xff] %v8664_v22  ;;  %3629 = vmin.xlane.f32.xlu0 %v8662_v0  ;;  %4434 = vmin.xlane.f32.xlu1 %v8664_v22  ;;  %v3654_v22 = vshra.s32 %v8677_v14, 16 }
 0x5e5   :  { %v4043_v33 = vpop.xlane.xlu0 %4042 }
 0x5e6   :  { %vm4082_vm12 = vcmp.eq.f32.partialorder %v8278_v49, %v4043_v33  ;;  %v8687_v49 = vcvt.s32.f32 %v3640_v51  ;;  %v8692_v33 = vsel %vm4075_vm13, %v7906_v26, 128  ;;  %v8704_v40 = vcvt.s32.f32 %v3654_v22 }
 0x5e7   :  { %v8680_v8 = vsel %vm4082_vm12, %v7906_v26, 128  ;;  %10397 = vst [vmem:[#allocation106_spill] sm:$0xff] %v8692_v33  ;;  %v4361_v51 = vshra.s32 %v8692_v33, 16  ;;  %v4037_v33 = vpop.xlane.xlu1 %4036 }
 0x5e8   :  { %4336 = vmin.xlane.f32.xlu0 %v8674_v29  ;;  %v4459_v30 = vshra.s32 %v8680_v8, 16  ;;  %vm4079_vm9 = vcmp.eq.f32.partialorder %v10413_v59, %v4037_v33 }
 0x5e9   :  { %v3340_v52 = vpop.xlane.xlu0 %3339 }
 0x5ea   :  { %vm3377_vm14 = vcmp.eq.f32.partialorder %v8292_v46, %v3340_v52  ;;  %v8689_v11 = vcvt.s32.f32 %v4459_v30  ;;  %v8709_v52 = vsel %vm3369_vm15, %v7906_v26, 128 }
 0x5eb   :  { %v8695_v0 = vsel %vm3377_vm14, %v7906_v26, 128  ;;  %10399 = vst [vmem:[#allocation108_spill] sm:$0xff] %v8709_v52  ;;  %v3668_v22 = vshra.s32 %v8709_v52, 16 }
 0x5ec   :  { %10396 = vst [vmem:[#allocation105_spill] sm:$0xff] %v8689_v11  ;;  %3643 = vmin.xlane.f32.xlu0 %v8687_v49  ;;  %4462 = vmin.xlane.f32.xlu1 %v8689_v11  ;;  %v3780_v25 = vshra.s32 %v8695_v0, 16  ;;  %v8725_v11 = vsel %vm3370_vm1, %v7906_v26, 128 }
 0x5ed   :  { %v4047_v46 = vpop.xlane.xlu0 %4046  ;;  %10401 = vst [vmem:[#allocation110_spill] sm:$0xff] %v8725_v11 }
 0x5ee   :  { %vm4084_vm0 = vcmp.eq.f32.partialorder %v8306_v42, %v4047_v46  ;;  %v8706_v30 = vcvt.s32.f32 %v3780_v25  ;;  %v8720_v25 = vcvt.s32.f32 %v4361_v51  ;;  %v8736_v51 = vcvt.s32.f32 %v3668_v22 }
 0x5ef   :  { %v8712_v6 = vsel %vm4084_vm0, %v7906_v26, 128 }
 0x5f0   :  { %10398 = vst [vmem:[#allocation107_spill] sm:$0xff] %v8706_v30  ;;  %3657 = vmin.xlane.f32.xlu0 %v8704_v40  ;;  %3783 = vmin.xlane.f32.xlu1 %v8706_v30  ;;  %v4487_v63 = vshra.s32 %v8712_v6, 16  ;;  %10402 = vst [vmem:[#allocation111_spill] sm:$0xff] %v8736_v51  ;;  %v3334_v30 = vpop.xlane.xlu1 %3333 }
 0x5f1   :  { %v3344_v42 = vpop.xlane.xlu0 %3343 }
 0x5f2   :  { %vm3379_vm2 = vcmp.eq.f32.partialorder %v8320_v7, %v3344_v42  ;;  %v8722_v46 = vcvt.s32.f32 %v4487_v63  ;;  %v3682_v7 = vshra.s32 %v8725_v11, 16  ;;  %v8741_v42 = vsel %vm4077_vm3, %v7906_v26, 128 }
 0x5f3   :  { %v8728_v12 = vsel %vm3379_vm2, %v7906_v26, 128  ;;  %10404 = vst [vmem:[#allocation113_spill] sm:$0xff] %v8741_v42  ;;  %v4389_v22 = vshra.s32 %v8741_v42, 16 }
 0x5f4   :  { %10400 = vst [vmem:[#allocation109_spill] sm:$0xff] %v8722_v46  ;;  %4364 = vmin.xlane.f32.xlu0 %v8720_v25  ;;  %4490 = vmin.xlane.f32.xlu1 %v8722_v46  ;;  %v3808_v43 = vshra.s32 %v8728_v12, 16  ;;  %v8758_v46 = vsel %vm3371_vm5, %v7906_v26, 128  ;;  %v4041_v42 = vpop.xlane.xlu1 %4040 }
 0x5f5   :  { %v4051_v52 = vpop.xlane.xlu0 %4050  ;;  %10408 = vst [vmem:[#allocation115_spill] sm:$0xff] %v8758_v46 }
 0x5f6   :  { %vm4086_vm4 = vcmp.eq.f32.partialorder %v8334_v32, %v4051_v52  ;;  %v8738_v63 = vcvt.s32.f32 %v3808_v43  ;;  %v8753_v43 = vcvt.s32.f32 %v3682_v7  ;;  %v3696_v7 = vshra.s32 %v8758_v46, 16 }
 0x5f7   :  { %v8744_v50 = vsel %vm4086_vm4, %v7906_v26, 128 }
 0x5f8   :  { %10403 = vst [vmem:[#allocation112_spill] sm:$0xff] %v8738_v63  ;;  %3671 = vmin.xlane.f32.xlu0 %v8736_v51  ;;  %3811 = vmin.xlane.f32.xlu1 %v8738_v63  ;;  %v4515_v32 = vshra.s32 %v8744_v50, 16  ;;  %10406 = vst [vmem:[#allocation42_spill] sm:$0xff] %v8753_v43  ;;  %v8774_v63 = vsel %vm3372_vm7, %v7906_v26, 128  ;;  %v3338_v46 = vpop.xlane.xlu1 %3337 }
 0x5f9   :  { %v3348_v52 = vpop.xlane.xlu0 %3347  ;;  %10412 = vst [vmem:[#allocation117_spill] sm:$0xff] %v8774_v63 }
 0x5fa   :  { %vm3381_vm6 = vcmp.eq.f32.partialorder %v8348_v62, %v3348_v52  ;;  %v8755_v11 = vcvt.s32.f32 %v4515_v32  ;;  %v8769_v32 = vcvt.s32.f32 %v4389_v22  ;;  %v8784_v22 = vcvt.s32.f32 %v3696_v7 }
 0x5fb   :  { %v8761_v10 = vsel %vm3381_vm6, %v7906_v26, 128 }
 0x5fc   :  { %10407 = vst [vmem:[#allocation114_spill] sm:$0xff] %v8755_v11  ;;  %v3836_v51 = vshra.s32 %v8761_v10, 16  ;;  %3685 = vmin.xlane.f32.xlu0 %v8753_v43  ;;  %4518 = vmin.xlane.f32.xlu1 %v8755_v11  ;;  %10410 = vst [vmem:[#allocation22_spill] sm:$0xff] %v8769_v32  ;;  %v10416_v11 = vld [vmem:[#allocation44_spill] sm:$0xff] }
 0x5fd   :  { %v4055_v62 = vpop.xlane.xlu0 %4054  ;;  %10414 = vst [vmem:[#allocation25_spill] sm:$0xff] %v8784_v22  ;;  %vm3373_vm10 = vcmp.eq.f32.partialorder %v10416_v11, %v8632_v57  ;;  %v10422_v11 = vld [vmem:[#allocation32_spill] sm:$0xff] }
 0x5fe   :  { %vm4088_vm8 = vcmp.eq.f32.partialorder %v8359_v31, %v4055_v62  ;;  %v8771_v52 = vcvt.s32.f32 %v3836_v51  ;;  %v3710_v31 = vshra.s32 %v8774_v63, 16  ;;  %v8789_v62 = vsel %vm4079_vm9, %v7906_v26, 128  ;;  %v4045_v63 = vpop.xlane.xlu1 %4044 }
 0x5ff   :  { %v8777_v37 = vsel %vm4088_vm8, %v7906_v26, 128  ;;  %10415 = vst [vmem:[#allocation118_spill] sm:$0xff] %v8789_v62  ;;  %v4417_v33 = vshra.s32 %v8789_v62, 16  ;;  %v8799_v7 = vsel %vm3373_vm10, %v7906_v26, 128  ;;  %vm4081_vm12 = vcmp.eq.f32.partialorder %v10422_v11, %v4041_v42 }
 0x600   :  { %10411 = vst [vmem:[#allocation116_spill] sm:$0xff] %v8771_v52  ;;  %v4543_v43 = vshra.s32 %v8777_v37, 16  ;;  %4392 = vmin.xlane.f32.xlu0 %v8769_v32  ;;  %3839 = vmin.xlane.f32.xlu1 %v8771_v52  ;;  %v8796_v59 = vcvt.s32.f32 %v3710_v31  ;;  %10418 = vst [vmem:[#allocation119_spill] sm:$0xff] %v8799_v7  ;;  %v3724_v32 = vshra.s32 %v8799_v7, 16 }
 0x601   :  { %v8804_v52 = vcvt.s32.f32 %v4417_v33  ;;  %v3415_v33 = vand.u32 65535, %v8370_v1 }
 0x602   :  { %v8786_v51 = vcvt.s32.f32 %v4543_v43  ;;  %10417 = vst [vmem:[#allocation44_spill] sm:$0xff] %v8796_v59  ;;  %v10419_v43 = vld [vmem:[#allocation26_spill] sm:$0xff]  ;;  %v8812_v62 = vcvt.s32.f32 %v3724_v32  ;;  %v10426_v32 = vld [vmem:[#allocation41_spill] sm:$0xff] }
 0x603   :  { %vm3374_vm11 = vcmp.eq.f32.partialorder %v10419_v43, %v3334_v30  ;;  %10420 = vst [vmem:[#allocation26_spill] sm:$0xff] %v8804_v52  ;;  %v8815_v30 = vsel %vm4081_vm12, %v7906_v26, 128  ;;  %v3342_v43 = vpop.xlane.xlu1 %3341  ;;  %vm3376_vm14 = vcmp.eq.f32.partialorder %v10426_v32, %v3338_v46  ;;  %v3429_v46 = vand.u32 65535, %v8389_v41 }
 0x604   :  { %3699 = vmin.xlane.f32.xlu0 %v8784_v22  ;;  %4546 = vmin.xlane.f32.xlu1 %v8786_v51  ;;  %v8807_v57 = vsel %vm3374_vm11, %v7906_v26, 128  ;;  %10423 = vst [vmem:[#allocation32_spill] sm:$0xff] %v8815_v30  ;;  %v4445_v7 = vshra.s32 %v8815_v30, 16  ;;  %v3417_v22 = vcvt.s32.f32 %v3415_v33  ;;  %v8837_v1 = vsel %vm3376_vm14, %v7906_v26, 128  ;;  %v10428_v30 = vld [vmem:[#allocation55_spill] sm:$0xff] }
 0x605   :  { %10421 = vst [vmem:[#allocation120_spill] sm:$0xff] %v8807_v57  ;;  %v3738_v31 = vshra.s32 %v8807_v57, 16  ;;  %10427 = vst [vmem:[#allocation41_spill] sm:$0xff] %v8837_v1  ;;  %vm4083_vm0 = vcmp.eq.f32.partialorder %v10428_v30, %v4045_v63  ;;  %v3766_v33 = vshra.s32 %v8837_v1, 16  ;;  %v3431_v30 = vcvt.s32.f32 %v3429_v46 }
 0x607   :  { %v8822_v42 = vcvt.s32.f32 %v3738_v31  ;;  %v4049_v57 = vpop.xlane.xlu1 %4048  ;;  %v8854_v41 = vcvt.s32.f32 %v3766_v33 }
 0x608   :  { %3713 = vmin.xlane.f32.xlu0 %v8796_v59  ;;  %v10424_v59 = vld [vmem:[#allocation33_spill] sm:$0xff]  ;;  %vm4085_vm3 = vcmp.eq.f32.partialorder %v8316_v16, %v4049_v57 }
 0x609   :  { %vm3375_vm13 = vcmp.eq.f32.partialorder %v10424_v59, %v8659_v36  ;;  %v8832_v59 = vcvt.s32.f32 %v4445_v7  ;;  %v8846_v7 = vsel %vm4083_vm0, %v7906_v26, 128 }
 0x60a   :  { %v8825_v11 = vsel %vm3375_vm13, %v7906_v26, 128  ;;  %10429 = vst [vmem:[#allocation55_spill] sm:$0xff] %v8846_v7 }
 0x60b   :  { %10425 = vst [vmem:[#allocation33_spill] sm:$0xff] %v8825_v11  ;;  %v3752_v36 = vshra.s32 %v8825_v11, 16  ;;  %v3346_v11 = vpop.xlane.xlu1 %3345 }
 0x60c   :  { %4420 = vmin.xlane.f32.xlu0 %v8804_v52  ;;  %vm3380_vm5 = vcmp.eq.f32.partialorder %v8330_v19, %v3346_v11  ;;  %v10434_v11 = vld [vmem:[#allocation68_spill] sm:$0xff] }
 0x60d   :  { %v8843_v32 = vcvt.s32.f32 %v3752_v36 }
 0x610   :  { %3727 = vmin.xlane.f32.xlu0 %v8812_v62 }
 0x614   :  { %3741 = vmin.xlane.f32.xlu0 %v8822_v42 }
 0x615   :  { %v8829_v52 = vpop.xlane.xlu0 %3419 }
 0x616   :  { %vm3421_vm15 = vcmp.eq.f32.partialorder %v8374_v34, %v8829_v52  ;;  %v10430_v34 = vld [vmem:[#allocation64_spill] sm:$0xff] }
 0x617   :  { %v3422_v31 = vsel %vm3421_vm15, %v3417_v22, inf  ;;  %vm3378_vm1 = vcmp.eq.f32.partialorder %v10430_v34, %v3342_v43  ;;  %v4136_v22 = vand.u32 65535, %v8386_v2  ;;  %v3443_v2 = vand.u32 65535, %v8399_v54  ;;  %v4053_v43 = vpop.xlane.xlu1 %4052 }
 0x618   :  { %4448 = vmin.xlane.f32.xlu0 %v8832_v59  ;;  %3423 = vmin.xlane.f32.xlu1 %v3422_v31  ;;  %v4473_v31 = vshra.s32 %v8846_v7, 16  ;;  %v8859_v36 = vsel %vm3378_vm1, %v7906_v26, 128  ;;  %v3457_v54 = vand.u32 65535, %v8413_v9  ;;  %vm4087_vm7 = vcmp.eq.f32.partialorder %v10434_v11, %v4053_v43  ;;  %v10435_v9 = vld [vmem:[#allocation77_spill] sm:$0xff] }
 0x619   :  { %v4138_v34 = vcvt.s32.f32 %v4136_v22  ;;  %v3794_v33 = vshra.s32 %v8859_v36, 16  ;;  %v10439_v43 = vld [vmem:[#allocation65_spill] sm:$0xff] }
 0x61a   :  { %v8867_v7 = vcvt.s32.f32 %v4473_v31 }
 0x61b   :  { %v3350_v31 = vpop.xlane.xlu1 %3349 }
 0x61c   :  { %3755 = vmin.xlane.f32.xlu0 %v8843_v32  ;;  %10431 = vst [vmem:[#allocation64_spill] sm:$0xff] %v8867_v7  ;;  %vm3382_vm9 = vcmp.eq.f32.partialorder %v10439_v43, %v3350_v31 }
 0x61d   :  { %v8851_v63 = vpop.xlane.xlu0 %3433 }
 0x61e   :  { %vm3435_vm2 = vcmp.eq.f32.partialorder %v8395_v4, %v8851_v63  ;;  %v8872_v4 = vsel %vm4085_vm3, %v7906_v26, 128 }
 0x61f   :  { %v3436_v1 = vsel %vm3435_vm2, %v3431_v30, inf  ;;  %10432 = vst [vmem:[#allocation121_spill] sm:$0xff] %v8872_v4  ;;  %v4501_v22 = vshra.s32 %v8872_v4, 16  ;;  %v8880_v30 = vcvt.s32.f32 %v3794_v33  ;;  %v4057_v11 = vpop.xlane.xlu1 %4056 }
 0x620   :  { %3769 = vmin.xlane.f32.xlu0 %v8854_v41  ;;  %3437 = vmin.xlane.f32.xlu1 %v3436_v1  ;;  %v3445_v1 = vcvt.s32.f32 %v3443_v2 }
 0x621   :  { %v8864_v46 = vpop.xlane.xlu0 %4140  ;;  %v8893_v4 = vcvt.s32.f32 %v4501_v22 }
 0x622   :  { %vm4142_vm4 = vcmp.eq.f32.partialorder %v8407_v21, %v8864_v46  ;;  %v8885_v21 = vsel %vm3380_vm5, %v7906_v26, 128 }
 0x623   :  { %v4143_v16 = vsel %vm4142_vm4, %v4138_v34, inf  ;;  %10433 = vst [vmem:[#allocation122_spill] sm:$0xff] %v8885_v21  ;;  %v4164_v34 = vand.u32 65535, %v10435_v9  ;;  %v3822_v33 = vshra.s32 %v8885_v21, 16  ;;  %10436 = vst [vmem:[#allocation68_spill] sm:$0xff] %v8893_v4 }
 0x624   :  { %4476 = vmin.xlane.f32.xlu0 %v8867_v7  ;;  %4144 = vmin.xlane.f32.xlu1 %v4143_v16  ;;  %v3459_v16 = vcvt.s32.f32 %v3457_v54  ;;  %v8898_v7 = vsel %vm4087_vm7, %v7906_v26, 128 }
 0x625   :  { %v8877_v57 = vpop.xlane.xlu0 %3447  ;;  %10438 = vst [vmem:[#allocation77_spill] sm:$0xff] %v8898_v7  ;;  %v4166_v9 = vcvt.s32.f32 %v4164_v34  ;;  %v4529_v22 = vshra.s32 %v8898_v7, 16  ;;  %v8906_v21 = vcvt.s32.f32 %v3822_v33 }
 0x626   :  { %vm3449_vm6 = vcmp.eq.f32.partialorder %v8419_v18, %v8877_v57  ;;  %v10437_v18 = vld [vmem:[#allocation76_spill] sm:$0xff] }
 0x627   :  { %v3450_v19 = vsel %vm3449_vm6, %v3445_v1, inf  ;;  %10440 = vst [vmem:[#allocation76_spill] sm:$0xff] %v8906_v21  ;;  %v8919_v7 = vcvt.s32.f32 %v4529_v22 }
 0x628   :  { %3797 = vmin.xlane.f32.xlu0 %v8880_v30  ;;  %3451 = vmin.xlane.f32.xlu1 %v3450_v19  ;;  %v3471_v19 = vand.u32 65535, %v8437_v39  ;;  %v10443_v39 = vld [vmem:[#allocation82_spill] sm:$0xff] }
 0x629   :  { %v8890_v2 = vpop.xlane.xlu0 %3461 }
 0x62a   :  { %vm3463_vm8 = vcmp.eq.f32.partialorder %v10437_v18, %v8890_v2  ;;  %v10442_v18 = vld [vmem:[#allocation67_spill] sm:$0xff]  ;;  %v3473_v34 = vcvt.s32.f32 %v3471_v19 }
 0x62b   :  { %v3464_v1 = vsel %vm3463_vm8, %v3459_v16, inf  ;;  %v8911_v16 = vsel %vm3382_vm9, %v7906_v26, 128  ;;  %vm4089_vm11 = vcmp.eq.f32.partialorder %v10442_v18, %v4057_v11  ;;  %10444 = vst [vmem:[#allocation67_spill] sm:$0xff] %v8919_v7  ;;  %v4192_v11 = vand.u32 65535, %v8461_v48 }
 0x62c   :  { %4504 = vmin.xlane.f32.xlu0 %v8893_v4  ;;  %3465 = vmin.xlane.f32.xlu1 %v3464_v1  ;;  %10441 = vst [vmem:[#allocation65_spill] sm:$0xff] %v8911_v16  ;;  %v3485_v1 = vand.u32 65535, %v10443_v39  ;;  %v3850_v33 = vshra.s32 %v8911_v16, 16  ;;  %v8924_v4 = vsel %vm4089_vm11, %v7906_v26, 128  ;;  %v8938_v16 = vpop.xlane.xlu1 %4126 }
 0x62d   :  { %v8903_v54 = vpop.xlane.xlu0 %4168  ;;  %v4557_v19 = vshra.s32 %v8924_v4, 16 }
 0x62e   :  { %vm4170_vm10 = vcmp.eq.f32.partialorder %v8443_v60, %v8903_v54  ;;  %v10445_v60 = vld [vmem:[#allocation81_spill] sm:$0xff]  ;;  %v3487_v18 = vcvt.s32.f32 %v3485_v1  ;;  %v8931_v39 = vcvt.s32.f32 %v3850_v33  ;;  %v4194_v1 = vcvt.s32.f32 %v4192_v11 }
 0x62f   :  { %v4171_v31 = vsel %vm4170_vm10, %v4166_v9, inf  ;;  %10449 = vst [vmem:[#allocation81_spill] sm:$0xff] %v8938_v16 }
 0x630   :  { %3825 = vmin.xlane.f32.xlu0 %v8906_v21  ;;  %4172 = vmin.xlane.f32.xlu1 %v4171_v31  ;;  %10446 = vst [vmem:[#allocation82_spill] sm:$0xff] %v8931_v39  ;;  %v8942_v21 = vcvt.s32.f32 %v4557_v19 }
 0x631   :  { %v8916_v43 = vpop.xlane.xlu0 %3475 }
 0x632   :  { %vm3477_vm12 = vcmp.eq.f32.partialorder %v10445_v60, %v8916_v43 }
 0x633   :  { %v3478_v9 = vsel %vm3477_vm12, %v3473_v34, inf  ;;  %v10447_v34 = vld [vmem:[#allocation71_spill] sm:$0xff] }
 0x634   :  { %4532 = vmin.xlane.f32.xlu0 %v8919_v7  ;;  %3479 = vmin.xlane.f32.xlu1 %v3478_v9  ;;  %v4122_v60 = vand.u32 65535, %v10447_v34  ;;  %v10448_v7 = vld [vmem:[#allocation86_spill] sm:$0xff]  ;;  %v8951_v34 = vpop.xlane.xlu1 %4154 }
 0x635   :  { %v8928_v31 = vpop.xlane.xlu0 %3489  ;;  %v3499_v9 = vand.u32 65535, %v10448_v7  ;;  %10451 = vst [vmem:[#allocation86_spill] sm:$0xff] %v8942_v21  ;;  %v3513_v7 = vand.u32 65535, %v8485_v45 }
 0x636   :  { %vm3491_vm13 = vcmp.eq.f32.partialorder %v8467_v23, %v8928_v31  ;;  %v10452_v23 = vld [vmem:[#allocation74_spill] sm:$0xff]  ;;  %v4124_v11 = vcvt.s32.f32 %v4122_v60 }
 0x637   :  { %v3492_v22 = vsel %vm3491_vm13, %v3487_v18, inf  ;;  %vm4128_vm15 = vcmp.eq.f32.partialorder %v10452_v23, %v8938_v16  ;;  %v10453_v18 = vld [vmem:[#allocation70_spill] sm:$0xff]  ;;  %10454 = vst [vmem:[#allocation74_spill] sm:$0xff] %v8951_v34  ;;  %v3501_v19 = vcvt.s32.f32 %v3499_v9  ;;  %v10456_v23 = vld [vmem:[#allocation80_spill] sm:$0xff]  ;;  %v3515_v9 = vcvt.s32.f32 %v3513_v7 }
 0x638   :  { %3853 = vmin.xlane.f32.xlu0 %v8931_v39  ;;  %3493 = vmin.xlane.f32.xlu1 %v3492_v22  ;;  %v4150_v22 = vand.u32 65535, %v10453_v18  ;;  %v4178_v18 = vand.u32 65535, %v10456_v23  ;;  %v8961_v16 = vpop.xlane.xlu1 %4182 }
 0x639   :  { %v8940_v48 = vpop.xlane.xlu0 %4196 }
 0x63a   :  { %10450 = vst [vmem:[#allocation71_spill] sm:$0xff] %v8940_v48  ;;  %vm4198_vm14 = vcmp.eq.f32.partialorder %v8479_v47, %v8940_v48  ;;  %v4129_v47 = vsel %vm4128_vm15, %v4124_v11, inf  ;;  %v4152_v60 = vcvt.s32.f32 %v4150_v22  ;;  %v4180_v22 = vcvt.s32.f32 %v4178_v18 }
 0x63b   :  { %v4199_v33 = vsel %vm4198_vm14, %v4194_v1, inf }
 0x63c   :  { %4560 = vmin.xlane.f32.xlu0 %v8942_v21  ;;  %4200 = vmin.xlane.f32.xlu1 %v4199_v33  ;;  %v10455_v33 = vld [vmem:[#allocation72_spill] sm:$0xff]  ;;  %v10457_v21 = vld [vmem:[#allocation87_spill] sm:$0xff]  ;;  %v8971_v23 = vpop.xlane.xlu1 %4210 }
 0x63d   :  { %v8953_v39 = vpop.xlane.xlu0 %3503  ;;  %vm4156_vm1 = vcmp.eq.f32.partialorder %v10455_v33, %v8951_v34  ;;  %v4220_v45 = vand.u32 65535, %v10457_v21  ;;  %v10460_v33 = vld [vmem:[#allocation37_spill] sm:$0xff]  ;;  %10461 = vst [vmem:[#allocation70_spill] sm:$0xff] %v8971_v23 }
 0x63e   :  { %vm3505_vm0 = vcmp.eq.f32.partialorder %v8491_v28, %v8953_v39  ;;  %v4157_v28 = vsel %vm4156_vm1, %v4152_v60, inf  ;;  %v3527_v21 = vand.u32 65535, %v10460_v33 }
 0x63f   :  { %v3506_v1 = vsel %vm3505_vm0, %v3501_v19, inf  ;;  %v10458_v19 = vld [vmem:[#allocation78_spill] sm:$0xff]  ;;  %v4222_v7 = vcvt.s32.f32 %v4220_v45 }
 0x640   :  { %4130 = vmin.xlane.f32.xlu0 %v4129_v47  ;;  %3507 = vmin.xlane.f32.xlu1 %v3506_v1  ;;  %vm4184_vm3 = vcmp.eq.f32.partialorder %v10458_v19, %v8961_v16  ;;  %v10459_v47 = vld [vmem:[#allocation84_spill] sm:$0xff]  ;;  %v3529_v45 = vcvt.s32.f32 %v3527_v21 }
 0x641   :  { %v8963_v48 = vpop.xlane.xlu0 %3517  ;;  %v4206_v1 = vand.u32 65535, %v10459_v47  ;;  %v8981_v47 = vpop.xlane.xlu1 %4238 }
 0x642   :  { %vm3519_vm2 = vcmp.eq.f32.partialorder %v8503_v13, %v8963_v48  ;;  %v4185_v13 = vsel %vm4184_vm3, %v4180_v22, inf  ;;  %10464 = vst [vmem:[#allocation72_spill] sm:$0xff] %v8981_v47 }
 0x643   :  { %v3520_v11 = vsel %vm3519_vm2, %v3515_v9, inf  ;;  %v10462_v9 = vld [vmem:[#allocation83_spill] sm:$0xff]  ;;  %v4208_v18 = vcvt.s32.f32 %v4206_v1 }
 0x644   :  { %4158 = vmin.xlane.f32.xlu0 %v4157_v28  ;;  %3521 = vmin.xlane.f32.xlu1 %v3520_v11  ;;  %vm4212_vm5 = vcmp.eq.f32.partialorder %v10462_v9, %v8971_v23  ;;  %v3541_v28 = vand.u32 65535, %v8519_v56  ;;  %v10463_v11 = vld [vmem:[#allocation88_spill] sm:$0xff] }
 0x645   :  { %v8973_v34 = vpop.xlane.xlu0 %4224  ;;  %v4234_v19 = vand.u32 65535, %v10463_v11  ;;  %v8991_v11 = vpop.xlane.xlu1 %4266 }
 0x646   :  { %vm4226_vm4 = vcmp.eq.f32.partialorder %v8515_v53, %v8973_v34  ;;  %v4213_v53 = vsel %vm4212_vm5, %v4208_v18, inf  ;;  %v3543_v21 = vcvt.s32.f32 %v3541_v28 }
 0x647   :  { %v4227_v60 = vsel %vm4226_vm4, %v4222_v7, inf  ;;  %v10465_v7 = vld [vmem:[#allocation85_spill] sm:$0xff]  ;;  %v4236_v1 = vcvt.s32.f32 %v4234_v19 }
 0x648   :  { %4186 = vmin.xlane.f32.xlu0 %v4185_v13  ;;  %4228 = vmin.xlane.f32.xlu1 %v4227_v60  ;;  %vm4240_vm7 = vcmp.eq.f32.partialorder %v10465_v7, %v8981_v47  ;;  %v10466_v13 = vld [vmem:[#allocation51_spill] sm:$0xff]  ;;  %v10467_v60 = vld [vmem:[#allocation45_spill] sm:$0xff] }
 0x649   :  { %v8983_v33 = vpop.xlane.xlu0 %3531  ;;  %v4248_v56 = vand.u32 65535, %v10466_v13  ;;  %v4262_v9 = vand.u32 65535, %v10467_v60  ;;  %v10470_v7 = vld [vmem:[#allocation27_spill] sm:$0xff]  ;;  %v9001_v60 = vpop.xlane.xlu1 %4294 }
 0x64a   :  { %vm3533_vm6 = vcmp.eq.f32.partialorder %v8529_v20, %v8983_v33  ;;  %v4241_v20 = vsel %vm4240_vm7, %v4236_v1, inf  ;;  %v4290_v13 = vand.u32 65535, %v10470_v7  ;;  %10471 = vst [vmem:[#allocation80_spill] sm:$0xff] %v9001_v60 }
 0x64b   :  { %v3534_v22 = vsel %vm3533_vm6, %v3529_v45, inf  ;;  %v10468_v45 = vld [vmem:[#allocation31_spill] sm:$0xff]  ;;  %v4264_v19 = vcvt.s32.f32 %v4262_v9  ;;  %v4250_v28 = vcvt.s32.f32 %v4248_v56 }
 0x64c   :  { %4214 = vmin.xlane.f32.xlu0 %v4213_v53  ;;  %3535 = vmin.xlane.f32.xlu1 %v3534_v22  ;;  %vm4268_vm9 = vcmp.eq.f32.partialorder %v10468_v45, %v8991_v11  ;;  %v10469_v53 = vld [vmem:[#allocation46_spill] sm:$0xff]  ;;  %v4292_v9 = vcvt.s32.f32 %v4290_v13 }
 0x64d   :  { %v8993_v23 = vpop.xlane.xlu0 %3545  ;;  %v3555_v22 = vand.u32 65535, %v10469_v53 }
 0x64e   :  { %vm3547_vm8 = vcmp.eq.f32.partialorder %v8541_v15, %v8993_v23  ;;  %v4269_v15 = vsel %vm4268_vm9, %v4264_v19, inf }
 0x64f   :  { %v3548_v18 = vsel %vm3547_vm8, %v3543_v21, inf  ;;  %v10472_v21 = vld [vmem:[#allocation47_spill] sm:$0xff]  ;;  %v3557_v56 = vcvt.s32.f32 %v3555_v22 }
 0x650   :  { %4242 = vmin.xlane.f32.xlu0 %v4241_v20  ;;  %3549 = vmin.xlane.f32.xlu1 %v3548_v18  ;;  %vm4296_vm11 = vcmp.eq.f32.partialorder %v10472_v21, %v9001_v60  ;;  %v3569_v20 = vand.u32 65535, %v8561_v17  ;;  %v10473_v18 = vld [vmem:[#allocation49_spill] sm:$0xff] }
 0x651   :  { %v9003_v47 = vpop.xlane.xlu0 %4252  ;;  %v4318_v45 = vand.u32 65535, %v10473_v18  ;;  %v9011_v53 = vpop.xlane.xlu1 %4322 }
 0x652   :  { %vm4254_vm10 = vcmp.eq.f32.partialorder %v8555_v35, %v9003_v47  ;;  %10474 = vst [vmem:[#allocation87_spill] sm:$0xff] %v9011_v53  ;;  %v4297_v35 = vsel %vm4296_vm11, %v4292_v9, inf  ;;  %v3571_v22 = vcvt.s32.f32 %v3569_v20 }
 0x653   :  { %v4255_v1 = vsel %vm4254_vm10, %v4250_v28, inf  ;;  %v10475_v28 = vld [vmem:[#allocation89_spill] sm:$0xff]  ;;  %v4320_v13 = vcvt.s32.f32 %v4318_v45  ;;  %v10480_v45 = vld [vmem:[#allocation94_spill] sm:$0xff] }
 0x654   :  { %4270 = vmin.xlane.f32.xlu0 %v4269_v15  ;;  %4256 = vmin.xlane.f32.xlu1 %v4255_v1  ;;  %vm4324_vm13 = vcmp.eq.f32.partialorder %v10475_v28, %v9011_v53  ;;  %v10476_v15 = vld [vmem:[#allocation90_spill] sm:$0xff]  ;;  %v10477_v1 = vld [vmem:[#allocation91_spill] sm:$0xff]  ;;  %v4374_v28 = vand.u32 65535, %v8600_v55 }
 0x655   :  { %v9013_v7 = vpop.xlane.xlu0 %3559  ;;  %v4276_v17 = vand.u32 65535, %v10476_v15  ;;  %v4346_v21 = vand.u32 65535, %v10477_v1  ;;  %v10481_v55 = vld [vmem:[#allocation95_spill] sm:$0xff] }
 0x656   :  { %vm3561_vm12 = vcmp.eq.f32.partialorder %v8567_v61, %v9013_v7  ;;  %v4325_v61 = vsel %vm4324_vm13, %v4320_v13, inf  ;;  %v3597_v13 = vand.u32 65535, %v10480_v45 }
 0x657   :  { %v3562_v19 = vsel %vm3561_vm12, %v3557_v56, inf  ;;  %v10478_v56 = vld [vmem:[#allocation92_spill] sm:$0xff]  ;;  %v4348_v1 = vcvt.s32.f32 %v4346_v21  ;;  %v4278_v53 = vcvt.s32.f32 %v4276_v17 }
 0x658   :  { %4298 = vmin.xlane.f32.xlu0 %v4297_v35  ;;  %3563 = vmin.xlane.f32.xlu1 %v3562_v19  ;;  %v10479_v35 = vld [vmem:[#allocation93_spill] sm:$0xff] }
 0x659   :  { %v9021_v18 = vpop.xlane.xlu1 %4350  ;;  %v9023_v60 = vpop.xlane.xlu0 %3573  ;;  %v3583_v19 = vand.u32 65535, %v10479_v35  ;;  %v4402_v35 = vand.u32 65535, %v8627_v58 }
 0x65a   :  { %vm3575_vm14 = vcmp.eq.f32.partialorder %v8582_v44, %v9023_v60  ;;  %vm4352_vm15 = vcmp.eq.f32.partialorder %v10478_v56, %v9021_v18 }
 0x65b   :  { %v3576_v9 = vsel %vm3575_vm14, %v3571_v22, inf  ;;  %v4353_v20 = vsel %vm4352_vm15, %v4348_v1, inf  ;;  %v3585_v56 = vcvt.s32.f32 %v3583_v19 }
 0x65c   :  { %4326 = vmin.xlane.f32.xlu0 %v4325_v61  ;;  %3577 = vmin.xlane.f32.xlu1 %v3576_v9  ;;  %v4376_v9 = vcvt.s32.f32 %v4374_v28  ;;  %v10483_v28 = vld [vmem:[#allocation97_spill] sm:$0xff] }
 0x65d   :  { %v9031_v15 = vpop.xlane.xlu0 %4280 }
 0x65e   :  { %vm4282_vm0 = vcmp.eq.f32.partialorder %v8594_v38, %v9031_v15 }
 0x65f   :  { %v4283_v44 = vsel %vm4282_vm0, %v4278_v53, inf  ;;  %v10482_v53 = vld [vmem:[#allocation96_spill] sm:$0xff] }
 0x660   :  { %4354 = vmin.xlane.f32.xlu0 %v4353_v20  ;;  %4284 = vmin.xlane.f32.xlu1 %v4283_v44  ;;  %v4304_v21 = vand.u32 65535, %v10482_v53  ;;  %v3599_v20 = vcvt.s32.f32 %v3597_v13  ;;  %v4430_v53 = vand.u32 65535, %v8653_v3  ;;  %v10490_v3 = vld [vmem:[#allocation103_spill] sm:$0xff] }
 0x661   :  { %v9036_v22 = vpop.xlane.xlu1 %4378  ;;  %v9038_v61 = vpop.xlane.xlu0 %3587 }
 0x662   :  { %vm3589_vm1 = vcmp.eq.f32.partialorder %v8608_v5, %v9038_v61  ;;  %vm4380_vm2 = vcmp.eq.f32.partialorder %v10481_v55, %v9036_v22  ;;  %v10484_v5 = vld [vmem:[#allocation98_spill] sm:$0xff]  ;;  %v4306_v55 = vcvt.s32.f32 %v4304_v21 }
 0x663   :  { %v4381_v17 = vsel %vm4380_vm2, %v4376_v9, inf  ;;  %v3590_v38 = vsel %vm3589_vm1, %v3585_v56, inf  ;;  %v3611_v44 = vand.u32 65535, %v10484_v5  ;;  %v4404_v56 = vcvt.s32.f32 %v4402_v35  ;;  %v10486_v35 = vld [vmem:[#allocation100_spill] sm:$0xff] }
 0x664   :  { %4382 = vmin.xlane.f32.xlu0 %v4381_v17  ;;  %3591 = vmin.xlane.f32.xlu1 %v3590_v38  ;;  %v10485_v17 = vld [vmem:[#allocation99_spill] sm:$0xff] }
 0x665   :  { %v9046_v1 = vpop.xlane.xlu0 %3601  ;;  %v3625_v38 = vand.u32 65535, %v10485_v17  ;;  %v10491_v17 = vld [vmem:[#allocation104_spill] sm:$0xff] }
 0x666   :  { %vm3603_vm3 = vcmp.eq.f32.partialorder %v10483_v28, %v9046_v1  ;;  %v3613_v28 = vcvt.s32.f32 %v3611_v44 }
 0x667   :  { %v3604_v19 = vsel %vm3603_vm3, %v3599_v20, inf }
 0x668   :  { %3605 = vmin.xlane.f32.xlu1 %v3604_v19 }
 0x669   :  { %v9051_v45 = vpop.xlane.xlu1 %4406  ;;  %v9053_v9 = vpop.xlane.xlu0 %4308 }
 0x66a   :  { %vm4310_vm4 = vcmp.eq.f32.partialorder %v8635_v24, %v9053_v9  ;;  %vm4408_vm5 = vcmp.eq.f32.partialorder %v8637_v27, %v9051_v45  ;;  %v10487_v24 = vld [vmem:[#allocation101_spill] sm:$0xff] }
 0x66b   :  { %v4409_v58 = vsel %vm4408_vm5, %v4404_v56, inf  ;;  %v4311_v13 = vsel %vm4310_vm4, %v4306_v55, inf  ;;  %v4332_v19 = vand.u32 65535, %v10487_v24  ;;  %v4432_v56 = vcvt.s32.f32 %v4430_v53 }
 0x66c   :  { %4410 = vmin.xlane.f32.xlu0 %v4409_v58  ;;  %4312 = vmin.xlane.f32.xlu1 %v4311_v13  ;;  %v3627_v55 = vcvt.s32.f32 %v3625_v38  ;;  %v10489_v58 = vld [vmem:[#allocation102_spill] sm:$0xff]  ;;  %v3653_v53 = vand.u32 65535, %v8677_v14 }
 0x66d   :  { %v9061_v20 = vpop.xlane.xlu0 %3615  ;;  %v4334_v24 = vcvt.s32.f32 %v4332_v19 }
 0x66e   :  { %vm3617_vm6 = vcmp.eq.f32.partialorder %v10486_v35, %v9061_v20  ;;  %v4458_v35 = vand.u32 65535, %v8680_v8  ;;  %v10493_v8 = vld [vmem:[#allocation105_spill] sm:$0xff] }
 0x66f   :  { %v3618_v21 = vsel %vm3617_vm6, %v3613_v28, inf  ;;  %v3639_v28 = vand.u32 65535, %v10491_v17 }
 0x670   :  { %3619 = vmin.xlane.f32.xlu1 %v3618_v21 }
 0x671   :  { %v9066_v5 = vpop.xlane.xlu1 %4434  ;;  %v9068_v27 = vpop.xlane.xlu0 %3629 }
 0x672   :  { %10488 = vst [vmem:[#allocation78_spill] sm:$0xff] %v9066_v5  ;;  %vm3631_vm7 = vcmp.eq.f32.partialorder %v10489_v58, %v9068_v27  ;;  %vm4436_vm8 = vcmp.eq.f32.partialorder %v10490_v3, %v9066_v5  ;;  %v3779_v58 = vand.u32 65535, %v8695_v0  ;;  %v4460_v3 = vcvt.s32.f32 %v4458_v35 }
 0x673   :  { %v4437_v44 = vsel %vm4436_vm8, %v4432_v56, inf  ;;  %v3632_v13 = vsel %vm3631_vm7, %v3627_v55, inf  ;;  %v4486_v0 = vand.u32 65535, %v8712_v6  ;;  %v3807_v6 = vand.u32 65535, %v8728_v12 }
 0x674   :  { %4438 = vmin.xlane.f32.xlu0 %v4437_v44  ;;  %3633 = vmin.xlane.f32.xlu1 %v3632_v13  ;;  %v3641_v44 = vcvt.s32.f32 %v3639_v28  ;;  %v10494_v13 = vld [vmem:[#allocation106_spill] sm:$0xff]  ;;  %v3781_v35 = vcvt.s32.f32 %v3779_v58  ;;  %v3655_v28 = vcvt.s32.f32 %v3653_v53  ;;  %v4514_v12 = vand.u32 65535, %v8744_v50 }
 0x675   :  { %v9076_v21 = vpop.xlane.xlu0 %4336  ;;  %v4360_v14 = vand.u32 65535, %v10494_v13  ;;  %v4488_v58 = vcvt.s32.f32 %v4486_v0  ;;  %v3809_v0 = vcvt.s32.f32 %v3807_v6 }
 0x676   :  { %vm4338_vm9 = vcmp.eq.f32.partialorder %v8674_v29, %v9076_v21 }
 0x677   :  { %v4339_v38 = vsel %vm4338_vm9, %v4334_v24, inf  ;;  %v4362_v53 = vcvt.s32.f32 %v4360_v14 }
 0x678   :  { %4340 = vmin.xlane.f32.xlu1 %v4339_v38 }
 0x679   :  { %v9082_v56 = vpop.xlane.xlu1 %4462  ;;  %v9084_v55 = vpop.xlane.xlu0 %3643 }
 0x67a   :  { %10492 = vst [vmem:[#allocation84_spill] sm:$0xff] %v9082_v56  ;;  %vm3645_vm10 = vcmp.eq.f32.partialorder %v8687_v49, %v9084_v55  ;;  %vm4464_vm11 = vcmp.eq.f32.partialorder %v10493_v8, %v9082_v56  ;;  %v10495_v49 = vld [vmem:[#allocation107_spill] sm:$0xff] }
 0x67b   :  { %v4465_v19 = vsel %vm4464_vm11, %v4460_v3, inf  ;;  %v3646_v29 = vsel %vm3645_vm10, %v3641_v44, inf  ;;  %v10496_v44 = vld [vmem:[#allocation108_spill] sm:$0xff] }
 0x67c   :  { %4466 = vmin.xlane.f32.xlu0 %v4465_v19  ;;  %3647 = vmin.xlane.f32.xlu1 %v3646_v29  ;;  %v3667_v8 = vand.u32 65535, %v10496_v44  ;;  %v10499_v44 = vld [vmem:[#allocation112_spill] sm:$0xff] }
 0x67d   :  { %v9092_v17 = vpop.xlane.xlu1 %3783  ;;  %v9094_v24 = vpop.xlane.xlu0 %3657 }
 0x67e   :  { %vm3659_vm12 = vcmp.eq.f32.partialorder %v8704_v40, %v9094_v24  ;;  %vm3785_vm13 = vcmp.eq.f32.partialorder %v10495_v49, %v9092_v17  ;;  %v10497_v40 = vld [vmem:[#allocation109_spill] sm:$0xff]  ;;  %v3669_v14 = vcvt.s32.f32 %v3667_v8  ;;  %v4516_v8 = vcvt.s32.f32 %v4514_v12 }
 0x67f   :  { %v3786_v38 = vsel %vm3785_vm13, %v3781_v35, inf  ;;  %v3660_v3 = vsel %vm3659_vm12, %v3655_v28, inf  ;;  %v10498_v28 = vld [vmem:[#allocation110_spill] sm:$0xff]  ;;  %vm3027_vm13 = vcmp.lt.s32.totalorder %v7906_v26, 4 }
 0x680   :  { %3787 = vmin.xlane.f32.xlu0 %v3786_v38  ;;  %3661 = vmin.xlane.f32.xlu1 %v3660_v3  ;;  %v3681_v49 = vand.u32 65535, %v10498_v28  ;;  %v3835_v28 = vand.u32 65535, %v8761_v10  ;;  %v4542_v10 = vand.u32 65535, %v8777_v37 }
 0x681   :  { %v9102_v19 = vpop.xlane.xlu1 %4490  ;;  %v9104_v29 = vpop.xlane.xlu0 %4364 }
 0x682   :  { %vm4366_vm14 = vcmp.eq.f32.partialorder %v8720_v25, %v9104_v29  ;;  %vm4492_vm15 = vcmp.eq.f32.partialorder %v10497_v40, %v9102_v19  ;;  %v10500_v25 = vld [vmem:[#allocation111_spill] sm:$0xff]  ;;  %v10501_v40 = vld [vmem:[#allocation53_spill] sm:$0xff]  ;;  %v3683_v5 = vcvt.s32.f32 %v3681_v49  ;;  %v3837_v49 = vcvt.s32.f32 %v3835_v28 }
 0x683   :  { %v4493_v13 = vsel %vm4492_vm15, %v4488_v58, inf  ;;  %v4367_v35 = vsel %vm4366_vm14, %v4362_v53, inf  ;;  %v4544_v28 = vcvt.s32.f32 %v4542_v10  ;;  %v10517_v10 = vld [vmem:[#allocation44_spill] sm:$0xff] }
 0x684   :  { %4494 = vmin.xlane.f32.xlu0 %v4493_v13  ;;  %4368 = vmin.xlane.f32.xlu1 %v4367_v35  ;;  %v4827_v13 = vmul.f32 -1.442695, %v10501_v40  ;;  %v10502_v35 = vld [vmem:[#allocation113_spill] sm:$0xff] }
 0x685   :  { %v9112_v38 = vpop.xlane.xlu1 %3811  ;;  %v9114_v3 = vpop.xlane.xlu0 %3671  ;;  %v4388_v50 = vand.u32 65535, %v10502_v35 }
 0x686   :  { %vm3813_vm0 = vcmp.eq.f32.partialorder %v10499_v44, %v9112_v38  ;;  %vm3673_vm1 = vcmp.eq.f32.partialorder %v10500_v25, %v9114_v3  ;;  %v10504_v44 = vld [vmem:[#allocation114_spill] sm:$0xff]  ;;  %5425 = vpow2.f32 %v4827_v13 }
 0x687   :  { %v3814_v58 = vsel %vm3813_vm0, %v3809_v0, inf  ;;  %v3674_v53 = vsel %vm3673_vm1, %v3669_v14, inf  ;;  %v10505_v0 = vld [vmem:[#allocation42_spill] sm:$0xff]  ;;  %v4390_v12 = vcvt.s32.f32 %v4388_v50 }
 0x688   :  { %3815 = vmin.xlane.f32.xlu0 %v3814_v58  ;;  %3675 = vmin.xlane.f32.xlu1 %v3674_v53  ;;  %v10506_v58 = vld [vmem:[#allocation115_spill] sm:$0xff] }
 0x689   :  { %v9123_v56 = vpop.xlane.xlu1 %4518  ;;  %v9125_v6 = vpop.xlane.xlu0 %3685  ;;  %v3695_v53 = vand.u32 65535, %v10506_v58 }
 0x68a   :  { %10503 = vst [vmem:[#allocation37_spill] sm:$0xff] %v9125_v6  ;;  %vm4520_vm2 = vcmp.eq.f32.partialorder %v10504_v44, %v9123_v56  ;;  %vm3687_vm3 = vcmp.eq.f32.partialorder %v10505_v0, %v9125_v6  ;;  %v10509_v44 = vld [vmem:[#allocation116_spill] sm:$0xff]  ;;  %v10510_v0 = vld [vmem:[#allocation22_spill] sm:$0xff] }
 0x68b   :  { %v4521_v14 = vsel %vm4520_vm2, %v4516_v8, inf  ;;  %v3688_v25 = vsel %vm3687_vm3, %v3683_v5, inf  ;;  %v10511_v8 = vld [vmem:[#allocation56_spill] sm:$0xff]  ;;  %v3697_v50 = vcvt.s32.f32 %v3695_v53  ;;  %v10518_v53 = vld [vmem:[#allocation58_spill] sm:$0xff] }
 0x68c   :  { %4522 = vmin.xlane.f32.xlu0 %v4521_v14  ;;  %3689 = vmin.xlane.f32.xlu1 %v3688_v25  ;;  %v4828_v14 = vmul.f32 -1.442695, %v10511_v8  ;;  %v10512_v25 = vld [vmem:[#allocation117_spill] sm:$0xff] }
 0x68d   :  { %v9133_v40 = vpop.xlane.xlu1 %3839  ;;  %v9135_v35 = vpop.xlane.xlu0 %4392  ;;  %v3709_v37 = vand.u32 65535, %v10512_v25 }
 0x68e   :  { %10507 = vst [vmem:[#allocation83_spill] sm:$0xff] %v9133_v40  ;;  %10508 = vst [vmem:[#allocation88_spill] sm:$0xff] %v9135_v35  ;;  %vm3841_vm4 = vcmp.eq.f32.partialorder %v10509_v44, %v9133_v40  ;;  %vm4394_vm5 = vcmp.eq.f32.partialorder %v10510_v0, %v9135_v35  ;;  %v10514_v44 = vld [vmem:[#allocation25_spill] sm:$0xff]  ;;  %5427 = vpow2.f32 %v4828_v14  ;;  %v10515_v0 = vld [vmem:[#allocation118_spill] sm:$0xff]  ;;  %v4829_v40 = vmul.f32 -1.442695, %v10518_v53 }
 0x68f   :  { %v3842_v5 = vsel %vm3841_vm4, %v3837_v49, inf  ;;  %v4395_v13 = vsel %vm4394_vm5, %v4390_v12, inf  ;;  %v3711_v8 = vcvt.s32.f32 %v3709_v37 }
 0x690   :  { %3843 = vmin.xlane.f32.xlu0 %v3842_v5  ;;  %4396 = vmin.xlane.f32.xlu1 %v4395_v13  ;;  %v4416_v5 = vand.u32 65535, %v10515_v0  ;;  %v5426_v25 = vpop.eup %5425  ;;  %5429 = vpow2.f32 %v4829_v40  ;;  %v10522_v0 = vld [vmem:[#allocation120_spill] sm:$0xff] }
 0x691   :  { %v9143_v58 = vpop.xlane.xlu1 %4546  ;;  %v9145_v6 = vpop.xlane.xlu0 %3699  ;;  %v10525_v40 = vld [vmem:[#allocation32_spill] sm:$0xff] }
 0x692   :  { %10513 = vst [vmem:[#allocation85_spill] sm:$0xff] %v9143_v58  ;;  %vm4548_vm6 = vcmp.eq.f32.partialorder %v8786_v51, %v9143_v58  ;;  %vm3701_vm7 = vcmp.eq.f32.partialorder %v10514_v44, %v9145_v6  ;;  %v10519_v58 = vld [vmem:[#allocation69_spill] sm:$0xff]  ;;  %v4418_v14 = vcvt.s32.f32 %v4416_v5 }
 0x693   :  { %v4549_v49 = vsel %vm4548_vm6, %v4544_v28, inf  ;;  %v3702_v12 = vsel %vm3701_vm7, %v3697_v50, inf  ;;  %v4830_v35 = vmul.f32 -1.442695, %v10519_v58  ;;  %v10520_v28 = vld [vmem:[#allocation119_spill] sm:$0xff] }
 0x694   :  { %4550 = vmin.xlane.f32.xlu0 %v4549_v49  ;;  %3703 = vmin.xlane.f32.xlu1 %v3702_v12  ;;  %v3723_v50 = vand.u32 65535, %v10520_v28  ;;  %v3124_v49 = vadd.f32 1.0, %v5426_v25  ;;  %v10521_v12 = vld [vmem:[#allocation26_spill] sm:$0xff]  ;;  %v10524_v28 = vld [vmem:[#allocation75_spill] sm:$0xff] }
 0x695   :  { %v9152_v13 = vpop.xlane.xlu0 %3713  ;;  %5431 = vpow2.f32 %v4830_v35 }
 0x696   :  { %10516 = vst [vmem:[#allocation51_spill] sm:$0xff] %v9152_v13  ;;  %vm3715_vm8 = vcmp.eq.f32.partialorder %v10517_v10, %v9152_v13  ;;  %v3737_v10 = vand.u32 65535, %v10522_v0  ;;  %5433 = vrcp.f32 %v3124_v49  ;;  %v4832_v13 = vmul.f32 -1.442695, %v10524_v28  ;;  %v10527_v49 = vld [vmem:[#allocation33_spill] sm:$0xff] }
 0x697   :  { %v3716_v51 = vsel %vm3715_vm8, %v3711_v8, inf  ;;  %v3725_v8 = vcvt.s32.f32 %v3723_v50  ;;  %v3426_v0 = vcvt.f32.s32 %v8829_v52 }
 0x698   :  { %3717 = vmin.xlane.f32.xlu1 %v3716_v51  ;;  %v5428_v58 = vpop.eup %5427  ;;  %v10523_v51 = vld [vmem:[#allocation73_spill] sm:$0xff] }
 0x699   :  { %v9159_v44 = vpop.xlane.xlu0 %4420  ;;  %v4831_v5 = vmul.f32 -1.442695, %v10523_v51 }
 0x69a   :  { %vm4422_vm9 = vcmp.eq.f32.partialorder %v10521_v12, %v9159_v44  ;;  %v3739_v12 = vcvt.s32.f32 %v3737_v10  ;;  %v5430_v50 = vpop.eup %5429  ;;  %v3427_v10 = vshll.u32 %v3426_v0, 16 }
 0x69b   :  { %v4423_v37 = vsel %vm4422_vm9, %v4418_v14, inf  ;;  %v4444_v14 = vand.u32 65535, %v10525_v40  ;;  %5435 = vpow2.f32 %v4831_v5  ;;  %v3126_v5 = vadd.f32 1.0, %v5430_v50 }
 0x69c   :  { %4424 = vmin.xlane.f32.xlu1 %v4423_v37  ;;  %v3125_v37 = vadd.f32 1.0, %v5428_v58  ;;  %5437 = vpow2.f32 %v4832_v13 }
 0x69d   :  { %v9164_v53 = vpop.xlane.xlu0 %3727  ;;  %v4446_v28 = vcvt.s32.f32 %v4444_v14 }
 0x69e   :  { %vm3729_vm10 = vcmp.eq.f32.partialorder %v8812_v62, %v9164_v53  ;;  %5439 = vrcp.f32 %v3125_v37  ;;  %v3440_v37 = vcvt.f32.s32 %v8851_v63 }
 0x69f   :  { %v3730_v25 = vsel %vm3729_vm10, %v3725_v8, inf  ;;  %v3751_v8 = vand.u32 65535, %v10527_v49  ;;  %v5432_v40 = vpop.eup %5431  ;;  %5441 = vrcp.f32 %v3126_v5 }
 0x6a0   :  { %3731 = vmin.xlane.f32.xlu1 %v3730_v25 }
 0x6a1   :  { %v9171_v35 = vpop.xlane.xlu0 %3741  ;;  %v3753_v14 = vcvt.s32.f32 %v3751_v8 }
 0x6a2   :  { %10526 = vst [vmem:[#allocation45_spill] sm:$0xff] %v9171_v35  ;;  %vm3743_vm11 = vcmp.eq.f32.partialorder %v8822_v42, %v9171_v35  ;;  %v5434_v42 = vpop.eup %5433 }
 0x6a3   :  { %v3744_v62 = vsel %vm3743_vm11, %v3739_v12, inf  ;;  %v3127_v12 = vadd.f32 1.0, %v5432_v40  ;;  %v3220_v50 = vsel %vm3027_vm13, %v5434_v42, 0.0  ;;  %v3441_v42 = vshll.u32 %v3440_v37, 16 }
 0x6a4   :  { %3745 = vmin.xlane.f32.xlu1 %v3744_v62  ;;  %v10529_v62 = vld [vmem:[#allocation41_spill] sm:$0xff] }
 0x6a5   :  { %v3424_v51 = vpop.xlane.xlu1 %3423  ;;  %v9177_v25 = vpop.xlane.xlu0 %4448  ;;  %v3765_v49 = vand.u32 65535, %v10529_v62  ;;  %5443 = vrcp.f32 %v3127_v12 }
 0x6a6   :  { %10528 = vst [vmem:[#allocation31_spill] sm:$0xff] %v9177_v25  ;;  %v3425_v58 = vcvt.f32.s32 %v3424_v51  ;;  %vm4450_vm12 = vcmp.eq.f32.partialorder %v8832_v59, %v9177_v25  ;;  %v10531_v59 = vld [vmem:[#allocation79_spill] sm:$0xff]  ;;  %v9944_v51 = vmov 0.0   ;;  %v5436_v63 = vpop.eup %5435  ;;  %v4147_v25 = vcvt.f32.s32 %v8864_v46 }
 0x6a7   :  { %v4451_v52 = vsel %vm4450_vm12, %v4446_v28, inf  ;;  %v4833_v0 = vmul.f32 -1.442695, %v10531_v59  ;;  %v3767_v59 = vcvt.s32.f32 %v3765_v49  ;;  %v3454_v49 = vcvt.f32.s32 %v8877_v57  ;;  %v10538_v57 = vld [vmem:[#allocation50_spill] sm:$0xff] }
 0x6a8   :  { %v3428_v13 = vadd.s32 %v3427_v10, %v3425_v58  ;;  %4452 = vmin.xlane.f32.xlu1 %v4451_v52  ;;  %v10532_v10 = vld [vmem:[#allocation48_spill] sm:$0xff]  ;;  %v10533_v52 = vld [vmem:[#allocation55_spill] sm:$0xff] }
 0x6a9   :  { %v9183_v35 = vpop.xlane.xlu0 %3755  ;;  %v4834_v58 = vmul.f32 -1.442695, %v10532_v10  ;;  %5445 = vpow2.f32 %v4833_v0  ;;  %v10535_v0 = vld [vmem:[#allocation64_spill] sm:$0xff] }
 0x6aa   :  { %10530 = vst [vmem:[#allocation46_spill] sm:$0xff] %v9183_v35  ;;  %vm3863_vm14 = vcmp.eq.s32.totalorder %v7906_v26, %v3428_v13  ;;  %vm3757_vm15 = vcmp.eq.f32.partialorder %v8843_v32, %v9183_v35  ;;  %v4472_v13 = vand.u32 65535, %v10533_v52  ;;  %v5438_v35 = vpop.eup %5437  ;;  %v4148_v52 = vshll.u32 %v4147_v25, 16  ;;  %v10539_v25 = vld [vmem:[#allocation121_spill] sm:$0xff] }
 0x6ab   :  { %v3895_v28 = vsel %vm3863_vm14, 1.0, %v9944_v51  ;;  %v3758_v40 = vsel %vm3757_vm15, %v3753_v14, inf  ;;  %v5440_v14 = vpop.eup %5439  ;;  %5447 = vpow2.f32 %v4834_v58 }
 0x6ac   :  { %v9194_v8 = vadd.f32 %v3895_v28, %v3220_v50  ;;  %3759 = vmin.xlane.f32.xlu1 %v3758_v40  ;;  %v3128_v50 = vadd.f32 1.0, %v5436_v63  ;;  %v3129_v28 = vadd.f32 1.0, %v5438_v35  ;;  %v3793_v40 = vand.u32 65535, %v8859_v36  ;;  %v10536_v63 = vld [vmem:[#allocation30_spill] sm:$0xff] }
 0x6ad   :  { %v3438_v32 = vpop.xlane.xlu1 %3437  ;;  %v9197_v62 = vpop.xlane.xlu0 %3769  ;;  %v4474_v46 = vcvt.s32.f32 %v4472_v13  ;;  %v4835_v58 = vmul.f32 -1.442695, %v10536_v63  ;;  %v3221_v35 = vsel %vm3027_vm13, %v5440_v14, 0.0  ;;  %v3468_v14 = vcvt.f32.s32 %v8890_v2 }
 0x6ae   :  { %v3439_v51 = vcvt.f32.s32 %v3438_v32  ;;  %vm3771_vm0 = vcmp.eq.f32.partialorder %v8854_v41, %v9197_v62  ;;  %5449 = vrcp.f32 %v3128_v50  ;;  %v3795_v63 = vcvt.s32.f32 %v3793_v40  ;;  %v10540_v40 = vld [vmem:[#allocation20_spill] sm:$0xff] }
 0x6af   :  { %v3772_v5 = vsel %vm3771_vm0, %v3767_v59, inf  ;;  %v4836_v59 = vmul.f32 -1.442695, %v10538_v57  ;;  %5451 = vrcp.f32 %v3129_v28  ;;  %v4175_v57 = vcvt.f32.s32 %v8903_v54 }
 0x6b0   :  { %v3442_v12 = vadd.s32 %v3441_v42, %v3439_v51  ;;  %3773 = vmin.xlane.f32.xlu1 %v3772_v5  ;;  %v10537_v51 = vmov 0.0   ;;  %v4500_v5 = vand.u32 65535, %v10539_v25  ;;  %5453 = vpow2.f32 %v4835_v58 }
 0x6b1   :  { %v4145_v10 = vpop.xlane.xlu1 %4144  ;;  %v9204_v37 = vpop.xlane.xlu0 %4476  ;;  %5455 = vpow2.f32 %v4836_v59  ;;  %v3469_v58 = vshll.u32 %v3468_v14, 16 }
 0x6b2   :  { %10534 = vst [vmem:[#allocation27_spill] sm:$0xff] %v9204_v37  ;;  %vm3864_vm1 = vcmp.eq.s32.totalorder %v7906_v26, %v3442_v12  ;;  %v4146_v41 = vcvt.f32.s32 %v4145_v10  ;;  %vm4478_vm2 = vcmp.eq.f32.partialorder %v10535_v0, %v9204_v37  ;;  %v3455_v12 = vshll.u32 %v3454_v49, 16  ;;  %v5442_v37 = vpop.eup %5441 }
 0x6b3   :  { %v3896_v36 = vsel %vm3864_vm1, 1.0, %v10537_v51  ;;  %v4479_v32 = vsel %vm4478_vm2, %v4474_v46, inf  ;;  %v5444_v50 = vpop.eup %5443  ;;  %v3222_v54 = vsel %vm3027_vm13, %v5442_v37, 0.0 }
 0x6b4   :  { %v3928_v42 = vadd.f32 %v3896_v36, %v3221_v35  ;;  %v4149_v13 = vadd.s32 %v4148_v52, %v4146_v41  ;;  %4480 = vmin.xlane.f32.xlu1 %v4479_v32  ;;  %v5446_v35 = vpop.eup %5445  ;;  %v4837_v36 = vmul.f32 -1.442695, %v10540_v40  ;;  %v10541_v32 = vld [vmem:[#allocation122_spill] sm:$0xff]  ;;  %v4176_v40 = vshll.u32 %v4175_v57, 16 }
 0x6b5   :  { %v3452_v10 = vpop.xlane.xlu1 %3451  ;;  %v9215_v0 = vpop.xlane.xlu0 %3797  ;;  %v3821_v2 = vand.u32 65535, %v10541_v32 }
 0x6b6   :  { %vm4571_vm3 = vcmp.eq.s32.totalorder %v7906_v26, %v4149_v13  ;;  %v3453_v46 = vcvt.f32.s32 %v3452_v10  ;;  %vm3799_vm4 = vcmp.eq.f32.partialorder %v8880_v30, %v9215_v0  ;;  %v4502_v30 = vcvt.s32.f32 %v4500_v5  ;;  %v5448_v10 = vpop.eup %5447 }
 0x6b7   :  { %v4603_v28 = vsel %vm4571_vm3, 1.0, %v10537_v51  ;;  %v3800_v52 = vsel %vm3799_vm4, %v3795_v63, inf  ;;  %5457 = vpow2.f32 %v4837_v36  ;;  %v3223_v36 = vsel %vm3027_vm13, %v5444_v50, 0.0 }
 0x6b8   :  { %v4635_v49 = vadd.f32 %v4603_v28, %v3928_v42  ;;  %v3456_v41 = vadd.s32 %v3455_v12, %v3453_v46  ;;  %3801 = vmin.xlane.f32.xlu1 %v3800_v52  ;;  %v10543_v42 = vld [vmem:[#allocation68_spill] sm:$0xff]  ;;  %v10544_v12 = vld [vmem:[#allocation57_spill] sm:$0xff]  ;;  %v3130_v28 = vadd.f32 1.0, %v5446_v35 }
 0x6b9   :  { %v3466_v13 = vpop.xlane.xlu1 %3465  ;;  %v9225_v25 = vpop.xlane.xlu0 %4504  ;;  %v4838_v63 = vmul.f32 -1.442695, %v10544_v12  ;;  %v10547_v35 = vld [vmem:[#allocation76_spill] sm:$0xff] }
 0x6ba   :  { %10542 = vst [vmem:[#allocation47_spill] sm:$0xff] %v9225_v25  ;;  %4667 = vst [vmem:[%s9707_s8 + $0x8] sm:$0xff] %v4635_v49  ;;  %vm3865_vm5 = vcmp.eq.s32.totalorder %v7906_v26, %v3456_v41  ;;  %v3467_v59 = vcvt.f32.s32 %v3466_v13  ;;  %vm4506_vm6 = vcmp.eq.f32.partialorder %v10543_v42, %v9225_v25  ;;  %v10545_v49 = vld [vmem:[#allocation77_spill] sm:$0xff]  ;;  %v3823_v42 = vcvt.s32.f32 %v3821_v2  ;;  %v5450_v12 = vpop.eup %5449 }
 0x6bb   :  { %v3897_v46 = vsel %vm3865_vm5, 1.0, %v10537_v51  ;;  %v4507_v5 = vsel %vm4506_vm6, %v4502_v30, inf  ;;  %v4528_v41 = vand.u32 65535, %v10545_v49  ;;  %v3482_v25 = vcvt.f32.s32 %v8916_v43  ;;  %v5452_v30 = vpop.eup %5451 }
 0x6bc   :  { %v9237_v14 = vadd.f32 %v3897_v46, %v3222_v54  ;;  %v3470_v52 = vadd.s32 %v3469_v58, %v3467_v59  ;;  %4508 = vmin.xlane.f32.xlu1 %v4507_v5  ;;  %5459 = vpow2.f32 %v4838_v63  ;;  %v3131_v59 = vadd.f32 1.0, %v5448_v10  ;;  %v5454_v43 = vpop.eup %5453  ;;  %v10548_v46 = vld [vmem:[#allocation65_spill] sm:$0xff] }
 0x6bd   :  { %v4173_v32 = vpop.xlane.xlu1 %4172  ;;  %v9240_v13 = vpop.xlane.xlu0 %3825  ;;  %5461 = vrcp.f32 %v3130_v28  ;;  %v3849_v5 = vand.u32 65535, %v10548_v46  ;;  %v4530_v63 = vcvt.s32.f32 %v4528_v41  ;;  %v10549_v28 = vld [vmem:[#allocation67_spill] sm:$0xff] }
 0x6be   :  { %10546 = vst [vmem:[#allocation49_spill] sm:$0xff] %v9240_v13  ;;  %vm3866_vm7 = vcmp.eq.s32.totalorder %v7906_v26, %v3470_v52  ;;  %v4174_v37 = vcvt.f32.s32 %v4173_v32  ;;  %vm3827_vm8 = vcmp.eq.f32.partialorder %v10547_v35, %v9240_v13  ;;  %v3496_v52 = vcvt.f32.s32 %v8928_v31  ;;  %v5456_v35 = vpop.eup %5455  ;;  %v10551_v46 = vld [vmem:[#allocation71_spill] sm:$0xff] }
 0x6bf   :  { %v3898_v57 = vsel %vm3866_vm7, 1.0, %v10537_v51  ;;  %v3828_v58 = vsel %vm3827_vm8, %v3823_v42, inf  ;;  %v3483_v13 = vshll.u32 %v3482_v25, 16  ;;  %5463 = vrcp.f32 %v3131_v59 }
 0x6c0   :  { %v3930_v2 = vadd.f32 %v3898_v57, %v3223_v36  ;;  %v4177_v54 = vadd.s32 %v4176_v40, %v4174_v37  ;;  %3829 = vmin.xlane.f32.xlu1 %v3828_v58  ;;  %v3132_v42 = vadd.f32 1.0, %v5454_v43  ;;  %v3133_v31 = vadd.f32 1.0, %v5456_v35 }
 0x6c1   :  { %v3480_v49 = vpop.xlane.xlu1 %3479  ;;  %v9251_v32 = vpop.xlane.xlu0 %4532  ;;  %v4556_v57 = vand.u32 65535, %v8924_v4  ;;  %v3497_v41 = vshll.u32 %v3496_v52, 16  ;;  %v3224_v4 = vsel %vm3027_vm13, %v5450_v12, 0.0 }
 0x6c2   :  { %vm4573_vm9 = vcmp.eq.s32.totalorder %v7906_v26, %v4177_v54  ;;  %v3481_v50 = vcvt.f32.s32 %v3480_v49  ;;  %vm4534_vm10 = vcmp.eq.f32.partialorder %v10549_v28, %v9251_v32  ;;  %v3851_v54 = vcvt.s32.f32 %v3849_v5 }
 0x6c3   :  { %v4605_v10 = vsel %vm4573_vm9, 1.0, %v10537_v51  ;;  %v4535_v40 = vsel %vm4534_vm10, %v4530_v63, inf  ;;  %v4203_v49 = vcvt.f32.s32 %v10551_v46  ;;  %v3225_v5 = vsel %vm3027_vm13, %v5452_v30, 0.0  ;;  %v10553_v63 = vld [vmem:[#allocation52_spill] sm:$0xff] }
 0x6c4   :  { %v4637_v37 = vadd.f32 %v4605_v10, %v3930_v2  ;;  %v3484_v36 = vadd.s32 %v3483_v13, %v3481_v50  ;;  %4536 = vmin.xlane.f32.xlu1 %v4535_v40  ;;  %v10552_v13 = vld [vmem:[#allocation82_spill] sm:$0xff]  ;;  %v5458_v2 = vpop.eup %5457  ;;  %5465 = vrcp.f32 %v3132_v42  ;;  %v4839_v35 = vmul.f32 -1.442695, %v10553_v63  ;;  %v10554_v40 = vld [vmem:[#allocation59_spill] sm:$0xff] }
 0x6c5   :  { %v3494_v58 = vpop.xlane.xlu1 %3493  ;;  %v9258_v25 = vpop.xlane.xlu0 %3853  ;;  %5467 = vrcp.f32 %v3133_v31  ;;  %v4204_v30 = vshll.u32 %v4203_v49, 16  ;;  %v10557_v49 = vld [vmem:[#allocation74_spill] sm:$0xff] }
 0x6c6   :  { %10550 = vst [vmem:[#allocation89_spill] sm:$0xff] %v9258_v25  ;;  %4669 = vst [vmem:[%s9707_s8 + $0x18] sm:$0xff] %v4637_v37  ;;  %vm3867_vm11 = vcmp.eq.s32.totalorder %v7906_v26, %v3484_v36  ;;  %v3495_v59 = vcvt.f32.s32 %v3494_v58  ;;  %vm3855_vm12 = vcmp.eq.f32.partialorder %v10552_v13, %v9258_v25  ;;  %v5460_v10 = vpop.eup %5459  ;;  %v4840_v37 = vmul.f32 -1.442695, %v10554_v40  ;;  %v10555_v36 = vld [vmem:[#allocation81_spill] sm:$0xff] }
 0x6c7   :  { %v3899_v43 = vsel %vm3867_vm11, 1.0, %v10537_v51  ;;  %v3856_v52 = vsel %vm3855_vm12, %v3851_v54, inf  ;;  %v4133_v58 = vcvt.f32.s32 %v10555_v36  ;;  %v4558_v13 = vcvt.s32.f32 %v4556_v57  ;;  %v5462_v25 = vpop.eup %5461  ;;  %v10556_v54 = vld [vmem:[#allocation86_spill] sm:$0xff] }
 0x6c8   :  { %v9273_v50 = vadd.f32 %v3899_v43, %v3224_v4  ;;  %v3498_v28 = vadd.s32 %v3497_v41, %v3495_v59  ;;  %3857 = vmin.xlane.f32.xlu1 %v3856_v52  ;;  %v3134_v41 = vadd.f32 1.0, %v5458_v2  ;;  %v3510_v59 = vcvt.f32.s32 %v8953_v39 }
 0x6c9   :  { %v4201_v12 = vpop.xlane.xlu1 %4200  ;;  %v9277_v46 = vpop.xlane.xlu0 %4560  ;;  %v3135_v43 = vadd.f32 1.0, %v5460_v10  ;;  %5469 = vpow2.f32 %v4839_v35  ;;  %v4134_v57 = vshll.u32 %v4133_v58, 16  ;;  %v4161_v40 = vcvt.f32.s32 %v10557_v49 }
 0x6ca   :  { %vm3868_vm14 = vcmp.eq.s32.totalorder %v7906_v26, %v3498_v28  ;;  %v4202_v42 = vcvt.f32.s32 %v4201_v12  ;;  %vm4562_vm15 = vcmp.eq.f32.partialorder %v10556_v54, %v9277_v46  ;;  %5471 = vpow2.f32 %v4840_v37  ;;  %v5464_v12 = vpop.eup %5463 }
 0x6cb   :  { %v3900_v31 = vsel %vm3868_vm14, 1.0, %v10537_v51  ;;  %v4563_v4 = vsel %vm4562_vm15, %v4558_v13, inf  ;;  %v9287_v28 = vsel %vm3027_vm13, %v5462_v25, 0.0  ;;  %v3524_v39 = vcvt.f32.s32 %v8963_v48 }
 0x6cc   :  { %v3932_v52 = vadd.f32 %v3900_v31, %v3225_v5  ;;  %v4205_v63 = vadd.s32 %v4204_v30, %v4202_v42  ;;  %4564 = vmin.xlane.f32.xlu1 %v4563_v4  ;;  %5473 = vrcp.f32 %v3134_v41  ;;  %v10558_v5 = vld [vmem:[#allocation54_spill] sm:$0xff]  ;;  %v3511_v37 = vshll.u32 %v3510_v59, 16  ;;  %v10559_v30 = vld [vmem:[#allocation39_spill] sm:$0xff] }
 0x6cd   :  { %v3508_v36 = vpop.xlane.xlu1 %3507  ;;  %v4131_v2 = vpop.xlane.xlu0 %4130  ;;  %v4841_v13 = vmul.f32 -1.442695, %v10558_v5  ;;  %5475 = vrcp.f32 %v3135_v43  ;;  %v4842_v42 = vmul.f32 -1.442695, %v10559_v30  ;;  %v4162_v31 = vshll.u32 %v4161_v40, 16 }
 0x6ce   :  { %vm4575_vm0 = vcmp.eq.s32.totalorder %v7906_v26, %v4205_v63  ;;  %v3509_v10 = vcvt.f32.s32 %v3508_v36  ;;  %v4132_v35 = vcvt.f32.s32 %v4131_v2  ;;  %v4189_v4 = vcvt.f32.s32 %v8961_v16  ;;  %v9296_v2 = vpop.eup %5465  ;;  %v10560_v16 = vld [vmem:[#allocation70_spill] sm:$0xff] }
 0x6cf   :  { %v4607_v58 = vsel %vm4575_vm0, 1.0, %v10537_v51  ;;  %v4231_v48 = vcvt.f32.s32 %v8973_v34  ;;  %v3525_v41 = vshll.u32 %v3524_v39, 16  ;;  %5477 = vpow2.f32 %v4841_v13 }
 0x6d0   :  { %v4639_v25 = vadd.f32 %v4607_v58, %v3932_v52  ;;  %v4135_v54 = vadd.s32 %v4134_v57, %v4132_v35  ;;  %v3512_v49 = vadd.s32 %v3511_v37, %v3509_v10  ;;  %v9302_v52 = vpop.eup %5467  ;;  %v4217_v57 = vcvt.f32.s32 %v10560_v16 }
 0x6d1   :  { %v3522_v63 = vpop.xlane.xlu1 %3521  ;;  %v4159_v36 = vpop.xlane.xlu0 %4158  ;;  %v3227_v40 = vsel %vm3027_vm13, %v5464_v12, 0.0  ;;  %5479 = vpow2.f32 %v4842_v42  ;;  %v4190_v5 = vshll.u32 %v4189_v4, 16  ;;  %v4232_v37 = vshll.u32 %v4231_v48, 16 }
 0x6d2   :  { %4671 = vst [vmem:[%s9707_s8 + $0x28] sm:$0xff] %v4639_v25  ;;  %vm4570_vm1 = vcmp.eq.s32.totalorder %v7906_v26, %v4135_v54  ;;  %v3523_v59 = vcvt.f32.s32 %v3522_v63  ;;  %v4160_v43 = vcvt.f32.s32 %v4159_v36  ;;  %v3538_v58 = vcvt.f32.s32 %v8983_v33  ;;  %v10561_v54 = vld [vmem:[#allocation36_spill] sm:$0xff] }
 0x6d3   :  { %v4602_v34 = vsel %vm4570_vm1, 1.0, %v10537_v51  ;;  %vm3869_vm2 = vcmp.eq.s32.totalorder %v7906_v26, %v3512_v49  ;;  %v9311_v25 = vpop.eup %5469  ;;  %v4843_v33 = vmul.f32 -1.442695, %v10561_v54  ;;  %v10562_v63 = vld [vmem:[#allocation72_spill] sm:$0xff] }
 0x6d4   :  { %v4634_v39 = vadd.f32 %v4602_v34, %v9194_v8  ;;  %v3526_v10 = vadd.s32 %v3525_v41, %v3523_v59  ;;  %v4163_v35 = vadd.s32 %v4162_v31, %v4160_v43  ;;  %v9318_v42 = vpop.eup %5471  ;;  %v4218_v31 = vshll.u32 %v4217_v57, 16 }
 0x6d5   :  { %v4229_v30 = vpop.xlane.xlu1 %4228  ;;  %v4187_v13 = vpop.xlane.xlu0 %4186  ;;  %v4245_v36 = vcvt.f32.s32 %v10562_v63  ;;  %v3539_v34 = vshll.u32 %v3538_v58, 16  ;;  %5481 = vpow2.f32 %v4843_v33 }
 0x6d6   :  { %4666 = vst [vmem:[%s9707_s8] sm:$0xff] %v4634_v39  ;;  %vm3870_vm3 = vcmp.eq.s32.totalorder %v7906_v26, %v3526_v10  ;;  %vm4572_vm4 = vcmp.eq.s32.totalorder %v7906_v26, %v4163_v35  ;;  %v4230_v8 = vcvt.f32.s32 %v4229_v30  ;;  %v4188_v12 = vcvt.f32.s32 %v4187_v13  ;;  %v9325_v16 = vpop.eup %5473 }
 0x6d7   :  { %v3902_v4 = vsel %vm3870_vm3, 1.0, %v10537_v51  ;;  %v4604_v48 = vsel %vm4572_vm4, 1.0, %v10537_v51  ;;  %v3552_v39 = vcvt.f32.s32 %v8993_v23  ;;  %v3901_v10 = vsel %vm3869_vm2, 1.0, %v10537_v51  ;;  %v9331_v13 = vpop.eup %5475  ;;  %v10563_v23 = vld [vmem:[#allocation38_spill] sm:$0xff] }
 0x6d8   :  { %v4636_v41 = vadd.f32 %v4604_v48, %v9237_v14  ;;  %v4233_v59 = vadd.s32 %v4232_v37, %v4230_v8  ;;  %v4191_v43 = vadd.s32 %v4190_v5, %v4188_v12  ;;  %v3934_v57 = vadd.f32 %v3902_v4, %v3227_v40 }
 0x6d9   :  { %v3536_v35 = vpop.xlane.xlu1 %3535  ;;  %v4215_v30 = vpop.xlane.xlu0 %4214  ;;  %v4844_v37 = vmul.f32 -1.442695, %v10563_v23  ;;  %v4246_v48 = vshll.u32 %v4245_v36, 16  ;;  %v3553_v63 = vshll.u32 %v3552_v39, 16  ;;  %v3566_v23 = vcvt.f32.s32 %v9013_v7 }
 0x6da   :  { %4668 = vst [vmem:[%s9707_s8 + $0x10] sm:$0xff] %v4636_v41  ;;  %vm4577_vm5 = vcmp.eq.s32.totalorder %v7906_v26, %v4233_v59  ;;  %vm4574_vm6 = vcmp.eq.s32.totalorder %v7906_v26, %v4191_v43  ;;  %v3537_v14 = vcvt.f32.s32 %v3536_v35  ;;  %v4216_v5 = vcvt.f32.s32 %v4215_v30  ;;  %v5478_v4 = vpop.eup %5477  ;;  %v10564_v30 = vld [vmem:[#allocation28_spill] sm:$0xff] }
 0x6db   :  { %v4609_v49 = vsel %vm4577_vm5, 1.0, %v10537_v51  ;;  %v4606_v40 = vsel %vm4574_vm6, 1.0, %v10537_v51  ;;  %v4259_v41 = vcvt.f32.s32 %v9003_v47  ;;  %v3933_v59 = vadd.f32 %v3901_v10, %v9287_v28  ;;  %v9344_v35 = vpop.eup %5479 }
 0x6dc   :  { %v4641_v58 = vadd.f32 %v4609_v49, %v3934_v57  ;;  %v4638_v8 = vadd.f32 %v4606_v40, %v9273_v50  ;;  %v3540_v12 = vadd.s32 %v3539_v34, %v3537_v14  ;;  %v4219_v54 = vadd.s32 %v4218_v31, %v4216_v5 }
 0x6dd   :  { %v3550_v43 = vpop.xlane.xlu1 %3549  ;;  %v4243_v33 = vpop.xlane.xlu0 %4242  ;;  %5483 = vpow2.f32 %v4844_v37  ;;  %v3228_v28 = vsel %vm3027_vm13, %v9296_v2, 0.0  ;;  %v4273_v34 = vcvt.f32.s32 %v8991_v11  ;;  %v4845_v14 = vmul.f32 -1.442695, %v10564_v30 }
 0x6de   :  { %4673 = vst [vmem:[%s9707_s8 + $0x38] sm:$0xff] %v4641_v58  ;;  %4670 = vst [vmem:[%s9707_s8 + $0x20] sm:$0xff] %v4638_v8  ;;  %vm3871_vm7 = vcmp.eq.s32.totalorder %v7906_v26, %v3540_v12  ;;  %vm4576_vm8 = vcmp.eq.s32.totalorder %v7906_v26, %v4219_v54  ;;  %v3551_v50 = vcvt.f32.s32 %v3550_v43  ;;  %v4244_v47 = vcvt.f32.s32 %v4243_v33  ;;  %v10565_v43 = vld [vmem:[#allocation21_spill] sm:$0xff] }
 0x6df   :  { %v3903_v31 = vsel %vm3871_vm7, 1.0, %v10537_v51  ;;  %v4608_v36 = vsel %vm4576_vm8, 1.0, %v10537_v51  ;;  %v4260_v5 = vshll.u32 %v4259_v41, 16  ;;  %v3136_v58 = vadd.f32 1.0, %v9311_v25 }
 0x6e0   :  { %v4640_v39 = vadd.f32 %v4608_v36, %v3933_v59  ;;  %v3554_v10 = vadd.s32 %v3553_v63, %v3551_v50  ;;  %v4247_v57 = vadd.s32 %v4246_v48, %v4244_v47  ;;  %v3935_v49 = vadd.f32 %v3903_v31, %v3228_v28  ;;  %v5482_v59 = vpop.eup %5481 }
 0x6e1   :  { %v4257_v37 = vpop.xlane.xlu1 %4256  ;;  %v4271_v40 = vpop.xlane.xlu0 %4270  ;;  %v3229_v8 = vsel %vm3027_vm13, %v9302_v52, 0.0  ;;  %v3137_v54 = vadd.f32 1.0, %v9318_v42  ;;  %v4274_v48 = vshll.u32 %v4273_v34, 16  ;;  %5485 = vpow2.f32 %v4845_v14 }
 0x6e2   :  { %4672 = vst [vmem:[%s9707_s8 + $0x30] sm:$0xff] %v4640_v39  ;;  %vm3872_vm9 = vcmp.eq.s32.totalorder %v7906_v26, %v3554_v10  ;;  %vm4578_vm10 = vcmp.eq.s32.totalorder %v7906_v26, %v4247_v57  ;;  %v4258_v11 = vcvt.f32.s32 %v4257_v37  ;;  %v4272_v2 = vcvt.f32.s32 %v4271_v40  ;;  %v10566_v57 = vld [vmem:[#allocation34_spill] sm:$0xff] }
 0x6e3   :  { %v3904_v7 = vsel %vm3872_vm9, 1.0, %v10537_v51  ;;  %v4610_v12 = vsel %vm4578_vm10, 1.0, %v10537_v51  ;;  %v4846_v33 = vmul.f32 -1.442695, %v10565_v43  ;;  %v3567_v50 = vshll.u32 %v3566_v23, 16 }
 0x6e4   :  { %v4642_v63 = vadd.f32 %v4610_v12, %v3935_v49  ;;  %v4261_v41 = vadd.s32 %v4260_v5, %v4258_v11  ;;  %v3580_v25 = vcvt.f32.s32 %v9023_v60  ;;  %v3936_v28 = vadd.f32 %v3904_v7, %v3229_v8  ;;  %v10567_v11 = vld [vmem:[#allocation62_spill] sm:$0xff] }
 0x6e5   :  { %v3564_v47 = vpop.xlane.xlu1 %3563  ;;  %v4275_v52 = vadd.s32 %v4274_v48, %v4272_v2  ;;  %5487 = vrcp.f32 %v3136_v58  ;;  %v3138_v31 = vadd.f32 1.0, %v5478_v4  ;;  %v3230_v60 = vsel %vm3027_vm13, %v9325_v16, 0.0  ;;  %v4299_v40 = vpop.xlane.xlu0 %4298  ;;  %v10568_v2 = vld [vmem:[#allocation80_spill] sm:$0xff] }
 0x6e6   :  { %4674 = vst [vmem:[%s9707_s8 + $0x40] sm:$0xff] %v4642_v63  ;;  %vm4579_vm11 = vcmp.eq.s32.totalorder %v7906_v26, %v4261_v41  ;;  %v3565_v42 = vcvt.f32.s32 %v3564_v47  ;;  %5489 = vrcp.f32 %v3137_v54  ;;  %v4853_v30 = vmul.f32 -1.442695, %v10566_v57 }
 0x6e7   :  { %v4611_v36 = vsel %vm4579_vm11, 1.0, %v10537_v51  ;;  %v5484_v10 = vpop.eup %5483  ;;  %5491 = vpow2.f32 %v4846_v33  ;;  %v4287_v14 = vcvt.f32.s32 %v9031_v15  ;;  %v3231_v5 = vsel %vm3027_vm13, %v9331_v13, 0.0 }
 0x6e8   :  { %v4643_v34 = vadd.f32 %v4611_v36, %v3936_v28  ;;  %v3568_v39 = vadd.s32 %v3567_v50, %v3565_v42  ;;  %v3581_v23 = vshll.u32 %v3580_v25, 16  ;;  %vm4580_vm12 = vcmp.eq.s32.totalorder %v7906_v26, %v4275_v52  ;;  %v10569_v50 = vld [vmem:[#allocation40_spill] sm:$0xff] }
 0x6e9   :  { %v3578_v4 = vpop.xlane.xlu1 %3577  ;;  %5493 = vrcp.f32 %v3138_v31  ;;  %v3139_v49 = vadd.f32 1.0, %v9344_v35  ;;  %v3140_v37 = vadd.f32 1.0, %v5482_v59  ;;  %v4855_v13 = vmul.f32 -1.442695, %v10567_v11  ;;  %v10570_v31 = vld [vmem:[#allocation29_spill] sm:$0xff] }
 0x6ea   :  { %4675 = vst [vmem:[%s9707_s8 + $0x48] sm:$0xff] %v4643_v34  ;;  %vm3873_vm14 = vcmp.eq.s32.totalorder %v7906_v26, %v3568_v39  ;;  %v3579_v16 = vcvt.f32.s32 %v3578_v4  ;;  %v4301_v58 = vcvt.f32.s32 %v10568_v2  ;;  %5495 = vpow2.f32 %v4853_v30 }
 0x6eb   :  { %v3905_v15 = vsel %vm3873_vm14, 1.0, %v10537_v51  ;;  %v4288_v12 = vshll.u32 %v4287_v14, 16  ;;  %v3594_v54 = vcvt.f32.s32 %v9038_v61  ;;  %v4612_v48 = vsel %vm4580_vm12, 1.0, %v10537_v51  ;;  %v5486_v59 = vpop.eup %5485 }
 0x6ec   :  { %v3937_v8 = vadd.f32 %v3905_v15, %v3230_v60  ;;  %v3582_v7 = vadd.s32 %v3581_v23, %v3579_v16  ;;  %v4300_v43 = vcvt.f32.s32 %v4299_v40  ;;  %5497 = vrcp.f32 %v3139_v49  ;;  %v9407_v60 = vpop.xlane.xlu0 %4326 }
 0x6ed   :  { %v4285_v63 = vpop.xlane.xlu1 %4284  ;;  %v3141_v33 = vadd.f32 1.0, %v5484_v10  ;;  %v4847_v25 = vmul.f32 -1.442695, %v10569_v50  ;;  %5499 = vpow2.f32 %v4855_v13  ;;  %v4302_v28 = vshll.u32 %v4301_v58, 16 }
 0x6ee   :  { %v4644_v41 = vadd.f32 %v4612_v48, %v3937_v8  ;;  %vm3874_vm15 = vcmp.eq.s32.totalorder %v7906_v26, %v3582_v7  ;;  %v4286_v35 = vcvt.f32.s32 %v4285_v63  ;;  %5501 = vrcp.f32 %v3140_v37  ;;  %v10571_v7 = vld [vmem:[#allocation63_spill] sm:$0xff] }
 0x6ef   :  { %v3906_v47 = vsel %vm3874_vm15, 1.0, %v10537_v51  ;;  %v5488_v42 = vpop.eup %5487  ;;  %v4848_v36 = vmul.f32 -1.442695, %v10570_v31  ;;  %v3595_v34 = vshll.u32 %v3594_v54, 16  ;;  %v3608_v57 = vcvt.f32.s32 %v9046_v1  ;;  %v10572_v54 = vld [vmem:[#allocation87_spill] sm:$0xff] }
 0x6f0   :  { %4676 = vst [vmem:[%s9707_s8 + $0x50] sm:$0xff] %v4644_v41  ;;  %v3938_v61 = vadd.f32 %v3906_v47, %v3231_v5  ;;  %v4289_v52 = vadd.s32 %v4288_v12, %v4286_v35  ;;  %v5490_v10 = vpop.eup %5489  ;;  %v4303_v30 = vadd.s32 %v4302_v28, %v4300_v43  ;;  %5503 = vrcp.f32 %v3141_v33  ;;  %v9418_v58 = vpop.xlane.xlu0 %4354  ;;  %v10573_v35 = vld [vmem:[#allocation24_spill] sm:$0xff] }
 0x6f1   :  { %v3592_v39 = vpop.xlane.xlu1 %3591  ;;  %v5492_v4 = vpop.eup %5491  ;;  %v3142_v23 = vadd.f32 1.0, %v5486_v59  ;;  %5505 = vpow2.f32 %v4847_v25  ;;  %v4315_v15 = vcvt.f32.s32 %v9053_v9  ;;  %v3609_v11 = vshll.u32 %v3608_v57, 16 }
 0x6f2   :  { %vm4581_vm0 = vcmp.eq.s32.totalorder %v7906_v26, %v4289_v52  ;;  %v3593_v14 = vcvt.f32.s32 %v3592_v39  ;;  %5507 = vpow2.f32 %v4848_v36  ;;  %vm4582_vm1 = vcmp.eq.s32.totalorder %v7906_v26, %v4303_v30 }
 0x6f3   :  { %v4613_v5 = vsel %vm4581_vm0, 1.0, %v10537_v51  ;;  %v5494_v37 = vpop.eup %5493  ;;  %5509 = vrcp.f32 %v3142_v23  ;;  %v3143_v2 = vadd.f32 1.0, %v5492_v4  ;;  %v3232_v8 = vsel %vm3027_vm13, %v5488_v42, 0.0 }
 0x6f4   :  { %v4645_v16 = vadd.f32 %v4613_v5, %v3938_v61  ;;  %v3596_v49 = vadd.s32 %v3595_v34, %v3593_v14  ;;  %v5496_v13 = vpop.eup %5495  ;;  %v4857_v12 = vmul.f32 -1.442695, %v10571_v7  ;;  %v4329_v48 = vcvt.f32.s32 %v10572_v54  ;;  %v9438_v23 = vpop.xlane.xlu0 %4382 }
 0x6f5   :  { %v3606_v40 = vpop.xlane.xlu1 %3605  ;;  %v4849_v59 = vmul.f32 -1.442695, %v10573_v35  ;;  %v4316_v33 = vshll.u32 %v4315_v15, 16  ;;  %v3622_v50 = vcvt.f32.s32 %v9061_v20  ;;  %v4614_v25 = vsel %vm4582_vm1, 1.0, %v10537_v51 }
 0x6f6   :  { %4677 = vst [vmem:[%s9707_s8 + $0x58] sm:$0xff] %v4645_v16  ;;  %vm3875_vm2 = vcmp.eq.s32.totalorder %v7906_v26, %v3596_v49  ;;  %v3607_v1 = vcvt.f32.s32 %v3606_v40  ;;  %v5498_v43 = vpop.eup %5497  ;;  %v4328_v61 = vcvt.f32.s32 %v9407_v60  ;;  %5511 = vrcp.f32 %v3143_v2 }
 0x6f7   :  { %v3907_v9 = vsel %vm3875_vm2, 1.0, %v10537_v51  ;;  %v5500_v28 = vpop.eup %5499  ;;  %v3150_v36 = vadd.f32 1.0, %v5496_v13  ;;  %v3233_v34 = vsel %vm3027_vm13, %v5490_v10, 0.0  ;;  %5513 = vpow2.f32 %v4857_v12 }
 0x6f8   :  { %v3939_v63 = vadd.f32 %v3907_v9, %v3232_v8  ;;  %v3610_v41 = vadd.s32 %v3609_v11, %v3607_v1  ;;  %v5502_v31 = vpop.eup %5501  ;;  %v4330_v39 = vshll.u32 %v4329_v48, 16  ;;  %5515 = vpow2.f32 %v4849_v59  ;;  %v10574_v11 = vld [vmem:[#allocation23_spill] sm:$0xff] }
 0x6f9   :  { %v4313_v47 = vpop.xlane.xlu1 %4312  ;;  %v3152_v14 = vadd.f32 1.0, %v5500_v28  ;;  %v3623_v4 = vshll.u32 %v3622_v50, 16  ;;  %v3636_v10 = vcvt.f32.s32 %v9068_v27  ;;  %v4850_v1 = vmul.f32 -1.442695, %v10574_v11  ;;  %v9447_v54 = vpop.xlane.xlu0 %4410 }
 0x6fa   :  { %v4646_v52 = vadd.f32 %v4614_v25, %v3939_v63  ;;  %vm3876_vm3 = vcmp.eq.s32.totalorder %v7906_v26, %v3610_v41  ;;  %v4314_v42 = vcvt.f32.s32 %v4313_v47  ;;  %v5504_v30 = vpop.eup %5503  ;;  %v4331_v49 = vadd.s32 %v4330_v39, %v4328_v61 }
 0x6fb   :  { %v3908_v20 = vsel %vm3876_vm3, 1.0, %v10537_v51  ;;  %v5506_v16 = vpop.eup %5505  ;;  %5517 = vrcp.f32 %v3150_v36  ;;  %v3234_v8 = vsel %vm3027_vm13, %v5494_v37, 0.0  ;;  %v4343_v27 = vcvt.f32.s32 %v9076_v21 }
 0x6fc   :  { %4678 = vst [vmem:[%s9707_s8 + $0x60] sm:$0xff] %v4646_v52  ;;  %v3940_v57 = vadd.f32 %v3908_v20, %v3233_v34  ;;  %v4317_v60 = vadd.s32 %v4316_v33, %v4314_v42  ;;  %v5508_v40 = vpop.eup %5507  ;;  %v3144_v12 = vadd.f32 1.0, %v5506_v16  ;;  %5519 = vrcp.f32 %v3152_v14 }
 0x6fd   :  { %v3620_v5 = vpop.xlane.xlu1 %3619  ;;  %v5510_v7 = vpop.eup %5509  ;;  %v3235_v48 = vsel %vm3027_vm13, %v5498_v43, 0.0  ;;  %v3637_v41 = vshll.u32 %v3636_v10, 16  ;;  %vm4584_vm5 = vcmp.eq.s32.totalorder %v7906_v26, %v4331_v49  ;;  %v3145_v35 = vadd.f32 1.0, %v5508_v40  ;;  %v10575_v43 = vld [vmem:[#allocation43_spill] sm:$0xff] }
 0x6fe   :  { %vm4583_vm4 = vcmp.eq.s32.totalorder %v7906_v26, %v4317_v60  ;;  %v3621_v15 = vcvt.f32.s32 %v3620_v5  ;;  %5521 = vpow2.f32 %v4850_v1  ;;  %v9459_v59 = vsel %vm3027_vm13, %v5502_v31, 0.0  ;;  %v10576_v60 = vld [vmem:[#allocation60_spill] sm:$0xff] }
 0x6ff   :  { %v4615_v13 = vsel %vm4583_vm4, 1.0, %v10537_v51  ;;  %v4851_v33 = vmul.f32 -1.442695, %v10575_v43  ;;  %v4357_v50 = vcvt.f32.s32 %v9021_v18  ;;  %5523 = vrcp.f32 %v3144_v12 }
 0x700   :  { %v4647_v2 = vadd.f32 %v4615_v13, %v3940_v57  ;;  %v3624_v9 = vadd.s32 %v3623_v4, %v3621_v15  ;;  %v5512_v28 = vpop.eup %5511  ;;  %v4344_v61 = vshll.u32 %v4343_v27, 16  ;;  %v3650_v52 = vcvt.f32.s32 %v9084_v55 }
 0x701   :  { %v3634_v63 = vpop.xlane.xlu1 %3633  ;;  %v4616_v42 = vsel %vm4584_vm5, 1.0, %v10537_v51  ;;  %v9467_v36 = vpop.xlane.xlu0 %4438  ;;  %v4356_v20 = vcvt.f32.s32 %v9418_v58  ;;  %5525 = vrcp.f32 %v3145_v35  ;;  %v4852_v14 = vmul.f32 -1.442695, %v10576_v60 }
 0x702   :  { %4679 = vst [vmem:[%s9707_s8 + $0x68] sm:$0xff] %v4647_v2  ;;  %vm3877_vm6 = vcmp.eq.s32.totalorder %v7906_v26, %v3624_v9  ;;  %v3635_v37 = vcvt.f32.s32 %v3634_v63  ;;  %v5514_v31 = vpop.eup %5513  ;;  %v9475_v4 = vsel %vm3027_vm13, %v5504_v30, 0.0  ;;  %5527 = vpow2.f32 %v4851_v33 }
 0x703   :  { %v3909_v21 = vsel %vm3877_vm6, 1.0, %v10537_v51  ;;  %v5516_v57 = vpop.eup %5515  ;;  %v4358_v5 = vshll.u32 %v4357_v50, 16  ;;  %v3154_v49 = vadd.f32 1.0, %v5514_v31  ;;  %v3790_v15 = vcvt.f32.s32 %v9092_v17 }
 0x704   :  { %v3941_v25 = vadd.f32 %v3909_v21, %v3234_v8  ;;  %v3638_v47 = vadd.s32 %v3637_v41, %v3635_v37  ;;  %v3664_v40 = vcvt.f32.s32 %v9094_v24  ;;  %v9486_v30 = vsel %vm3027_vm13, %v5510_v7, 0.0 }
 0x705   :  { %v4341_v34 = vpop.xlane.xlu1 %4340  ;;  %v5518_v10 = vpop.eup %5517  ;;  %v3651_v13 = vshll.u32 %v3650_v52, 16  ;;  %v4359_v2 = vadd.s32 %v4358_v5, %v4356_v20  ;;  %v9489_v12 = vadd.f32 1.0, %v5516_v57  ;;  %5529 = vpow2.f32 %v4852_v14 }
 0x706   :  { %v4648_v39 = vadd.f32 %v4616_v42, %v3941_v25  ;;  %vm3878_vm7 = vcmp.eq.s32.totalorder %v7906_v26, %v3638_v47  ;;  %v4342_v18 = vcvt.f32.s32 %v4341_v34  ;;  %v5520_v9 = vpop.eup %5519  ;;  %v4385_v17 = vcvt.f32.s32 %v9036_v22 }
 0x707   :  { %v3910_v55 = vsel %vm3878_vm7, 1.0, %v10537_v51  ;;  %v3246_v63 = vsel %vm3027_vm13, %v5518_v10, 0.0  ;;  %v9497_v7 = vsel %vm3027_vm13, %v5512_v28, 0.0  ;;  %5531 = vrcp.f32 %v3154_v49 }
 0x708   :  { %4680 = vst [vmem:[%s9707_s8 + $0x70] sm:$0xff] %v4648_v39  ;;  %v3942_v58 = vadd.f32 %v3910_v55, %v3235_v48  ;;  %v4345_v16 = vadd.s32 %v4344_v61, %v4342_v18  ;;  %v9499_v41 = vpop.eup %5521  ;;  %v3791_v37 = vshll.u32 %v3790_v15, 16  ;;  %v3665_v35 = vshll.u32 %v3664_v40, 16 }
 0x709   :  { %v3648_v11 = vpop.xlane.xlu1 %3647  ;;  %v9482_v1 = vpop.xlane.xlu0 %4466  ;;  %v4371_v21 = vcvt.f32.s32 %v9104_v29  ;;  %vm4586_vm9 = vcmp.eq.s32.totalorder %v7906_v26, %v4359_v2  ;;  %v4386_v47 = vshll.u32 %v4385_v17, 16  ;;  %v4497_v28 = vcvt.f32.s32 %v9102_v19 }
 0x70a   :  { %vm4585_vm8 = vcmp.eq.s32.totalorder %v7906_v26, %v4345_v16  ;;  %v3649_v8 = vcvt.f32.s32 %v3648_v11  ;;  %v9507_v25 = vpop.eup %5523  ;;  %v9513_v29 = vsel %vm3027_vm13, %v5520_v9, 0.0  ;;  %v3818_v52 = vcvt.f32.s32 %v9112_v38 }
 0x70b   :  { %v4617_v24 = vsel %vm4585_vm8, 1.0, %v10537_v51  ;;  %v9517_v20 = vpop.eup %5525  ;;  %v4372_v39 = vshll.u32 %v4371_v21, 16  ;;  %v3678_v18 = vcvt.f32.s32 %v9114_v3  ;;  %v4618_v19 = vsel %vm4586_vm9, 1.0, %v10537_v51 }
 0x70c   :  { %v4649_v27 = vadd.f32 %v4617_v24, %v3942_v58  ;;  %v3652_v48 = vadd.s32 %v3651_v13, %v3649_v8  ;;  %v4384_v57 = vcvt.f32.s32 %v9438_v23  ;;  %v9524_v55 = vpop.eup %5527  ;;  %v4413_v5 = vcvt.f32.s32 %v9051_v45  ;;  %v10577_v13 = vld [vmem:[#allocation37_spill] sm:$0xff] }
 0x70d   :  { %v3662_v43 = vpop.xlane.xlu1 %3661  ;;  %v3788_v22 = vpop.xlane.xlu0 %3787  ;;  %v4498_v58 = vshll.u32 %v4497_v28, 16  ;;  %v3819_v10 = vshll.u32 %v3818_v52, 16  ;;  %v4525_v11 = vcvt.f32.s32 %v9123_v56  ;;  %v3692_v45 = vcvt.f32.s32 %v10577_v13 }
 0x70e   :  { %4681 = vst [vmem:[%s9707_s8 + $0x78] sm:$0xff] %v4649_v27  ;;  %vm3879_vm10 = vcmp.eq.s32.totalorder %v7906_v26, %v3652_v48  ;;  %v3663_v33 = vcvt.f32.s32 %v3662_v43  ;;  %v3789_v50 = vcvt.f32.s32 %v3788_v22  ;;  %v4387_v2 = vadd.s32 %v4386_v47, %v4384_v57 }
 0x70f   :  { %v3911_v61 = vsel %vm3879_vm10, 1.0, %v10537_v51  ;;  %v9535_v40 = vpop.eup %5529  ;;  %v3679_v24 = vshll.u32 %v3678_v18, 16  ;;  %v4526_v47 = vshll.u32 %v4525_v11, 16  ;;  %v3693_v28 = vshll.u32 %v3692_v45, 16 }
 0x710   :  { %v3943_v42 = vadd.f32 %v3911_v61, %v9459_v59  ;;  %v3666_v34 = vadd.s32 %v3665_v35, %v3663_v33  ;;  %v3792_v31 = vadd.s32 %v3791_v37, %v3789_v50  ;;  %vm4588_vm0 = vcmp.eq.s32.totalorder %v7906_v26, %v4387_v2 }
 0x711   :  { %v4369_v60 = vpop.xlane.xlu1 %4368  ;;  %v4495_v14 = vpop.xlane.xlu0 %4494  ;;  %5533 = vrcp.f32 %v9489_v12 }
 0x712   :  { %v4650_v38 = vadd.f32 %v4618_v19, %v3943_v42  ;;  %vm3880_vm11 = vcmp.eq.s32.totalorder %v7906_v26, %v3666_v34  ;;  %vm3889_vm12 = vcmp.eq.s32.totalorder %v7906_v26, %v3792_v31  ;;  %v4370_v59 = vcvt.f32.s32 %v4369_v60  ;;  %v5532_v37 = vpop.eup %5531  ;;  %v10579_v31 = vld [vmem:[#allocation83_spill] sm:$0xff] }
 0x713   :  { %v3912_v3 = vsel %vm3880_vm11, 1.0, %v10537_v51  ;;  %v4496_v16 = vcvt.f32.s32 %v4495_v14  ;;  %v3921_v49 = vsel %vm3889_vm12, 1.0, %v10537_v51 }
 0x714   :  { %4682 = vst [vmem:[%s9707_s8 + $0x80] sm:$0xff] %v4650_v38  ;;  %v3944_v23 = vadd.f32 %v3912_v3, %v9475_v4  ;;  %v4373_v15 = vadd.s32 %v4372_v39, %v4370_v59  ;;  %v10578_v4 = vld [vmem:[#allocation88_spill] sm:$0xff]  ;;  %v3953_v21 = vadd.f32 %v3921_v49, %v3246_v63  ;;  %v3846_v39 = vcvt.f32.s32 %v10579_v31 }
 0x715   :  { %v4499_v8 = vadd.s32 %v4498_v58, %v4496_v16  ;;  %v3676_v9 = vpop.xlane.xlu1 %3675  ;;  %v3816_v17 = vpop.xlane.xlu0 %3815  ;;  %v4399_v35 = vcvt.f32.s32 %v10578_v4  ;;  %v10580_v58 = vld [vmem:[#allocation85_spill] sm:$0xff]  ;;  %v3706_v16 = vcvt.f32.s32 %v9145_v6 }
 0x716   :  { %vm4587_vm14 = vcmp.eq.s32.totalorder %v7906_v26, %v4373_v15  ;;  %v3677_v27 = vcvt.f32.s32 %v3676_v9  ;;  %v3817_v48 = vcvt.f32.s32 %v3816_v17  ;;  %v4553_v3 = vcvt.f32.s32 %v10580_v58 }
 0x717   :  { %v4619_v43 = vsel %vm4587_vm14, 1.0, %v10537_v51  ;;  %vm4596_vm15 = vcmp.eq.s32.totalorder %v7906_v26, %v4499_v8  ;;  %v4400_v18 = vshll.u32 %v4399_v35, 16  ;;  %v4414_v8 = vshll.u32 %v4413_v5, 16 }
 0x718   :  { %v4651_v56 = vadd.f32 %v4619_v43, %v3944_v23  ;;  %v4628_v22 = vsel %vm4596_vm15, 1.0, %v10537_v51  ;;  %v3680_v33 = vadd.s32 %v3679_v24, %v3677_v27  ;;  %v3820_v50 = vadd.s32 %v3819_v10, %v3817_v48  ;;  %v10581_v27 = vld [vmem:[#allocation51_spill] sm:$0xff] }
 0x719   :  { %v4660_v61 = vadd.f32 %v4628_v22, %v3953_v21  ;;  %v3690_v52 = vpop.xlane.xlu1 %3689  ;;  %v4523_v42 = vpop.xlane.xlu0 %4522  ;;  %v4620_v10 = vsel %vm4588_vm0, 1.0, %v10537_v51  ;;  %v4412_v23 = vcvt.f32.s32 %v9447_v54  ;;  %v4554_v17 = vshll.u32 %v4553_v3, 16 }
 0x71a   :  { %4683 = vst [vmem:[%s9707_s8 + $0x88] sm:$0xff] %v4651_v56  ;;  %vm3881_vm1 = vcmp.eq.s32.totalorder %v7906_v26, %v3680_v33  ;;  %vm3891_vm2 = vcmp.eq.s32.totalorder %v7906_v26, %v3820_v50  ;;  %v3691_v63 = vcvt.f32.s32 %v3690_v52  ;;  %v4524_v34 = vcvt.f32.s32 %v4523_v42 }
 0x71b   :  { %4692 = vst [vmem:[%s9707_s8 + $0xd0] sm:$0xff] %v4660_v61  ;;  %v3913_v19 = vsel %vm3881_vm1, 1.0, %v10537_v51  ;;  %v3923_v57 = vsel %vm3891_vm2, 1.0, %v10537_v51  ;;  %v3707_v24 = vshll.u32 %v3706_v16, 16  ;;  %v3720_v48 = vcvt.f32.s32 %v10581_v27 }
 0x71c   :  { %v3945_v60 = vadd.f32 %v3913_v19, %v9486_v30  ;;  %v3955_v14 = vadd.f32 %v3923_v57, %v9513_v29  ;;  %v3694_v38 = vadd.s32 %v3693_v28, %v3691_v63  ;;  %v4527_v59 = vadd.s32 %v4526_v47, %v4524_v34 }
 0x71d   :  { %v4397_v49 = vpop.xlane.xlu1 %4396  ;;  %v3844_v15 = vpop.xlane.xlu0 %3843  ;;  %v3847_v29 = vshll.u32 %v3846_v39, 16  ;;  %v4415_v43 = vadd.s32 %v4414_v8, %v4412_v23  ;;  %v3250_v22 = vsel %vm3027_vm13, %v5532_v37, 0.0  ;;  %v3147_v61 = vadd.f32 1.0, %v9499_v41  ;;  %v10582_v37 = vld [vmem:[#allocation35_spill] sm:$0xff] }
 0x71e   :  { %v4652_v11 = vadd.f32 %v4620_v10, %v3945_v60  ;;  %vm3882_vm3 = vcmp.eq.s32.totalorder %v7906_v26, %v3694_v38  ;;  %vm4598_vm4 = vcmp.eq.s32.totalorder %v7906_v26, %v4527_v59  ;;  %v4398_v30 = vcvt.f32.s32 %v4397_v49 }
 0x71f   :  { %v3914_v13 = vsel %vm3882_vm3, 1.0, %v10537_v51  ;;  %v4630_v45 = vsel %vm4598_vm4, 1.0, %v10537_v51  ;;  %v3845_v6 = vcvt.f32.s32 %v3844_v15  ;;  %v3721_v52 = vshll.u32 %v3720_v48, 16  ;;  %v10586_v48 = vld [vmem:[#allocation31_spill] sm:$0xff] }
 0x720   :  { %4684 = vst [vmem:[%s9707_s8 + $0x90] sm:$0xff] %v4652_v11  ;;  %v3946_v54 = vadd.f32 %v3914_v13, %v9497_v7  ;;  %v4662_v2 = vadd.f32 %v4630_v45, %v3955_v14  ;;  %v4401_v9 = vadd.s32 %v4400_v18, %v4398_v30  ;;  %v4427_v42 = vcvt.f32.s32 %v9159_v44  ;;  %v10583_v18 = vld [vmem:[#allocation78_spill] sm:$0xff]  ;;  %v5534_v11 = vpop.eup %5533  ;;  %v10584_v45 = vld [vmem:[#allocation45_spill] sm:$0xff] }
 0x721   :  { %v3848_v4 = vadd.s32 %v3847_v29, %v3845_v6  ;;  %v3704_v35 = vpop.xlane.xlu1 %3703  ;;  %v4551_v21 = vpop.xlane.xlu0 %4550  ;;  %vm4590_vm7 = vcmp.eq.s32.totalorder %v7906_v26, %v4415_v43  ;;  %v4854_v31 = vmul.f32 -1.442695, %v10582_v37  ;;  %v3240_v41 = vsel %vm3027_vm13, %v9507_v25, 0.0 }
 0x722   :  { %4694 = vst [vmem:[%s9707_s8 + $0xe0] sm:$0xff] %v4662_v2  ;;  %vm4589_vm5 = vcmp.eq.s32.totalorder %v7906_v26, %v4401_v9  ;;  %v3705_v5 = vcvt.f32.s32 %v3704_v35  ;;  %v4552_v56 = vcvt.f32.s32 %v4551_v21  ;;  %v4441_v19 = vcvt.f32.s32 %v10583_v18  ;;  %v10585_v2 = vld [vmem:[#allocation61_spill] sm:$0xff] }
 0x723   :  { %v4621_v7 = vsel %vm4589_vm5, 1.0, %v10537_v51  ;;  %vm3893_vm6 = vcmp.eq.s32.totalorder %v7906_v26, %v3848_v4  ;;  %5535 = vrcp.f32 %v3147_v61  ;;  %v4428_v38 = vshll.u32 %v4427_v42, 16 }
 0x724   :  { %v4653_v33 = vadd.f32 %v4621_v7, %v3946_v54  ;;  %v3925_v50 = vsel %vm3893_vm6, 1.0, %v10537_v51  ;;  %v3708_v47 = vadd.s32 %v3707_v24, %v3705_v5  ;;  %v4555_v28 = vadd.s32 %v4554_v17, %v4552_v56 }
 0x725   :  { %v3957_v63 = vadd.f32 %v3925_v50, %v3250_v22  ;;  %v3718_v34 = vpop.xlane.xlu1 %3717  ;;  %v3734_v59 = vcvt.f32.s32 %v9164_v53  ;;  %v4622_v58 = vsel %vm4590_vm7, 1.0, %v10537_v51  ;;  %v4440_v25 = vcvt.f32.s32 %v9467_v36 }
 0x726   :  { %4685 = vst [vmem:[%s9707_s8 + $0x98] sm:$0xff] %v4653_v33  ;;  %vm3883_vm8 = vcmp.eq.s32.totalorder %v7906_v26, %v3708_v47  ;;  %vm4600_vm9 = vcmp.eq.s32.totalorder %v7906_v26, %v4555_v28  ;;  %v3719_v12 = vcvt.f32.s32 %v3718_v34  ;;  %v3241_v23 = vsel %vm3027_vm13, %v9517_v20, 0.0  ;;  %v10588_v47 = vld [vmem:[#allocation46_spill] sm:$0xff] }
 0x727   :  { %v3915_v44 = vsel %vm3883_vm8, 1.0, %v10537_v51  ;;  %v4632_v39 = vsel %vm4600_vm9, 1.0, %v10537_v51  ;;  %5537 = vpow2.f32 %v4854_v31  ;;  %v4442_v49 = vshll.u32 %v4441_v19, 16 }
 0x728   :  { %v3947_v57 = vadd.f32 %v3915_v44, %v3240_v41  ;;  %v4664_v60 = vadd.f32 %v4632_v39, %v3957_v63  ;;  %v3722_v14 = vadd.s32 %v3721_v52, %v3719_v12  ;;  %v3148_v30 = vadd.f32 1.0, %v9524_v55  ;;  %v10589_v41 = vld [vmem:[#allocation66_spill] sm:$0xff] }
 0x729   :  { %v4425_v3 = vpop.xlane.xlu1 %4424  ;;  %v3735_v29 = vshll.u32 %v3734_v59, 16  ;;  %v3748_v6 = vcvt.f32.s32 %v10584_v45  ;;  %v4443_v8 = vadd.s32 %v4442_v49, %v4440_v25  ;;  %v4856_v9 = vmul.f32 -1.442695, %v10585_v2 }
 0x72a   :  { %v4654_v16 = vadd.f32 %v4622_v58, %v3947_v57  ;;  %4696 = vst [vmem:[%s9707_s8 + $0xf0] sm:$0xff] %v4664_v60  ;;  %vm3884_vm10 = vcmp.eq.s32.totalorder %v7906_v26, %v3722_v14  ;;  %v4426_v10 = vcvt.f32.s32 %v4425_v3  ;;  %5539 = vrcp.f32 %v3148_v30 }
 0x72b   :  { %v3916_v53 = vsel %vm3884_vm10, 1.0, %v10537_v51  ;;  %v3149_v27 = vadd.f32 1.0, %v9535_v40  ;;  %v4455_v4 = vcvt.f32.s32 %v10586_v48  ;;  %v3749_v35 = vshll.u32 %v3748_v6, 16  ;;  %v10587_v40 = vld [vmem:[#allocation84_spill] sm:$0xff] }
 0x72c   :  { %4686 = vst [vmem:[%s9707_s8 + $0xa0] sm:$0xff] %v4654_v16  ;;  %v3948_v36 = vadd.f32 %v3916_v53, %v3241_v23  ;;  %v4429_v15 = vadd.s32 %v4428_v38, %v4426_v10  ;;  %vm4592_vm12 = vcmp.eq.s32.totalorder %v7906_v26, %v4443_v8  ;;  %v3242_v5 = vsel %vm3027_vm13, %v5534_v11, 0.0  ;;  %v10590_v10 = vld [vmem:[#allocation27_spill] sm:$0xff] }
 0x72d   :  { %v3732_v13 = vpop.xlane.xlu1 %3731  ;;  %v5536_v43 = vpop.eup %5535  ;;  %5541 = vpow2.f32 %v4856_v9  ;;  %v4469_v7 = vcvt.f32.s32 %v10587_v40  ;;  %v4456_v50 = vshll.u32 %v4455_v4, 16  ;;  %v3762_v28 = vcvt.f32.s32 %v10588_v47  ;;  %v10592_v47 = vld [vmem:[#allocation49_spill] sm:$0xff] }
 0x72e   :  { %vm4591_vm11 = vcmp.eq.s32.totalorder %v7906_v26, %v4429_v15  ;;  %v3733_v20 = vcvt.f32.s32 %v3732_v13  ;;  %5543 = vrcp.f32 %v3149_v27  ;;  %v4624_v61 = vsel %vm4592_vm12, 1.0, %v10537_v51 }
 0x72f   :  { %v4623_v54 = vsel %vm4591_vm11, 1.0, %v10537_v51  ;;  %v4468_v63 = vcvt.f32.s32 %v9482_v1  ;;  %v3243_v37 = vsel %vm3027_vm13, %v5536_v43, 0.0  ;;  %v4858_v44 = vmul.f32 -1.442695, %v10589_v41 }
 0x730   :  { %v4655_v17 = vadd.f32 %v4623_v54, %v3948_v36  ;;  %v3736_v24 = vadd.s32 %v3735_v29, %v3733_v20  ;;  %v4470_v39 = vshll.u32 %v4469_v7, 16  ;;  %v3763_v1 = vshll.u32 %v3762_v28, 16 }
 0x731   :  { %v3746_v55 = vpop.xlane.xlu1 %3745  ;;  %v5538_v42 = vpop.eup %5537  ;;  %v3776_v14 = vcvt.f32.s32 %v9197_v62  ;;  %5545 = vpow2.f32 %v4858_v44  ;;  %v4483_v23 = vcvt.f32.s32 %v10590_v10  ;;  %v3804_v54 = vcvt.f32.s32 %v9215_v0  ;;  %v10591_v0 = vld [vmem:[#allocation47_spill] sm:$0xff] }
 0x732   :  { %4687 = vst [vmem:[%s9707_s8 + $0xa8] sm:$0xff] %v4655_v17  ;;  %vm3885_vm14 = vcmp.eq.s32.totalorder %v7906_v26, %v3736_v24  ;;  %v3747_v21 = vcvt.f32.s32 %v3746_v55  ;;  %v3151_v57 = vadd.f32 1.0, %v5538_v42  ;;  %v4471_v38 = vadd.s32 %v4470_v39, %v4468_v63 }
 0x733   :  { %v3917_v56 = vsel %vm3885_vm14, 1.0, %v10537_v51  ;;  %v3777_v36 = vshll.u32 %v3776_v14, 16  ;;  %v4484_v6 = vshll.u32 %v4483_v23, 16  ;;  %v3832_v28 = vcvt.f32.s32 %v10592_v47 }
 0x734   :  { %v3949_v22 = vadd.f32 %v3917_v56, %v3242_v5  ;;  %v3750_v33 = vadd.s32 %v3749_v35, %v3747_v21  ;;  %v5540_v58 = vpop.eup %5539  ;;  %5547 = vrcp.f32 %v3151_v57  ;;  %vm4594_vm1 = vcmp.eq.s32.totalorder %v7906_v26, %v4471_v38 }
 0x735   :  { %v4453_v52 = vpop.xlane.xlu1 %4452  ;;  %v3244_v11 = vsel %vm3027_vm13, %v5540_v58, 0.0  ;;  %v4626_v8 = vsel %vm4594_vm1, 1.0, %v10537_v51  ;;  %v3805_v35 = vshll.u32 %v3804_v54, 16  ;;  %v4511_v21 = vcvt.f32.s32 %v10591_v0 }
 0x736   :  { %v4656_v34 = vadd.f32 %v4624_v61, %v3949_v22  ;;  %vm3886_vm15 = vcmp.eq.s32.totalorder %v7906_v26, %v3750_v33  ;;  %v4454_v12 = vcvt.f32.s32 %v4453_v52  ;;  %v4567_v10 = vcvt.f32.s32 %v9277_v46 }
 0x737   :  { %v3918_v31 = vsel %vm3886_vm15, 1.0, %v10537_v51  ;;  %v5542_v49 = vpop.eup %5541 }
 0x738   :  { %4688 = vst [vmem:[%s9707_s8 + $0xb0] sm:$0xff] %v4656_v34  ;;  %v3950_v18 = vadd.f32 %v3918_v31, %v3243_v37  ;;  %v4457_v19 = vadd.s32 %v4456_v50, %v4454_v12  ;;  %v5544_v15 = vpop.eup %5543  ;;  %v3153_v45 = vadd.f32 1.0, %v5542_v49  ;;  %v4512_v50 = vshll.u32 %v4511_v21, 16 }
 0x739   :  { %v3760_v60 = vpop.xlane.xlu1 %3759  ;;  %v3245_v17 = vsel %vm3027_vm13, %v5544_v15, 0.0  ;;  %v3833_v37 = vshll.u32 %v3832_v28, 16  ;;  %v4539_v31 = vcvt.f32.s32 %v9251_v32 }
 0x73a   :  { %vm4593_vm0 = vcmp.eq.s32.totalorder %v7906_v26, %v4457_v19  ;;  %v3761_v59 = vcvt.f32.s32 %v3760_v60  ;;  %5549 = vrcp.f32 %v3153_v45  ;;  %v10593_v60 = vld [vmem:[#allocation89_spill] sm:$0xff] }
 0x73b   :  { %v4625_v3 = vsel %vm4593_vm0, 1.0, %v10537_v51  ;;  %v5546_v55 = vpop.eup %5545  ;;  %v3860_v14 = vcvt.f32.s32 %v10593_v60 }
 0x73c   :  { %v4657_v25 = vadd.f32 %v4625_v3, %v3950_v18  ;;  %v3764_v16 = vadd.s32 %v3763_v1, %v3761_v59  ;;  %v3155_v22 = vadd.f32 1.0, %v5546_v55  ;;  %v4540_v1 = vshll.u32 %v4539_v31, 16 }
 0x73d   :  { %v3774_v53 = vpop.xlane.xlu1 %3773 }
 0x73e   :  { %4689 = vst [vmem:[%s9707_s8 + $0xb8] sm:$0xff] %v4657_v25  ;;  %vm3887_vm2 = vcmp.eq.s32.totalorder %v7906_v26, %v3764_v16  ;;  %v3775_v62 = vcvt.f32.s32 %v3774_v53  ;;  %v5548_v5 = vpop.eup %5547  ;;  %5551 = vrcp.f32 %v3155_v22  ;;  %v3861_v16 = vshll.u32 %v3860_v14, 16 }
 0x73f   :  { %v3919_v30 = vsel %vm3887_vm2, 1.0, %v10537_v51  ;;  %v3247_v52 = vsel %vm3027_vm13, %v5548_v5, 0.0 }
 0x740   :  { %v3951_v29 = vadd.f32 %v3919_v30, %v3244_v11  ;;  %v3778_v13 = vadd.s32 %v3777_v36, %v3775_v62  ;;  %v4568_v11 = vshll.u32 %v4567_v10, 16 }
 0x741   :  { %v4481_v20 = vpop.xlane.xlu1 %4480 }
 0x742   :  { %v4658_v2 = vadd.f32 %v4626_v8, %v3951_v29  ;;  %vm3888_vm3 = vcmp.eq.s32.totalorder %v7906_v26, %v3778_v13  ;;  %v4482_v9 = vcvt.f32.s32 %v4481_v20 }
 0x743   :  { %v3920_v24 = vsel %vm3888_vm3, 1.0, %v10537_v51 }
 0x744   :  { %4690 = vst [vmem:[%s9707_s8 + $0xc0] sm:$0xff] %v4658_v2  ;;  %v3952_v27 = vadd.f32 %v3920_v24, %v3245_v17  ;;  %v4485_v48 = vadd.s32 %v4484_v6, %v4482_v9  ;;  %v5550_v44 = vpop.eup %5549 }
 0x745   :  { %v3802_v4 = vpop.xlane.xlu1 %3801  ;;  %v3249_v32 = vsel %vm3027_vm13, %v5550_v44, 0.0 }
 0x746   :  { %vm4595_vm4 = vcmp.eq.s32.totalorder %v7906_v26, %v4485_v48  ;;  %v3803_v43 = vcvt.f32.s32 %v3802_v4 }
 0x747   :  { %v4627_v56 = vsel %vm4595_vm4, 1.0, %v10537_v51 }
 0x748   :  { %v4659_v40 = vadd.f32 %v4627_v56, %v3952_v27  ;;  %v3806_v7 = vadd.s32 %v3805_v35, %v3803_v43  ;;  %v5552_v53 = vpop.eup %5551 }
 0x749   :  { %v4509_v33 = vpop.xlane.xlu1 %4508  ;;  %v3251_v46 = vsel %vm3027_vm13, %v5552_v53, 0.0 }
 0x74a   :  { %4691 = vst [vmem:[%s9707_s8 + $0xc8] sm:$0xff] %v4659_v40  ;;  %vm3890_vm5 = vcmp.eq.s32.totalorder %v7906_v26, %v3806_v7  ;;  %v4510_v61 = vcvt.f32.s32 %v4509_v33 }
 0x74b   :  { %v3922_v42 = vsel %vm3890_vm5, 1.0, %v10537_v51 }
 0x74c   :  { %v3954_v63 = vadd.f32 %v3922_v42, %v3247_v52  ;;  %v4513_v34 = vadd.s32 %v4512_v50, %v4510_v61 }
 0x74d   :  { %v3830_v12 = vpop.xlane.xlu1 %3829 }
 0x74e   :  { %vm4597_vm6 = vcmp.eq.s32.totalorder %v7906_v26, %v4513_v34  ;;  %v3831_v41 = vcvt.f32.s32 %v3830_v12 }
 0x74f   :  { %v4629_v39 = vsel %vm4597_vm6, 1.0, %v10537_v51 }
 0x750   :  { %v4661_v18 = vadd.f32 %v4629_v39, %v3954_v63  ;;  %v3834_v19 = vadd.s32 %v3833_v37, %v3831_v41 }
 0x751   :  { %v4537_v57 = vpop.xlane.xlu1 %4536 }
 0x752   :  { %4693 = vst [vmem:[%s9707_s8 + $0xd8] sm:$0xff] %v4661_v18  ;;  %vm3892_vm7 = vcmp.eq.s32.totalorder %v7906_v26, %v3834_v19  ;;  %v4538_v38 = vcvt.f32.s32 %v4537_v57 }
 0x753   :  { %v3924_v59 = vsel %vm3892_vm7, 1.0, %v10537_v51 }
 0x754   :  { %v3956_v58 = vadd.f32 %v3924_v59, %v3249_v32  ;;  %v4541_v3 = vadd.s32 %v4540_v1, %v4538_v38 }
 0x755   :  { %v3858_v25 = vpop.xlane.xlu1 %3857 }
 0x756   :  { %vm4599_vm8 = vcmp.eq.s32.totalorder %v7906_v26, %v4541_v3  ;;  %v3859_v23 = vcvt.f32.s32 %v3858_v25 }
 0x757   :  { %v4631_v49 = vsel %vm4599_vm8, 1.0, %v10537_v51 }
 0x758   :  { %v4663_v36 = vadd.f32 %v4631_v49, %v3956_v58  ;;  %v3862_v62 = vadd.s32 %v3861_v16, %v3859_v23 }
 0x759   :  { %v4565_v15 = vpop.xlane.xlu1 %4564 }
 0x75a   :  { %4695 = vst [vmem:[%s9707_s8 + $0xe8] sm:$0xff] %v4663_v36  ;;  %vm3894_vm9 = vcmp.eq.s32.totalorder %v7906_v26, %v3862_v62  ;;  %v4566_v30 = vcvt.f32.s32 %v4565_v15 }
 0x75b   :  { %v3926_v29 = vsel %vm3894_vm9, 1.0, %v10537_v51 }
 0x75c   :  { %v3958_v13 = vadd.f32 %v3926_v29, %v3251_v46  ;;  %v4569_v45 = vadd.s32 %v4568_v11, %v4566_v30 }
 0x75e   :  { %vm4601_vm10 = vcmp.eq.s32.totalorder %v7906_v26, %v4569_v45 }
 0x75f   :  { %v4633_v6 = vsel %vm4601_vm10, 1.0, %v10537_v51 }
 0x760   :  { %v4665_v8 = vadd.f32 %v4633_v6, %v3958_v13 }
 0x762   :  { %4697 = vst [vmem:[%s9707_s8 + $0xf8] sm:$0xff] %v4665_v8 }
 0x763   :  { %4702 = vsyncpa [#allocation3], 1 }
 0x764   :  { %4703 = vsyncpa [#allocation5], 1 }
 0x765   :  { %4704 = vsyncpa [#allocation8], 1 }
 0x766   :  { %4705 = vsyncpa [#allocation11], 1 }
 0x767   :  { %4706 = vsyncpa [#allocation14], 1 }

</bundles_post_ra>
